<compile_context>
chip_gen: v5e
topology: v5e:2x2
jax: 0.10.0
libtpu: 0.0.40
codegen_flags: <defaults>
</compile_context>

<pallas_src>
import jax
import jax.numpy as jnp
from jax import lax
from jax.experimental import pallas as pl
from jax.experimental.pallas import tpu as pltpu


def _round_up(x, m):
    return (x + m - 1) // m * m


# ----------------------------------------------------------------------------
# Fused kernel.  grid = (batch_chunks ["parallel"], spatial_tiles ["arbitrary"])
# ----------------------------------------------------------------------------
def _triplet_fused_kernel(
    x_ref,        # (BCH, TILE_P, C)  bf16 : one spatial tile of a batch chunk
    w_stem_ref,   # (C, FEAT)         f32  : 1x1-conv stem weights (stand-in)
    w_img_ref,    # (FEAT, Dp)        bf16 : img_projection weight * (1/HW)
    b_img_ref,    # (1, Dp)           f32
    pos_ref,      # (BCH, TXT)        bf16 : pos caption sentence vectors
    neg_ref,      # (BCH, TXT)        bf16 : neg caption sentence vectors
    w_txt_ref,    # (TXT, Dp)         bf16 : txt_projection weight
    b_txt_ref,    # (1, Dp)           f32
    img_out_ref,  # (BCH, Dp)         f32
    pos_out_ref,  # (BCH, Dp)         f32
    neg_out_ref,  # (BCH, Dp)         f32
    acc_ref,      # (BCH, FEAT)       f32  scratch: running spatial sum
):
    t = pl.program_id(1)
    nt = pl.num_programs(1)
    tile_p, cin = x_ref.shape[1], x_ref.shape[2]
    feat_dim = acc_ref.shape[1]

    # --- step 0 of each batch chunk: zero the pooled-sum accumulator and run
    #     the caption branch.  The MXU is idle during the spatial sweep, so
    #     both txt projections hide under the VPU-bound stem instead of
    #     sitting on the finalize critical path. ---
    @pl.when(t == 0)
    def _init_and_captions():
        acc_ref[...] = jnp.zeros_like(acc_ref)
        pos_out_ref[...] = (
            jnp.dot(pos_ref[...], w_txt_ref[...],
                    preferred_element_type=jnp.float32)
            + b_txt_ref[...])
        neg_out_ref[...] = (
            jnp.dot(neg_ref[...], w_txt_ref[...],
                    preferred_element_type=jnp.float32)
            + b_txt_ref[...])

    # --- stem: per-pixel 1x1 conv (C -> FEAT) + ReLU with the spatial
    #     reduction fused in.  Work is sliced into (CHUNK pixels x F_CHUNK
    #     features) so the live intermediate is a few tens of vregs; nothing
    #     of size (B, TILE_P, FEAT) is ever materialized.  The C=3
    #     contraction stays on the VPU as unrolled broadcast-FMAs in f32
    #     (v5e has no bf16 VALU; the MXU is reserved for the projections). ---
    CHUNK = 8                              # pixels per inner step (1 sublane group)
    F_CHUNK = min(256, feat_dim)           # features per slice (bounds live vregs)
    n_chunks = tile_p // CHUNK

    def chunk_body(i, tile_sum):
        p0 = pl.multiple_of(i * CHUNK, CHUNK)
        xc = x_ref[:, pl.ds(p0, CHUNK), :].astype(jnp.float32)    # (BCH,CHUNK,C)
        x_cols = [xc[:, :, c:c + 1] for c in range(cin)]          # (BCH,CHUNK,1)
        pieces = []
        for f0 in range(0, feat_dim, F_CHUNK):                    # static unroll
            w0 = w_stem_ref[0:1, f0:f0 + F_CHUNK].reshape(1, 1, F_CHUNK)
            f = x_cols[0] * w0
            for c in range(1, cin):
                wc = w_stem_ref[c:c + 1, f0:f0 + F_CHUNK].reshape(1, 1, F_CHUNK)
                f = f + x_cols[c] * wc
            pieces.append(jnp.sum(jnp.maximum(f, 0.0), axis=1))   # (BCH,F_CHUNK)
        return tile_sum + jnp.concatenate(pieces, axis=-1)        # (BCH,FEAT)

    tile_sum = lax.fori_loop(0, n_chunks, chunk_body,
                             jnp.zeros(acc_ref.shape, jnp.float32))
    acc_ref[...] += tile_sum

    # --- last spatial tile: GAP (1/HW already folded into w_img) + image
    #     projection on the MXU (bf16 operands, f32 accumulate). ---
    @pl.when(t == nt - 1)
    def _finalize_image():
        pooled = acc_ref[...].astype(jnp.bfloat16)                # (BCH, FEAT)
        img_out_ref[...] = (
            jnp.dot(pooled, w_img_ref[...],
                    preferred_element_type=jnp.float32)
            + b_img_ref[...])


# ----------------------------------------------------------------------------
# One-time parameter prep (hoisted out of the per-step forward)
# ----------------------------------------------------------------------------
def prepare_params(params, hw):
    """Pad embedding dim to a lane multiple, cast projection weights to bf16,
    and fold the 1/HW global-average-pool scale into the image projection."""
    D = params["w_img"].shape[1]
    Dp = _round_up(D, 128)
    pad = ((0, 0), (0, Dp - D))
    w_img = jnp.pad(params["w_img"] * (1.0 / hw), pad).astype(jnp.bfloat16)
    b_img = jnp.pad(params["b_img"], pad)
    w_txt = jnp.pad(params["w_txt"], pad).astype(jnp.bfloat16)
    b_txt = jnp.pad(params["b_txt"], pad)
    return dict(w_stem=params["w_stem"],          # stays f32 (VPU stem math)
                w_img=w_img, b_img=b_img, w_txt=w_txt, b_txt=b_txt)


# ----------------------------------------------------------------------------
# Forward wrapper (mirrors TripletNetworkITT.forward, non-test branch)
# ----------------------------------------------------------------------------
def _triplet_forward_impl(prepped, anchor_imgs_nchw, pos_caps, neg_caps, *, emb_dim):
    w_stem = prepped["w_stem"]
    w_img, b_img = prepped["w_img"], prepped["b_img"]
    w_txt, b_txt = prepped["w_txt"], prepped["b_txt"]

    B, C, H, W = anchor_imgs_nchw.shape
    HW = H * W
    FEAT, Dp = w_img.shape
    TXT = w_txt.shape[0]

    # NCHW -> (B, HW, C) with a bf16 cast in the same pass (halves the image
    # HBM traffic for both the rearrange write and the kernel read).
    # TODO(synk): at production image sizes this materialized rearrange is the
    # remaining HBM cost; fold it into the kernel (NCHW-native stem or
    # allow_input_fusion) if it shows up on the roofline.
    x_bpc = jnp.transpose(anchor_imgs_nchw, (0, 2, 3, 1)).reshape(B, HW, C)
    x_bpc = x_bpc.astype(jnp.bfloat16)

    # Big spatial tile: per-grid-step overhead amortized; with the chunked
    # stem, live-vreg/VMEM use no longer scales with TILE_P.
    TILE_P = min(512, _round_up(HW, 8))
    HW_pad = _round_up(HW, TILE_P)
    if HW_pad != HW:
        # zero rows contribute relu(0)=0 to the sum; 1/HW uses the real HW
        x_bpc = jnp.pad(x_bpc, ((0, 0), (0, HW_pad - HW), (0, 0)))
    n_tiles = HW_pad // TILE_P

    # Batch split: 2 sublane-aligned chunks -> leading "parallel" grid axis
    # feeds both v7x TensorCores; single chunk otherwise (v5e/v6e: 1 TC).
    BCH = B // 2 if (B % 16 == 0) else B
    n_b = B // BCH

    pos_bf = pos_caps.astype(jnp.bfloat16)
    neg_bf = neg_caps.astype(jnp.bfloat16)

    full2d = lambda bi, t: (0, 0)
    batch_row = lambda bi, t: (bi, 0)

    grid_spec = pltpu.PrefetchScalarGridSpec(
        num_scalar_prefetch=0,
        grid=(n_b, n_tiles),
        in_specs=[
            pl.BlockSpec((BCH, TILE_P, C), lambda bi, t: (bi, t, 0)),  # x tiles
            pl.BlockSpec((C, FEAT), full2d),       # w_stem  (grid-invariant)
            pl.BlockSpec((FEAT, Dp), full2d),      # w_img   (grid-invariant)
            pl.BlockSpec((1, Dp), full2d),         # b_img
            pl.BlockSpec((BCH, TXT), batch_row),   # pos captions
            pl.BlockSpec((BCH, TXT), batch_row),   # neg captions
            pl.BlockSpec((TXT, Dp), full2d),       # w_txt
            pl.BlockSpec((1, Dp), full2d),         # b_txt
        ],
        out_specs=[
            pl.BlockSpec((BCH, Dp), batch_row),    # img_emb
            pl.BlockSpec((BCH, Dp), batch_row),    # pos_emb
            pl.BlockSpec((BCH, Dp), batch_row),    # neg_emb
        ],
        scratch_shapes=[pltpu.VMEM((BCH, FEAT), jnp.float32)],
    )

    img_p, pos_p, neg_p = pl.pallas_call(
        _triplet_fused_kernel,
        out_shape=(
            jax.ShapeDtypeStruct((B, Dp), jnp.float32),
            jax.ShapeDtypeStruct((B, Dp), jnp.float32),
            jax.ShapeDtypeStruct((B, Dp), jnp.float32),
        ),
        grid_spec=grid_spec,
        compiler_params=pltpu.CompilerParams(
            # batch axis parallel (v7x 2-TC sharding), spatial axis = reduction
            dimension_semantics=("parallel", "arbitrary"),
            # explicit VMEM budget (fits on v7x's 64 MiB).
            # TODO(synk): single-buffer the grid-invariant weight operands
            # (pipeline_mode=pl.Buffered(1)) for very large embedding dims.
            vmem_limit_bytes=64 * 1024 * 1024,
        ),
    )(x_bpc, w_stem, w_img, b_img, pos_bf, neg_bf, w_txt, b_txt)

    return img_p[:, :emb_dim], pos_p[:, :emb_dim], neg_p[:, :emb_dim]


triplet_forward = jax.jit(_triplet_forward_impl, static_argnames=("emb_dim",))


# ----------------------------------------------------------------------------
# Parameter construction (deterministic, mimics nn.Linear uniform init)
# ----------------------------------------------------------------------------
def init_params(key, c_in, feat_dim, txt_dim, embedding_dim):
    k0, k1, k2, k3, k4 = jax.random.split(key, 5)

    def linear_init(kw, kb, fan_in, fan_out):
        bound = 1.0 / jnp.sqrt(fan_in)
        w = jax.random.uniform(kw, (fan_in, fan_out), jnp.float32, -bound, bound)
        b = jax.random.uniform(kb, (1, fan_out), jnp.float32, -bound, bound)
        return w, b

    # stand-in backbone "stem" (1x1 conv weights, C_in -> 2048)
    w_stem = jax.random.normal(k0, (c_in, feat_dim), jnp.float32) * 0.1
    # img_projection: Linear(2048, embedding_dim)
    w_img, b_img = linear_init(k1, k2, feat_dim, embedding_dim)
    # txt_projection: Linear(300, embedding_dim)
    w_txt, b_txt = linear_init(k3, k4, txt_dim, embedding_dim)
    return dict(w_stem=w_stem, w_img=w_img, b_img=b_img,
                w_txt=w_txt, b_txt=b_txt)


# ----------------------------------------------------------------------------
# Reference (pure-JAX, f32) for a numerical sanity check
# ----------------------------------------------------------------------------
def triplet_forward_ref(params, anchor_imgs_nchw, pos_caps, neg_caps):
    B, C, H, W = anchor_imgs_nchw.shape
    x_bpc = jnp.transpose(anchor_imgs_nchw, (0, 2, 3, 1)).reshape(B, H * W, C)
    feat = jnp.maximum(jnp.einsum("bpc,cf->bpf", x_bpc, params["w_stem"]), 0.0)
    pooled = jnp.mean(feat, axis=1)
    img_emb = pooled @ params["w_img"] + params["b_img"]
    pos_emb = pos_caps @ params["w_txt"] + params["b_txt"]
    neg_emb = neg_caps @ params["w_txt"] + params["b_txt"]
    return img_emb, pos_emb, neg_emb


if __name__ == "__main__":
    # Small, module-consistent shapes (exercise both grid axes: 2 batch
    # chunks of 8, 2 spatial tiles of 512 pixels).
    B = 16             # batch
    C_IN = 3           # image channels (NCHW)
    H = W = 32         # spatial -> HW = 1024
    FEAT_DIM = 2048    # ResNet50 feature dim (img_projection fan-in)
    TXT_DIM = 300      # fasttext sentence-vector dim (txt_projection fan-in)
    EMB_DIM = 32       # embedding_dim

    key = jax.random.PRNGKey(0)
    k_params, k_img, k_pos, k_neg = jax.random.split(key, 4)

    params = init_params(k_params, C_IN, FEAT_DIM, TXT_DIM, EMB_DIM)
    prepped = prepare_params(params, hw=H * W)   # once per model, not per step

    anchor_imgs = jax.random.normal(k_img, (B, C_IN, H, W), jnp.float32)
    pos_captions = jax.random.normal(k_pos, (B, TXT_DIM), jnp.float32)
    neg_captions = jax.random.normal(k_neg, (B, TXT_DIM), jnp.float32)

    out = triplet_forward(prepped, anchor_imgs, pos_captions, neg_captions,
                          emb_dim=EMB_DIM)
    out = jax.block_until_ready(out)

    ref = triplet_forward_ref(params, anchor_imgs, pos_captions, neg_captions)
    # bf16 image/caption storage + bf16 MXU operands -> loosened tolerance.
    for o, r in zip(out, ref):
        assert o.shape == (B, EMB_DIM)
        assert jnp.allclose(o, r, atol=2e-2, rtol=2e-2), float(
            jnp.max(jnp.abs(o - r)))

    print("KERNEL_OK")
</pallas_src>

<mosaic_0001>
module attributes {stable_mosaic.version = 11 : i64} {
  func.func @_triplet_fused_kernel(%arg0: i32, %arg1: i32, %arg2: memref<8x512x3xbf16, #tpu.memory_space<vmem>>, %arg3: memref<3x2048xf32, #tpu.memory_space<vmem>>, %arg4: memref<2048x128xbf16, #tpu.memory_space<vmem>>, %arg5: memref<1x128xf32, #tpu.memory_space<vmem>>, %arg6: memref<8x300xbf16, #tpu.memory_space<vmem>>, %arg7: memref<8x300xbf16, #tpu.memory_space<vmem>>, %arg8: memref<300x128xbf16, #tpu.memory_space<vmem>>, %arg9: memref<1x128xf32, #tpu.memory_space<vmem>>, %arg10: memref<8x128xf32, #tpu.memory_space<vmem>>, %arg11: memref<8x128xf32, #tpu.memory_space<vmem>>, %arg12: memref<8x128xf32, #tpu.memory_space<vmem>>, %arg13: memref<8x2048xf32, #tpu.memory_space<vmem>>) attributes {dimension_semantics = [#tpu.dimension_semantics<parallel>, #tpu.dimension_semantics<arbitrary>], iteration_bounds = array<i64: 2, 2>, scalar_prefetch = 0 : i64, scratch_operands = 1 : i64, tpu.core_type = #tpu.core_type<tc>, window_params = [{transform_indices = @transform_0, window_bounds = array<i64: 8, 512, 3>}, {pipeline_mode = #tpu.pipeline_mode<synchronous>, transform_indices = @transform_1, window_bounds = array<i64: 3, 2048>}, {pipeline_mode = #tpu.pipeline_mode<synchronous>, transform_indices = @transform_2, window_bounds = array<i64: 2048, 128>}, {pipeline_mode = #tpu.pipeline_mode<synchronous>, transform_indices = @transform_3, window_bounds = array<i64: 1, 128>}, {transform_indices = @transform_4, window_bounds = array<i64: 8, 300>}, {transform_indices = @transform_5, window_bounds = array<i64: 8, 300>}, {pipeline_mode = #tpu.pipeline_mode<synchronous>, transform_indices = @transform_6, window_bounds = array<i64: 300, 128>}, {pipeline_mode = #tpu.pipeline_mode<synchronous>, transform_indices = @transform_7, window_bounds = array<i64: 1, 128>}, {transform_indices = @transform_8, window_bounds = array<i64: 8, 128>}, {transform_indices = @transform_9, window_bounds = array<i64: 8, 128>}, {transform_indices = @transform_10, window_bounds = array<i64: 8, 128>}]} {
    %c0_i32 = arith.constant 0 : i32
    %0 = arith.cmpi eq, %arg1, %c0_i32 : i32
    %1 = arith.extui %0 : i1 to i32
    %c0_i32_0 = arith.constant 0 : i32
    %2 = arith.cmpi ne, %1, %c0_i32_0 : i32
    scf.if %2 {
      %cst_8 = arith.constant 0.000000e+00 : f32
      %12 = vector.broadcast %cst_8 : f32 to vector<8x2048xf32>
      %c0_9 = arith.constant 0 : index
      %c0_10 = arith.constant 0 : index
      %13 = vector.load %arg13[%c0_9, %c0_10] : memref<8x2048xf32, #tpu.memory_space<vmem>>, vector<8x2048xf32>
      tpu.vector_store %arg13[%c0_9, %c0_10], %12 {strides = array<i32>} : memref<8x2048xf32, #tpu.memory_space<vmem>>, vector<8x2048xf32>,
      %c0_11 = arith.constant 0 : index
      %c0_12 = arith.constant 0 : index
      %14 = vector.load %arg6[%c0_11, %c0_12] : memref<8x300xbf16, #tpu.memory_space<vmem>>, vector<8x300xbf16>
      %c0_13 = arith.constant 0 : index
      %c0_14 = arith.constant 0 : index
      %15 = vector.load %arg8[%c0_13, %c0_14] : memref<300x128xbf16, #tpu.memory_space<vmem>>, vector<300x128xbf16>
      %cst_15 = arith.constant dense<0.000000e+00> : vector<8x128xf32>
      %16 = tpu.matmul %14, %15, %cst_15 {dimension_numbers = #tpu.dot_dimension_numbers<[1], [0], [0], [1], [0, 0, 1, 1], [], []>} : vector<8x300xbf16>, vector<300x128xbf16>, vector<8x128xf32> -> vector<8x128xf32>
      %c0_16 = arith.constant 0 : index
      %c0_17 = arith.constant 0 : index
      %17 = vector.load %arg9[%c0_16, %c0_17] : memref<1x128xf32, #tpu.memory_space<vmem>>, vector<1x128xf32>
      %18 = vector.broadcast %17 : vector<1x128xf32> to vector<8x128xf32>
      %19 = arith.addf %16, %18 : vector<8x128xf32>
      %c0_18 = arith.constant 0 : index
      %c0_19 = arith.constant 0 : index
      %20 = vector.load %arg11[%c0_18, %c0_19] : memref<8x128xf32, #tpu.memory_space<vmem>>, vector<8x128xf32>
      tpu.vector_store %arg11[%c0_18, %c0_19], %19 {strides = array<i32>} : memref<8x128xf32, #tpu.memory_space<vmem>>, vector<8x128xf32>,
      %c0_20 = arith.constant 0 : index
      %c0_21 = arith.constant 0 : index
      %21 = vector.load %arg7[%c0_20, %c0_21] : memref<8x300xbf16, #tpu.memory_space<vmem>>, vector<8x300xbf16>
      %c0_22 = arith.constant 0 : index
      %c0_23 = arith.constant 0 : index
      %22 = vector.load %arg8[%c0_22, %c0_23] : memref<300x128xbf16, #tpu.memory_space<vmem>>, vector<300x128xbf16>
      %cst_24 = arith.constant dense<0.000000e+00> : vector<8x128xf32>
      %23 = tpu.matmul %21, %22, %cst_24 {dimension_numbers = #tpu.dot_dimension_numbers<[1], [0], [0], [1], [0, 0, 1, 1], [], []>} : vector<8x300xbf16>, vector<300x128xbf16>, vector<8x128xf32> -> vector<8x128xf32>
      %c0_25 = arith.constant 0 : index
      %c0_26 = arith.constant 0 : index
      %24 = vector.load %arg9[%c0_25, %c0_26] : memref<1x128xf32, #tpu.memory_space<vmem>>, vector<1x128xf32>
      %25 = vector.broadcast %24 : vector<1x128xf32> to vector<8x128xf32>
      %26 = arith.addf %23, %25 : vector<8x128xf32>
      %c0_27 = arith.constant 0 : index
      %c0_28 = arith.constant 0 : index
      %27 = vector.load %arg12[%c0_27, %c0_28] : memref<8x128xf32, #tpu.memory_space<vmem>>, vector<8x128xf32>
      tpu.vector_store %arg12[%c0_27, %c0_28], %26 {strides = array<i32>} : memref<8x128xf32, #tpu.memory_space<vmem>>, vector<8x128xf32>,
    } else {
    }
    %cst = arith.constant 0.000000e+00 : f32
    %3 = vector.broadcast %cst : f32 to vector<8x2048xf32>
    %c0_i32_1 = arith.constant 0 : i32
    %c64_i32 = arith.constant 64 : i32
    %4 = arith.addi %c0_i32_1, %c64_i32 : i32
    %c1_i32 = arith.constant 1 : i32
    %5 = scf.for %arg14 = %c0_i32_1 to %4 step %c1_i32 iter_args(%arg15 = %3) -> (vector<8x2048xf32>)  : i32 {
      %c8_i32 = arith.constant 8 : i32
      %12 = arith.muli %arg14, %c8_i32 : i32
      %13 = tpu.assume_multiple %12, 8 : i32
      %c0_8 = arith.constant 0 : index
      %14 = arith.index_cast %13 : i32 to index
      %c0_9 = arith.constant 0 : index
      %15 = vector.load %arg2[%c0_8, %14, %c0_9] : memref<8x512x3xbf16, #tpu.memory_space<vmem>>, vector<8x8x3xbf16>
      %16 = arith.extf %15 : vector<8x8x3xbf16> to vector<8x8x3xf32>
      %17 = vector.extract_strided_slice %16 {offsets = [0, 0, 0], sizes = [8, 8, 1], strides = [1, 1, 1]} : vector<8x8x3xf32> to vector<8x8x1xf32>
      %18 = vector.extract_strided_slice %16 {offsets = [0, 0, 1], sizes = [8, 8, 1], strides = [1, 1, 1]} : vector<8x8x3xf32> to vector<8x8x1xf32>
      %19 = vector.extract_strided_slice %16 {offsets = [0, 0, 2], sizes = [8, 8, 1], strides = [1, 1, 1]} : vector<8x8x3xf32> to vector<8x8x1xf32>
      %c0_10 = arith.constant 0 : index
      %c0_11 = arith.constant 0 : index
      %20 = vector.load %arg3[%c0_10, %c0_11] : memref<3x2048xf32, #tpu.memory_space<vmem>>, vector<1x256xf32>
      %21 = vector.shape_cast %20 : vector<1x256xf32> to vector<1x1x256xf32>
      %22 = vector.broadcast %17 : vector<8x8x1xf32> to vector<8x8x256xf32>
      %23 = vector.broadcast %21 : vector<1x1x256xf32> to vector<8x8x256xf32>
      %24 = arith.mulf %22, %23 : vector<8x8x256xf32>
      %c1 = arith.constant 1 : index
      %c0_12 = arith.constant 0 : index
      %25 = vector.load %arg3[%c1, %c0_12] : memref<3x2048xf32, #tpu.memory_space<vmem>>, vector<1x256xf32>
      %26 = vector.shape_cast %25 : vector<1x256xf32> to vector<1x1x256xf32>
      %27 = vector.broadcast %18 : vector<8x8x1xf32> to vector<8x8x256xf32>
      %28 = vector.broadcast %26 : vector<1x1x256xf32> to vector<8x8x256xf32>
      %29 = arith.mulf %27, %28 : vector<8x8x256xf32>
      %30 = arith.addf %24, %29 : vector<8x8x256xf32>
      %c2 = arith.constant 2 : index
      %c0_13 = arith.constant 0 : index
      %31 = vector.load %arg3[%c2, %c0_13] : memref<3x2048xf32, #tpu.memory_space<vmem>>, vector<1x256xf32>
      %32 = vector.shape_cast %31 : vector<1x256xf32> to vector<1x1x256xf32>
      %33 = vector.broadcast %19 : vector<8x8x1xf32> to vector<8x8x256xf32>
      %34 = vector.broadcast %32 : vector<1x1x256xf32> to vector<8x8x256xf32>
      %35 = arith.mulf %33, %34 : vector<8x8x256xf32>
      %36 = arith.addf %30, %35 : vector<8x8x256xf32>
      %cst_14 = arith.constant 0.000000e+00 : f32
      %37 = vector.broadcast %cst_14 : f32 to vector<8x8x256xf32>
      %38 = arith.maximumf %36, %37 : vector<8x8x256xf32>
      %cst_15 = arith.constant dense<0.000000e+00> : vector<8x256xf32>
      %39 = vector.multi_reduction <add>, %38, %cst_15 [1] : vector<8x8x256xf32> to vector<8x256xf32>
      %c0_16 = arith.constant 0 : index
      %c256 = arith.constant 256 : index
      %40 = vector.load %arg3[%c0_16, %c256] : memref<3x2048xf32, #tpu.memory_space<vmem>>, vector<1x256xf32>
      %41 = vector.shape_cast %40 : vector<1x256xf32> to vector<1x1x256xf32>
      %42 = vector.broadcast %17 : vector<8x8x1xf32> to vector<8x8x256xf32>
      %43 = vector.broadcast %41 : vector<1x1x256xf32> to vector<8x8x256xf32>
      %44 = arith.mulf %42, %43 : vector<8x8x256xf32>
      %c1_17 = arith.constant 1 : index
      %c256_18 = arith.constant 256 : index
      %45 = vector.load %arg3[%c1_17, %c256_18] : memref<3x2048xf32, #tpu.memory_space<vmem>>, vector<1x256xf32>
      %46 = vector.shape_cast %45 : vector<1x256xf32> to vector<1x1x256xf32>
      %47 = vector.broadcast %18 : vector<8x8x1xf32> to vector<8x8x256xf32>
      %48 = vector.broadcast %46 : vector<1x1x256xf32> to vector<8x8x256xf32>
      %49 = arith.mulf %47, %48 : vector<8x8x256xf32>
      %50 = arith.addf %44, %49 : vector<8x8x256xf32>
      %c2_19 = arith.constant 2 : index
      %c256_20 = arith.constant 256 : index
      %51 = vector.load %arg3[%c2_19, %c256_20] : memref<3x2048xf32, #tpu.memory_space<vmem>>, vector<1x256xf32>
      %52 = vector.shape_cast %51 : vector<1x256xf32> to vector<1x1x256xf32>
      %53 = vector.broadcast %19 : vector<8x8x1xf32> to vector<8x8x256xf32>
      %54 = vector.broadcast %52 : vector<1x1x256xf32> to vector<8x8x256xf32>
      %55 = arith.mulf %53, %54 : vector<8x8x256xf32>
      %56 = arith.addf %50, %55 : vector<8x8x256xf32>
      %cst_21 = arith.constant 0.000000e+00 : f32
      %57 = vector.broadcast %cst_21 : f32 to vector<8x8x256xf32>
      %58 = arith.maximumf %56, %57 : vector<8x8x256xf32>
      %cst_22 = arith.constant dense<0.000000e+00> : vector<8x256xf32>
      %59 = vector.multi_reduction <add>, %58, %cst_22 [1] : vector<8x8x256xf32> to vector<8x256xf32>
      %c0_23 = arith.constant 0 : index
      %c512 = arith.constant 512 : index
      %60 = vector.load %arg3[%c0_23, %c512] : memref<3x2048xf32, #tpu.memory_space<vmem>>, vector<1x256xf32>
      %61 = vector.shape_cast %60 : vector<1x256xf32> to vector<1x1x256xf32>
      %62 = vector.broadcast %17 : vector<8x8x1xf32> to vector<8x8x256xf32>
      %63 = vector.broadcast %61 : vector<1x1x256xf32> to vector<8x8x256xf32>
      %64 = arith.mulf %62, %63 : vector<8x8x256xf32>
      %c1_24 = arith.constant 1 : index
      %c512_25 = arith.constant 512 : index
      %65 = vector.load %arg3[%c1_24, %c512_25] : memref<3x2048xf32, #tpu.memory_space<vmem>>, vector<1x256xf32>
      %66 = vector.shape_cast %65 : vector<1x256xf32> to vector<1x1x256xf32>
      %67 = vector.broadcast %18 : vector<8x8x1xf32> to vector<8x8x256xf32>
      %68 = vector.broadcast %66 : vector<1x1x256xf32> to vector<8x8x256xf32>
      %69 = arith.mulf %67, %68 : vector<8x8x256xf32>
      %70 = arith.addf %64, %69 : vector<8x8x256xf32>
      %c2_26 = arith.constant 2 : index
      %c512_27 = arith.constant 512 : index
      %71 = vector.load %arg3[%c2_26, %c512_27] : memref<3x2048xf32, #tpu.memory_space<vmem>>, vector<1x256xf32>
      %72 = vector.shape_cast %71 : vector<1x256xf32> to vector<1x1x256xf32>
      %73 = vector.broadcast %19 : vector<8x8x1xf32> to vector<8x8x256xf32>
      %74 = vector.broadcast %72 : vector<1x1x256xf32> to vector<8x8x256xf32>
      %75 = arith.mulf %73, %74 : vector<8x8x256xf32>
      %76 = arith.addf %70, %75 : vector<8x8x256xf32>
      %cst_28 = arith.constant 0.000000e+00 : f32
      %77 = vector.broadcast %cst_28 : f32 to vector<8x8x256xf32>
      %78 = arith.maximumf %76, %77 : vector<8x8x256xf32>
      %cst_29 = arith.constant dense<0.000000e+00> : vector<8x256xf32>
      %79 = vector.multi_reduction <add>, %78, %cst_29 [1] : vector<8x8x256xf32> to vector<8x256xf32>
      %c0_30 = arith.constant 0 : index
      %c768 = arith.constant 768 : index
      %80 = vector.load %arg3[%c0_30, %c768] : memref<3x2048xf32, #tpu.memory_space<vmem>>, vector<1x256xf32>
      %81 = vector.shape_cast %80 : vector<1x256xf32> to vector<1x1x256xf32>
      %82 = vector.broadcast %17 : vector<8x8x1xf32> to vector<8x8x256xf32>
      %83 = vector.broadcast %81 : vector<1x1x256xf32> to vector<8x8x256xf32>
      %84 = arith.mulf %82, %83 : vector<8x8x256xf32>
      %c1_31 = arith.constant 1 : index
      %c768_32 = arith.constant 768 : index
      %85 = vector.load %arg3[%c1_31, %c768_32] : memref<3x2048xf32, #tpu.memory_space<vmem>>, vector<1x256xf32>
      %86 = vector.shape_cast %85 : vector<1x256xf32> to vector<1x1x256xf32>
      %87 = vector.broadcast %18 : vector<8x8x1xf32> to vector<8x8x256xf32>
      %88 = vector.broadcast %86 : vector<1x1x256xf32> to vector<8x8x256xf32>
      %89 = arith.mulf %87, %88 : vector<8x8x256xf32>
      %90 = arith.addf %84, %89 : vector<8x8x256xf32>
      %c2_33 = arith.constant 2 : index
      %c768_34 = arith.constant 768 : index
      %91 = vector.load %arg3[%c2_33, %c768_34] : memref<3x2048xf32, #tpu.memory_space<vmem>>, vector<1x256xf32>
      %92 = vector.shape_cast %91 : vector<1x256xf32> to vector<1x1x256xf32>
      %93 = vector.broadcast %19 : vector<8x8x1xf32> to vector<8x8x256xf32>
      %94 = vector.broadcast %92 : vector<1x1x256xf32> to vector<8x8x256xf32>
      %95 = arith.mulf %93, %94 : vector<8x8x256xf32>
      %96 = arith.addf %90, %95 : vector<8x8x256xf32>
      %cst_35 = arith.constant 0.000000e+00 : f32
      %97 = vector.broadcast %cst_35 : f32 to vector<8x8x256xf32>
      %98 = arith.maximumf %96, %97 : vector<8x8x256xf32>
      %cst_36 = arith.constant dense<0.000000e+00> : vector<8x256xf32>
      %99 = vector.multi_reduction <add>, %98, %cst_36 [1] : vector<8x8x256xf32> to vector<8x256xf32>
      %c0_37 = arith.constant 0 : index
      %c1024 = arith.constant 1024 : index
      %100 = vector.load %arg3[%c0_37, %c1024] : memref<3x2048xf32, #tpu.memory_space<vmem>>, vector<1x256xf32>
      %101 = vector.shape_cast %100 : vector<1x256xf32> to vector<1x1x256xf32>
      %102 = vector.broadcast %17 : vector<8x8x1xf32> to vector<8x8x256xf32>
      %103 = vector.broadcast %101 : vector<1x1x256xf32> to vector<8x8x256xf32>
      %104 = arith.mulf %102, %103 : vector<8x8x256xf32>
      %c1_38 = arith.constant 1 : index
      %c1024_39 = arith.constant 1024 : index
      %105 = vector.load %arg3[%c1_38, %c1024_39] : memref<3x2048xf32, #tpu.memory_space<vmem>>, vector<1x256xf32>
      %106 = vector.shape_cast %105 : vector<1x256xf32> to vector<1x1x256xf32>
      %107 = vector.broadcast %18 : vector<8x8x1xf32> to vector<8x8x256xf32>
      %108 = vector.broadcast %106 : vector<1x1x256xf32> to vector<8x8x256xf32>
      %109 = arith.mulf %107, %108 : vector<8x8x256xf32>
      %110 = arith.addf %104, %109 : vector<8x8x256xf32>
      %c2_40 = arith.constant 2 : index
      %c1024_41 = arith.constant 1024 : index
      %111 = vector.load %arg3[%c2_40, %c1024_41] : memref<3x2048xf32, #tpu.memory_space<vmem>>, vector<1x256xf32>
      %112 = vector.shape_cast %111 : vector<1x256xf32> to vector<1x1x256xf32>
      %113 = vector.broadcast %19 : vector<8x8x1xf32> to vector<8x8x256xf32>
      %114 = vector.broadcast %112 : vector<1x1x256xf32> to vector<8x8x256xf32>
      %115 = arith.mulf %113, %114 : vector<8x8x256xf32>
      %116 = arith.addf %110, %115 : vector<8x8x256xf32>
      %cst_42 = arith.constant 0.000000e+00 : f32
      %117 = vector.broadcast %cst_42 : f32 to vector<8x8x256xf32>
      %118 = arith.maximumf %116, %117 : vector<8x8x256xf32>
      %cst_43 = arith.constant dense<0.000000e+00> : vector<8x256xf32>
      %119 = vector.multi_reduction <add>, %118, %cst_43 [1] : vector<8x8x256xf32> to vector<8x256xf32>
      %c0_44 = arith.constant 0 : index
      %c1280 = arith.constant 1280 : index
      %120 = vector.load %arg3[%c0_44, %c1280] : memref<3x2048xf32, #tpu.memory_space<vmem>>, vector<1x256xf32>
      %121 = vector.shape_cast %120 : vector<1x256xf32> to vector<1x1x256xf32>
      %122 = vector.broadcast %17 : vector<8x8x1xf32> to vector<8x8x256xf32>
      %123 = vector.broadcast %121 : vector<1x1x256xf32> to vector<8x8x256xf32>
      %124 = arith.mulf %122, %123 : vector<8x8x256xf32>
      %c1_45 = arith.constant 1 : index
      %c1280_46 = arith.constant 1280 : index
      %125 = vector.load %arg3[%c1_45, %c1280_46] : memref<3x2048xf32, #tpu.memory_space<vmem>>, vector<1x256xf32>
      %126 = vector.shape_cast %125 : vector<1x256xf32> to vector<1x1x256xf32>
      %127 = vector.broadcast %18 : vector<8x8x1xf32> to vector<8x8x256xf32>
      %128 = vector.broadcast %126 : vector<1x1x256xf32> to vector<8x8x256xf32>
      %129 = arith.mulf %127, %128 : vector<8x8x256xf32>
      %130 = arith.addf %124, %129 : vector<8x8x256xf32>
      %c2_47 = arith.constant 2 : index
      %c1280_48 = arith.constant 1280 : index
      %131 = vector.load %arg3[%c2_47, %c1280_48] : memref<3x2048xf32, #tpu.memory_space<vmem>>, vector<1x256xf32>
      %132 = vector.shape_cast %131 : vector<1x256xf32> to vector<1x1x256xf32>
      %133 = vector.broadcast %19 : vector<8x8x1xf32> to vector<8x8x256xf32>
      %134 = vector.broadcast %132 : vector<1x1x256xf32> to vector<8x8x256xf32>
      %135 = arith.mulf %133, %134 : vector<8x8x256xf32>
      %136 = arith.addf %130, %135 : vector<8x8x256xf32>
      %cst_49 = arith.constant 0.000000e+00 : f32
      %137 = vector.broadcast %cst_49 : f32 to vector<8x8x256xf32>
      %138 = arith.maximumf %136, %137 : vector<8x8x256xf32>
      %cst_50 = arith.constant dense<0.000000e+00> : vector<8x256xf32>
      %139 = vector.multi_reduction <add>, %138, %cst_50 [1] : vector<8x8x256xf32> to vector<8x256xf32>
      %c0_51 = arith.constant 0 : index
      %c1536 = arith.constant 1536 : index
      %140 = vector.load %arg3[%c0_51, %c1536] : memref<3x2048xf32, #tpu.memory_space<vmem>>, vector<1x256xf32>
      %141 = vector.shape_cast %140 : vector<1x256xf32> to vector<1x1x256xf32>
      %142 = vector.broadcast %17 : vector<8x8x1xf32> to vector<8x8x256xf32>
      %143 = vector.broadcast %141 : vector<1x1x256xf32> to vector<8x8x256xf32>
      %144 = arith.mulf %142, %143 : vector<8x8x256xf32>
      %c1_52 = arith.constant 1 : index
      %c1536_53 = arith.constant 1536 : index
      %145 = vector.load %arg3[%c1_52, %c1536_53] : memref<3x2048xf32, #tpu.memory_space<vmem>>, vector<1x256xf32>
      %146 = vector.shape_cast %145 : vector<1x256xf32> to vector<1x1x256xf32>
      %147 = vector.broadcast %18 : vector<8x8x1xf32> to vector<8x8x256xf32>
      %148 = vector.broadcast %146 : vector<1x1x256xf32> to vector<8x8x256xf32>
      %149 = arith.mulf %147, %148 : vector<8x8x256xf32>
      %150 = arith.addf %144, %149 : vector<8x8x256xf32>
      %c2_54 = arith.constant 2 : index
      %c1536_55 = arith.constant 1536 : index
      %151 = vector.load %arg3[%c2_54, %c1536_55] : memref<3x2048xf32, #tpu.memory_space<vmem>>, vector<1x256xf32>
      %152 = vector.shape_cast %151 : vector<1x256xf32> to vector<1x1x256xf32>
      %153 = vector.broadcast %19 : vector<8x8x1xf32> to vector<8x8x256xf32>
      %154 = vector.broadcast %152 : vector<1x1x256xf32> to vector<8x8x256xf32>
      %155 = arith.mulf %153, %154 : vector<8x8x256xf32>
      %156 = arith.addf %150, %155 : vector<8x8x256xf32>
      %cst_56 = arith.constant 0.000000e+00 : f32
      %157 = vector.broadcast %cst_56 : f32 to vector<8x8x256xf32>
      %158 = arith.maximumf %156, %157 : vector<8x8x256xf32>
      %cst_57 = arith.constant dense<0.000000e+00> : vector<8x256xf32>
      %159 = vector.multi_reduction <add>, %158, %cst_57 [1] : vector<8x8x256xf32> to vector<8x256xf32>
      %c0_58 = arith.constant 0 : index
      %c1792 = arith.constant 1792 : index
      %160 = vector.load %arg3[%c0_58, %c1792] : memref<3x2048xf32, #tpu.memory_space<vmem>>, vector<1x256xf32>
      %161 = vector.shape_cast %160 : vector<1x256xf32> to vector<1x1x256xf32>
      %162 = vector.broadcast %17 : vector<8x8x1xf32> to vector<8x8x256xf32>
      %163 = vector.broadcast %161 : vector<1x1x256xf32> to vector<8x8x256xf32>
      %164 = arith.mulf %162, %163 : vector<8x8x256xf32>
      %c1_59 = arith.constant 1 : index
      %c1792_60 = arith.constant 1792 : index
      %165 = vector.load %arg3[%c1_59, %c1792_60] : memref<3x2048xf32, #tpu.memory_space<vmem>>, vector<1x256xf32>
      %166 = vector.shape_cast %165 : vector<1x256xf32> to vector<1x1x256xf32>
      %167 = vector.broadcast %18 : vector<8x8x1xf32> to vector<8x8x256xf32>
      %168 = vector.broadcast %166 : vector<1x1x256xf32> to vector<8x8x256xf32>
      %169 = arith.mulf %167, %168 : vector<8x8x256xf32>
      %170 = arith.addf %164, %169 : vector<8x8x256xf32>
      %c2_61 = arith.constant 2 : index
      %c1792_62 = arith.constant 1792 : index
      %171 = vector.load %arg3[%c2_61, %c1792_62] : memref<3x2048xf32, #tpu.memory_space<vmem>>, vector<1x256xf32>
      %172 = vector.shape_cast %171 : vector<1x256xf32> to vector<1x1x256xf32>
      %173 = vector.broadcast %19 : vector<8x8x1xf32> to vector<8x8x256xf32>
      %174 = vector.broadcast %172 : vector<1x1x256xf32> to vector<8x8x256xf32>
      %175 = arith.mulf %173, %174 : vector<8x8x256xf32>
      %176 = arith.addf %170, %175 : vector<8x8x256xf32>
      %cst_63 = arith.constant 0.000000e+00 : f32
      %177 = vector.broadcast %cst_63 : f32 to vector<8x8x256xf32>
      %178 = arith.maximumf %176, %177 : vector<8x8x256xf32>
      %cst_64 = arith.constant dense<0.000000e+00> : vector<8x256xf32>
      %179 = vector.multi_reduction <add>, %178, %cst_64 [1] : vector<8x8x256xf32> to vector<8x256xf32>
      %180 = tpu.concatenate %39, %59, %79, %99, %119, %139, %159, %179 in 1 : vector<8x256xf32>, vector<8x256xf32>, vector<8x256xf32>, vector<8x256xf32>, vector<8x256xf32>, vector<8x256xf32>, vector<8x256xf32>, vector<8x256xf32> -> vector<8x2048xf32>
      %181 = arith.addf %arg15, %180 : vector<8x2048xf32>
      scf.yield %181 : vector<8x2048xf32>
    }
    %c64_i32_2 = arith.constant 64 : i32
    %c0 = arith.constant 0 : index
    %c0_3 = arith.constant 0 : index
    %6 = vector.load %arg13[%c0, %c0_3] : memref<8x2048xf32, #tpu.memory_space<vmem>>, vector<8x2048xf32>
    %7 = arith.addf %6, %5 : vector<8x2048xf32>
    %c0_4 = arith.constant 0 : index
    %c0_5 = arith.constant 0 : index
    %8 = vector.load %arg13[%c0_4, %c0_5] : memref<8x2048xf32, #tpu.memory_space<vmem>>, vector<8x2048xf32>
    tpu.vector_store %arg13[%c0_4, %c0_5], %7 {strides = array<i32>} : memref<8x2048xf32, #tpu.memory_space<vmem>>, vector<8x2048xf32>,
    %c1_i32_6 = arith.constant 1 : i32
    %9 = arith.cmpi eq, %arg1, %c1_i32_6 : i32
    %10 = arith.extui %9 : i1 to i32
    %c0_i32_7 = arith.constant 0 : i32
    %11 = arith.cmpi ne, %10, %c0_i32_7 : i32
    scf.if %11 {
      %c0_8 = arith.constant 0 : index
      %c0_9 = arith.constant 0 : index
      %12 = vector.load %arg13[%c0_8, %c0_9] : memref<8x2048xf32, #tpu.memory_space<vmem>>, vector<8x2048xf32>
      %13 = arith.truncf %12 : vector<8x2048xf32> to vector<8x2048xbf16>
      %c0_10 = arith.constant 0 : index
      %c0_11 = arith.constant 0 : index
      %14 = vector.load %arg4[%c0_10, %c0_11] : memref<2048x128xbf16, #tpu.memory_space<vmem>>, vector<2048x128xbf16>
      %cst_12 = arith.constant dense<0.000000e+00> : vector<8x128xf32>
      %15 = tpu.matmul %13, %14, %cst_12 {dimension_numbers = #tpu.dot_dimension_numbers<[1], [0], [0], [1], [0, 0, 1, 1], [], []>} : vector<8x2048xbf16>, vector<2048x128xbf16>, vector<8x128xf32> -> vector<8x128xf32>
      %c0_13 = arith.constant 0 : index
      %c0_14 = arith.constant 0 : index
      %16 = vector.load %arg5[%c0_13, %c0_14] : memref<1x128xf32, #tpu.memory_space<vmem>>, vector<1x128xf32>
      %17 = vector.broadcast %16 : vector<1x128xf32> to vector<8x128xf32>
      %18 = arith.addf %15, %17 : vector<8x128xf32>
      %c0_15 = arith.constant 0 : index
      %c0_16 = arith.constant 0 : index
      %19 = vector.load %arg10[%c0_15, %c0_16] : memref<8x128xf32, #tpu.memory_space<vmem>>, vector<8x128xf32>
      tpu.vector_store %arg10[%c0_15, %c0_16], %18 {strides = array<i32>} : memref<8x128xf32, #tpu.memory_space<vmem>>, vector<8x128xf32>,
    } else {
    }
    return
  }
  func.func @transform_0(%arg0: i32, %arg1: i32) -> (i32, i32, i32) {
    %c0_i32 = arith.constant 0 : i32
    %c0_i32_0 = arith.constant 0 : i32
    return %arg0, %arg1, %c0_i32 : i32, i32, i32
  }
  func.func @transform_1(%arg0: i32, %arg1: i32) -> (i32, i32) {
    %c0_i32 = arith.constant 0 : i32
    %c0_i32_0 = arith.constant 0 : i32
    %c0_i32_1 = arith.constant 0 : i32
    return %c0_i32, %c0_i32_0 : i32, i32
  }
  func.func @transform_2(%arg0: i32, %arg1: i32) -> (i32, i32) {
    %c0_i32 = arith.constant 0 : i32
    %c0_i32_0 = arith.constant 0 : i32
    %c0_i32_1 = arith.constant 0 : i32
    return %c0_i32, %c0_i32_0 : i32, i32
  }
  func.func @transform_3(%arg0: i32, %arg1: i32) -> (i32, i32) {
    %c0_i32 = arith.constant 0 : i32
    %c0_i32_0 = arith.constant 0 : i32
    %c0_i32_1 = arith.constant 0 : i32
    return %c0_i32, %c0_i32_0 : i32, i32
  }
  func.func @transform_4(%arg0: i32, %arg1: i32) -> (i32, i32) {
    %c0_i32 = arith.constant 0 : i32
    %c0_i32_0 = arith.constant 0 : i32
    return %arg0, %c0_i32 : i32, i32
  }
  func.func @transform_5(%arg0: i32, %arg1: i32) -> (i32, i32) {
    %c0_i32 = arith.constant 0 : i32
    %c0_i32_0 = arith.constant 0 : i32
    return %arg0, %c0_i32 : i32, i32
  }
  func.func @transform_6(%arg0: i32, %arg1: i32) -> (i32, i32) {
    %c0_i32 = arith.constant 0 : i32
    %c0_i32_0 = arith.constant 0 : i32
    %c0_i32_1 = arith.constant 0 : i32
    return %c0_i32, %c0_i32_0 : i32, i32
  }
  func.func @transform_7(%arg0: i32, %arg1: i32) -> (i32, i32) {
    %c0_i32 = arith.constant 0 : i32
    %c0_i32_0 = arith.constant 0 : i32
    %c0_i32_1 = arith.constant 0 : i32
    return %c0_i32, %c0_i32_0 : i32, i32
  }
  func.func @transform_8(%arg0: i32, %arg1: i32) -> (i32, i32) {
    %c0_i32 = arith.constant 0 : i32
    %c0_i32_0 = arith.constant 0 : i32
    return %arg0, %c0_i32 : i32, i32
  }
  func.func @transform_9(%arg0: i32, %arg1: i32) -> (i32, i32) {
    %c0_i32 = arith.constant 0 : i32
    %c0_i32_0 = arith.constant 0 : i32
    return %arg0, %c0_i32 : i32, i32
  }
  func.func @transform_10(%arg0: i32, %arg1: i32) -> (i32, i32) {
    %c0_i32 = arith.constant 0 : i32
    %c0_i32_0 = arith.constant 0 : i32
    return %arg0, %c0_i32 : i32, i32
  }
}

</mosaic_0001>

<bundles_post_ra>
// kernel: _triplet_forward_impl.1
= control target key start
LH: loop header
LB: loop body
LE: loop exit
PB: predicated region body
PF: predicated region fallthrough
CT: control target
= control target key end

     0   :  { %s13926_s0 = inlined_call_operand.vmem [shape: bf16[16,1024,3], index: 0, kind: input, shape index: {}]   ;;  %s13927_s1 = inlined_call_operand.vmem [shape: f32[3,2048], index: 1, kind: input, shape index: {}]   ;;  %s13928_s2 = inlined_call_operand.vmem [shape: bf16[2048,128], index: 2, kind: input, shape index: {}]   ;;  %s13929_s3 = inlined_call_operand.vmem [shape: f32[1,128], index: 3, kind: input, shape index: {}]   ;;  %s13930_s4 = inlined_call_operand.vmem [shape: bf16[16,300], index: 4, kind: input, shape index: {}]   ;;  %s13931_s5 = inlined_call_operand.vmem [shape: bf16[16,300], index: 5, kind: input, shape index: {}]   ;;  %s13932_s6 = inlined_call_operand.vmem [shape: bf16[300,128], index: 6, kind: input, shape index: {}]   ;;  %s13933_s7 = inlined_call_operand.vmem [shape: f32[1,128], index: 7, kind: input, shape index: {}]   ;;  %s13934_s8 = inlined_call_operand.hbm [shape: f32[16,128], index: 8, kind: output, shape index: {0}]   ;;  %s13935_s9 = inlined_call_operand.hbm [shape: f32[16,128], index: 9, kind: output, shape index: {1}]   ;;  %s13936_s10 = inlined_call_operand.hbm [shape: f32[16,128], index: 10, kind: output, shape index: {2}]  }
   0x1   :  { %14045 = sst [smem:[#allocation184_spill]] %s13926_s0 }
   0x2   :  { %14046 = sst [smem:[#allocation185_spill]] %s13927_s1 }
   0x3   :  { %14047 = sst [smem:[#allocation186_spill]] %s13930_s4 }
   0x4   :  { %14048 = sst [smem:[#allocation187_spill]] %s13934_s8 }
   0x5   :  { %14049 = sst [smem:[#allocation188_spill]] %s13936_s10 }
   0x6   :  { %16 = vsyncpa [#allocation5], 0 }
   0x7   :  { %18 = vsyncpa [#allocation5 + $0x1], 0 }
   0x8   :  { %19 = vsyncpa [#allocation7], 0 }
   0x9   :  { %21 = vsyncpa [#allocation7 + $0x1], 0  ;;  %s10339_s13 = smov 0   ;;  %s10341_s14 = smov 0  }
   0xa   :  { %s10343_s15 = smov 0   ;;  %s10345_s16 = smov 0  }
   0xb   :  { %s10347_s17 = smov 0   ;;  %s10349_s18 = smov 0  }
   0xc   :  { %s10351_s19 = smov 0   ;;  %s10353_s20 = smov 0  }
   0xd   :  { %s10355_s21 = smov 0   ;;  %s10357_s22 = smov 0  }
   0xe LB: > { %14050 = sst [smem:[#allocation11_spill]] %s10174_s13  ;;  %s13940_s23 = sadd.s32 4294967295, %s10210_s22   ;;  %s10210_s22 = sphi %s10357_s22, %s27_s22   ;;  %s10206_s21 = sphi %s10355_s21, %s14695_s21   ;;  %s10202_s20 = sphi %s10353_s20, %s14694_s20   ;;  %s10198_s19 = sphi %s10351_s19, %s14693_s19   ;;  %s10194_s18 = sphi %s10349_s18, %s14692_s18   ;;  %s10190_s17 = sphi %s10347_s17, %s14691_s17   ;;  %s10186_s16 = sphi %s10345_s16, %s14690_s16   ;;  %s10182_s15 = sphi %s10343_s15, %s14698_s15   ;;  %s10178_s14 = sphi %s10341_s14, %s14697_s14   ;;  %s10174_s13 = sphi %s10339_s13, %s14696_s13  }
   0xf   : > { %14051 = sst [smem:[#allocation12_spill]] %s10190_s17  ;;  %s13941_s24 = sadd.s32 4294967294, %s10210_s22  }
  0x10   : > { %14052 = sst [smem:[#allocation13_spill]] %s10202_s20  ;;  %s36_s25 = sadd.s32 1, %s10202_s20 }
  0x11   : > { %14053 = sst [smem:[#allocation14_spill]] %s10206_s21  ;;  %s39_s26 = sadd.s32 1, %s10206_s21 }
  0x12   : > { %p37_p0 = scmp.ge.s32.totalorder %s36_s25, 2  ;;  %s48_s27 = sadd.s32 1, %s10190_s17 }
  0x13   : > { %p55_p1 = scmp.ne.s32.totalorder %s10190_s17, %s10186_s16  ;;  %p56_p2 = scmp.eq.s32.totalorder %s10210_s22, 0 }
  0x14   : > { %s14700_s25 = smov (%p37_p0, %s36_s25), 0  ;;  %s14702_s26 = smov (!%p37_p0, %s39_s26), %s10206_s21 }
  0x15   : > { %14054 = sst [smem:[#allocation15_spill]] %s14700_s25  ;;  %s44_s28 = ssub.s32 %s10202_s20, %s14700_s25 }
  0x16   : > { %p10402_p3 = por %p56_p2, %p55_p1  ;;  %p41_p4 = scmp.ge.s32.totalorder %s14702_s26, 2 }
  0x17   : > { %s231_s30 = sadd.s32 1, %s10182_s15  ;;  %p241_p5 = scmp.ne.s32.totalorder %s10182_s15, %s10178_s14 }
  0x18   : > { %p242_p6 = scmp.eq.s32.totalorder %s13940_s23, 3  ;;  %s14704_s26 = smov (%p41_p4, %s14702_s26), 0 }
  0x19   : > { %14056 = sst [smem:[#allocation16_spill]] %s14704_s26  ;;  %p247_p8 = scmp.ne.s32.totalorder %s10178_s14, %s10174_s13 }
  0x1a   : > { %p10413_p7 = por %p242_p6, %p241_p5  ;;  %s43_s12 = ssub.s32 %s10206_s21, %s14704_s26 }
  0x1b   : > { %p248_p9 = scmp.eq.s32.totalorder %s13941_s24, 3  ;;  %s45_s25 = sor.u32 %s44_s28, %s43_s12 }
  0x1c   : > { %p229_p10 = scmp.eq.s32.totalorder %s43_s12, 0  ;;  %p46_p11 = scmp.eq.s32.totalorder %s45_s25, 0 }
  0x1d   : > { %p10423_p12 = por %p248_p9, %p247_p8  ;;  %p8782_p13 = scmp.ge.s32.totalorder %s10210_s22, 4 }
  0x1e   : > { %s10428_s8 = scalar_select %p229_p10, %s10182_s15, %s231_s30  }
  0x1f   : > { %s14058_s10 = scalar_select %p10423_p12, 1, 0 }
  0x20   : > { %s10431_s23 = scalar_select %p46_p11, %s10190_s17, %s48_s27  }
  0x21   : > { %14059 = sst [smem:[#allocation17_spill]] %s14058_s10  ;;  %331 = sbr.rel (%p8782_p13) target bundleno = 304 (0x130), region = 36 }
  0x22   : > { %14060 = sst [smem:[#allocation18_spill]] %s10431_s23 }
  0x26   : > { %334 = sbr.rel (!%p10402_p3) target bundleno = 304 (0x130), region = 40  ;;  %s336_s28 = sand.u32 (%p10402_p3), 1, %s10190_s17  }
  0x27   : > { %s8785_s12 = sshll.u32 (%p10402_p3), %s10202_s20, 6  ;;  %s8783_s25 = sshll.u32 (%p10402_p3), %s336_s28, 11 }
  0x28   : > { %s9496_s24 = sshll.u32 (%p10402_p3), %s10206_s21, 10  ;;  %s14061_s0 = sld [smem:[#allocation184_spill]] (%p10402_p3) }
  0x29   : > { %s342_s26 = sadd.s32 (%p10402_p3), %s9496_s24, %s8785_s12  ;;  %s10447_s24 = scalar_lea.vmem (%p10402_p3), [#allocation3], %s8783_s25 }
  0x2a   : > { %s8787_s13 = sshll.u32 (%p10402_p3), %s342_s26, 2 }
  0x2e   : > { %s10442_s27 = scalar_lea.vmem %s14061_s0, %s8787_s13 }
  0x2f   : > { %v361_v0 = vld [vmem:[%s10442_s27] sm:$0xff]   ;;  %v365_v1 = vld [vmem:[%s10442_s27 + $0x8] sm:$0xff]   ;;  %v369_v2 = vld [vmem:[%s10442_s27 + $0x10] sm:$0xff]  }
  0x30   : > { %362 = vst [vmem:[%s10447_s24] sm:$0xff] %v361_v0   ;;  %v373_v3 = vld [vmem:[%s10442_s27 + $0x18] sm:$0xff]   ;;  %v377_v4 = vld [vmem:[%s10442_s27 + $0x20] sm:$0xff]   ;;  %v381_v5 = vld [vmem:[%s10442_s27 + $0x28] sm:$0xff]  }
  0x31   : > { %366 = vst [vmem:[%s10447_s24 + $0x8] sm:$0xff] %v365_v1   ;;  %v385_v6 = vld [vmem:[%s10442_s27 + $0x30] sm:$0xff]   ;;  %v389_v7 = vld [vmem:[%s10442_s27 + $0x38] sm:$0xff]   ;;  %v393_v8 = vld [vmem:[%s10442_s27 + $0x40] sm:$0xff]  }
  0x32   : > { %370 = vst [vmem:[%s10447_s24 + $0x10] sm:$0xff] %v369_v2   ;;  %v397_v9 = vld [vmem:[%s10442_s27 + $0x48] sm:$0xff]   ;;  %v401_v10 = vld [vmem:[%s10442_s27 + $0x50] sm:$0xff]   ;;  %v405_v11 = vld [vmem:[%s10442_s27 + $0x58] sm:$0xff]  }
  0x33   : > { %374 = vst [vmem:[%s10447_s24 + $0x18] sm:$0xff] %v373_v3   ;;  %v409_v12 = vld [vmem:[%s10442_s27 + $0x60] sm:$0xff]   ;;  %v413_v13 = vld [vmem:[%s10442_s27 + $0x68] sm:$0xff]   ;;  %v417_v14 = vld [vmem:[%s10442_s27 + $0x70] sm:$0xff]  }
  0x34   : > { %378 = vst [vmem:[%s10447_s24 + $0x20] sm:$0xff] %v377_v4   ;;  %v421_v15 = vld [vmem:[%s10442_s27 + $0x78] sm:$0xff]   ;;  %v425_v16 = vld [vmem:[%s10442_s27 + $0x80] sm:$0xff]   ;;  %v429_v17 = vld [vmem:[%s10442_s27 + $0x88] sm:$0xff]  }
  0x35   : > { %382 = vst [vmem:[%s10447_s24 + $0x28] sm:$0xff] %v381_v5   ;;  %v433_v18 = vld [vmem:[%s10442_s27 + $0x90] sm:$0xff]   ;;  %v437_v19 = vld [vmem:[%s10442_s27 + $0x98] sm:$0xff]   ;;  %v441_v20 = vld [vmem:[%s10442_s27 + $0xa0] sm:$0xff]  }
  0x36   : > { %386 = vst [vmem:[%s10447_s24 + $0x30] sm:$0xff] %v385_v6   ;;  %v445_v21 = vld [vmem:[%s10442_s27 + $0xa8] sm:$0xff]   ;;  %v449_v22 = vld [vmem:[%s10442_s27 + $0xb0] sm:$0xff]   ;;  %v453_v23 = vld [vmem:[%s10442_s27 + $0xb8] sm:$0xff]  }
  0x37   : > { %390 = vst [vmem:[%s10447_s24 + $0x38] sm:$0xff] %v389_v7   ;;  %v457_v24 = vld [vmem:[%s10442_s27 + $0xc0] sm:$0xff]   ;;  %v461_v25 = vld [vmem:[%s10442_s27 + $0xc8] sm:$0xff]   ;;  %v465_v26 = vld [vmem:[%s10442_s27 + $0xd0] sm:$0xff]  }
  0x38   : > { %394 = vst [vmem:[%s10447_s24 + $0x40] sm:$0xff] %v393_v8   ;;  %v469_v27 = vld [vmem:[%s10442_s27 + $0xd8] sm:$0xff]   ;;  %v473_v28 = vld [vmem:[%s10442_s27 + $0xe0] sm:$0xff]   ;;  %v477_v29 = vld [vmem:[%s10442_s27 + $0xe8] sm:$0xff]  }
  0x39   : > { %398 = vst [vmem:[%s10447_s24 + $0x48] sm:$0xff] %v397_v9   ;;  %v481_v30 = vld [vmem:[%s10442_s27 + $0xf0] sm:$0xff]   ;;  %v485_v31 = vld [vmem:[%s10442_s27 + $0xf8] sm:$0xff]   ;;  %v489_v32 = vld [vmem:[%s10442_s27 + $0x200] sm:$0xff]  }
  0x3a   : > { %402 = vst [vmem:[%s10447_s24 + $0x50] sm:$0xff] %v401_v10   ;;  %v493_v33 = vld [vmem:[%s10442_s27 + $0x208] sm:$0xff]   ;;  %v497_v34 = vld [vmem:[%s10442_s27 + $0x210] sm:$0xff]   ;;  %v501_v35 = vld [vmem:[%s10442_s27 + $0x218] sm:$0xff]  }
  0x3b   : > { %406 = vst [vmem:[%s10447_s24 + $0x58] sm:$0xff] %v405_v11   ;;  %v505_v36 = vld [vmem:[%s10442_s27 + $0x220] sm:$0xff]   ;;  %v509_v37 = vld [vmem:[%s10442_s27 + $0x228] sm:$0xff]   ;;  %v513_v38 = vld [vmem:[%s10442_s27 + $0x230] sm:$0xff]  }
  0x3c   : > { %410 = vst [vmem:[%s10447_s24 + $0x60] sm:$0xff] %v409_v12   ;;  %v517_v39 = vld [vmem:[%s10442_s27 + $0x238] sm:$0xff]   ;;  %v521_v40 = vld [vmem:[%s10442_s27 + $0x240] sm:$0xff]   ;;  %v525_v41 = vld [vmem:[%s10442_s27 + $0x248] sm:$0xff]  }
  0x3d   : > { %414 = vst [vmem:[%s10447_s24 + $0x68] sm:$0xff] %v413_v13   ;;  %v529_v42 = vld [vmem:[%s10442_s27 + $0x250] sm:$0xff]   ;;  %v533_v43 = vld [vmem:[%s10442_s27 + $0x258] sm:$0xff]   ;;  %v537_v44 = vld [vmem:[%s10442_s27 + $0x260] sm:$0xff]  }
  0x3e   : > { %418 = vst [vmem:[%s10447_s24 + $0x70] sm:$0xff] %v417_v14   ;;  %v541_v45 = vld [vmem:[%s10442_s27 + $0x268] sm:$0xff]   ;;  %v545_v46 = vld [vmem:[%s10442_s27 + $0x270] sm:$0xff]   ;;  %v549_v47 = vld [vmem:[%s10442_s27 + $0x278] sm:$0xff]  }
  0x3f   : > { %422 = vst [vmem:[%s10447_s24 + $0x78] sm:$0xff] %v421_v15   ;;  %v553_v48 = vld [vmem:[%s10442_s27 + $0x280] sm:$0xff]   ;;  %v557_v49 = vld [vmem:[%s10442_s27 + $0x288] sm:$0xff]   ;;  %v561_v50 = vld [vmem:[%s10442_s27 + $0x290] sm:$0xff]  }
  0x40   : > { %426 = vst [vmem:[%s10447_s24 + $0x80] sm:$0xff] %v425_v16   ;;  %v565_v51 = vld [vmem:[%s10442_s27 + $0x298] sm:$0xff]   ;;  %v569_v52 = vld [vmem:[%s10442_s27 + $0x2a0] sm:$0xff]   ;;  %v573_v53 = vld [vmem:[%s10442_s27 + $0x2a8] sm:$0xff]  }
  0x41   : > { %430 = vst [vmem:[%s10447_s24 + $0x88] sm:$0xff] %v429_v17   ;;  %v577_v54 = vld [vmem:[%s10442_s27 + $0x2b0] sm:$0xff]   ;;  %v581_v55 = vld [vmem:[%s10442_s27 + $0x2b8] sm:$0xff]   ;;  %v585_v56 = vld [vmem:[%s10442_s27 + $0x2c0] sm:$0xff]  }
  0x42   : > { %434 = vst [vmem:[%s10447_s24 + $0x90] sm:$0xff] %v433_v18   ;;  %v589_v57 = vld [vmem:[%s10442_s27 + $0x2c8] sm:$0xff]   ;;  %v593_v58 = vld [vmem:[%s10442_s27 + $0x2d0] sm:$0xff]   ;;  %v597_v59 = vld [vmem:[%s10442_s27 + $0x2d8] sm:$0xff]  }
  0x43   : > { %438 = vst [vmem:[%s10447_s24 + $0x98] sm:$0xff] %v437_v19   ;;  %v601_v60 = vld [vmem:[%s10442_s27 + $0x2e0] sm:$0xff]   ;;  %v605_v61 = vld [vmem:[%s10442_s27 + $0x2e8] sm:$0xff]   ;;  %v609_v62 = vld [vmem:[%s10442_s27 + $0x2f0] sm:$0xff]  }
  0x44   : > { %442 = vst [vmem:[%s10447_s24 + $0xa0] sm:$0xff] %v441_v20   ;;  %v613_v63 = vld [vmem:[%s10442_s27 + $0x2f8] sm:$0xff]   ;;  %v617_v0 = vld [vmem:[%s10442_s27 + $0x400] sm:$0xff]   ;;  %v621_v1 = vld [vmem:[%s10442_s27 + $0x408] sm:$0xff]  }
  0x45   : > { %446 = vst [vmem:[%s10447_s24 + $0xa8] sm:$0xff] %v445_v21   ;;  %v625_v2 = vld [vmem:[%s10442_s27 + $0x410] sm:$0xff]   ;;  %v629_v3 = vld [vmem:[%s10442_s27 + $0x418] sm:$0xff]   ;;  %v633_v4 = vld [vmem:[%s10442_s27 + $0x420] sm:$0xff]  }
  0x46   : > { %450 = vst [vmem:[%s10447_s24 + $0xb0] sm:$0xff] %v449_v22   ;;  %v637_v5 = vld [vmem:[%s10442_s27 + $0x428] sm:$0xff]   ;;  %v641_v6 = vld [vmem:[%s10442_s27 + $0x430] sm:$0xff]   ;;  %v645_v7 = vld [vmem:[%s10442_s27 + $0x438] sm:$0xff]  }
  0x47   : > { %454 = vst [vmem:[%s10447_s24 + $0xb8] sm:$0xff] %v453_v23   ;;  %v649_v8 = vld [vmem:[%s10442_s27 + $0x440] sm:$0xff]   ;;  %v653_v9 = vld [vmem:[%s10442_s27 + $0x448] sm:$0xff]   ;;  %v657_v10 = vld [vmem:[%s10442_s27 + $0x450] sm:$0xff]  }
  0x48   : > { %458 = vst [vmem:[%s10447_s24 + $0xc0] sm:$0xff] %v457_v24   ;;  %v661_v11 = vld [vmem:[%s10442_s27 + $0x458] sm:$0xff]   ;;  %v665_v12 = vld [vmem:[%s10442_s27 + $0x460] sm:$0xff]   ;;  %v669_v13 = vld [vmem:[%s10442_s27 + $0x468] sm:$0xff]  }
  0x49   : > { %462 = vst [vmem:[%s10447_s24 + $0xc8] sm:$0xff] %v461_v25   ;;  %v673_v14 = vld [vmem:[%s10442_s27 + $0x470] sm:$0xff]   ;;  %v677_v15 = vld [vmem:[%s10442_s27 + $0x478] sm:$0xff]   ;;  %v681_v16 = vld [vmem:[%s10442_s27 + $0x480] sm:$0xff]  }
  0x4a   : > { %466 = vst [vmem:[%s10447_s24 + $0xd0] sm:$0xff] %v465_v26   ;;  %v685_v17 = vld [vmem:[%s10442_s27 + $0x488] sm:$0xff]   ;;  %v689_v18 = vld [vmem:[%s10442_s27 + $0x490] sm:$0xff]   ;;  %v693_v19 = vld [vmem:[%s10442_s27 + $0x498] sm:$0xff]  }
  0x4b   : > { %470 = vst [vmem:[%s10447_s24 + $0xd8] sm:$0xff] %v469_v27   ;;  %v697_v20 = vld [vmem:[%s10442_s27 + $0x4a0] sm:$0xff]   ;;  %v701_v21 = vld [vmem:[%s10442_s27 + $0x4a8] sm:$0xff]   ;;  %v705_v22 = vld [vmem:[%s10442_s27 + $0x4b0] sm:$0xff]  }
  0x4c   : > { %474 = vst [vmem:[%s10447_s24 + $0xe0] sm:$0xff] %v473_v28   ;;  %v709_v23 = vld [vmem:[%s10442_s27 + $0x4b8] sm:$0xff]   ;;  %v713_v24 = vld [vmem:[%s10442_s27 + $0x4c0] sm:$0xff]   ;;  %v717_v25 = vld [vmem:[%s10442_s27 + $0x4c8] sm:$0xff]  }
  0x4d   : > { %478 = vst [vmem:[%s10447_s24 + $0xe8] sm:$0xff] %v477_v29   ;;  %v721_v26 = vld [vmem:[%s10442_s27 + $0x4d0] sm:$0xff]   ;;  %v725_v27 = vld [vmem:[%s10442_s27 + $0x4d8] sm:$0xff]   ;;  %v729_v28 = vld [vmem:[%s10442_s27 + $0x4e0] sm:$0xff]  }
  0x4e   : > { %482 = vst [vmem:[%s10447_s24 + $0xf0] sm:$0xff] %v481_v30   ;;  %v733_v29 = vld [vmem:[%s10442_s27 + $0x4e8] sm:$0xff]   ;;  %v737_v30 = vld [vmem:[%s10442_s27 + $0x4f0] sm:$0xff]  }
  0x4f   : > { %486 = vst [vmem:[%s10447_s24 + $0xf8] sm:$0xff] %v485_v31   ;;  %v741_v31 = vld [vmem:[%s10442_s27 + $0x4f8] sm:$0xff]  }
  0x50   : > { %490 = vst [vmem:[%s10447_s24 + $0x100] sm:$0xff] %v489_v32   ;;  %v745_v32 = vld [vmem:[%s10442_s27 + $0x600] sm:$0xff]  }
  0x51   : > { %494 = vst [vmem:[%s10447_s24 + $0x108] sm:$0xff] %v493_v33   ;;  %v749_v33 = vld [vmem:[%s10442_s27 + $0x608] sm:$0xff]  }
  0x52   : > { %498 = vst [vmem:[%s10447_s24 + $0x110] sm:$0xff] %v497_v34   ;;  %v753_v34 = vld [vmem:[%s10442_s27 + $0x610] sm:$0xff]  }
  0x53   : > { %502 = vst [vmem:[%s10447_s24 + $0x118] sm:$0xff] %v501_v35   ;;  %v757_v35 = vld [vmem:[%s10442_s27 + $0x618] sm:$0xff]  }
  0x54   : > { %506 = vst [vmem:[%s10447_s24 + $0x120] sm:$0xff] %v505_v36   ;;  %v761_v36 = vld [vmem:[%s10442_s27 + $0x620] sm:$0xff]  }
  0x55   : > { %510 = vst [vmem:[%s10447_s24 + $0x128] sm:$0xff] %v509_v37   ;;  %v765_v37 = vld [vmem:[%s10442_s27 + $0x628] sm:$0xff]  }
  0x56   : > { %514 = vst [vmem:[%s10447_s24 + $0x130] sm:$0xff] %v513_v38   ;;  %v769_v38 = vld [vmem:[%s10442_s27 + $0x630] sm:$0xff]  }
  0x57   : > { %518 = vst [vmem:[%s10447_s24 + $0x138] sm:$0xff] %v517_v39   ;;  %v773_v39 = vld [vmem:[%s10442_s27 + $0x638] sm:$0xff]  }
  0x58   : > { %522 = vst [vmem:[%s10447_s24 + $0x140] sm:$0xff] %v521_v40   ;;  %v777_v40 = vld [vmem:[%s10442_s27 + $0x640] sm:$0xff]  }
  0x59   : > { %526 = vst [vmem:[%s10447_s24 + $0x148] sm:$0xff] %v525_v41   ;;  %v781_v41 = vld [vmem:[%s10442_s27 + $0x648] sm:$0xff]  }
  0x5a   : > { %530 = vst [vmem:[%s10447_s24 + $0x150] sm:$0xff] %v529_v42   ;;  %v785_v42 = vld [vmem:[%s10442_s27 + $0x650] sm:$0xff]  }
  0x5b   : > { %534 = vst [vmem:[%s10447_s24 + $0x158] sm:$0xff] %v533_v43   ;;  %v789_v43 = vld [vmem:[%s10442_s27 + $0x658] sm:$0xff]  }
  0x5c   : > { %538 = vst [vmem:[%s10447_s24 + $0x160] sm:$0xff] %v537_v44   ;;  %v793_v44 = vld [vmem:[%s10442_s27 + $0x660] sm:$0xff]  }
  0x5d   : > { %542 = vst [vmem:[%s10447_s24 + $0x168] sm:$0xff] %v541_v45   ;;  %v797_v45 = vld [vmem:[%s10442_s27 + $0x668] sm:$0xff]  }
  0x5e   : > { %546 = vst [vmem:[%s10447_s24 + $0x170] sm:$0xff] %v545_v46   ;;  %v801_v46 = vld [vmem:[%s10442_s27 + $0x670] sm:$0xff]  }
  0x5f   : > { %550 = vst [vmem:[%s10447_s24 + $0x178] sm:$0xff] %v549_v47   ;;  %v805_v47 = vld [vmem:[%s10442_s27 + $0x678] sm:$0xff]  }
  0x60   : > { %554 = vst [vmem:[%s10447_s24 + $0x180] sm:$0xff] %v553_v48   ;;  %v809_v48 = vld [vmem:[%s10442_s27 + $0x680] sm:$0xff]  }
  0x61   : > { %558 = vst [vmem:[%s10447_s24 + $0x188] sm:$0xff] %v557_v49   ;;  %v813_v49 = vld [vmem:[%s10442_s27 + $0x688] sm:$0xff]  }
  0x62   : > { %562 = vst [vmem:[%s10447_s24 + $0x190] sm:$0xff] %v561_v50   ;;  %v817_v50 = vld [vmem:[%s10442_s27 + $0x690] sm:$0xff]  }
  0x63   : > { %566 = vst [vmem:[%s10447_s24 + $0x198] sm:$0xff] %v565_v51   ;;  %v821_v51 = vld [vmem:[%s10442_s27 + $0x698] sm:$0xff]  }
  0x64   : > { %570 = vst [vmem:[%s10447_s24 + $0x1a0] sm:$0xff] %v569_v52   ;;  %v825_v52 = vld [vmem:[%s10442_s27 + $0x6a0] sm:$0xff]  }
  0x65   : > { %574 = vst [vmem:[%s10447_s24 + $0x1a8] sm:$0xff] %v573_v53   ;;  %v829_v53 = vld [vmem:[%s10442_s27 + $0x6a8] sm:$0xff]  }
  0x66   : > { %578 = vst [vmem:[%s10447_s24 + $0x1b0] sm:$0xff] %v577_v54   ;;  %v833_v54 = vld [vmem:[%s10442_s27 + $0x6b0] sm:$0xff]  }
  0x67   : > { %582 = vst [vmem:[%s10447_s24 + $0x1b8] sm:$0xff] %v581_v55   ;;  %v837_v55 = vld [vmem:[%s10442_s27 + $0x6b8] sm:$0xff]  }
  0x68   : > { %586 = vst [vmem:[%s10447_s24 + $0x1c0] sm:$0xff] %v585_v56   ;;  %v841_v56 = vld [vmem:[%s10442_s27 + $0x6c0] sm:$0xff]  }
  0x69   : > { %590 = vst [vmem:[%s10447_s24 + $0x1c8] sm:$0xff] %v589_v57   ;;  %v845_v57 = vld [vmem:[%s10442_s27 + $0x6c8] sm:$0xff]  }
  0x6a   : > { %594 = vst [vmem:[%s10447_s24 + $0x1d0] sm:$0xff] %v593_v58   ;;  %v849_v58 = vld [vmem:[%s10442_s27 + $0x6d0] sm:$0xff]  }
  0x6b   : > { %598 = vst [vmem:[%s10447_s24 + $0x1d8] sm:$0xff] %v597_v59   ;;  %v853_v59 = vld [vmem:[%s10442_s27 + $0x6d8] sm:$0xff]  }
  0x6c   : > { %602 = vst [vmem:[%s10447_s24 + $0x1e0] sm:$0xff] %v601_v60   ;;  %v857_v60 = vld [vmem:[%s10442_s27 + $0x6e0] sm:$0xff]  }
  0x6d   : > { %606 = vst [vmem:[%s10447_s24 + $0x1e8] sm:$0xff] %v605_v61   ;;  %v861_v61 = vld [vmem:[%s10442_s27 + $0x6e8] sm:$0xff]  }
  0x6e   : > { %610 = vst [vmem:[%s10447_s24 + $0x1f0] sm:$0xff] %v609_v62   ;;  %v865_v62 = vld [vmem:[%s10442_s27 + $0x6f0] sm:$0xff]  }
  0x6f   : > { %614 = vst [vmem:[%s10447_s24 + $0x1f8] sm:$0xff] %v613_v63   ;;  %v869_v63 = vld [vmem:[%s10442_s27 + $0x6f8] sm:$0xff]  }
  0x70   : > { %618 = vst [vmem:[%s10447_s24 + $0x200] sm:$0xff] %v617_v0   ;;  %v873_v0 = vld [vmem:[%s10442_s27 + $0x800] sm:$0xff]  }
  0x71   : > { %622 = vst [vmem:[%s10447_s24 + $0x208] sm:$0xff] %v621_v1   ;;  %v877_v1 = vld [vmem:[%s10442_s27 + $0x808] sm:$0xff]  }
  0x72   : > { %626 = vst [vmem:[%s10447_s24 + $0x210] sm:$0xff] %v625_v2   ;;  %v881_v2 = vld [vmem:[%s10442_s27 + $0x810] sm:$0xff]  }
  0x73   : > { %630 = vst [vmem:[%s10447_s24 + $0x218] sm:$0xff] %v629_v3   ;;  %v885_v3 = vld [vmem:[%s10442_s27 + $0x818] sm:$0xff]  }
  0x74   : > { %634 = vst [vmem:[%s10447_s24 + $0x220] sm:$0xff] %v633_v4   ;;  %v889_v4 = vld [vmem:[%s10442_s27 + $0x820] sm:$0xff]  }
  0x75   : > { %638 = vst [vmem:[%s10447_s24 + $0x228] sm:$0xff] %v637_v5   ;;  %v893_v5 = vld [vmem:[%s10442_s27 + $0x828] sm:$0xff]  }
  0x76   : > { %642 = vst [vmem:[%s10447_s24 + $0x230] sm:$0xff] %v641_v6   ;;  %v897_v6 = vld [vmem:[%s10442_s27 + $0x830] sm:$0xff]  }
  0x77   : > { %646 = vst [vmem:[%s10447_s24 + $0x238] sm:$0xff] %v645_v7   ;;  %v901_v7 = vld [vmem:[%s10442_s27 + $0x838] sm:$0xff]  }
  0x78   : > { %650 = vst [vmem:[%s10447_s24 + $0x240] sm:$0xff] %v649_v8   ;;  %v905_v8 = vld [vmem:[%s10442_s27 + $0x840] sm:$0xff]  }
  0x79   : > { %654 = vst [vmem:[%s10447_s24 + $0x248] sm:$0xff] %v653_v9   ;;  %v909_v9 = vld [vmem:[%s10442_s27 + $0x848] sm:$0xff]  }
  0x7a   : > { %658 = vst [vmem:[%s10447_s24 + $0x250] sm:$0xff] %v657_v10   ;;  %v913_v10 = vld [vmem:[%s10442_s27 + $0x850] sm:$0xff]  }
  0x7b   : > { %662 = vst [vmem:[%s10447_s24 + $0x258] sm:$0xff] %v661_v11   ;;  %v917_v11 = vld [vmem:[%s10442_s27 + $0x858] sm:$0xff]  }
  0x7c   : > { %666 = vst [vmem:[%s10447_s24 + $0x260] sm:$0xff] %v665_v12   ;;  %v921_v12 = vld [vmem:[%s10442_s27 + $0x860] sm:$0xff]  }
  0x7d   : > { %670 = vst [vmem:[%s10447_s24 + $0x268] sm:$0xff] %v669_v13   ;;  %v925_v13 = vld [vmem:[%s10442_s27 + $0x868] sm:$0xff]  }
  0x7e   : > { %674 = vst [vmem:[%s10447_s24 + $0x270] sm:$0xff] %v673_v14   ;;  %v929_v14 = vld [vmem:[%s10442_s27 + $0x870] sm:$0xff]  }
  0x7f   : > { %678 = vst [vmem:[%s10447_s24 + $0x278] sm:$0xff] %v677_v15   ;;  %v933_v15 = vld [vmem:[%s10442_s27 + $0x878] sm:$0xff]  }
  0x80   : > { %682 = vst [vmem:[%s10447_s24 + $0x280] sm:$0xff] %v681_v16   ;;  %v937_v16 = vld [vmem:[%s10442_s27 + $0x880] sm:$0xff]  }
  0x81   : > { %686 = vst [vmem:[%s10447_s24 + $0x288] sm:$0xff] %v685_v17   ;;  %v941_v17 = vld [vmem:[%s10442_s27 + $0x888] sm:$0xff]  }
  0x82   : > { %690 = vst [vmem:[%s10447_s24 + $0x290] sm:$0xff] %v689_v18   ;;  %v945_v18 = vld [vmem:[%s10442_s27 + $0x890] sm:$0xff]  }
  0x83   : > { %694 = vst [vmem:[%s10447_s24 + $0x298] sm:$0xff] %v693_v19   ;;  %v949_v19 = vld [vmem:[%s10442_s27 + $0x898] sm:$0xff]  }
  0x84   : > { %698 = vst [vmem:[%s10447_s24 + $0x2a0] sm:$0xff] %v697_v20   ;;  %v953_v20 = vld [vmem:[%s10442_s27 + $0x8a0] sm:$0xff]  }
  0x85   : > { %702 = vst [vmem:[%s10447_s24 + $0x2a8] sm:$0xff] %v701_v21   ;;  %v957_v21 = vld [vmem:[%s10442_s27 + $0x8a8] sm:$0xff]  }
  0x86   : > { %706 = vst [vmem:[%s10447_s24 + $0x2b0] sm:$0xff] %v705_v22   ;;  %v961_v22 = vld [vmem:[%s10442_s27 + $0x8b0] sm:$0xff]  }
  0x87   : > { %710 = vst [vmem:[%s10447_s24 + $0x2b8] sm:$0xff] %v709_v23   ;;  %v965_v23 = vld [vmem:[%s10442_s27 + $0x8b8] sm:$0xff]  }
  0x88   : > { %714 = vst [vmem:[%s10447_s24 + $0x2c0] sm:$0xff] %v713_v24   ;;  %v969_v24 = vld [vmem:[%s10442_s27 + $0x8c0] sm:$0xff]  }
  0x89   : > { %718 = vst [vmem:[%s10447_s24 + $0x2c8] sm:$0xff] %v717_v25   ;;  %v973_v25 = vld [vmem:[%s10442_s27 + $0x8c8] sm:$0xff]  }
  0x8a   : > { %722 = vst [vmem:[%s10447_s24 + $0x2d0] sm:$0xff] %v721_v26   ;;  %v977_v26 = vld [vmem:[%s10442_s27 + $0x8d0] sm:$0xff]  }
  0x8b   : > { %726 = vst [vmem:[%s10447_s24 + $0x2d8] sm:$0xff] %v725_v27   ;;  %v981_v27 = vld [vmem:[%s10442_s27 + $0x8d8] sm:$0xff]  }
  0x8c   : > { %730 = vst [vmem:[%s10447_s24 + $0x2e0] sm:$0xff] %v729_v28   ;;  %v985_v28 = vld [vmem:[%s10442_s27 + $0x8e0] sm:$0xff]  }
  0x8d   : > { %734 = vst [vmem:[%s10447_s24 + $0x2e8] sm:$0xff] %v733_v29   ;;  %v989_v29 = vld [vmem:[%s10442_s27 + $0x8e8] sm:$0xff]  }
  0x8e   : > { %738 = vst [vmem:[%s10447_s24 + $0x2f0] sm:$0xff] %v737_v30   ;;  %v993_v30 = vld [vmem:[%s10442_s27 + $0x8f0] sm:$0xff]  }
  0x8f   : > { %742 = vst [vmem:[%s10447_s24 + $0x2f8] sm:$0xff] %v741_v31   ;;  %v997_v31 = vld [vmem:[%s10442_s27 + $0x8f8] sm:$0xff]  }
  0x90   : > { %746 = vst [vmem:[%s10447_s24 + $0x300] sm:$0xff] %v745_v32   ;;  %v1001_v32 = vld [vmem:[%s10442_s27 + $0xa00] sm:$0xff]  }
  0x91   : > { %750 = vst [vmem:[%s10447_s24 + $0x308] sm:$0xff] %v749_v33   ;;  %v1005_v33 = vld [vmem:[%s10442_s27 + $0xa08] sm:$0xff]  }
  0x92   : > { %754 = vst [vmem:[%s10447_s24 + $0x310] sm:$0xff] %v753_v34   ;;  %v1009_v34 = vld [vmem:[%s10442_s27 + $0xa10] sm:$0xff]  }
  0x93   : > { %758 = vst [vmem:[%s10447_s24 + $0x318] sm:$0xff] %v757_v35   ;;  %v1013_v35 = vld [vmem:[%s10442_s27 + $0xa18] sm:$0xff]  }
  0x94   : > { %762 = vst [vmem:[%s10447_s24 + $0x320] sm:$0xff] %v761_v36   ;;  %v1017_v36 = vld [vmem:[%s10442_s27 + $0xa20] sm:$0xff]  }
  0x95   : > { %766 = vst [vmem:[%s10447_s24 + $0x328] sm:$0xff] %v765_v37   ;;  %v1021_v37 = vld [vmem:[%s10442_s27 + $0xa28] sm:$0xff]  }
  0x96   : > { %770 = vst [vmem:[%s10447_s24 + $0x330] sm:$0xff] %v769_v38   ;;  %v1025_v38 = vld [vmem:[%s10442_s27 + $0xa30] sm:$0xff]  }
  0x97   : > { %774 = vst [vmem:[%s10447_s24 + $0x338] sm:$0xff] %v773_v39   ;;  %v1029_v39 = vld [vmem:[%s10442_s27 + $0xa38] sm:$0xff]  }
  0x98   : > { %778 = vst [vmem:[%s10447_s24 + $0x340] sm:$0xff] %v777_v40   ;;  %v1033_v40 = vld [vmem:[%s10442_s27 + $0xa40] sm:$0xff]  }
  0x99   : > { %782 = vst [vmem:[%s10447_s24 + $0x348] sm:$0xff] %v781_v41   ;;  %v1037_v41 = vld [vmem:[%s10442_s27 + $0xa48] sm:$0xff]  }
  0x9a   : > { %786 = vst [vmem:[%s10447_s24 + $0x350] sm:$0xff] %v785_v42   ;;  %v1041_v42 = vld [vmem:[%s10442_s27 + $0xa50] sm:$0xff]  }
  0x9b   : > { %790 = vst [vmem:[%s10447_s24 + $0x358] sm:$0xff] %v789_v43   ;;  %v1045_v43 = vld [vmem:[%s10442_s27 + $0xa58] sm:$0xff]  }
  0x9c   : > { %794 = vst [vmem:[%s10447_s24 + $0x360] sm:$0xff] %v793_v44   ;;  %v1049_v44 = vld [vmem:[%s10442_s27 + $0xa60] sm:$0xff]  }
  0x9d   : > { %798 = vst [vmem:[%s10447_s24 + $0x368] sm:$0xff] %v797_v45   ;;  %v1053_v45 = vld [vmem:[%s10442_s27 + $0xa68] sm:$0xff]  }
  0x9e   : > { %802 = vst [vmem:[%s10447_s24 + $0x370] sm:$0xff] %v801_v46   ;;  %v1057_v46 = vld [vmem:[%s10442_s27 + $0xa70] sm:$0xff]  }
  0x9f   : > { %806 = vst [vmem:[%s10447_s24 + $0x378] sm:$0xff] %v805_v47   ;;  %v1061_v47 = vld [vmem:[%s10442_s27 + $0xa78] sm:$0xff]  }
  0xa0   : > { %810 = vst [vmem:[%s10447_s24 + $0x380] sm:$0xff] %v809_v48   ;;  %v1065_v48 = vld [vmem:[%s10442_s27 + $0xa80] sm:$0xff]  }
  0xa1   : > { %814 = vst [vmem:[%s10447_s24 + $0x388] sm:$0xff] %v813_v49   ;;  %v1069_v49 = vld [vmem:[%s10442_s27 + $0xa88] sm:$0xff]  }
  0xa2   : > { %818 = vst [vmem:[%s10447_s24 + $0x390] sm:$0xff] %v817_v50   ;;  %v1073_v50 = vld [vmem:[%s10442_s27 + $0xa90] sm:$0xff]  }
  0xa3   : > { %822 = vst [vmem:[%s10447_s24 + $0x398] sm:$0xff] %v821_v51   ;;  %v1077_v51 = vld [vmem:[%s10442_s27 + $0xa98] sm:$0xff]  }
  0xa4   : > { %826 = vst [vmem:[%s10447_s24 + $0x3a0] sm:$0xff] %v825_v52   ;;  %v1081_v52 = vld [vmem:[%s10442_s27 + $0xaa0] sm:$0xff]  }
  0xa5   : > { %830 = vst [vmem:[%s10447_s24 + $0x3a8] sm:$0xff] %v829_v53   ;;  %v1085_v53 = vld [vmem:[%s10442_s27 + $0xaa8] sm:$0xff]  }
  0xa6   : > { %834 = vst [vmem:[%s10447_s24 + $0x3b0] sm:$0xff] %v833_v54   ;;  %v1089_v54 = vld [vmem:[%s10442_s27 + $0xab0] sm:$0xff]  }
  0xa7   : > { %838 = vst [vmem:[%s10447_s24 + $0x3b8] sm:$0xff] %v837_v55   ;;  %v1093_v55 = vld [vmem:[%s10442_s27 + $0xab8] sm:$0xff]  }
  0xa8   : > { %842 = vst [vmem:[%s10447_s24 + $0x3c0] sm:$0xff] %v841_v56   ;;  %v1097_v56 = vld [vmem:[%s10442_s27 + $0xac0] sm:$0xff]  }
  0xa9   : > { %846 = vst [vmem:[%s10447_s24 + $0x3c8] sm:$0xff] %v845_v57   ;;  %v1101_v57 = vld [vmem:[%s10442_s27 + $0xac8] sm:$0xff]  }
  0xaa   : > { %850 = vst [vmem:[%s10447_s24 + $0x3d0] sm:$0xff] %v849_v58   ;;  %v1105_v58 = vld [vmem:[%s10442_s27 + $0xad0] sm:$0xff]  }
  0xab   : > { %854 = vst [vmem:[%s10447_s24 + $0x3d8] sm:$0xff] %v853_v59   ;;  %v1109_v59 = vld [vmem:[%s10442_s27 + $0xad8] sm:$0xff]  }
  0xac   : > { %858 = vst [vmem:[%s10447_s24 + $0x3e0] sm:$0xff] %v857_v60   ;;  %v1113_v60 = vld [vmem:[%s10442_s27 + $0xae0] sm:$0xff]  }
  0xad   : > { %862 = vst [vmem:[%s10447_s24 + $0x3e8] sm:$0xff] %v861_v61   ;;  %v1117_v61 = vld [vmem:[%s10442_s27 + $0xae8] sm:$0xff]  }
  0xae   : > { %866 = vst [vmem:[%s10447_s24 + $0x3f0] sm:$0xff] %v865_v62   ;;  %v1121_v62 = vld [vmem:[%s10442_s27 + $0xaf0] sm:$0xff]  }
  0xaf   : > { %870 = vst [vmem:[%s10447_s24 + $0x3f8] sm:$0xff] %v869_v63   ;;  %v1125_v63 = vld [vmem:[%s10442_s27 + $0xaf8] sm:$0xff]  }
  0xb0   : > { %874 = vst [vmem:[%s10447_s24 + $0x400] sm:$0xff] %v873_v0   ;;  %v1129_v0 = vld [vmem:[%s10442_s27 + $0xc00] sm:$0xff]  }
  0xb1   : > { %878 = vst [vmem:[%s10447_s24 + $0x408] sm:$0xff] %v877_v1   ;;  %v1133_v1 = vld [vmem:[%s10442_s27 + $0xc08] sm:$0xff]  }
  0xb2   : > { %882 = vst [vmem:[%s10447_s24 + $0x410] sm:$0xff] %v881_v2   ;;  %v1137_v2 = vld [vmem:[%s10442_s27 + $0xc10] sm:$0xff]  }
  0xb3   : > { %886 = vst [vmem:[%s10447_s24 + $0x418] sm:$0xff] %v885_v3   ;;  %v1141_v3 = vld [vmem:[%s10442_s27 + $0xc18] sm:$0xff]  }
  0xb4   : > { %890 = vst [vmem:[%s10447_s24 + $0x420] sm:$0xff] %v889_v4   ;;  %v1145_v4 = vld [vmem:[%s10442_s27 + $0xc20] sm:$0xff]  }
  0xb5   : > { %894 = vst [vmem:[%s10447_s24 + $0x428] sm:$0xff] %v893_v5   ;;  %v1149_v5 = vld [vmem:[%s10442_s27 + $0xc28] sm:$0xff]  }
  0xb6   : > { %898 = vst [vmem:[%s10447_s24 + $0x430] sm:$0xff] %v897_v6   ;;  %v1153_v6 = vld [vmem:[%s10442_s27 + $0xc30] sm:$0xff]  }
  0xb7   : > { %902 = vst [vmem:[%s10447_s24 + $0x438] sm:$0xff] %v901_v7   ;;  %v1157_v7 = vld [vmem:[%s10442_s27 + $0xc38] sm:$0xff]  }
  0xb8   : > { %906 = vst [vmem:[%s10447_s24 + $0x440] sm:$0xff] %v905_v8   ;;  %v1161_v8 = vld [vmem:[%s10442_s27 + $0xc40] sm:$0xff]  }
  0xb9   : > { %910 = vst [vmem:[%s10447_s24 + $0x448] sm:$0xff] %v909_v9   ;;  %v1165_v9 = vld [vmem:[%s10442_s27 + $0xc48] sm:$0xff]  }
  0xba   : > { %914 = vst [vmem:[%s10447_s24 + $0x450] sm:$0xff] %v913_v10   ;;  %v1169_v10 = vld [vmem:[%s10442_s27 + $0xc50] sm:$0xff]  }
  0xbb   : > { %918 = vst [vmem:[%s10447_s24 + $0x458] sm:$0xff] %v917_v11   ;;  %v1173_v11 = vld [vmem:[%s10442_s27 + $0xc58] sm:$0xff]  }
  0xbc   : > { %922 = vst [vmem:[%s10447_s24 + $0x460] sm:$0xff] %v921_v12   ;;  %v1177_v12 = vld [vmem:[%s10442_s27 + $0xc60] sm:$0xff]  }
  0xbd   : > { %926 = vst [vmem:[%s10447_s24 + $0x468] sm:$0xff] %v925_v13   ;;  %v1181_v13 = vld [vmem:[%s10442_s27 + $0xc68] sm:$0xff]  }
  0xbe   : > { %930 = vst [vmem:[%s10447_s24 + $0x470] sm:$0xff] %v929_v14   ;;  %v1185_v14 = vld [vmem:[%s10442_s27 + $0xc70] sm:$0xff]  }
  0xbf   : > { %934 = vst [vmem:[%s10447_s24 + $0x478] sm:$0xff] %v933_v15   ;;  %v1189_v15 = vld [vmem:[%s10442_s27 + $0xc78] sm:$0xff]  }
  0xc0   : > { %938 = vst [vmem:[%s10447_s24 + $0x480] sm:$0xff] %v937_v16   ;;  %v1193_v16 = vld [vmem:[%s10442_s27 + $0xc80] sm:$0xff]  }
  0xc1   : > { %942 = vst [vmem:[%s10447_s24 + $0x488] sm:$0xff] %v941_v17   ;;  %v1197_v17 = vld [vmem:[%s10442_s27 + $0xc88] sm:$0xff]  }
  0xc2   : > { %946 = vst [vmem:[%s10447_s24 + $0x490] sm:$0xff] %v945_v18   ;;  %v1201_v18 = vld [vmem:[%s10442_s27 + $0xc90] sm:$0xff]  }
  0xc3   : > { %950 = vst [vmem:[%s10447_s24 + $0x498] sm:$0xff] %v949_v19   ;;  %v1205_v19 = vld [vmem:[%s10442_s27 + $0xc98] sm:$0xff]  }
  0xc4   : > { %954 = vst [vmem:[%s10447_s24 + $0x4a0] sm:$0xff] %v953_v20   ;;  %v1209_v20 = vld [vmem:[%s10442_s27 + $0xca0] sm:$0xff]  }
  0xc5   : > { %958 = vst [vmem:[%s10447_s24 + $0x4a8] sm:$0xff] %v957_v21   ;;  %v1213_v21 = vld [vmem:[%s10442_s27 + $0xca8] sm:$0xff]  }
  0xc6   : > { %962 = vst [vmem:[%s10447_s24 + $0x4b0] sm:$0xff] %v961_v22   ;;  %v1217_v22 = vld [vmem:[%s10442_s27 + $0xcb0] sm:$0xff]  }
  0xc7   : > { %966 = vst [vmem:[%s10447_s24 + $0x4b8] sm:$0xff] %v965_v23   ;;  %v1221_v23 = vld [vmem:[%s10442_s27 + $0xcb8] sm:$0xff]  }
  0xc8   : > { %970 = vst [vmem:[%s10447_s24 + $0x4c0] sm:$0xff] %v969_v24   ;;  %v1225_v24 = vld [vmem:[%s10442_s27 + $0xcc0] sm:$0xff]  }
  0xc9   : > { %974 = vst [vmem:[%s10447_s24 + $0x4c8] sm:$0xff] %v973_v25   ;;  %v1229_v25 = vld [vmem:[%s10442_s27 + $0xcc8] sm:$0xff]  }
  0xca   : > { %978 = vst [vmem:[%s10447_s24 + $0x4d0] sm:$0xff] %v977_v26   ;;  %v1233_v26 = vld [vmem:[%s10442_s27 + $0xcd0] sm:$0xff]  }
  0xcb   : > { %982 = vst [vmem:[%s10447_s24 + $0x4d8] sm:$0xff] %v981_v27   ;;  %v1237_v27 = vld [vmem:[%s10442_s27 + $0xcd8] sm:$0xff]  }
  0xcc   : > { %986 = vst [vmem:[%s10447_s24 + $0x4e0] sm:$0xff] %v985_v28   ;;  %v1241_v28 = vld [vmem:[%s10442_s27 + $0xce0] sm:$0xff]  }
  0xcd   : > { %990 = vst [vmem:[%s10447_s24 + $0x4e8] sm:$0xff] %v989_v29   ;;  %v1245_v29 = vld [vmem:[%s10442_s27 + $0xce8] sm:$0xff]  }
  0xce   : > { %994 = vst [vmem:[%s10447_s24 + $0x4f0] sm:$0xff] %v993_v30   ;;  %v1249_v30 = vld [vmem:[%s10442_s27 + $0xcf0] sm:$0xff]  }
  0xcf   : > { %998 = vst [vmem:[%s10447_s24 + $0x4f8] sm:$0xff] %v997_v31   ;;  %v1253_v31 = vld [vmem:[%s10442_s27 + $0xcf8] sm:$0xff]  }
  0xd0   : > { %1002 = vst [vmem:[%s10447_s24 + $0x500] sm:$0xff] %v1001_v32   ;;  %v1257_v32 = vld [vmem:[%s10442_s27 + $0xe00] sm:$0xff]  }
  0xd1   : > { %1006 = vst [vmem:[%s10447_s24 + $0x508] sm:$0xff] %v1005_v33   ;;  %v1261_v33 = vld [vmem:[%s10442_s27 + $0xe08] sm:$0xff]  }
  0xd2   : > { %1010 = vst [vmem:[%s10447_s24 + $0x510] sm:$0xff] %v1009_v34   ;;  %v1265_v34 = vld [vmem:[%s10442_s27 + $0xe10] sm:$0xff]  }
  0xd3   : > { %1014 = vst [vmem:[%s10447_s24 + $0x518] sm:$0xff] %v1013_v35   ;;  %v1269_v35 = vld [vmem:[%s10442_s27 + $0xe18] sm:$0xff]  }
  0xd4   : > { %1018 = vst [vmem:[%s10447_s24 + $0x520] sm:$0xff] %v1017_v36   ;;  %v1273_v36 = vld [vmem:[%s10442_s27 + $0xe20] sm:$0xff]  }
  0xd5   : > { %1022 = vst [vmem:[%s10447_s24 + $0x528] sm:$0xff] %v1021_v37   ;;  %v1277_v37 = vld [vmem:[%s10442_s27 + $0xe28] sm:$0xff]  }
  0xd6   : > { %1026 = vst [vmem:[%s10447_s24 + $0x530] sm:$0xff] %v1025_v38   ;;  %v1281_v38 = vld [vmem:[%s10442_s27 + $0xe30] sm:$0xff]  }
  0xd7   : > { %1030 = vst [vmem:[%s10447_s24 + $0x538] sm:$0xff] %v1029_v39   ;;  %v1285_v39 = vld [vmem:[%s10442_s27 + $0xe38] sm:$0xff]  }
  0xd8   : > { %1034 = vst [vmem:[%s10447_s24 + $0x540] sm:$0xff] %v1033_v40   ;;  %v1289_v40 = vld [vmem:[%s10442_s27 + $0xe40] sm:$0xff]  }
  0xd9   : > { %1038 = vst [vmem:[%s10447_s24 + $0x548] sm:$0xff] %v1037_v41   ;;  %v1293_v41 = vld [vmem:[%s10442_s27 + $0xe48] sm:$0xff]  }
  0xda   : > { %1042 = vst [vmem:[%s10447_s24 + $0x550] sm:$0xff] %v1041_v42   ;;  %v1297_v42 = vld [vmem:[%s10442_s27 + $0xe50] sm:$0xff]  }
  0xdb   : > { %1046 = vst [vmem:[%s10447_s24 + $0x558] sm:$0xff] %v1045_v43   ;;  %v1301_v43 = vld [vmem:[%s10442_s27 + $0xe58] sm:$0xff]  }
  0xdc   : > { %1050 = vst [vmem:[%s10447_s24 + $0x560] sm:$0xff] %v1049_v44   ;;  %v1305_v44 = vld [vmem:[%s10442_s27 + $0xe60] sm:$0xff]  }
  0xdd   : > { %1054 = vst [vmem:[%s10447_s24 + $0x568] sm:$0xff] %v1053_v45   ;;  %v1309_v45 = vld [vmem:[%s10442_s27 + $0xe68] sm:$0xff]  }
  0xde   : > { %1058 = vst [vmem:[%s10447_s24 + $0x570] sm:$0xff] %v1057_v46   ;;  %v1313_v46 = vld [vmem:[%s10442_s27 + $0xe70] sm:$0xff]  }
  0xdf   : > { %1062 = vst [vmem:[%s10447_s24 + $0x578] sm:$0xff] %v1061_v47   ;;  %v1317_v47 = vld [vmem:[%s10442_s27 + $0xe78] sm:$0xff]  }
  0xe0   : > { %1066 = vst [vmem:[%s10447_s24 + $0x580] sm:$0xff] %v1065_v48   ;;  %v1321_v48 = vld [vmem:[%s10442_s27 + $0xe80] sm:$0xff]  }
  0xe1   : > { %1070 = vst [vmem:[%s10447_s24 + $0x588] sm:$0xff] %v1069_v49   ;;  %v1325_v49 = vld [vmem:[%s10442_s27 + $0xe88] sm:$0xff]  }
  0xe2   : > { %1074 = vst [vmem:[%s10447_s24 + $0x590] sm:$0xff] %v1073_v50   ;;  %v1329_v50 = vld [vmem:[%s10442_s27 + $0xe90] sm:$0xff]  }
  0xe3   : > { %1078 = vst [vmem:[%s10447_s24 + $0x598] sm:$0xff] %v1077_v51   ;;  %v1333_v51 = vld [vmem:[%s10442_s27 + $0xe98] sm:$0xff]  }
  0xe4   : > { %1082 = vst [vmem:[%s10447_s24 + $0x5a0] sm:$0xff] %v1081_v52   ;;  %v1337_v52 = vld [vmem:[%s10442_s27 + $0xea0] sm:$0xff]  }
  0xe5   : > { %1086 = vst [vmem:[%s10447_s24 + $0x5a8] sm:$0xff] %v1085_v53   ;;  %v1341_v53 = vld [vmem:[%s10442_s27 + $0xea8] sm:$0xff]  }
  0xe6   : > { %1090 = vst [vmem:[%s10447_s24 + $0x5b0] sm:$0xff] %v1089_v54   ;;  %v1345_v54 = vld [vmem:[%s10442_s27 + $0xeb0] sm:$0xff]  }
  0xe7   : > { %1094 = vst [vmem:[%s10447_s24 + $0x5b8] sm:$0xff] %v1093_v55   ;;  %v1349_v55 = vld [vmem:[%s10442_s27 + $0xeb8] sm:$0xff]  }
  0xe8   : > { %1098 = vst [vmem:[%s10447_s24 + $0x5c0] sm:$0xff] %v1097_v56   ;;  %v1353_v56 = vld [vmem:[%s10442_s27 + $0xec0] sm:$0xff]  }
  0xe9   : > { %1102 = vst [vmem:[%s10447_s24 + $0x5c8] sm:$0xff] %v1101_v57   ;;  %v1357_v57 = vld [vmem:[%s10442_s27 + $0xec8] sm:$0xff]  }
  0xea   : > { %1106 = vst [vmem:[%s10447_s24 + $0x5d0] sm:$0xff] %v1105_v58   ;;  %v1361_v58 = vld [vmem:[%s10442_s27 + $0xed0] sm:$0xff]  }
  0xeb   : > { %1110 = vst [vmem:[%s10447_s24 + $0x5d8] sm:$0xff] %v1109_v59   ;;  %v1365_v59 = vld [vmem:[%s10442_s27 + $0xed8] sm:$0xff]  }
  0xec   : > { %1114 = vst [vmem:[%s10447_s24 + $0x5e0] sm:$0xff] %v1113_v60   ;;  %v1369_v60 = vld [vmem:[%s10442_s27 + $0xee0] sm:$0xff]  }
  0xed   : > { %1118 = vst [vmem:[%s10447_s24 + $0x5e8] sm:$0xff] %v1117_v61   ;;  %v1373_v61 = vld [vmem:[%s10442_s27 + $0xee8] sm:$0xff]  }
  0xee   : > { %1122 = vst [vmem:[%s10447_s24 + $0x5f0] sm:$0xff] %v1121_v62   ;;  %v1377_v62 = vld [vmem:[%s10442_s27 + $0xef0] sm:$0xff]  }
  0xef   : > { %1126 = vst [vmem:[%s10447_s24 + $0x5f8] sm:$0xff] %v1125_v63   ;;  %v1381_v63 = vld [vmem:[%s10442_s27 + $0xef8] sm:$0xff]  }
  0xf0   : > { %1130 = vst [vmem:[%s10447_s24 + $0x600] sm:$0xff] %v1129_v0  }
  0xf1   : > { %1134 = vst [vmem:[%s10447_s24 + $0x608] sm:$0xff] %v1133_v1  }
  0xf2   : > { %1138 = vst [vmem:[%s10447_s24 + $0x610] sm:$0xff] %v1137_v2  }
  0xf3   : > { %1142 = vst [vmem:[%s10447_s24 + $0x618] sm:$0xff] %v1141_v3  }
  0xf4   : > { %1146 = vst [vmem:[%s10447_s24 + $0x620] sm:$0xff] %v1145_v4  }
  0xf5   : > { %1150 = vst [vmem:[%s10447_s24 + $0x628] sm:$0xff] %v1149_v5  }
  0xf6   : > { %1154 = vst [vmem:[%s10447_s24 + $0x630] sm:$0xff] %v1153_v6  }
  0xf7   : > { %1158 = vst [vmem:[%s10447_s24 + $0x638] sm:$0xff] %v1157_v7  }
  0xf8   : > { %1162 = vst [vmem:[%s10447_s24 + $0x640] sm:$0xff] %v1161_v8  }
  0xf9   : > { %1166 = vst [vmem:[%s10447_s24 + $0x648] sm:$0xff] %v1165_v9  }
  0xfa   : > { %1170 = vst [vmem:[%s10447_s24 + $0x650] sm:$0xff] %v1169_v10  }
  0xfb   : > { %1174 = vst [vmem:[%s10447_s24 + $0x658] sm:$0xff] %v1173_v11  }
  0xfc   : > { %1178 = vst [vmem:[%s10447_s24 + $0x660] sm:$0xff] %v1177_v12  }
  0xfd   : > { %1182 = vst [vmem:[%s10447_s24 + $0x668] sm:$0xff] %v1181_v13  }
  0xfe   : > { %1186 = vst [vmem:[%s10447_s24 + $0x670] sm:$0xff] %v1185_v14  }
  0xff   : > { %1190 = vst [vmem:[%s10447_s24 + $0x678] sm:$0xff] %v1189_v15  }
 0x100   : > { %1194 = vst [vmem:[%s10447_s24 + $0x680] sm:$0xff] %v1193_v16  }
 0x101   : > { %1198 = vst [vmem:[%s10447_s24 + $0x688] sm:$0xff] %v1197_v17  }
 0x102   : > { %1202 = vst [vmem:[%s10447_s24 + $0x690] sm:$0xff] %v1201_v18  }
 0x103   : > { %1206 = vst [vmem:[%s10447_s24 + $0x698] sm:$0xff] %v1205_v19  }
 0x104   : > { %1210 = vst [vmem:[%s10447_s24 + $0x6a0] sm:$0xff] %v1209_v20  }
 0x105   : > { %1214 = vst [vmem:[%s10447_s24 + $0x6a8] sm:$0xff] %v1213_v21  }
 0x106   : > { %1218 = vst [vmem:[%s10447_s24 + $0x6b0] sm:$0xff] %v1217_v22  }
 0x107   : > { %1222 = vst [vmem:[%s10447_s24 + $0x6b8] sm:$0xff] %v1221_v23  }
 0x108   : > { %1226 = vst [vmem:[%s10447_s24 + $0x6c0] sm:$0xff] %v1225_v24  }
 0x109   : > { %1230 = vst [vmem:[%s10447_s24 + $0x6c8] sm:$0xff] %v1229_v25  }
 0x10a   : > { %1234 = vst [vmem:[%s10447_s24 + $0x6d0] sm:$0xff] %v1233_v26  }
 0x10b   : > { %1238 = vst [vmem:[%s10447_s24 + $0x6d8] sm:$0xff] %v1237_v27  }
 0x10c   : > { %1242 = vst [vmem:[%s10447_s24 + $0x6e0] sm:$0xff] %v1241_v28  }
 0x10d   : > { %1246 = vst [vmem:[%s10447_s24 + $0x6e8] sm:$0xff] %v1245_v29  }
 0x10e   : > { %1250 = vst [vmem:[%s10447_s24 + $0x6f0] sm:$0xff] %v1249_v30  }
 0x10f   : > { %1254 = vst [vmem:[%s10447_s24 + $0x6f8] sm:$0xff] %v1253_v31  }
 0x110   : > { %1258 = vst [vmem:[%s10447_s24 + $0x700] sm:$0xff] %v1257_v32  }
 0x111   : > { %1262 = vst [vmem:[%s10447_s24 + $0x708] sm:$0xff] %v1261_v33  }
 0x112   : > { %1266 = vst [vmem:[%s10447_s24 + $0x710] sm:$0xff] %v1265_v34  }
 0x113   : > { %1270 = vst [vmem:[%s10447_s24 + $0x718] sm:$0xff] %v1269_v35  }
 0x114   : > { %1274 = vst [vmem:[%s10447_s24 + $0x720] sm:$0xff] %v1273_v36  }
 0x115   : > { %1278 = vst [vmem:[%s10447_s24 + $0x728] sm:$0xff] %v1277_v37  }
 0x116   : > { %1282 = vst [vmem:[%s10447_s24 + $0x730] sm:$0xff] %v1281_v38  }
 0x117   : > { %1286 = vst [vmem:[%s10447_s24 + $0x738] sm:$0xff] %v1285_v39  }
 0x118   : > { %1290 = vst [vmem:[%s10447_s24 + $0x740] sm:$0xff] %v1289_v40  }
 0x119   : > { %1294 = vst [vmem:[%s10447_s24 + $0x748] sm:$0xff] %v1293_v41  }
 0x11a   : > { %1298 = vst [vmem:[%s10447_s24 + $0x750] sm:$0xff] %v1297_v42  }
 0x11b   : > { %1302 = vst [vmem:[%s10447_s24 + $0x758] sm:$0xff] %v1301_v43  }
 0x11c   : > { %1306 = vst [vmem:[%s10447_s24 + $0x760] sm:$0xff] %v1305_v44  }
 0x11d   : > { %1310 = vst [vmem:[%s10447_s24 + $0x768] sm:$0xff] %v1309_v45  }
 0x11e   : > { %1314 = vst [vmem:[%s10447_s24 + $0x770] sm:$0xff] %v1313_v46  }
 0x11f   : > { %1318 = vst [vmem:[%s10447_s24 + $0x778] sm:$0xff] %v1317_v47  }
 0x120   : > { %1322 = vst [vmem:[%s10447_s24 + $0x780] sm:$0xff] %v1321_v48  }
 0x121   : > { %1326 = vst [vmem:[%s10447_s24 + $0x788] sm:$0xff] %v1325_v49  }
 0x122   : > { %1330 = vst [vmem:[%s10447_s24 + $0x790] sm:$0xff] %v1329_v50  }
 0x123   : > { %1334 = vst [vmem:[%s10447_s24 + $0x798] sm:$0xff] %v1333_v51  }
 0x124   : > { %1338 = vst [vmem:[%s10447_s24 + $0x7a0] sm:$0xff] %v1337_v52  }
 0x125   : > { %1342 = vst [vmem:[%s10447_s24 + $0x7a8] sm:$0xff] %v1341_v53  }
 0x126   : > { %1346 = vst [vmem:[%s10447_s24 + $0x7b0] sm:$0xff] %v1345_v54  }
 0x127   : > { %1350 = vst [vmem:[%s10447_s24 + $0x7b8] sm:$0xff] %v1349_v55  }
 0x128   : > { %1354 = vst [vmem:[%s10447_s24 + $0x7c0] sm:$0xff] %v1353_v56  }
 0x129   : > { %1358 = vst [vmem:[%s10447_s24 + $0x7c8] sm:$0xff] %v1357_v57  }
 0x12a   : > { %1362 = vst [vmem:[%s10447_s24 + $0x7d0] sm:$0xff] %v1361_v58  }
 0x12b   : > { %1366 = vst [vmem:[%s10447_s24 + $0x7d8] sm:$0xff] %v1365_v59  }
 0x12c   : > { %1370 = vst [vmem:[%s10447_s24 + $0x7e0] sm:$0xff] %v1369_v60  }
 0x12d   : > { %1374 = vst [vmem:[%s10447_s24 + $0x7e8] sm:$0xff] %v1373_v61  }
 0x12e   : > { %1378 = vst [vmem:[%s10447_s24 + $0x7f0] sm:$0xff] %v1377_v62  }
 0x12f   : > { %1382 = vst [vmem:[%s10447_s24 + $0x7f8] sm:$0xff] %v1381_v63  }
 0x130 PF: > { %p8788_p0 = scmp.ge.s32.totalorder %s10210_s22, 1  ;;  %p4521_p1 = scmp.lt.s32.totalorder %s10210_s22, 5 }
 0x132   : > { %p4522_p2 = pnand %p8788_p0, %p4521_p1 }
 0x133   : > { %s4528_s10 = sand.u32 (!%p4522_p2), 1, %s10186_s16   ;;  %s13946_s13 = sand.u32 (!%p4522_p2), 1, %s10178_s14  }
 0x134   : > { %4525 = sbr.rel (%p4522_p2) target bundleno = 1476 (0x5c4), region = 100  ;;  %s10962_s26 = sshll.u32 (!%p4522_p2), %s4528_s10, 11 }
 0x135   : > { %s10966_s29 = sshll.u32 (!%p4522_p2), %s13946_s13, 3  ;;  %p4587_p3 = scmp.lt.s32.totalorder (!%p4522_p2), %s10198_s19, 1 }
 0x136   : > { %s14062_s4 = sld [smem:[#allocation186_spill]] (!%p4522_p2)  ;;  %s4530_s0 = scalar_lea.vmem (!%p4522_p2), [#allocation3], %s10962_s26 }
 0x137   : > { %s4577_s13 = scalar_lea.vmem (!%p4522_p2), [#allocation6], %s10966_s29  ;;  %s14044_s20 = scalar_lea.vmem (!%p4522_p2), [#allocation8], %s10966_s29 }
 0x138   : > { %p8795_p4 = scmp.ne.s32.totalorder (!%p4522_p2), %s10194_s18, 0 }
 0x139   : > { %s4588_s28 = scalar_select %p4587_p3, %s10198_s19, 1 }
 0x13a   : > { %4601 = sbr.rel (%p8795_p4) target bundleno = 506 (0x1fa), region = 108 }
 0x13b   : > { %s9663_s12 = smul.u32 12, %s4588_s28 }
 0x13d   : > { %s10973_s27 = scalar_lea.vmem %s14062_s4, %s9663_s12  ;;  %s10978_s10 = scalar_lea.vmem %s13931_s5, %s9663_s12 }
 0x13f   : > { %v9504_v0 = vld [vmem:[%s13932_s6 + $0x38] sm:$0xff]  ;;  %v8870_v1 = vld [vmem:[%s13932_s6 + $0x90] sm:$0xf]  ;;  %v9515_v2 = vld [vmem:[%s13932_s6 + $0x90] sm:$0x30]  ;;  %v10280_v3 = vmov 0.0  }
 0x140   : > { %4602 = vst [vmem:[#allocation2 + $0x30] sm:$0xff] %v10280_v3  ;;  %v8871_v4 = vor.u32 %v9515_v2, %v8870_v1  ;;  %vm4789_vm0 = vcmask 1045504   ;;  %v9512_v5 = vld [vmem:[%s13932_s6 + $0x78] sm:$0xff]  ;;  %4793 = vmatpush.bf16.msra.mxu0 %v9504_v0  ;;  %v9503_v7 = vld [vmem:[%s13932_s6 + $0x30] sm:$0xff]  ;;  %v9514_v11 = vld [vmem:[%s13932_s6 + $0x88] sm:$0xff]  ;;  %vm4785_vm1 = vcmask 359424  }
 0x141   : > { %v9523_v6 = vld [vmem:[%s13932_s6 + $0x38] sm:$0xff]  ;;  %4603 = vst [vmem:[#allocation2] sm:$0xff] %v10280_v3  ;;  %4806 = vmatpush.bf16.msra.mxu1 %v9512_v5  ;;  %v9511_v9 = vld [vmem:[%s13932_s6 + $0x70] sm:$0xff]  ;;  %v9502_v12 = vld [vmem:[%s13932_s6 + $0x28] sm:$0xff] }
 0x142   : > { %4604 = vst [vmem:[#allocation2 + $0x58] sm:$0xff] %v10280_v3  ;;  %v4791_v8 = vsel %vm4789_vm0, %v8871_v4, 0  ;;  %5006 = vmatpush.bf16.msra.mxu3 %v9523_v6  ;;  %v9522_v10 = vld [vmem:[%s13932_s6 + $0x30] sm:$0xff]  ;;  %v4619_v13 = vld [vmem:[%s10973_s27 + $0x8] sm:$0xf]  ;;  %v9513_v16 = vld [vmem:[%s13932_s6 + $0x80] sm:$0xff] }
 0x143   : > { %4605 = vst [vmem:[#allocation2 + $0x18] sm:$0xff] %v10280_v3  ;;  %4824 = vmatpush.bf16.msra.mxu2 %v4791_v8  ;;  %v9510_v14 = vld [vmem:[%s13932_s6 + $0x68] sm:$0xff]  ;;  %v4666_v17 = vunpack.c.l.b16 %v4619_v13  ;;  %v9531_v18 = vld [vmem:[%s13932_s6 + $0x78] sm:$0xff]  ;;  %v9501_v19 = vld [vmem:[%s13932_s6 + $0x20] sm:$0xff] }
 0x144   : > { %4606 = vst [vmem:[#allocation2 + $0x50] sm:$0xff] %v10280_v3  ;;  %4794 = vmatpush.bf16.msra.mxu0 %v9503_v7  ;;  %v9521_v15 = vld [vmem:[%s13932_s6 + $0x28] sm:$0xff]  ;;  %v9509_v20 = vld [vmem:[%s13932_s6 + $0x60] sm:$0xff]  ;;  %v9530_v23 = vld [vmem:[%s13932_s6 + $0x70] sm:$0xff] }
 0x145   : > { %4607 = vst [vmem:[#allocation2 + $0x68] sm:$0xff] %v10280_v3  ;;  %4807 = vmatpush.bf16.msra.mxu1 %v9511_v9  ;;  %v9520_v21 = vld [vmem:[%s13932_s6 + $0x20] sm:$0xff]  ;;  %v4669_v22 = vpack.c.b16 %v4666_v17, %v4666_v17  ;;  %v9500_v24 = vld [vmem:[%s13932_s6 + $0x18] sm:$0xff]  ;;  %v9529_v27 = vld [vmem:[%s13932_s6 + $0x68] sm:$0xff] }
 0x146   : > { %4608 = vst [vmem:[#allocation2 + $0x8] sm:$0xff] %v10280_v3  ;;  %5007 = vmatpush.bf16.msra.mxu3 %v9522_v10  ;;  %v9508_v25 = vld [vmem:[%s13932_s6 + $0x58] sm:$0xff]  ;;  %v9499_v28 = vld [vmem:[%s13932_s6 + $0x10] sm:$0xff]  ;;  %v9528_v31 = vld [vmem:[%s13932_s6 + $0x60] sm:$0xff] }
 0x147   : > { %4609 = vst [vmem:[#allocation2 + $0x48] sm:$0xff] %v10280_v3  ;;  %4825 = vmatpush.bf16.msra.mxu2 %v9514_v11  ;;  %v9519_v26 = vld [vmem:[%s13932_s6 + $0x18] sm:$0xff]  ;;  %v9507_v29 = vld [vmem:[%s13932_s6 + $0x50] sm:$0xff]  ;;  %v9498_v32 = vld [vmem:[%s13932_s6 + $0x8] sm:$0xff] }
 0x148   : > { %4610 = vst [vmem:[#allocation2 + $0x40] sm:$0xff] %v10280_v3  ;;  %4795 = vmatpush.bf16.msra.mxu0 %v9502_v12  ;;  %v9518_v30 = vld [vmem:[%s13932_s6 + $0x10] sm:$0xff]  ;;  %v4618_v33 = vld [vmem:[%s10973_s27] sm:$0xff]  ;;  %v9506_v36 = vld [vmem:[%s13932_s6 + $0x48] sm:$0xff] }
 0x149   : > { %4611 = vst [vmem:[#allocation2 + $0x20] sm:$0xff] %v10280_v3  ;;  %4808 = vmatpush.bf16.msra.mxu1 %v9510_v14  ;;  %v8947_v34 = vld [vmem:[%s13932_s6 + $0x90] sm:$0xf]  ;;  %v9534_v35 = vld [vmem:[%s13932_s6 + $0x90] sm:$0x30]  ;;  %v9517_v37 = vld [vmem:[%s13932_s6 + $0x8] sm:$0xff]  ;;  %v4664_v40 = vunpack.c.l.b16 %v4618_v33  ;;  %v4665_v43 = vunpack.c.h.b16 %v4618_v33 }
 0x14a   : > { %4612 = vst [vmem:[#allocation2 + $0x10] sm:$0xff] %v10280_v3  ;;  %5008 = vmatpush.bf16.msra.mxu3 %v9521_v15  ;;  %v4833_v38 = vld [vmem:[%s10978_s10] sm:$0xff]  ;;  %v9527_v39 = vld [vmem:[%s13932_s6 + $0x58] sm:$0xff]  ;;  %v8948_v41 = vor.u32 %v9534_v35, %v8947_v34  ;;  %v9526_v47 = vld [vmem:[%s13932_s6 + $0x50] sm:$0xff] }
 0x14b   : > { %4613 = vst [vmem:[#allocation2 + $0x38] sm:$0xff] %v10280_v3  ;;  %4826 = vmatpush.bf16.msra.mxu2 %v9513_v16  ;;  %v9497_v42 = vld [vmem:[%s13932_s6] sm:$0xff]  ;;  %v4879_v44 = vunpack.c.l.b16 %v4833_v38  ;;  %v4667_v48 = vpack.c.b16 %v4664_v40, %v4664_v40  ;;  %v4668_v50 = vpack.c.b16 %v4665_v43, %v4665_v43  ;;  %v9533_v52 = vld [vmem:[%s13932_s6 + $0x88] sm:$0xff]  ;;  %v4880_v54 = vunpack.c.h.b16 %v4833_v38 }
 0x14c   : > { %4614 = vst [vmem:[#allocation2 + $0x60] sm:$0xff] %v10280_v3  ;;  %4796 = vmatpush.bf16.msra.mxu0 %v9501_v19  ;;  %v9505_v45 = vld [vmem:[%s13932_s6 + $0x40] sm:$0xff]  ;;  %v5004_v49 = vsel %vm4789_vm0, %v8948_v41, 0  ;;  %v9525_v53 = vld [vmem:[%s13932_s6 + $0x48] sm:$0xff] }
 0x14d   : > { %4615 = vst [vmem:[#allocation2 + $0x70] sm:$0xff] %v10280_v3  ;;  %4809 = vmatpush.bf16.msra.mxu1 %v9509_v20  ;;  %v9516_v46 = vld [vmem:[%s13932_s6] sm:$0xff]  ;;  %v4882_v51 = vpack.c.b16 %v4879_v44, %v4879_v44  ;;  %v4834_v57 = vld [vmem:[%s10978_s10 + $0x8] sm:$0xf]  ;;  %v4883_v58 = vpack.c.b16 %v4880_v54, %v4880_v54 }
 0x14e   : > { %4616 = vst [vmem:[#allocation2 + $0x78] sm:$0xff] %v10280_v3  ;;  %5009 = vmatpush.bf16.msra.mxu3 %v9520_v21  ;;  %8872 = vmatmul.msk.bf16.vlgmr.msra.gmra.mxu2 %vm4785_vm1, %v4669_v22  ;;  %v9532_v55 = vld [vmem:[%s13932_s6 + $0x80] sm:$0xff]  ;;  %v4881_v59 = vunpack.c.l.b16 %v4834_v57 }
 0x14f   : > { %5019 = vmatpush.bf16.msrb.mxu2 %v9531_v18  ;;  %4617 = vst [vmem:[#allocation2 + $0x28] sm:$0xff] %v10280_v3  ;;  %v9524_v56 = vld [vmem:[%s13932_s6 + $0x40] sm:$0xff] }
 0x150   : > { %4797 = vmatpush.bf16.msra.mxu0 %v9500_v24  ;;  %v4884_v60 = vpack.c.b16 %v4881_v59, %v4881_v59  ;;  %v9901_v62 = vld [vmem:[%s13933_s7] ss:$0 sm:$0xff] }
 0x151   : > { %4810 = vmatpush.bf16.msra.mxu1 %v9508_v25  ;;  %v9902_v8 = vld [vmem:[%s13933_s7] ss:$0 sm:$0xff] }
 0x152   : > { %5010 = vmatpush.bf16.msra.mxu3 %v9519_v26 }
 0x153   : > { %5020 = vmatpush.bf16.msrb.mxu2 %v9530_v23 }
 0x154   : > { %4798 = vmatpush.bf16.msra.mxu0 %v9499_v28 }
 0x155   : > { %4811 = vmatpush.bf16.msra.mxu1 %v9507_v29 }
 0x156   : > { %5011 = vmatpush.bf16.msra.mxu3 %v9518_v30 }
 0x157   : > { %5021 = vmatpush.bf16.msrb.mxu2 %v9529_v27 }
 0x158   : > { %4799 = vmatpush.bf16.msra.mxu0 %v9498_v32 }
 0x159   : > { %4812 = vmatpush.bf16.msra.mxu1 %v9506_v36 }
 0x15a   : > { %5012 = vmatpush.bf16.msra.mxu3 %v9517_v37 }
 0x15b   : > { %5022 = vmatpush.bf16.msrb.mxu2 %v9528_v31 }
 0x15c   : > { %4800 = vmatpush.bf16.msra.mxu0 %v9497_v42 }
 0x15d   : > { %4813 = vmatpush.bf16.msra.mxu1 %v9505_v45 }
 0x15e   : > { %5013 = vmatpush.bf16.msra.mxu3 %v9516_v46 }
 0x15f   : > { %5023 = vmatpush.bf16.msrb.mxu2 %v9527_v39  ;;  %4801 = vmatmul.bf16.vlgmr.msra.gmra.mxu0 %v4667_v48 }
 0x160   : > { %5037 = vmatpush.bf16.msrb.mxu0 %v5004_v49  ;;  %4814 = vmatmul.bf16.vlgmr.msra.gmra.mxu1 %v4668_v50 }
 0x161   : > { %5014 = vmatmul.bf16.vlgmr.msra.gmra.mxu3 %v4882_v51 }
 0x163   : > { %5024 = vmatpush.bf16.msrb.mxu2 %v9526_v47 }
 0x164   : > { %5038 = vmatpush.bf16.msrb.mxu0 %v9533_v52 }
 0x167   : > { %5025 = vmatpush.bf16.msrb.mxu2 %v9525_v53 }
 0x168   : > { %5039 = vmatpush.bf16.msrb.mxu0 %v9532_v55 }
 0x16b   : > { %5026 = vmatpush.bf16.msrb.mxu2 %v9524_v56 }
 0x16e   : > { %5027 = vmatmul.bf16.vlgmr.msrb.gmra.mxu2 %v4883_v58 }
 0x16f   : > { %8949 = vmatmul.msk.bf16.vlgmr.msrb.gmra.mxu0 %vm4785_vm1, %v4884_v60 }
 0x1d1   : > { %v4828_v61 = vpop.f32.mrf.mxu2 }
 0x1d9   : > { %v4830_v63 = vpop.f32.mrf.mxu2 }
 0x1dc   : > { %v4802_v0 = vpop.f32.mrf.mxu0 }
 0x1dd   : > { %v4803_v1 = vadd.f32 %v9901_v62, %v4802_v0  ;;  %v4815_v2 = vpop.f32.mrf.mxu1 }
 0x1df   : > { %v4816_v3 = vadd.f32 %v4815_v2, %v4803_v1 }
 0x1e1   : > { %v4829_v4 = vadd.f32 %v4828_v61, %v4816_v3 }
 0x1e3   : > { %4832 = vst [vmem:[%s4577_s13] sm:$0xff] %v4829_v4 }
 0x1e4   : > { %v5015_v5 = vpop.f32.mrf.mxu3  ;;  %v4804_v6 = vpop.f32.mrf.mxu0 }
 0x1e5   : > { %v4817_v7 = vpop.f32.mrf.mxu1  ;;  %v5016_v9 = vadd.f32 %v9902_v8, %v5015_v5 }
 0x1ec   : > { %v5017_v10 = vpop.f32.mrf.mxu3  ;;  %v5041_v11 = vpop.f32.mrf.mxu0 }
 0x1f1   : > { %v5028_v12 = vpop.f32.mrf.mxu2 }
 0x1f2   : > { %v5029_v13 = vadd.f32 %v5028_v12, %v5016_v9 }
 0x1f4   : > { %v5042_v14 = vadd.f32 %v5041_v11, %v5029_v13  ;;  %v5043_v15 = vpop.f32.mrf.mxu0 }
 0x1f6   : > { %5045 = vst [vmem:[%s14044_s20] sm:$0xff] %v5042_v14 }
 0x1f9   : > { %v5030_v16 = vpop.f32.mrf.mxu2 }
 0x1fa PF: > { %v11123_v17 = vmov 0.0   ;;  %v11125_v18 = vmov 0.0   ;;  %v11127_v19 = vmov 0.0   ;;  %v11129_v20 = vmov 0.0   ;;  %s11155_s23 = smov 0  }
 0x1fb   : > { %v11131_v21 = vmov 0.0   ;;  %v11133_v22 = vmov 0.0   ;;  %v11135_v23 = vmov 0.0   ;;  %v11137_v24 = vmov 0.0  }
 0x1fc   : > { %v11139_v25 = vmov 0.0   ;;  %v11141_v26 = vmov 0.0   ;;  %v11143_v27 = vmov 0.0   ;;  %v11145_v28 = vmov 0.0  }
 0x1fd   : > { %v11147_v29 = vmov 0.0   ;;  %v11149_v30 = vmov 0.0   ;;  %v11151_v31 = vmov 0.0   ;;  %v11153_v32 = vmov 0.0  }
 0x1fe LB: >> { %14063 = vst [vmem:[#allocation19_spill] sm:$0xff] %v10214_v17  ;;  %v10281_v33 = vmov 0   ;;  %s8950_s27 = sshll.u32 %s10278_s23, 3  ;;  %v10282_v34 = vmov 1   ;;  %v10283_v55 = vmov 2   ;;  %s14079_s1 = sld [smem:[#allocation185_spill]]  ;;  %s10278_s23 = sphi %s11155_s23, %s5051_s23   ;;  %v10274_v32 = vphi %v11153_v32, %v14677_v32   ;;  %v10270_v31 = vphi %v11151_v31, %v14676_v31   ;;  %v10266_v30 = vphi %v11149_v30, %v14675_v30   ;;  %v10262_v29 = vphi %v11147_v29, %v14674_v29   ;;  %v10258_v28 = vphi %v11145_v28, %v14673_v28   ;;  %v10254_v27 = vphi %v11143_v27, %v14672_v27   ;;  %v10250_v26 = vphi %v11141_v26, %v14671_v26   ;;  %v10246_v25 = vphi %v11139_v25, %v14670_v25   ;;  %v10242_v24 = vphi %v11137_v24, %v14669_v24   ;;  %v10238_v23 = vphi %v11135_v23, %v14668_v23   ;;  %v10234_v22 = vphi %v11133_v22, %v14667_v22   ;;  %v10230_v21 = vphi %v11131_v21, %v14666_v21   ;;  %v10226_v20 = vphi %v11129_v20, %v14665_v20   ;;  %v10222_v19 = vphi %v11127_v19, %v14664_v19   ;;  %v10218_v18 = vphi %v11125_v18, %v14663_v18   ;;  %v10214_v17 = vphi %v11123_v17, %v14662_v17  }
 0x1ff   : >> { %14064 = vst [vmem:[#allocation20_spill] sm:$0xff] %v10218_v18  ;;  %9914 = vset.pattern.permute.xlu1 %v10281_v33  ;;  %9903 = vset.pattern.permute.xlu0 %v10281_v33  ;;  %s5069_s4 = sshra.s32 %s8950_s27, 3  ;;  %vm6912_vm2 = vcmask 1041409   ;;  %vm6914_vm3 = vcmask 1042434   ;;  %vm6916_vm4 = vcmask 1043459   ;;  %vm6918_vm5 = vcmask 1044484  }
 0x200   : >> { %14065 = vst [vmem:[#allocation21_spill] sm:$0xff] %v10222_v19  ;;  %9925 = vset.pattern.permute.xlu2 %v10282_v34  ;;  %s8951_s28 = sshll.u32 %s5069_s4, 2  ;;  %vm6920_vm6 = vcmask 1045509   ;;  %vm6922_vm7 = vcmask 1046534   ;;  %vm6924_vm8 = vcmask 1047559   ;;  %s5051_s23 = sadd.s32 1, %s10278_s23  }
 0x201   : >> { %14066 = vst [vmem:[#allocation22_spill] sm:$0xff] %v10226_v20  ;;  %s5072_s25 = scalar_lea.vmem %s4530_s0, %s8951_s28 [#allocation3]  ;;  %p13394_p5 = scmp.ge.s32.totalorder %s5051_s23, 64  }
 0x202   : >> { %14067 = vst [vmem:[#allocation23_spill] sm:$0xff] %v10230_v21  ;;  %v5077_v35 = vld [vmem:[%s5072_s25 + $0x400] sm:$0xf]  ;;  %p8975_p6 = scmp.ne.s32.totalorder (%p13394_p5), %s10194_s18, 1 }
 0x203   : >> { %14068 = vst [vmem:[#allocation24_spill] sm:$0xff] %v10234_v22  ;;  %v5078_v36 = vld [vmem:[%s5072_s25 + $0x500] sm:$0xf]  ;;  %v5085_v38 = vunpack.c.l.bf16 %v5077_v35 }
 0x204   : >> { %14069 = vst [vmem:[#allocation25_spill] sm:$0xff] %v10238_v23  ;;  %v5073_v37 = vld [vmem:[%s5072_s25] sm:$0xf]  ;;  %v5086_v39 = vunpack.c.l.bf16 %v5078_v36  ;;  %v8955_v57 = vld [vmem:[%s14079_s1 + $0x9] ss:$4 sm:$0x3] }
 0x205   : >> { %14070 = vst [vmem:[#allocation26_spill] sm:$0xff] %v10242_v24  ;;  %v5074_v40 = vld [vmem:[%s5072_s25 + $0x100] sm:$0xf]  ;;  %v5081_v41 = vunpack.c.l.bf16 %v5073_v37  ;;  %v8958_v58 = vld [vmem:[%s14079_s1 + $0x11] ss:$4 sm:$0x3] }
 0x206   : >> { %14071 = vst [vmem:[#allocation27_spill] sm:$0xff] %v10246_v25  ;;  %v5082_v42 = vunpack.c.l.bf16 %v5074_v40  ;;  %v5079_v43 = vld [vmem:[%s5072_s25 + $0x600] sm:$0xf]  ;;  %v9915_v45 = vpack.i.bf16 %v5086_v39, %v5085_v38  ;;  %v8961_v59 = vld [vmem:[%s14079_s1 + $0x19] ss:$4 sm:$0x3] }
 0x207   : >> { %14072 = vst [vmem:[#allocation28_spill] sm:$0xff] %v10250_v26  ;;  %v5080_v44 = vld [vmem:[%s5072_s25 + $0x700] sm:$0xf]  ;;  %v5087_v49 = vunpack.c.l.bf16 %v5079_v43  ;;  %v8967_v62 = vld [vmem:[%s14079_s1 + $0x29] ss:$4 sm:$0x3] }
 0x208   : >> { %14073 = vst [vmem:[#allocation29_spill] sm:$0xff] %v10254_v27  ;;  %v5075_v46 = vld [vmem:[%s5072_s25 + $0x200] sm:$0xf]  ;;  %v9904_v48 = vpack.i.bf16 %v5082_v42, %v5081_v41  ;;  %9916 = vperm.xlu1 %9914, %v9915_v45   ;;  %v5088_v50 = vunpack.c.l.bf16 %v5080_v44  ;;  %v11233_v0 = vperm.slane %v8955_v57, 0  ;;  %v11235_v1 = vperm.slane %v8955_v57, 1 }
 0x209   : >> { %14074 = vst [vmem:[#allocation30_spill] sm:$0xff] %v10258_v28  ;;  %v5076_v47 = vld [vmem:[%s5072_s25 + $0x300] sm:$0xf]  ;;  %v5083_v51 = vunpack.c.l.bf16 %v5075_v46  ;;  %v8970_v2 = vld [vmem:[%s14079_s1 + $0x31] ss:$4 sm:$0x3] }
 0x20a   : >> { %14075 = vst [vmem:[#allocation31_spill] sm:$0xff] %v10262_v29  ;;  %9905 = vperm.xlu0 %9903, %v9904_v48   ;;  %v5084_v52 = vunpack.c.l.bf16 %v5076_v47  ;;  %9927 = vperm.xlu2 %9925, %v9904_v48   ;;  %v9920_v53 = vpack.i.bf16 %v5088_v50, %v5087_v49  ;;  %v8952_v56 = vld [vmem:[%s14079_s1 + $0x1] ss:$4 sm:$0x3]  ;;  %v11240_v3 = vperm.slane %v8958_v58, 0  ;;  %v11242_v4 = vperm.slane %v8958_v58, 1 }
 0x20b   : >> { %14076 = vst [vmem:[#allocation32_spill] sm:$0xff] %v10266_v30  ;;  %v8964_v60 = vld [vmem:[%s14079_s1 + $0x21] ss:$4 sm:$0x3]  ;;  %v11226_v61 = vperm.slane %v8952_v56, 0  ;;  %v11231_v63 = vperm.slane %v8952_v56, 1 }
 0x20c   : >> { %14077 = vst [vmem:[#allocation33_spill] sm:$0xff] %v10270_v31  ;;  %v9909_v54 = vpack.i.bf16 %v5084_v52, %v5083_v51  ;;  %v11244_v5 = vperm.slane %v8961_v59, 0  ;;  %v8973_v6 = vld [vmem:[%s14079_s1 + $0x39] ss:$4 sm:$0x3]  ;;  %v11255_v9 = vperm.slane %v8961_v59, 1 }
 0x20d   : >> { %14078 = vst [vmem:[#allocation34_spill] sm:$0xff] %v10274_v32  ;;  %v5089_v7 = vld [vmem:[%s14079_s1] ss:$4 sm:$0x3]  ;;  %v11257_v10 = vperm.slane %v8964_v60, 0  ;;  %v11259_v11 = vperm.slane %v8964_v60, 1 }
 0x20e   : >> { %14080 = vst [vmem:[#allocation35_spill] sm:$0xff] %v11226_v61  ;;  %v8954_v8 = vld [vmem:[%s14079_s1 + $0x8] ss:$4 sm:$0x3]  ;;  %v11261_v12 = vperm.slane %v8967_v62, 0  ;;  %v11263_v13 = vperm.slane %v8967_v62, 1 }
 0x20f   : >> { %14081 = vst [vmem:[#allocation36_spill] sm:$0xff] %v11231_v63  ;;  %v11265_v14 = vperm.slane %v8970_v2, 0  ;;  %v11267_v15 = vperm.slane %v8970_v2, 1  ;;  %v11269_v16 = vperm.slane %v8973_v6, 0  ;;  %v11273_v35 = vperm.slane %v5089_v7, 0 }
 0x210   : >> { %9921 = vperm.xlu1 %9914, %v9920_v53   ;;  %14082 = vst [vmem:[#allocation37_spill] sm:$0xff] %v11233_v0  ;;  %v11275_v36 = vperm.slane %v5089_v7, 1  ;;  %v11277_v37 = vperm.slane %v8954_v8, 0  ;;  %v8957_v38 = vld [vmem:[%s14079_s1 + $0x10] ss:$4 sm:$0x3] }
 0x211   : >> { %14083 = vst [vmem:[#allocation38_spill] sm:$0xff] %v11235_v1  ;;  %v8960_v39 = vld [vmem:[%s14079_s1 + $0x18] ss:$4 sm:$0x3]  ;;  %v11299_v46 = vperm.slane %v8957_v38, 0  ;;  %v11301_v47 = vperm.slane %v8957_v38, 1 }
 0x212   : >> { %9910 = vperm.xlu0 %9903, %v9909_v54   ;;  %9932 = vperm.xlu2 %9925, %v9909_v54   ;;  %14084 = vst [vmem:[#allocation39_spill] sm:$0xff] %v11240_v3  ;;  %v8963_v40 = vld [vmem:[%s14079_s1 + $0x20] ss:$4 sm:$0x3]  ;;  %v11305_v49 = vperm.slane %v8960_v39, 1 }
 0x213   : >> { %14085 = vst [vmem:[#allocation40_spill] sm:$0xff] %v11242_v4  ;;  %v8966_v41 = vld [vmem:[%s14079_s1 + $0x28] ss:$4 sm:$0x3]  ;;  %v11307_v50 = vperm.slane %v8963_v40, 0  ;;  %v11309_v51 = vperm.slane %v8963_v40, 1 }
 0x214   : >> { %14086 = vst [vmem:[#allocation41_spill] sm:$0xff] %v11244_v5  ;;  %v8969_v43 = vld [vmem:[%s14079_s1 + $0x30] ss:$4 sm:$0x3]  ;;  %v11311_v52 = vperm.slane %v8966_v41, 0 }
 0x215   : >> { %14087 = vst [vmem:[#allocation42_spill] sm:$0xff] %v11255_v9  ;;  %v8972_v44 = vld [vmem:[%s14079_s1 + $0x38] ss:$4 sm:$0x3] }
 0x216   : >> { %14088 = vst [vmem:[#allocation43_spill] sm:$0xff] %v11257_v10  ;;  %v11319_v56 = vperm.slane %v8972_v44, 0  ;;  %v11327_v60 = vperm.slane %v8972_v44, 1 }
 0x217   : >> { %14089 = vst [vmem:[#allocation44_spill] sm:$0xff] %v11259_v11 }
 0x218   : >> { %9942 = vset.pattern.permute.xlu1 %v10283_v55  ;;  %14090 = vst [vmem:[#allocation45_spill] sm:$0xff] %v11261_v12 }
 0x219   : >> { %9944 = vperm.xlu1 %9942, %v9904_v48   ;;  %14091 = vst [vmem:[#allocation46_spill] sm:$0xff] %v11263_v13  ;;  %v11303_v48 = vperm.slane %v8960_v39, 0 }
 0x21a   : >> { %9936 = vset.pattern.permute.xlu0 %v10282_v34  ;;  %9948 = vset.pattern.permute.xlu2 %v10283_v55  ;;  %14092 = vst [vmem:[#allocation47_spill] sm:$0xff] %v11265_v14 }
 0x21b   : >> { %9938 = vperm.xlu0 %9936, %v9915_v45   ;;  %9950 = vperm.xlu2 %9948, %v9909_v54   ;;  %14093 = vst [vmem:[#allocation48_spill] sm:$0xff] %v11267_v15  ;;  %v11315_v54 = vperm.slane %v8969_v43, 0 }
 0x21c   : >> { %14094 = vst [vmem:[#allocation49_spill] sm:$0xff] %v11269_v16 }
 0x221   : >> { %9954 = vset.pattern.permute.xlu1 %v10282_v34  ;;  %v11271_v34 = vperm.slane %v8973_v6, 1 }
 0x222   : >> { %9956 = vperm.xlu1 %9954, %v9920_v53  }
 0x223   : >> { %9965 = vset.pattern.permute.xlu0 %v10283_v55  ;;  %9961 = vperm.xlu2 %9948, %v9915_v45   ;;  %14095 = vst [vmem:[#allocation50_spill] sm:$0xff] %v11271_v34  ;;  %v11297_v45 = vperm.slane %v8954_v8, 1  ;;  %v11317_v55 = vperm.slane %v8969_v43, 1 }
 0x224   : >> { %9967 = vperm.xlu0 %9965, %v9920_v53   ;;  %v11313_v53 = vperm.slane %v8966_v41, 1 }
 0x264   : >> { %v9928_v33 = vpop.permute.xlu2 %9927 }
 0x265   : >> { %v9930_v42 = vunpack.i.h.bf16 %v9928_v33  ;;  %v9929_v59 = vunpack.i.l.bf16 %v9928_v33 }
 0x267   : >> { %v11322_v57 = vmul.f32 %v9930_v42, %v11226_v61  ;;  %v11325_v58 = vmul.f32 %v9930_v42, %v11231_v63  ;;  %v11330_v62 = vmul.f32 %v9930_v42, %v11233_v0  ;;  %v11333_v2 = vmul.f32 %v9930_v42, %v11235_v1 }
 0x268   : >> { %v11336_v6 = vmul.f32 %v9930_v42, %v11240_v3  ;;  %v11339_v7 = vmul.f32 %v9930_v42, %v11242_v4  ;;  %v11342_v8 = vmul.f32 %v9930_v42, %v11244_v5  ;;  %v11345_v38 = vmul.f32 %v9930_v42, %v11255_v9 }
 0x269   : >> { %v11348_v33 = vmul.f32 %v9930_v42, %v11257_v10  ;;  %v11351_v39 = vmul.f32 %v9930_v42, %v11259_v11  ;;  %v11354_v41 = vmul.f32 %v9930_v42, %v11261_v12  ;;  %v11357_v43 = vmul.f32 %v9930_v42, %v11263_v13 }
 0x26a   : >> { %v11360_v44 = vmul.f32 %v9930_v42, %v11265_v14  ;;  %v11363_v17 = vmul.f32 %v9930_v42, %v11267_v15  ;;  %v11366_v18 = vmul.f32 %v9930_v42, %v11269_v16  ;;  %v11369_v19 = vmul.f32 %v9930_v42, %v11271_v34 }
 0x26b   : >> { %v11372_v20 = vmul.f32 %v9929_v59, %v11226_v61  ;;  %v11375_v21 = vmul.f32 %v9929_v59, %v11231_v63  ;;  %v11378_v22 = vmul.f32 %v9929_v59, %v11233_v0  ;;  %v11381_v23 = vmul.f32 %v9929_v59, %v11235_v1 }
 0x26c   : >> { %v9933_v40 = vpop.permute.xlu2 %9932  ;;  %v11384_v24 = vmul.f32 %v9929_v59, %v11240_v3  ;;  %v11387_v26 = vmul.f32 %v9929_v59, %v11242_v4  ;;  %v11390_v42 = vmul.f32 %v9929_v59, %v11244_v5  ;;  %v11393_v27 = vmul.f32 %v9929_v59, %v11255_v9 }
 0x26d   : >> { %v9935_v25 = vunpack.i.h.bf16 %v9933_v40  ;;  %v11396_v28 = vmul.f32 %v9929_v59, %v11257_v10  ;;  %v11399_v29 = vmul.f32 %v9929_v59, %v11259_v11  ;;  %v11402_v30 = vmul.f32 %v9929_v59, %v11261_v12 }
 0x26e   : >> { %14096 = vst [vmem:[#allocation51_spill] sm:$0xff] %v11384_v24  ;;  %v11405_v31 = vmul.f32 %v9929_v59, %v11263_v13  ;;  %v11408_v32 = vmul.f32 %v9929_v59, %v11265_v14 }
 0x26f   : >> { %14097 = vst [vmem:[#allocation52_spill] sm:$0xff] %v11387_v26  ;;  %v9934_v26 = vunpack.i.l.bf16 %v9933_v40  ;;  %v11441_v40 = vmul.f32 %v9935_v25, %v11255_v9 }
 0x270   : >> { %14098 = vst [vmem:[#allocation53_spill] sm:$0xff] %v11390_v42  ;;  %v11411_v42 = vmul.f32 %v9929_v59, %v11267_v15 }
 0x271   : >> { %14099 = vst [vmem:[#allocation54_spill] sm:$0xff] %v11393_v27  ;;  %v11414_v27 = vmul.f32 %v9929_v59, %v11269_v16  ;;  %v11480_v24 = vmul.f32 %v9934_v26, %v11240_v3 }
 0x272   : >> { %14100 = vst [vmem:[#allocation55_spill] sm:$0xff] %v11396_v28  ;;  %v11417_v28 = vmul.f32 %v9929_v59, %v11271_v34  ;;  %v11438_v59 = vmul.f32 %v9935_v25, %v11244_v5 }
 0x273   : >> { %14101 = vst [vmem:[#allocation56_spill] sm:$0xff] %v11399_v29  ;;  %v11420_v29 = vmul.f32 %v9935_v25, %v11226_v61 }
 0x274   : >> { %14102 = vst [vmem:[#allocation57_spill] sm:$0xff] %v11402_v30  ;;  %v11423_v30 = vmul.f32 %v9935_v25, %v11231_v63 }
 0x275   : >> { %14103 = vst [vmem:[#allocation58_spill] sm:$0xff] %v11405_v31  ;;  %v11426_v31 = vmul.f32 %v9935_v25, %v11233_v0 }
 0x276   : >> { %14104 = vst [vmem:[#allocation59_spill] sm:$0xff] %v11408_v32  ;;  %v11429_v32 = vmul.f32 %v9935_v25, %v11235_v1 }
 0x277   : >> { %14105 = vst [vmem:[#allocation60_spill] sm:$0xff] %v11411_v42  ;;  %v11432_v42 = vmul.f32 %v9935_v25, %v11240_v3  ;;  %v11501_v3 = vmul.f32 %v9934_v26, %v11263_v13 }
 0x278   : >> { %14106 = vst [vmem:[#allocation61_spill] sm:$0xff] %v11414_v27  ;;  %v11435_v27 = vmul.f32 %v9935_v25, %v11242_v4 }
 0x279   : >> { %14107 = vst [vmem:[#allocation62_spill] sm:$0xff] %v11417_v28 }
 0x27a   : >> { %14108 = vst [vmem:[#allocation63_spill] sm:$0xff] %v11420_v29  ;;  %v9917_v29 = vpop.permute.xlu1 %9916 }
 0x27b   : >> { %14109 = vst [vmem:[#allocation64_spill] sm:$0xff] %v11423_v30  ;;  %v11444_v30 = vmul.f32 %v9935_v25, %v11257_v10  ;;  %v9919_v28 = vunpack.i.h.bf16 %v9917_v29 }
 0x27c   : >> { %14110 = vst [vmem:[#allocation65_spill] sm:$0xff] %v11426_v31  ;;  %v11447_v31 = vmul.f32 %v9935_v25, %v11259_v11 }
 0x27d   : >> { %14111 = vst [vmem:[#allocation66_spill] sm:$0xff] %v11429_v32  ;;  %v11450_v32 = vmul.f32 %v9935_v25, %v11261_v12 }
 0x27e   : >> { %14112 = vst [vmem:[#allocation67_spill] sm:$0xff] %v11432_v42  ;;  %v11453_v42 = vmul.f32 %v9935_v25, %v11263_v13  ;;  %v11521_v13 = vmul.f32 %v9919_v28, %v11275_v36 }
 0x27f   : >> { %14113 = vst [vmem:[#allocation68_spill] sm:$0xff] %v11435_v27  ;;  %v11456_v27 = vmul.f32 %v9935_v25, %v11265_v14 }
 0x280   : >> { %14114 = vst [vmem:[#allocation69_spill] sm:$0xff] %v11438_v59  ;;  %v11459_v59 = vmul.f32 %v9935_v25, %v11267_v15 }
 0x281   : >> { %14115 = vst [vmem:[#allocation70_spill] sm:$0xff] %v11441_v40  ;;  %v11462_v40 = vmul.f32 %v9935_v25, %v11269_v16 }
 0x282   : >> { %14116 = vst [vmem:[#allocation71_spill] sm:$0xff] %v11444_v30  ;;  %v11465_v30 = vmul.f32 %v9935_v25, %v11271_v34  ;;  %v11483_v25 = vmul.f32 %v9934_v26, %v11242_v4  ;;  %v11504_v4 = vmul.f32 %v9934_v26, %v11265_v14  ;;  %v11524_v14 = vmul.f32 %v9919_v28, %v11277_v37 }
 0x283   : >> { %14117 = vst [vmem:[#allocation72_spill] sm:$0xff] %v11447_v31  ;;  %v11468_v31 = vmul.f32 %v9934_v26, %v11226_v61  ;;  %v11486_v61 = vmul.f32 %v9934_v26, %v11244_v5  ;;  %v11507_v5 = vmul.f32 %v9934_v26, %v11267_v15  ;;  %v11527_v15 = vmul.f32 %v9919_v28, %v11297_v45 }
 0x284   : >> { %14118 = vst [vmem:[#allocation73_spill] sm:$0xff] %v11450_v32  ;;  %v11471_v32 = vmul.f32 %v9934_v26, %v11231_v63  ;;  %v11489_v63 = vmul.f32 %v9934_v26, %v11255_v9  ;;  %v11510_v9 = vmul.f32 %v9934_v26, %v11269_v16  ;;  %v11542_v16 = vmul.f32 %v9919_v28, %v11307_v50 }
 0x285   : >> { %14119 = vst [vmem:[#allocation74_spill] sm:$0xff] %v11453_v42  ;;  %v11474_v42 = vmul.f32 %v9934_v26, %v11233_v0  ;;  %v11492_v0 = vmul.f32 %v9934_v26, %v11257_v10  ;;  %v9918_v10 = vunpack.i.l.bf16 %v9917_v29  ;;  %v11530_v29 = vmul.f32 %v9919_v28, %v11299_v46 }
 0x286   : >> { %14120 = vst [vmem:[#allocation75_spill] sm:$0xff] %v11456_v27  ;;  %v11477_v27 = vmul.f32 %v9934_v26, %v11235_v1  ;;  %v11495_v1 = vmul.f32 %v9934_v26, %v11259_v11  ;;  %v11515_v11 = vmul.f32 %v9934_v26, %v11271_v34  ;;  %v11539_v34 = vmul.f32 %v9919_v28, %v11305_v49 }
 0x287   : >> { %14121 = vst [vmem:[#allocation76_spill] sm:$0xff] %v11459_v59  ;;  %v9906_v59 = vpop.permute.xlu0 %9905 }
 0x288   : >> { %14122 = vst [vmem:[#allocation77_spill] sm:$0xff] %v11477_v27  ;;  %v11498_v27 = vmul.f32 %v9934_v26, %v11261_v12  ;;  %v11518_v12 = vmul.f32 %v9919_v28, %v11273_v35  ;;  %v11536_v26 = vmul.f32 %v9919_v28, %v11303_v48 }
 0x289   : >> { %14123 = vst [vmem:[#allocation78_spill] sm:$0xff] %v11483_v25 }
 0x28a   : >> { %14124 = vst [vmem:[#allocation79_spill] sm:$0xff] %v11486_v61 }
 0x28b   : >> { %14125 = vst [vmem:[#allocation80_spill] sm:$0xff] %v11489_v63  ;;  %v11512_v63 = vunpack.i.l.bf16 %v9906_v59 }
 0x28c   : >> { %14126 = vst [vmem:[#allocation81_spill] sm:$0xff] %v11492_v0  ;;  %v9908_v0 = vunpack.i.h.bf16 %v9906_v59  ;;  %v11533_v59 = vmul.f32 %v9919_v28, %v11301_v47 }
 0x28d   : >> { %14127 = vst [vmem:[#allocation82_spill] sm:$0xff] %v11495_v1 }
 0x28e   : >> { %14128 = vst [vmem:[#allocation83_spill] sm:$0xff] %v11498_v27 }
 0x28f   : >> { %14129 = vst [vmem:[#allocation84_spill] sm:$0xff] %v11501_v3  ;;  %v6692_v3 = vmul.f32 %v9908_v0, %v11319_v56 }
 0x290   : >> { %14130 = vst [vmem:[#allocation85_spill] sm:$0xff] %v11504_v4  ;;  %v6480_v4 = vmul.f32 %v9908_v0, %v11317_v55 }
 0x291   : >> { %14131 = vst [vmem:[#allocation86_spill] sm:$0xff] %v11507_v5  ;;  %v6479_v5 = vmul.f32 %v9908_v0, %v11315_v54 }
 0x292   : >> { %14132 = vst [vmem:[#allocation87_spill] sm:$0xff] %v11510_v9  ;;  %v6267_v9 = vmul.f32 %v9908_v0, %v11313_v53 }
 0x293   : >> { %14133 = vst [vmem:[#allocation88_spill] sm:$0xff] %v11515_v11 }
 0x294   : >> { %14134 = vst [vmem:[#allocation89_spill] sm:$0xff] %v11518_v12  ;;  %v5628_v12 = vmul.f32 %v9908_v0, %v11301_v47 }
 0x295   : >> { %14135 = vst [vmem:[#allocation90_spill] sm:$0xff] %v11521_v13  ;;  %v5415_v13 = vmul.f32 %v9908_v0, %v11297_v45 }
 0x296   : >> { %14136 = vst [vmem:[#allocation91_spill] sm:$0xff] %v11524_v14  ;;  %v11545_v14 = vmul.f32 %v9919_v28, %v11309_v51  ;;  %v11645_v61 = vadd.f32 %v11339_v7, %v5628_v12  ;;  %v11665_v12 = vadd.f32 %v11357_v43, %v6267_v9  ;;  %v5412_v7 = vmul.f32 %v11512_v63, %v11277_v37 }
 0x297   : >> { %14137 = vst [vmem:[#allocation92_spill] sm:$0xff] %v11527_v15  ;;  %v11548_v15 = vmul.f32 %v9919_v28, %v11311_v52  ;;  %v5413_v9 = vmul.f32 %v11512_v63, %v11297_v45 }
 0x298   : >> { %14138 = vst [vmem:[#allocation93_spill] sm:$0xff] %v11530_v29  ;;  %v11551_v29 = vmul.f32 %v9919_v28, %v11313_v53 }
 0x299   : >> { %14139 = vst [vmem:[#allocation94_spill] sm:$0xff] %v11533_v59  ;;  %v11554_v59 = vmul.f32 %v9919_v28, %v11315_v54 }
 0x29a   : >> { %14140 = vst [vmem:[#allocation95_spill] sm:$0xff] %v11536_v26  ;;  %v11557_v26 = vmul.f32 %v9919_v28, %v11317_v55 }
 0x29b   : >> { %14141 = vst [vmem:[#allocation96_spill] sm:$0xff] %v11539_v34  ;;  %v11560_v34 = vmul.f32 %v9919_v28, %v11319_v56 }
 0x29c   : >> { %14142 = vst [vmem:[#allocation97_spill] sm:$0xff] %v11542_v16  ;;  %v11563_v16 = vmul.f32 %v9919_v28, %v11327_v60  ;;  %v11584_v28 = vmul.f32 %v9918_v10, %v11303_v48 }
 0x29d   : >> { %14143 = vst [vmem:[#allocation98_spill] sm:$0xff] %v11545_v14  ;;  %v11566_v14 = vmul.f32 %v9918_v10, %v11273_v35 }
 0x29e   : >> { %14144 = vst [vmem:[#allocation99_spill] sm:$0xff] %v11548_v15  ;;  %v11569_v15 = vmul.f32 %v9918_v10, %v11275_v36 }
 0x29f   : >> { %14145 = vst [vmem:[#allocation100_spill] sm:$0xff] %v11551_v29  ;;  %v11572_v29 = vmul.f32 %v9918_v10, %v11277_v37 }
 0x2a0   : >> { %14146 = vst [vmem:[#allocation101_spill] sm:$0xff] %v11554_v59  ;;  %v11575_v59 = vmul.f32 %v9918_v10, %v11297_v45 }
 0x2a1   : >> { %14147 = vst [vmem:[#allocation102_spill] sm:$0xff] %v11557_v26  ;;  %v11578_v26 = vmul.f32 %v9918_v10, %v11299_v46 }
 0x2a2   : >> { %14148 = vst [vmem:[#allocation103_spill] sm:$0xff] %v11560_v34  ;;  %v11581_v34 = vmul.f32 %v9918_v10, %v11301_v47 }
 0x2a3   : >> { %14149 = vst [vmem:[#allocation104_spill] sm:$0xff] %v11563_v16  ;;  %v11600_v16 = vmul.f32 %v9918_v10, %v11313_v53 }
 0x2a4   : >> { %14150 = vst [vmem:[#allocation105_spill] sm:$0xff] %v11566_v14  ;;  %v11587_v14 = vmul.f32 %v9918_v10, %v11305_v49 }
 0x2a5   : >> { %14151 = vst [vmem:[#allocation106_spill] sm:$0xff] %v11569_v15  ;;  %v11590_v15 = vmul.f32 %v9918_v10, %v11307_v50 }
 0x2a6   : >> { %14152 = vst [vmem:[#allocation107_spill] sm:$0xff] %v11572_v29  ;;  %v11593_v29 = vmul.f32 %v9918_v10, %v11309_v51 }
 0x2a7   : >> { %14153 = vst [vmem:[#allocation108_spill] sm:$0xff] %v11575_v59  ;;  %v11596_v59 = vmul.f32 %v9918_v10, %v11311_v52 }
 0x2a8   : >> { %14154 = vst [vmem:[#allocation109_spill] sm:$0xff] %v11578_v26  ;;  %v5137_v26 = vmul.f32 %v9908_v0, %v11273_v35 }
 0x2a9   : >> { %14155 = vst [vmem:[#allocation110_spill] sm:$0xff] %v11581_v34  ;;  %v11603_v34 = vmul.f32 %v9918_v10, %v11315_v54 }
 0x2aa   : >> { %14156 = vst [vmem:[#allocation111_spill] sm:$0xff] %v11584_v28  ;;  %v11606_v28 = vmul.f32 %v9918_v10, %v11317_v55  ;;  %v11622_v11 = vadd.f32 %v11322_v57, %v5137_v26  ;;  %v11638_v26 = vadd.f32 %v11333_v2, %v5415_v13  ;;  %v11671_v2 = vadd.f32 %v11363_v17, %v6480_v4 }
 0x2ab   : >> { %14157 = vst [vmem:[#allocation112_spill] sm:$0xff] %v11587_v14  ;;  %v11609_v14 = vmul.f32 %v9918_v10, %v11319_v56  ;;  %v5626_v17 = vmul.f32 %v11512_v63, %v11301_v47  ;;  %v6051_v4 = vmul.f32 %v11512_v63, %v11307_v50 }
 0x2ac   : >> { %14158 = vst [vmem:[#allocation113_spill] sm:$0xff] %v11590_v15  ;;  %v11612_v15 = vmul.f32 %v9918_v10, %v11327_v60  ;;  %v6053_v10 = vmul.f32 %v9908_v0, %v11307_v50 }
 0x2ad   : >> { %14159 = vst [vmem:[#allocation114_spill] sm:$0xff] %v11593_v29  ;;  %v5138_v29 = vmul.f32 %v9908_v0, %v11275_v36 }
 0x2ae   : >> { %14160 = vst [vmem:[#allocation115_spill] sm:$0xff] %v11596_v59  ;;  %v5414_v59 = vmul.f32 %v9908_v0, %v11277_v37 }
 0x2af   : >> { %14161 = vst [vmem:[#allocation116_spill] sm:$0xff] %v11600_v16  ;;  %v5627_v16 = vmul.f32 %v9908_v0, %v11299_v46  ;;  %v11632_v27 = vadd.f32 %v11325_v58, %v5138_v29  ;;  %v11717_v29 = vadd.f32 %v11381_v23, %v5413_v9  ;;  %v14196_v23 = vld [vmem:[#allocation56_spill] sm:$0xff] }
 0x2b0   : >> { %14162 = vst [vmem:[#allocation117_spill] sm:$0xff] %v11603_v34  ;;  %v5840_v34 = vmul.f32 %v9908_v0, %v11303_v48  ;;  %v11635_v57 = vadd.f32 %v11330_v62, %v5414_v59  ;;  %v11654_v62 = vadd.f32 %v11348_v33, %v6053_v10  ;;  %v6477_v33 = vmul.f32 %v11512_v63, %v11315_v54 }
 0x2b1   : >> { %14163 = vst [vmem:[#allocation118_spill] sm:$0xff] %v11606_v28  ;;  %v5841_v28 = vmul.f32 %v9908_v0, %v11305_v49  ;;  %v11642_v1 = vadd.f32 %v11336_v6, %v5627_v16  ;;  %v5135_v16 = vmul.f32 %v11512_v63, %v11273_v35  ;;  %v11674_v6 = vadd.f32 %v11366_v18, %v6692_v3 }
 0x2b2   : >> { %14164 = vst [vmem:[#allocation119_spill] sm:$0xff] %v11609_v14  ;;  %v6266_v14 = vmul.f32 %v9908_v0, %v11311_v52  ;;  %v11648_v25 = vadd.f32 %v11342_v8, %v5840_v34  ;;  %v11668_v34 = vadd.f32 %v11360_v44, %v6479_v5  ;;  %v5625_v5 = vmul.f32 %v11512_v63, %v11299_v46 }
 0x2b3   : >> { %14165 = vst [vmem:[#allocation120_spill] sm:$0xff] %v11612_v15  ;;  %v6054_v15 = vmul.f32 %v9908_v0, %v11309_v51  ;;  %v11651_v58 = vadd.f32 %v11345_v38, %v5841_v28  ;;  %v5838_v18 = vmul.f32 %v11512_v63, %v11303_v48  ;;  %v11694_v3 = vadd.f32 %v11372_v20, %v5135_v16  ;;  %v14186_v28 = vld [vmem:[#allocation51_spill] sm:$0xff]  ;;  %v14188_v16 = vld [vmem:[#allocation52_spill] sm:$0xff] }
 0x2b4   : >> { %14166 = vst [vmem:[#allocation121_spill] sm:$0xff] %v11622_v11  ;;  %v6693_v11 = vmul.f32 %v9908_v0, %v11327_v60  ;;  %v11660_v0 = vadd.f32 %v11354_v41, %v6266_v14  ;;  %v5136_v14 = vmul.f32 %v11512_v63, %v11275_v36  ;;  %v6264_v8 = vmul.f32 %v11512_v63, %v11311_v52  ;;  %v9922_v41 = vpop.permute.xlu1 %9921 }
 0x2b5   : >> { %14167 = vst [vmem:[#allocation122_spill] sm:$0xff] %v11632_v27  ;;  %v11657_v13 = vadd.f32 %v11351_v39, %v6054_v15  ;;  %v6265_v38 = vmul.f32 %v11512_v63, %v11313_v53  ;;  %v6478_v39 = vmul.f32 %v11512_v63, %v11317_v55  ;;  %v6690_v20 = vmul.f32 %v11512_v63, %v11319_v56 }
 0x2b6   : >> { %14168 = vst [vmem:[#allocation123_spill] sm:$0xff] %v11635_v57  ;;  %v11677_v15 = vadd.f32 %v11369_v19, %v6693_v11  ;;  %v5839_v19 = vmul.f32 %v11512_v63, %v11305_v49  ;;  %v6052_v11 = vmul.f32 %v11512_v63, %v11309_v51  ;;  %v11711_v43 = vadd.f32 %v11375_v21, %v5136_v14  ;;  %v14192_v21 = vld [vmem:[#allocation54_spill] sm:$0xff] }
 0x2b7   : >> { %14169 = vst [vmem:[#allocation124_spill] sm:$0xff] %v11638_v26  ;;  %v11714_v44 = vadd.f32 %v11378_v22, %v5412_v7  ;;  %v6691_v59 = vmul.f32 %v11512_v63, %v11327_v60  ;;  %v11722_v10 = vadd.f32 %v14186_v28, %v5625_v5  ;;  %v9911_v22 = vpop.permute.xlu0 %9910  ;;  %v14194_v7 = vld [vmem:[#allocation55_spill] sm:$0xff]  ;;  %v14198_v63 = vld [vmem:[#allocation57_spill] sm:$0xff]  ;;  %v9924_v5 = vunpack.i.h.bf16 %v9922_v41 }
 0x2b8   : >> { %14170 = vst [vmem:[#allocation125_spill] sm:$0xff] %v11642_v1  ;;  %v11731_v14 = vadd.f32 %v14192_v21, %v5839_v19  ;;  %v11737_v9 = vadd.f32 %v14196_v23, %v6052_v11  ;;  %v14204_v11 = vld [vmem:[#allocation60_spill] sm:$0xff] }
 0x2b9   : >> { %14171 = vst [vmem:[#allocation126_spill] sm:$0xff] %v11645_v61  ;;  %v14259_v61 = vld [vmem:[#allocation76_spill] sm:$0xff] }
 0x2ba   : >> { %14172 = vst [vmem:[#allocation127_spill] sm:$0xff] %v11648_v25 }
 0x2bb   : >> { %14173 = vst [vmem:[#allocation128_spill] sm:$0xff] %v11651_v58 }
 0x2bc   : >> { %14174 = vst [vmem:[#allocation129_spill] sm:$0xff] %v11654_v62 }
 0x2bd   : >> { %14175 = vst [vmem:[#allocation130_spill] sm:$0xff] %v11657_v13 }
 0x2be   : >> { %14176 = vst [vmem:[#allocation131_spill] sm:$0xff] %v11660_v0  ;;  %v11763_v0 = vunpack.i.l.bf16 %v9911_v22 }
 0x2bf   : >> { %14177 = vst [vmem:[#allocation132_spill] sm:$0xff] %v11665_v12  ;;  %v11740_v12 = vadd.f32 %v14198_v63, %v6264_v8  ;;  %v14206_v8 = vld [vmem:[#allocation61_spill] sm:$0xff]  ;;  %v9923_v63 = vunpack.i.l.bf16 %v9922_v41  ;;  %v11783_v41 = vmul.f32 %v9924_v5, %v11297_v45 }
 0x2c0   : >> { %14178 = vst [vmem:[#allocation133_spill] sm:$0xff] %v11668_v34  ;;  %v11734_v34 = vadd.f32 %v14194_v7, %v6051_v4  ;;  %v14202_v4 = vld [vmem:[#allocation59_spill] sm:$0xff]  ;;  %v11758_v21 = vadd.f32 %v14206_v8, %v6690_v20  ;;  %v14208_v7 = vld [vmem:[#allocation62_spill] sm:$0xff]  ;;  %v11777_v20 = vmul.f32 %v9924_v5, %v11275_v36  ;;  %v11801_v8 = vmul.f32 %v9924_v5, %v11309_v51 }
 0x2c1   : >> { %14179 = vst [vmem:[#allocation134_spill] sm:$0xff] %v11671_v2  ;;  %v11752_v28 = vadd.f32 %v14202_v4, %v6477_v33  ;;  %v11761_v23 = vadd.f32 %v14208_v7, %v6691_v59  ;;  %v11780_v59 = vmul.f32 %v9924_v5, %v11277_v37  ;;  %v11795_v4 = vmul.f32 %v9924_v5, %v11305_v49 }
 0x2c2   : >> { %14180 = vst [vmem:[#allocation135_spill] sm:$0xff] %v11674_v6  ;;  %v14190_v6 = vld [vmem:[#allocation53_spill] sm:$0xff]  ;;  %v11804_v7 = vmul.f32 %v9924_v5, %v11311_v52  ;;  %v5140_v58 = vmul.f32 %v11763_v0, %v11275_v36  ;;  %v5416_v25 = vmul.f32 %v11763_v0, %v11277_v37 }
 0x2c3   : >> { %14181 = vst [vmem:[#allocation136_spill] sm:$0xff] %v11677_v15  ;;  %v11725_v15 = vadd.f32 %v14188_v16, %v5626_v17  ;;  %v11728_v2 = vadd.f32 %v14190_v6, %v5838_v18  ;;  %v8953_v17 = vld [vmem:[%s14079_s1 + $0x2] ss:$4 sm:$0x3]  ;;  %v14200_v18 = vld [vmem:[#allocation58_spill] sm:$0xff]  ;;  %v11755_v16 = vadd.f32 %v14204_v11, %v6478_v39  ;;  %v11774_v39 = vmul.f32 %v9924_v5, %v11273_v35 }
 0x2c4   : >> { %14182 = vst [vmem:[#allocation137_spill] sm:$0xff] %v11694_v3  ;;  %v8956_v6 = vld [vmem:[%s14079_s1 + $0xa] ss:$4 sm:$0x3]  ;;  %v11749_v19 = vadd.f32 %v14200_v18, %v6265_v38  ;;  %v11767_v38 = vperm.slane %v8953_v17, 1  ;;  %v11798_v11 = vmul.f32 %v9924_v5, %v11307_v50 }
 0x2c5   : >> { %14183 = vst [vmem:[#allocation138_spill] sm:$0xff] %v11711_v43  ;;  %v11769_v18 = vperm.slane %v8956_v6, 0  ;;  %v11771_v33 = vperm.slane %v8956_v6, 1  ;;  %v11792_v6 = vmul.f32 %v9924_v5, %v11303_v48 }
 0x2c6   : >> { %14184 = vst [vmem:[#allocation139_spill] sm:$0xff] %v11714_v44 }
 0x2c7   : >> { %14185 = vst [vmem:[#allocation140_spill] sm:$0xff] %v11717_v29 }
 0x2c8   : >> { %14187 = vst [vmem:[#allocation51_spill] sm:$0xff] %v11722_v10  ;;  %v14258_v10 = vld [vmem:[#allocation75_spill] sm:$0xff] }
 0x2c9   : >> { %14189 = vst [vmem:[#allocation52_spill] sm:$0xff] %v11725_v15  ;;  %v14257_v15 = vld [vmem:[#allocation74_spill] sm:$0xff] }
 0x2ca   : >> { %14191 = vst [vmem:[#allocation53_spill] sm:$0xff] %v11728_v2  ;;  %v5139_v2 = vmul.f32 %v11763_v0, %v11273_v35 }
 0x2cb   : >> { %14193 = vst [vmem:[#allocation54_spill] sm:$0xff] %v11731_v14 }
 0x2cc   : >> { %14195 = vst [vmem:[#allocation55_spill] sm:$0xff] %v11734_v34 }
 0x2cd   : >> { %14197 = vst [vmem:[#allocation56_spill] sm:$0xff] %v11737_v9  ;;  %v11765_v9 = vperm.slane %v8953_v17, 0  ;;  %v11789_v17 = vmul.f32 %v9924_v5, %v11301_v47 }
 0x2ce   : >> { %14199 = vst [vmem:[#allocation57_spill] sm:$0xff] %v11740_v12  ;;  %v9913_v12 = vunpack.i.h.bf16 %v9911_v22  ;;  %v11786_v22 = vmul.f32 %v9924_v5, %v11299_v46 }
 0x2cf   : >> { %14201 = vst [vmem:[#allocation58_spill] sm:$0xff] %v11749_v19  ;;  %v14249_v19 = vld [vmem:[#allocation66_spill] sm:$0xff] }
 0x2d0   : >> { %14203 = vst [vmem:[#allocation59_spill] sm:$0xff] %v11752_v28  ;;  %v14248_v28 = vld [vmem:[#allocation65_spill] sm:$0xff]  ;;  %v6057_v34 = vmul.f32 %v9913_v12, %v11307_v50  ;;  %v6058_v13 = vmul.f32 %v9913_v12, %v11309_v51  ;;  %v6270_v62 = vmul.f32 %v9913_v12, %v11311_v52  ;;  %v6697_v14 = vmul.f32 %v9913_v12, %v11327_v60 }
 0x2d1   : >> { %14205 = vst [vmem:[#allocation60_spill] sm:$0xff] %v11755_v16  ;;  %v14247_v16 = vld [vmem:[#allocation64_spill] sm:$0xff] }
 0x2d2   : >> { %14207 = vst [vmem:[#allocation61_spill] sm:$0xff] %v11758_v21  ;;  %v14246_v21 = vld [vmem:[#allocation63_spill] sm:$0xff] }
 0x2d3   : >> { %14209 = vst [vmem:[#allocation62_spill] sm:$0xff] %v11761_v23  ;;  %v5845_v23 = vmul.f32 %v9913_v12, %v11305_v49 }
 0x2d4   : >> { %14210 = vst [vmem:[#allocation141_spill] sm:$0xff] %v11765_v9 }
 0x2d5   : >> { %14211 = vst [vmem:[#allocation142_spill] sm:$0xff] %v11767_v38 }
 0x2d6   : >> { %14212 = vst [vmem:[#allocation143_spill] sm:$0xff] %v11769_v18 }
 0x2d7   : >> { %14213 = vst [vmem:[#allocation144_spill] sm:$0xff] %v11771_v33 }
 0x2d8   : >> { %14214 = vst [vmem:[#allocation145_spill] sm:$0xff] %v11774_v39  ;;  %v11869_v39 = vmul.f32 %v9923_v63, %v11319_v56 }
 0x2d9   : >> { %14215 = vst [vmem:[#allocation146_spill] sm:$0xff] %v11777_v20  ;;  %v11866_v20 = vmul.f32 %v9923_v63, %v11317_v55 }
 0x2da   : >> { %14216 = vst [vmem:[#allocation147_spill] sm:$0xff] %v11780_v59  ;;  %v11863_v59 = vmul.f32 %v9923_v63, %v11315_v54 }
 0x2db   : >> { %14217 = vst [vmem:[#allocation148_spill] sm:$0xff] %v11783_v41  ;;  %v11850_v41 = vmul.f32 %v9923_v63, %v11307_v50 }
 0x2dc   : >> { %14218 = vst [vmem:[#allocation149_spill] sm:$0xff] %v11786_v22  ;;  %v11807_v22 = vmul.f32 %v9924_v5, %v11313_v53 }
 0x2dd   : >> { %14219 = vst [vmem:[#allocation150_spill] sm:$0xff] %v11789_v17  ;;  %v11810_v17 = vmul.f32 %v9924_v5, %v11315_v54 }
 0x2de   : >> { %14220 = vst [vmem:[#allocation151_spill] sm:$0xff] %v11792_v6  ;;  %v11813_v6 = vmul.f32 %v9924_v5, %v11317_v55 }
 0x2df   : >> { %14221 = vst [vmem:[#allocation152_spill] sm:$0xff] %v11795_v4  ;;  %v11816_v4 = vmul.f32 %v9924_v5, %v11319_v56 }
 0x2e0   : >> { %14222 = vst [vmem:[#allocation153_spill] sm:$0xff] %v11798_v11  ;;  %v11819_v11 = vmul.f32 %v9924_v5, %v11327_v60  ;;  %v11840_v5 = vmul.f32 %v9923_v63, %v11303_v48 }
 0x2e1   : >> { %14223 = vst [vmem:[#allocation154_spill] sm:$0xff] %v11801_v8  ;;  %v11822_v8 = vmul.f32 %v9923_v63, %v11273_v35 }
 0x2e2   : >> { %14224 = vst [vmem:[#allocation155_spill] sm:$0xff] %v11804_v7  ;;  %v11825_v7 = vmul.f32 %v9923_v63, %v11275_v36 }
 0x2e3   : >> { %14225 = vst [vmem:[#allocation156_spill] sm:$0xff] %v11807_v22  ;;  %v11828_v22 = vmul.f32 %v9923_v63, %v11277_v37 }
 0x2e4   : >> { %14226 = vst [vmem:[#allocation157_spill] sm:$0xff] %v11810_v17  ;;  %v11831_v17 = vmul.f32 %v9923_v63, %v11297_v45 }
 0x2e5   : >> { %14227 = vst [vmem:[#allocation158_spill] sm:$0xff] %v11813_v6  ;;  %v11834_v6 = vmul.f32 %v9923_v63, %v11299_v46 }
 0x2e6   : >> { %14228 = vst [vmem:[#allocation159_spill] sm:$0xff] %v11816_v4  ;;  %v11837_v4 = vmul.f32 %v9923_v63, %v11301_v47 }
 0x2e7   : >> { %14229 = vst [vmem:[#allocation160_spill] sm:$0xff] %v11819_v11  ;;  %v5142_v11 = vmul.f32 %v9913_v12, %v11275_v36 }
 0x2e8   : >> { %14230 = vst [vmem:[#allocation161_spill] sm:$0xff] %v11822_v8  ;;  %v11843_v8 = vmul.f32 %v9923_v63, %v11305_v49 }
 0x2e9   : >> { %14231 = vst [vmem:[#allocation162_spill] sm:$0xff] %v11825_v7  ;;  %v5141_v7 = vmul.f32 %v9913_v12, %v11273_v35  ;;  %v5629_v35 = vmul.f32 %v11763_v0, %v11299_v46 }
 0x2ea   : >> { %14232 = vst [vmem:[#allocation163_spill] sm:$0xff] %v11828_v22  ;;  %v5418_v22 = vmul.f32 %v9913_v12, %v11277_v37 }
 0x2eb   : >> { %14233 = vst [vmem:[#allocation164_spill] sm:$0xff] %v11831_v17  ;;  %v5419_v17 = vmul.f32 %v9913_v12, %v11297_v45 }
 0x2ec   : >> { %14234 = vst [vmem:[#allocation165_spill] sm:$0xff] %v11834_v6  ;;  %v11853_v6 = vmul.f32 %v9923_v63, %v11309_v51 }
 0x2ed   : >> { %14235 = vst [vmem:[#allocation166_spill] sm:$0xff] %v11837_v4  ;;  %v11856_v4 = vmul.f32 %v9923_v63, %v11311_v52 }
 0x2ee   : >> { %14236 = vst [vmem:[#allocation167_spill] sm:$0xff] %v11840_v5  ;;  %v5631_v5 = vmul.f32 %v9913_v12, %v11299_v46  ;;  %v5842_v46 = vmul.f32 %v11763_v0, %v11303_v48 }
 0x2ef   : >> { %14237 = vst [vmem:[#allocation168_spill] sm:$0xff] %v11843_v8  ;;  %v11860_v8 = vmul.f32 %v9923_v63, %v11313_v53 }
 0x2f0   : >> { %14238 = vst [vmem:[#allocation169_spill] sm:$0xff] %v11850_v41  ;;  %v11872_v41 = vmul.f32 %v9923_v63, %v11327_v60  ;;  %v14250_v63 = vld [vmem:[#allocation67_spill] sm:$0xff] }
 0x2f1   : >> { %14239 = vst [vmem:[#allocation170_spill] sm:$0xff] %v11853_v6  ;;  %v5632_v6 = vmul.f32 %v9913_v12, %v11301_v47 }
 0x2f2   : >> { %14240 = vst [vmem:[#allocation171_spill] sm:$0xff] %v11856_v4  ;;  %v5844_v4 = vmul.f32 %v9913_v12, %v11303_v48  ;;  %v6056_v48 = vmul.f32 %v11763_v0, %v11309_v51  ;;  %v6694_v51 = vmul.f32 %v11763_v0, %v11319_v56 }
 0x2f3   : >> { %14241 = vst [vmem:[#allocation172_spill] sm:$0xff] %v11860_v8  ;;  %v11878_v8 = vadd.f32 %v14246_v21, %v5141_v7  ;;  %v6271_v21 = vmul.f32 %v9913_v12, %v11313_v53 }
 0x2f4   : >> { %14242 = vst [vmem:[#allocation173_spill] sm:$0xff] %v11863_v59  ;;  %v11881_v59 = vadd.f32 %v14247_v16, %v5142_v11  ;;  %v6483_v16 = vmul.f32 %v9913_v12, %v11315_v54  ;;  %v6484_v11 = vmul.f32 %v9913_v12, %v11317_v55 }
 0x2f5   : >> { %14243 = vst [vmem:[#allocation174_spill] sm:$0xff] %v11866_v20  ;;  %v11884_v20 = vadd.f32 %v14248_v28, %v5418_v22  ;;  %v6696_v28 = vmul.f32 %v9913_v12, %v11319_v56  ;;  %v14251_v22 = vld [vmem:[#allocation68_spill] sm:$0xff]  ;;  %v11929_v36 = vadd.f32 %v14257_v15, %v6271_v21  ;;  %v5843_v15 = vmul.f32 %v11763_v0, %v11305_v49 }
 0x2f6   : >> { %14244 = vst [vmem:[#allocation175_spill] sm:$0xff] %v11869_v39  ;;  %v11887_v39 = vadd.f32 %v14249_v19, %v5419_v17  ;;  %v11900_v19 = vadd.f32 %v14251_v22, %v5632_v6  ;;  %v14252_v17 = vld [vmem:[#allocation69_spill] sm:$0xff]  ;;  %v5417_v6 = vmul.f32 %v11763_v0, %v11297_v45  ;;  %v14254_v22 = vld [vmem:[#allocation71_spill] sm:$0xff]  ;;  %v11932_v37 = vadd.f32 %v14258_v10, %v6483_v16  ;;  %v9951_v10 = vpop.permute.xlu2 %9950 }
 0x2f7   : >> { %14245 = vst [vmem:[#allocation176_spill] sm:$0xff] %v11872_v41  ;;  %v11890_v41 = vadd.f32 %v14250_v63, %v5631_v5  ;;  %v11903_v7 = vadd.f32 %v14252_v17, %v5844_v4  ;;  %v14253_v5 = vld [vmem:[#allocation70_spill] sm:$0xff]  ;;  %v11918_v4 = vadd.f32 %v14254_v22, %v6057_v34  ;;  %v14255_v17 = vld [vmem:[#allocation72_spill] sm:$0xff]  ;;  %v11935_v45 = vadd.f32 %v14259_v61, %v6484_v11  ;;  %v14263_v16 = vld [vmem:[#allocation77_spill] sm:$0xff] }
 0x2f8   : >> { %v11906_v63 = vadd.f32 %v14253_v5, %v5845_v23  ;;  %v11921_v23 = vadd.f32 %v14255_v17, %v6058_v13  ;;  %v14256_v5 = vld [vmem:[#allocation73_spill] sm:$0xff]  ;;  %v11938_v34 = vadd.f32 %v11462_v40, %v6696_v28  ;;  %v11941_v13 = vadd.f32 %v11465_v30, %v6697_v14  ;;  %v14268_v17 = vld [vmem:[#allocation82_spill] sm:$0xff] }
 0x2f9   : >> { %v11924_v12 = vadd.f32 %v14256_v5, %v6270_v62  ;;  %14260 = vst [vmem:[#allocation63_spill] sm:$0xff] %v11935_v45  ;;  %v5630_v62 = vmul.f32 %v11763_v0, %v11301_v47  ;;  %v5210_v21 = vadd.f32 %v11468_v31, %v5139_v2  ;;  %v5211_v61 = vadd.f32 %v11471_v32, %v5140_v58  ;;  %v14267_v22 = vld [vmem:[#allocation81_spill] sm:$0xff] }
 0x2fa   : >> { %14261 = vst [vmem:[#allocation64_spill] sm:$0xff] %v11938_v34  ;;  %v5455_v40 = vadd.f32 %v11474_v42, %v5416_v25  ;;  %v5456_v11 = vadd.f32 %v14263_v16, %v5417_v6  ;;  %v11954_v30 = vadd.f32 %v11480_v24, %v5629_v35  ;;  %v6055_v47 = vmul.f32 %v11763_v0, %v11307_v50  ;;  %v14264_v25 = vld [vmem:[#allocation78_spill] sm:$0xff]  ;;  %v14265_v50 = vld [vmem:[#allocation79_spill] sm:$0xff] }
 0x2fb   : >> { %14262 = vst [vmem:[#allocation65_spill] sm:$0xff] %v11941_v13  ;;  %v6268_v49 = vmul.f32 %v11763_v0, %v11311_v52  ;;  %v6269_v31 = vmul.f32 %v11763_v0, %v11313_v53  ;;  %v6481_v32 = vmul.f32 %v11763_v0, %v11315_v54  ;;  %v6482_v42 = vmul.f32 %v11763_v0, %v11317_v55  ;;  %v14266_v53 = vld [vmem:[#allocation80_spill] sm:$0xff]  ;;  %v8959_v54 = vld [vmem:[%s14079_s1 + $0x12] ss:$4 sm:$0x3] }
 0x2fc   : >> { %v11968_v24 = vunpack.i.h.bf16 %v9951_v10  ;;  %v11971_v58 = vadd.f32 %v14264_v25, %v5630_v62  ;;  %v11974_v2 = vadd.f32 %v14265_v50, %v5842_v46  ;;  %v6695_v52 = vmul.f32 %v11763_v0, %v11327_v60  ;;  %v14269_v35 = vld [vmem:[#allocation83_spill] sm:$0xff]  ;;  %v14270_v46 = vld [vmem:[#allocation84_spill] sm:$0xff] }
 0x2fd   : >> { %v11981_v14 = vadd.f32 %v14266_v53, %v5843_v15  ;;  %v11990_v6 = vunpack.i.l.bf16 %v9951_v10  ;;  %v11993_v56 = vadd.f32 %v14267_v22, %v6055_v47  ;;  %v11996_v60 = vadd.f32 %v14268_v17, %v6056_v48  ;;  %v14271_v10 = vld [vmem:[#allocation85_spill] sm:$0xff]  ;;  %v14273_v47 = vld [vmem:[#allocation86_spill] sm:$0xff]  ;;  %v14275_v48 = vld [vmem:[#allocation87_spill] sm:$0xff] }
 0x2fe   : >> { %v5267_v55 = vmul.f32 %v11968_v24, %v11765_v9  ;;  %v5268_v28 = vmul.f32 %v11968_v24, %v11767_v38  ;;  %v5480_v0 = vmul.f32 %v11968_v24, %v11769_v18  ;;  %v5481_v5 = vmul.f32 %v11968_v24, %v11771_v33  ;;  %v14277_v53 = vld [vmem:[#allocation88_spill] sm:$0xff] }
 0x2ff   : >> { %v12003_v62 = vadd.f32 %v14269_v35, %v6268_v49  ;;  %v12006_v15 = vadd.f32 %v14270_v46, %v6269_v31  ;;  %v12009_v16 = vadd.f32 %v14271_v10, %v6481_v32  ;;  %v12012_v25 = vadd.f32 %v14273_v47, %v6482_v42 }
 0x300   : >> { %v12015_v50 = vadd.f32 %v14275_v48, %v6694_v51  ;;  %v12018_v22 = vadd.f32 %v14277_v53, %v6695_v52  ;;  %v12020_v17 = vperm.slane %v8959_v54, 0  ;;  %v12022_v1 = vperm.slane %v8959_v54, 1  ;;  %v8962_v51 = vld [vmem:[%s14079_s1 + $0x1a] ss:$4 sm:$0x3] }
 0x301   : >> { %14272 = vst [vmem:[#allocation66_spill] sm:$0xff] %v12009_v16  ;;  %v5265_v49 = vmul.f32 %v11990_v6, %v11765_v9  ;;  %v5266_v31 = vmul.f32 %v11990_v6, %v11767_v38  ;;  %v5283_v32 = vadd.f32 %v5267_v55, %v11878_v8  ;;  %v5284_v42 = vadd.f32 %v5268_v28, %v11881_v59  ;;  %v8965_v52 = vld [vmem:[%s14079_s1 + $0x22] ss:$4 sm:$0x3] }
 0x302   : >> { %14274 = vst [vmem:[#allocation67_spill] sm:$0xff] %v12012_v25  ;;  %v5478_v54 = vmul.f32 %v11990_v6, %v11769_v18  ;;  %v5479_v35 = vmul.f32 %v11990_v6, %v11771_v33  ;;  %v5496_v46 = vadd.f32 %v5480_v0, %v11884_v20  ;;  %v5497_v8 = vadd.f32 %v5481_v5, %v11887_v39  ;;  %v8968_v59 = vld [vmem:[%s14079_s1 + $0x2a] ss:$4 sm:$0x3] }
 0x303   : >> { %14276 = vst [vmem:[#allocation68_spill] sm:$0xff] %v12015_v50  ;;  %v5281_v55 = vadd.f32 %v5265_v49, %v5210_v21  ;;  %v5282_v28 = vadd.f32 %v5266_v31, %v5211_v61  ;;  %v5299_v10 = vmax.f32 %v5283_v32, 0.0  ;;  %v5300_v47 = vmax.f32 %v5284_v42, 0.0  ;;  %v8971_v48 = vld [vmem:[%s14079_s1 + $0x32] ss:$4 sm:$0x3] }
 0x304   : >> { %14278 = vst [vmem:[#allocation69_spill] sm:$0xff] %v12018_v22  ;;  %v5494_v53 = vadd.f32 %v5478_v54, %v5455_v40  ;;  %v5495_v29 = vadd.f32 %v5479_v35, %v5456_v11  ;;  %v5512_v44 = vmax.f32 %v5496_v46, 0.0  ;;  %v5513_v43 = vmax.f32 %v5497_v8, 0.0  ;;  %v8974_v39 = vld [vmem:[%s14079_s1 + $0x3a] ss:$4 sm:$0x3] }
 0x305   : >> { %14279 = vst [vmem:[#allocation70_spill] sm:$0xff] %v12020_v17  ;;  %v5297_v20 = vmax.f32 %v5281_v55, 0.0  ;;  %v5298_v0 = vmax.f32 %v5282_v28, 0.0  ;;  %v5345_v5 = vrot.slane %v5299_v10, 4  ;;  %v5351_v3 = vrot.slane %v5300_v47, 4 }
 0x306   : >> { %14280 = vst [vmem:[#allocation71_spill] sm:$0xff] %v12022_v1  ;;  %v12051_v21 = vperm.slane %v8962_v51, 0  ;;  %v12053_v61 = vperm.slane %v8962_v51, 1  ;;  %v5510_v49 = vmax.f32 %v5494_v53, 0.0  ;;  %v5511_v31 = vmax.f32 %v5495_v29, 0.0 }
 0x307   : >> { %v12055_v32 = vperm.slane %v8965_v52, 0  ;;  %v12057_v40 = vperm.slane %v8965_v52, 1  ;;  %v12059_v11 = vperm.slane %v8968_v59, 0  ;;  %v12061_v42 = vperm.slane %v8968_v59, 1 }
 0x308   : >> { %14281 = vst [vmem:[#allocation72_spill] sm:$0xff] %v12051_v21  ;;  %v5333_v54 = vrot.slane %v5297_v20, 4  ;;  %v5339_v35 = vrot.slane %v5298_v0, 4  ;;  %v5558_v46 = vrot.slane %v5512_v44, 4  ;;  %v5564_v8 = vrot.slane %v5513_v43, 4 }
 0x309   : >> { %14282 = vst [vmem:[#allocation73_spill] sm:$0xff] %v12053_v61  ;;  %v12063_v55 = vperm.slane %v8971_v48, 0  ;;  %v12065_v28 = vperm.slane %v8971_v48, 1  ;;  %v5346_v51 = vadd.f32 %v5345_v5, %v5299_v10  ;;  %v5352_v26 = vadd.f32 %v5351_v3, %v5300_v47 }
 0x30a   : >> { %14283 = vst [vmem:[#allocation74_spill] sm:$0xff] %v12059_v11  ;;  %v12067_v53 = vperm.slane %v8974_v39, 0  ;;  %v12069_v29 = vperm.slane %v8974_v39, 1  ;;  %v5546_v52 = vrot.slane %v5510_v49, 4  ;;  %v5552_v57 = vrot.slane %v5511_v31, 4 }
 0x30b   : >> { %14284 = vst [vmem:[#allocation75_spill] sm:$0xff] %v12061_v42  ;;  %v5693_v59 = vmul.f32 %v11968_v24, %v12020_v17  ;;  %v5694_v27 = vmul.f32 %v11968_v24, %v12022_v1  ;;  %v5906_v33 = vmul.f32 %v11968_v24, %v12051_v21  ;;  %v5907_v48 = vmul.f32 %v11968_v24, %v12053_v61 }
 0x30c   : >> { %14285 = vst [vmem:[#allocation76_spill] sm:$0xff] %v12063_v55  ;;  %v5334_v10 = vadd.f32 %v5333_v54, %v5297_v20  ;;  %v5340_v3 = vadd.f32 %v5339_v35, %v5298_v0  ;;  %v5559_v47 = vadd.f32 %v5558_v46, %v5512_v44  ;;  %v5565_v5 = vadd.f32 %v5564_v8, %v5513_v43 }
 0x30d   : >> { %14286 = vst [vmem:[#allocation77_spill] sm:$0xff] %v12065_v28  ;;  %v12081_v39 = vmul.f32 %v11968_v24, %v12055_v32  ;;  %v12085_v18 = vmul.f32 %v11968_v24, %v12057_v40  ;;  %v5347_v38 = vrot.slane %v5346_v51, 2  ;;  %v5353_v9 = vrot.slane %v5352_v26, 2 }
 0x30e   : >> { %14287 = vst [vmem:[#allocation78_spill] sm:$0xff] %v12067_v53  ;;  %v12089_v22 = vmul.f32 %v11968_v24, %v12059_v11  ;;  %v12093_v20 = vmul.f32 %v11968_v24, %v12061_v42  ;;  %v5547_v44 = vadd.f32 %v5546_v52, %v5510_v49  ;;  %v5553_v43 = vadd.f32 %v5552_v57, %v5511_v31 }
 0x30f   : >> { %14288 = vst [vmem:[#allocation79_spill] sm:$0xff] %v12069_v29  ;;  %v12097_v0 = vmul.f32 %v11968_v24, %v12063_v55  ;;  %v12101_v54 = vmul.f32 %v11968_v24, %v12065_v28  ;;  %v12105_v35 = vmul.f32 %v11968_v24, %v12067_v53  ;;  %v12109_v46 = vmul.f32 %v11968_v24, %v12069_v29 }
 0x310   : >> { %v5335_v8 = vrot.slane %v5334_v10, 2  ;;  %v5341_v50 = vrot.slane %v5340_v3, 2  ;;  %v5560_v49 = vrot.slane %v5559_v47, 2  ;;  %v5566_v57 = vrot.slane %v5565_v5, 2 }
 0x311   : >> { %14289 = vst [vmem:[#allocation80_spill] sm:$0xff] %v12097_v0  ;;  %v5348_v31 = vadd.f32 %v5347_v38, %v5346_v51  ;;  %v5354_v52 = vadd.f32 %v5353_v9, %v5352_v26  ;;  %v5691_v13 = vmul.f32 %v11990_v6, %v12020_v17  ;;  %v5692_v34 = vmul.f32 %v11990_v6, %v12022_v1 }
 0x312   : >> { %14290 = vst [vmem:[#allocation81_spill] sm:$0xff] %v12101_v54  ;;  %v5548_v25 = vrot.slane %v5547_v44, 2  ;;  %v5554_v16 = vrot.slane %v5553_v43, 2  ;;  %v5710_v53 = vadd.f32 %v5694_v27, %v11900_v19  ;;  %v5904_v38 = vmul.f32 %v11990_v6, %v12051_v21 }
 0x313   : >> { %14291 = vst [vmem:[#allocation82_spill] sm:$0xff] %v12105_v35  ;;  %v5709_v35 = vadd.f32 %v5693_v59, %v11890_v41  ;;  %v5707_v24 = vadd.f32 %v5691_v13, %v11954_v30  ;;  %v5905_v26 = vmul.f32 %v11990_v6, %v12053_v61  ;;  %v5922_v1 = vadd.f32 %v5906_v33, %v11903_v7 }
 0x314   : >> { %14292 = vst [vmem:[#allocation83_spill] sm:$0xff] %v12109_v46  ;;  %v5708_v46 = vadd.f32 %v5692_v34, %v11971_v58  ;;  %v5726_v51 = vmax.f32 %v5710_v53, 0.0  ;;  %v5923_v17 = vadd.f32 %v5907_v48, %v11906_v63  ;;  %v5920_v27 = vadd.f32 %v5904_v38, %v11974_v2 }
 0x315   : >> { %v5725_v9 = vmax.f32 %v5709_v35, 0.0  ;;  %v5723_v29 = vmax.f32 %v5707_v24, 0.0  ;;  %v5921_v19 = vadd.f32 %v5905_v26, %v11981_v14  ;;  %v5938_v30 = vmax.f32 %v5922_v1, 0.0 }
 0x316   : >> { %v5724_v41 = vmax.f32 %v5708_v46, 0.0  ;;  %v5777_v34 = vrot.slane %v5726_v51, 4  ;;  %v5939_v58 = vmax.f32 %v5923_v17, 0.0  ;;  %v5561_v59 = vadd.f32 %v5560_v49, %v5559_v47 }
 0x317   : >> { %v5771_v13 = vrot.slane %v5725_v9, 4  ;;  %v5567_v21 = vadd.f32 %v5566_v57, %v5565_v5  ;;  %v5936_v54 = vmax.f32 %v5920_v27, 0.0  ;;  %v5937_v61 = vmax.f32 %v5921_v19, 0.0 }
 0x318   : >> { %v5336_v35 = vadd.f32 %v5335_v8, %v5334_v10  ;;  %v5342_v53 = vadd.f32 %v5341_v50, %v5340_v3  ;;  %v5549_v45 = vadd.f32 %v5548_v25, %v5547_v44  ;;  %v5555_v33 = vadd.f32 %v5554_v16, %v5553_v43 }
 0x319   : >> { %v5759_v7 = vrot.slane %v5723_v29, 4  ;;  %v5765_v63 = vrot.slane %v5724_v41, 4  ;;  %v5772_v48 = vadd.f32 %v5771_v13, %v5725_v9  ;;  %v5778_v46 = vadd.f32 %v5777_v34, %v5726_v51 }
 0x31a   : >> { %v5349_v24 = vrot.slane %v5348_v31, 1  ;;  %v5355_v2 = vrot.slane %v5354_v52, 1  ;;  %v5984_v38 = vrot.slane %v5938_v30, 4  ;;  %v5990_v14 = vrot.slane %v5939_v58, 4 }
 0x31b   : >> { %v5562_v26 = vrot.slane %v5561_v59, 1  ;;  %v5568_v0 = vrot.slane %v5567_v21, 1  ;;  %v5972_v1 = vrot.slane %v5936_v54, 4  ;;  %v5978_v17 = vrot.slane %v5937_v61, 4 }
 0x31c   : >> { %v5337_v47 = vrot.slane %v5336_v35, 1  ;;  %v5343_v5 = vrot.slane %v5342_v53, 1  ;;  %v5550_v49 = vrot.slane %v5549_v45, 1  ;;  %v5556_v57 = vrot.slane %v5555_v33, 1 }
 0x31d   : >> { %v5760_v10 = vadd.f32 %v5759_v7, %v5723_v29  ;;  %v5766_v50 = vadd.f32 %v5765_v63, %v5724_v41  ;;  %v5773_v25 = vrot.slane %v5772_v48, 2  ;;  %v5779_v16 = vrot.slane %v5778_v46, 2 }
 0x31e   : >> { %v12127_v3 = vadd.f32 %v5349_v24, %v5348_v31  ;;  %v12129_v44 = vadd.f32 %v5355_v2, %v5354_v52  ;;  %v5985_v43 = vadd.f32 %v5984_v38, %v5938_v30  ;;  %v5991_v8 = vadd.f32 %v5990_v14, %v5939_v58 }
 0x31f   : >> { %v12131_v9 = vadd.f32 %v5562_v26, %v5561_v59  ;;  %v12133_v51 = vadd.f32 %v5568_v0, %v5567_v21  ;;  %v5973_v27 = vadd.f32 %v5972_v1, %v5936_v54  ;;  %v5979_v19 = vadd.f32 %v5978_v17, %v5937_v61 }
 0x320   : >> { %14293 = vst [vmem:[#allocation84_spill] sm:$0xff] %v12127_v3  ;;  %v12135_v13 = vadd.f32 %v5337_v47, %v5336_v35  ;;  %v12137_v34 = vadd.f32 %v5343_v5, %v5342_v53  ;;  %v12139_v29 = vadd.f32 %v5550_v49, %v5549_v45  ;;  %v12141_v41 = vadd.f32 %v5556_v57, %v5555_v33 }
 0x321   : >> { %14294 = vst [vmem:[#allocation85_spill] sm:$0xff] %v12129_v44  ;;  %v5761_v31 = vrot.slane %v5760_v10, 2  ;;  %v5767_v7 = vrot.slane %v5766_v50, 2  ;;  %v5774_v52 = vadd.f32 %v5773_v25, %v5772_v48  ;;  %v5780_v63 = vadd.f32 %v5779_v16, %v5778_v46 }
 0x322   : >> { %14295 = vst [vmem:[#allocation86_spill] sm:$0xff] %v12131_v9  ;;  %v5986_v30 = vrot.slane %v5985_v43, 2  ;;  %v5992_v58 = vrot.slane %v5991_v8, 2  ;;  %v6117_v21 = vmul.f32 %v11990_v6, %v12055_v32  ;;  %v6118_v61 = vmul.f32 %v11990_v6, %v12057_v40 }
 0x323   : >> { %14296 = vst [vmem:[#allocation87_spill] sm:$0xff] %v12133_v51  ;;  %v5974_v0 = vrot.slane %v5973_v27, 2  ;;  %v5980_v54 = vrot.slane %v5979_v19, 2  ;;  %v6135_v45 = vadd.f32 %v12081_v39, %v11918_v4  ;;  %v6136_v59 = vadd.f32 %v12085_v18, %v11921_v23 }
 0x324   : >> { %v6133_v35 = vadd.f32 %v6117_v21, %v11993_v56  ;;  %v6134_v53 = vadd.f32 %v6118_v61, %v11996_v60  ;;  %v6330_v33 = vmul.f32 %v11990_v6, %v12059_v11  ;;  %v6331_v48 = vmul.f32 %v11990_v6, %v12061_v42 }
 0x325   : >> { %v6151_v46 = vmax.f32 %v6135_v45, 0.0  ;;  %v6152_v24 = vmax.f32 %v6136_v59, 0.0  ;;  %v6348_v2 = vadd.f32 %v12089_v22, %v11924_v12  ;;  %v6349_v4 = vadd.f32 %v12093_v20, %v11929_v36 }
 0x326   : >> { %v6149_v39 = vmax.f32 %v6133_v35, 0.0  ;;  %v6150_v18 = vmax.f32 %v6134_v53, 0.0  ;;  %v6346_v23 = vadd.f32 %v6330_v33, %v12003_v62  ;;  %v6347_v56 = vadd.f32 %v6331_v48, %v12006_v15 }
 0x327   : >> { %v6197_v60 = vrot.slane %v6151_v46, 4  ;;  %v6203_v38 = vrot.slane %v6152_v24, 4  ;;  %v6364_v14 = vmax.f32 %v6348_v2, 0.0  ;;  %v6365_v26 = vmax.f32 %v6349_v4, 0.0 }
 0x328   : >> { %v5762_v1 = vadd.f32 %v5761_v31, %v5760_v10  ;;  %v5768_v17 = vadd.f32 %v5767_v7, %v5766_v50  ;;  %v6185_v47 = vrot.slane %v6149_v39, 4  ;;  %v6191_v5 = vrot.slane %v6150_v18, 4 }
 0x329   : >> { %v5975_v49 = vadd.f32 %v5974_v0, %v5973_v27  ;;  %v5981_v57 = vadd.f32 %v5980_v54, %v5979_v19  ;;  %v5987_v12 = vadd.f32 %v5986_v30, %v5985_v43  ;;  %v5993_v22 = vadd.f32 %v5992_v58, %v5991_v8 }
 0x32a   : >> { %v6198_v25 = vadd.f32 %v6197_v60, %v6151_v46  ;;  %v6204_v36 = vadd.f32 %v6203_v38, %v6152_v24  ;;  %v6362_v20 = vmax.f32 %v6346_v23, 0.0  ;;  %v6363_v16 = vmax.f32 %v6347_v56, 0.0 }
 0x32b   : >> { %v5775_v21 = vrot.slane %v5774_v52, 1  ;;  %v5781_v62 = vrot.slane %v5780_v63, 1  ;;  %v6410_v61 = vrot.slane %v6364_v14, 4  ;;  %v6416_v15 = vrot.slane %v6365_v26, 4 }
 0x32c   : >> { %v5763_v45 = vrot.slane %v5762_v1, 1  ;;  %v5769_v59 = vrot.slane %v5768_v17, 1  ;;  %v6186_v35 = vadd.f32 %v6185_v47, %v6149_v39  ;;  %v6192_v53 = vadd.f32 %v6191_v5, %v6150_v18  ;;  %v14304_v47 = vld [vmem:[#allocation80_spill] sm:$0xff] }
 0x32d   : >> { %v5976_v10 = vrot.slane %v5975_v49, 1  ;;  %v5982_v50 = vrot.slane %v5981_v57, 1  ;;  %v5988_v31 = vrot.slane %v5987_v12, 1  ;;  %v5994_v7 = vrot.slane %v5993_v22, 1 }
 0x32e   : >> { %v6199_v27 = vrot.slane %v6198_v25, 2  ;;  %v6205_v19 = vrot.slane %v6204_v36, 2  ;;  %v6398_v43 = vrot.slane %v6362_v20, 4  ;;  %v6404_v8 = vrot.slane %v6363_v16, 4 }
 0x32f   : >> { %v12163_v30 = vadd.f32 %v5775_v21, %v5774_v52  ;;  %v12165_v58 = vadd.f32 %v5781_v62, %v5780_v63  ;;  %v6411_v0 = vadd.f32 %v6410_v61, %v6364_v14  ;;  %v12167_v54 = vadd.f32 %v6416_v15, %v6365_v26  ;;  %v14310_v62 = vld [vmem:[#allocation79_spill] sm:$0xff] }
 0x330   : >> { %v12169_v33 = vadd.f32 %v5763_v45, %v5762_v1  ;;  %v12171_v48 = vadd.f32 %v5769_v59, %v5768_v17  ;;  %v6187_v46 = vrot.slane %v6186_v35, 2  ;;  %v6193_v24 = vrot.slane %v6192_v53, 2  ;;  %v14311_v59 = vld [vmem:[#allocation64_spill] sm:$0xff] }
 0x331   : >> { %14297 = vst [vmem:[#allocation88_spill] sm:$0xff] %v12163_v30  ;;  %v12173_v2 = vadd.f32 %v5976_v10, %v5975_v49  ;;  %v12175_v4 = vadd.f32 %v5982_v50, %v5981_v57  ;;  %v12177_v39 = vadd.f32 %v5988_v31, %v5987_v12  ;;  %v12179_v18 = vadd.f32 %v5994_v7, %v5993_v22  ;;  %v14305_v49 = vld [vmem:[#allocation63_spill] sm:$0xff]  ;;  %v14306_v57 = vld [vmem:[#allocation81_spill] sm:$0xff]  ;;  %v14307_v22 = vld [vmem:[#allocation66_spill] sm:$0xff] }
 0x332   : >> { %14298 = vst [vmem:[#allocation177_spill] sm:$0xff] %v12165_v58  ;;  %v6200_v52 = vadd.f32 %v6199_v27, %v6198_v25  ;;  %v12181_v63 = vadd.f32 %v6205_v19, %v6204_v36  ;;  %v6399_v23 = vadd.f32 %v6398_v43, %v6362_v20  ;;  %v6405_v56 = vadd.f32 %v6404_v8, %v6363_v16  ;;  %v14308_v36 = vld [vmem:[#allocation67_spill] sm:$0xff]  ;;  %v14309_v16 = vld [vmem:[#allocation78_spill] sm:$0xff]  ;;  %v14313_v10 = vld [vmem:[#allocation65_spill] sm:$0xff] }
 0x333   : >> { %14299 = vst [vmem:[#allocation178_spill] sm:$0xff] %v12171_v48  ;;  %v6412_v60 = vrot.slane %v6411_v0, 2  ;;  %v6418_v38 = vrot.slane %v12167_v54, 2  ;;  %v6543_v14 = vmul.f32 %v11990_v6, %v12063_v55  ;;  %v6544_v26 = vmul.f32 %v11990_v6, %v12065_v28  ;;  %v14315_v27 = vld [vmem:[#allocation68_spill] sm:$0xff]  ;;  %v14316_v43 = vld [vmem:[#allocation69_spill] sm:$0xff] }
 0x334   : >> { %14300 = vst [vmem:[#allocation179_spill] sm:$0xff] %v12173_v2  ;;  %v6188_v1 = vadd.f32 %v6187_v46, %v6186_v35  ;;  %v6194_v17 = vadd.f32 %v6193_v24, %v6192_v53  ;;  %v6561_v5 = vadd.f32 %v14304_v47, %v11932_v37  ;;  %v6562_v12 = vadd.f32 %v14306_v57, %v14305_v49  ;;  %v14312_v35 = vld [vmem:[#allocation82_spill] sm:$0xff]  ;;  %v14314_v37 = vld [vmem:[#allocation83_spill] sm:$0xff] }
 0x335   : >> { %14301 = vst [vmem:[#allocation180_spill] sm:$0xff] %v12175_v4  ;;  %v6559_v25 = vadd.f32 %v6543_v14, %v14307_v22  ;;  %v6560_v20 = vadd.f32 %v6544_v26, %v14308_v36  ;;  %v6756_v21 = vmul.f32 %v11990_v6, %v14309_v16  ;;  %v6757_v61 = vmul.f32 %v11990_v6, %v14310_v62 }
 0x336   : >> { %14302 = vst [vmem:[#allocation181_spill] sm:$0xff] %v12177_v39  ;;  %v6577_v15 = vmax.f32 %v6561_v5, 0.0  ;;  %v6578_v45 = vmax.f32 %v6562_v12, 0.0  ;;  %v6774_v53 = vadd.f32 %v14312_v35, %v14311_v59  ;;  %v6775_v50 = vadd.f32 %v14314_v37, %v14313_v10 }
 0x337   : >> { %14303 = vst [vmem:[#allocation182_spill] sm:$0xff] %v12179_v18  ;;  %v6575_v31 = vmax.f32 %v6559_v25, 0.0  ;;  %v6576_v7 = vmax.f32 %v6560_v20, 0.0  ;;  %v6772_v19 = vadd.f32 %v6756_v21, %v14315_v27  ;;  %v6773_v8 = vadd.f32 %v6757_v61, %v14316_v43 }
 0x338   : >> { %v6623_v46 = vrot.slane %v6577_v15, 4  ;;  %v6629_v24 = vrot.slane %v6578_v45, 4  ;;  %v6790_v14 = vmax.f32 %v6774_v53, 0.0  ;;  %v6791_v26 = vmax.f32 %v6775_v50, 0.0 }
 0x339   : >> { %v6611_v47 = vrot.slane %v6575_v31, 4  ;;  %v6617_v6 = vrot.slane %v6576_v7, 4  ;;  %v6788_v5 = vmax.f32 %v6772_v19, 0.0  ;;  %v6789_v49 = vmax.f32 %v6773_v8, 0.0 }
 0x33a   : >> { %v6624_v57 = vadd.f32 %v6623_v46, %v6577_v15  ;;  %v6630_v12 = vadd.f32 %v6629_v24, %v6578_v45  ;;  %v6836_v22 = vrot.slane %v6790_v14, 4  ;;  %v6842_v36 = vrot.slane %v6791_v26, 4 }
 0x33b   : >> { %v6612_v59 = vadd.f32 %v6611_v47, %v6575_v31  ;;  %v6618_v35 = vadd.f32 %v6617_v6, %v6576_v7  ;;  %v6824_v25 = vrot.slane %v6788_v5, 4  ;;  %v6830_v20 = vrot.slane %v6789_v49, 4 }
 0x33c   : >> { %v6400_v10 = vrot.slane %v6399_v23, 2  ;;  %v6406_v21 = vrot.slane %v6405_v56, 2  ;;  %v6413_v37 = vadd.f32 %v6412_v60, %v6411_v0  ;;  %v6625_v61 = vrot.slane %v6624_v57, 2 }
 0x33d   : >> { %v6201_v27 = vrot.slane %v6200_v52, 1  ;;  %v6631_v43 = vrot.slane %v6630_v12, 2  ;;  %v6837_v53 = vadd.f32 %v6836_v22, %v6790_v14  ;;  %v6843_v50 = vadd.f32 %v6842_v36, %v6791_v26 }
 0x33e   : >> { %v6613_v18 = vrot.slane %v6612_v59, 2  ;;  %v6619_v39 = vrot.slane %v6618_v35, 2  ;;  %v6825_v19 = vadd.f32 %v6824_v25, %v6788_v5  ;;  %v6831_v8 = vadd.f32 %v6830_v20, %v6789_v49  ;;  %v9945_v49 = vpop.permute.xlu1 %9944 }
 0x33f   : >> { %v6189_v15 = vrot.slane %v6188_v1, 1  ;;  %v6195_v45 = vrot.slane %v6194_v17, 1  ;;  %v6207_v46 = vrot.slane %v12181_v63, 1  ;;  %v6419_v31 = vadd.f32 %v6418_v38, %v12167_v54 }
 0x340   : >> { %v6401_v7 = vadd.f32 %v6400_v10, %v6399_v23  ;;  %v6407_v24 = vadd.f32 %v6406_v21, %v6405_v56  ;;  %v6414_v47 = vrot.slane %v6413_v37, 1  ;;  %v6626_v6 = vadd.f32 %v6625_v61, %v6624_v57  ;;  %v14323_v61 = vld [vmem:[#allocation141_spill] sm:$0xff] }
 0x341   : >> { %v12206_v0 = vadd.f32 %v6201_v27, %v6200_v52  ;;  %v6632_v60 = vadd.f32 %v6631_v43, %v6630_v12  ;;  %v6838_v58 = vrot.slane %v6837_v53, 2  ;;  %v6844_v14 = vrot.slane %v6843_v50, 2  ;;  %v14324_v27 = vld [vmem:[#allocation142_spill] sm:$0xff] }
 0x342   : >> { %v6614_v26 = vadd.f32 %v6613_v18, %v6612_v59  ;;  %v6620_v22 = vadd.f32 %v6619_v39, %v6618_v35  ;;  %v6826_v36 = vrot.slane %v6825_v19, 2  ;;  %v6832_v5 = vrot.slane %v6831_v8, 2 }
 0x343   : >> { %14317 = vst [vmem:[#allocation80_spill] sm:$0xff] %v12206_v0  ;;  %v12208_v25 = vadd.f32 %v6189_v15, %v6188_v1  ;;  %v12210_v20 = vadd.f32 %v6195_v45, %v6194_v17  ;;  %v12213_v54 = vadd.f32 %v6207_v46, %v12181_v63  ;;  %v6420_v23 = vrot.slane %v6419_v31, 1  ;;  %v14328_v45 = vld [vmem:[#allocation144_spill] sm:$0xff]  ;;  %v14339_v0 = vld [vmem:[#allocation139_spill] sm:$0xff] }
 0x344   : >> { %v6402_v56 = vrot.slane %v6401_v7, 1  ;;  %v6408_v38 = vrot.slane %v6407_v24, 1  ;;  %v12215_v52 = vadd.f32 %v6414_v47, %v6413_v37  ;;  %v6627_v57 = vrot.slane %v6626_v6, 1 }
 0x345   : >> { %14318 = vst [vmem:[#allocation63_spill] sm:$0xff] %v12208_v25  ;;  %v6633_v12 = vrot.slane %v6632_v60, 1  ;;  %v6839_v10 = vadd.f32 %v6838_v58, %v6837_v53  ;;  %v6845_v18 = vadd.f32 %v6844_v14, %v6843_v50  ;;  %v12217_v39 = vunpack.i.h.bf16 %v9945_v49  ;;  %v14327_v53 = vld [vmem:[#allocation143_spill] sm:$0xff] }
 0x346   : >> { %14319 = vst [vmem:[#allocation81_spill] sm:$0xff] %v12210_v20  ;;  %v6615_v59 = vrot.slane %v6614_v26, 1  ;;  %v6621_v35 = vrot.slane %v6620_v22, 1  ;;  %v6827_v1 = vadd.f32 %v6826_v36, %v6825_v19  ;;  %v6833_v21 = vadd.f32 %v6832_v5, %v6831_v8  ;;  %v14350_v20 = vld [vmem:[#allocation126_spill] sm:$0xff] }
 0x347   : >> { %14320 = vst [vmem:[#allocation66_spill] sm:$0xff] %v12213_v54  ;;  %v12219_v17 = vadd.f32 %v6420_v23, %v6419_v31  ;;  %v5263_v63 = vmul.f32 %v12217_v39, %v14323_v61  ;;  %v5264_v43 = vmul.f32 %v12217_v39, %v14324_v27  ;;  %v12225_v37 = vunpack.i.l.bf16 %v9945_v49  ;;  %v14333_v23 = vld [vmem:[#allocation121_spill] sm:$0xff] }
 0x348   : >> { %14321 = vst [vmem:[#allocation67_spill] sm:$0xff] %v12215_v52  ;;  %v12227_v15 = vadd.f32 %v6402_v56, %v6401_v7  ;;  %v12229_v58 = vadd.f32 %v6408_v38, %v6407_v24  ;;  %v5476_v50 = vmul.f32 %v12217_v39, %v14327_v53  ;;  %v5477_v19 = vmul.f32 %v12217_v39, %v14328_v45 }
 0x349   : >> { %14322 = vst [vmem:[#allocation64_spill] sm:$0xff] %v12219_v17  ;;  %v12235_v8 = vadd.f32 %v6627_v57, %v6626_v6  ;;  %v12237_v46 = vadd.f32 %v6633_v12, %v6632_v60  ;;  %v6840_v31 = vrot.slane %v6839_v10, 1  ;;  %v6846_v47 = vrot.slane %v6845_v18, 1  ;;  %v14334_v6 = vld [vmem:[#allocation122_spill] sm:$0xff]  ;;  %v14336_v12 = vld [vmem:[#allocation124_spill] sm:$0xff] }
 0x34a   : >> { %14325 = vst [vmem:[#allocation82_spill] sm:$0xff] %v12227_v15  ;;  %v12239_v14 = vadd.f32 %v6615_v59, %v6614_v26  ;;  %v12241_v36 = vadd.f32 %v6621_v35, %v6620_v22  ;;  %v6828_v7 = vrot.slane %v6827_v1, 1  ;;  %v6834_v5 = vrot.slane %v6833_v21, 1  ;;  %v14335_v22 = vld [vmem:[#allocation123_spill] sm:$0xff]  ;;  %v14337_v35 = vld [vmem:[#allocation137_spill] sm:$0xff] }
 0x34b   : >> { %14326 = vst [vmem:[#allocation65_spill] sm:$0xff] %v12229_v58  ;;  %v5261_v24 = vmul.f32 %v12225_v37, %v14323_v61  ;;  %v5262_v49 = vmul.f32 %v12225_v37, %v14324_v27  ;;  %v5279_v56 = vadd.f32 %v5263_v63, %v14333_v23  ;;  %v5280_v38 = vadd.f32 %v5264_v43, %v14334_v6  ;;  %v14340_v23 = vld [vmem:[#allocation140_spill] sm:$0xff]  ;;  %v14349_v58 = vld [vmem:[#allocation125_spill] sm:$0xff] }
 0x34c   : >> { %14329 = vst [vmem:[#allocation83_spill] sm:$0xff] %v12235_v8  ;;  %v5474_v60 = vmul.f32 %v12225_v37, %v14327_v53  ;;  %v5475_v26 = vmul.f32 %v12225_v37, %v14328_v45  ;;  %v5492_v57 = vadd.f32 %v5476_v50, %v14335_v22  ;;  %v5493_v59 = vadd.f32 %v5477_v19, %v14336_v12  ;;  %v14338_v8 = vld [vmem:[#allocation138_spill] sm:$0xff] }
 0x34d   : >> { %14330 = vst [vmem:[#allocation68_spill] sm:$0xff] %v12237_v46  ;;  %v5277_v46 = vadd.f32 %v5261_v24, %v14337_v35  ;;  %v5278_v17 = vadd.f32 %v5262_v49, %v14338_v8  ;;  %v5295_v52 = vmax.f32 %v5279_v56, 0.0  ;;  %v5296_v54 = vmax.f32 %v5280_v38, 0.0 }
 0x34e   : >> { %14331 = vst [vmem:[#allocation69_spill] sm:$0xff] %v12239_v14  ;;  %v5490_v63 = vadd.f32 %v5474_v60, %v14339_v0  ;;  %v5491_v43 = vadd.f32 %v5475_v26, %v14340_v23  ;;  %v5508_v6 = vmax.f32 %v5492_v57, 0.0  ;;  %v5509_v30 = vmax.f32 %v5493_v59, 0.0 }
 0x34f   : >> { %14332 = vst [vmem:[#allocation183_spill] sm:$0xff] %v12241_v36  ;;  %v5293_v51 = vmax.f32 %v5277_v46, 0.0  ;;  %v5294_v9 = vmax.f32 %v5278_v17, 0.0  ;;  %v5321_v44 = vrot.slane %v5295_v52, 4  ;;  %v5327_v3 = vrot.slane %v5296_v54, 4 }
 0x350   : >> { %v5506_v45 = vmax.f32 %v5490_v63, 0.0  ;;  %v5507_v50 = vmax.f32 %v5491_v43, 0.0  ;;  %v5534_v22 = vrot.slane %v5508_v6, 4  ;;  %v5540_v19 = vrot.slane %v5509_v30, 4  ;;  %v14345_v43 = vld [vmem:[#allocation70_spill] sm:$0xff] }
 0x351   : >> { %v5309_v12 = vrot.slane %v5293_v51, 4  ;;  %v5315_v24 = vrot.slane %v5294_v9, 4  ;;  %v5322_v35 = vadd.f32 %v5321_v44, %v5295_v52  ;;  %v5328_v8 = vadd.f32 %v5327_v3, %v5296_v54  ;;  %v14346_v3 = vld [vmem:[#allocation71_spill] sm:$0xff]  ;;  %v14347_v52 = vld [vmem:[#allocation72_spill] sm:$0xff] }
 0x352   : >> { %v5522_v49 = vrot.slane %v5506_v45, 4  ;;  %v5528_v56 = vrot.slane %v5507_v50, 4  ;;  %v5535_v38 = vadd.f32 %v5534_v22, %v5508_v6  ;;  %v5541_v0 = vadd.f32 %v5540_v19, %v5509_v30 }
 0x353   : >> { %v12259_v60 = vadd.f32 %v6840_v31, %v6839_v10  ;;  %v12261_v26 = vadd.f32 %v6846_v47, %v6845_v18  ;;  %v5310_v46 = vadd.f32 %v5309_v12, %v5293_v51  ;;  %v5316_v17 = vadd.f32 %v5315_v24, %v5294_v9  ;;  %v14348_v10 = vld [vmem:[#allocation73_spill] sm:$0xff] }
 0x354   : >> { %v12263_v57 = vadd.f32 %v6828_v7, %v6827_v1  ;;  %v12265_v59 = vadd.f32 %v6834_v5, %v6833_v21  ;;  %v5523_v63 = vadd.f32 %v5522_v49, %v5506_v45  ;;  %v5529_v23 = vadd.f32 %v5528_v56, %v5507_v50 }
 0x355   : >> { %14341 = vst [vmem:[#allocation121_spill] sm:$0xff] %v12259_v60  ;;  %v5689_v44 = vmul.f32 %v12217_v39, %v14345_v43  ;;  %v5690_v54 = vmul.f32 %v12217_v39, %v14346_v3  ;;  %v5902_v30 = vmul.f32 %v12217_v39, %v14347_v52  ;;  %v5903_v18 = vmul.f32 %v12217_v39, %v14348_v10 }
 0x356   : >> { %14342 = vst [vmem:[#allocation122_spill] sm:$0xff] %v12261_v26  ;;  %v5323_v51 = vrot.slane %v5322_v35, 2  ;;  %v5329_v9 = vrot.slane %v5328_v8, 2  ;;  %v5536_v1 = vrot.slane %v5535_v38, 2  ;;  %v5542_v31 = vrot.slane %v5541_v0, 2 }
 0x357   : >> { %14343 = vst [vmem:[#allocation123_spill] sm:$0xff] %v12263_v57  ;;  %v12277_v21 = vmul.f32 %v12217_v39, %v12055_v32  ;;  %v12281_v45 = vmul.f32 %v12217_v39, %v12057_v40  ;;  %v5311_v47 = vrot.slane %v5310_v46, 2  ;;  %v5317_v7 = vrot.slane %v5316_v17, 2 }
 0x358   : >> { %14344 = vst [vmem:[#allocation124_spill] sm:$0xff] %v12265_v59  ;;  %v12285_v5 = vmul.f32 %v12217_v39, %v12059_v11  ;;  %v12289_v6 = vmul.f32 %v12217_v39, %v12061_v42  ;;  %v5524_v50 = vrot.slane %v5523_v63, 2  ;;  %v5530_v22 = vrot.slane %v5529_v23, 2 }
 0x359   : >> { %v12293_v19 = vmul.f32 %v12217_v39, %v12063_v55  ;;  %v12297_v12 = vmul.f32 %v12217_v39, %v12065_v28  ;;  %v12301_v24 = vmul.f32 %v12217_v39, %v14309_v16  ;;  %v12305_v49 = vmul.f32 %v12217_v39, %v14310_v62  ;;  %v14351_v39 = vld [vmem:[#allocation51_spill] sm:$0xff] }
 0x35a   : >> { %v5324_v56 = vadd.f32 %v5323_v51, %v5322_v35  ;;  %v5330_v26 = vadd.f32 %v5329_v9, %v5328_v8  ;;  %v5537_v60 = vadd.f32 %v5536_v1, %v5535_v38  ;;  %v5543_v53 = vadd.f32 %v5542_v31, %v5541_v0  ;;  %v14352_v35 = vld [vmem:[#allocation52_spill] sm:$0xff]  ;;  %v14353_v51 = vld [vmem:[#allocation127_spill] sm:$0xff] }
 0x35b   : >> { %v5312_v27 = vadd.f32 %v5311_v47, %v5310_v46  ;;  %v5318_v61 = vadd.f32 %v5317_v7, %v5316_v17  ;;  %v5687_v59 = vmul.f32 %v12225_v37, %v14345_v43  ;;  %v5688_v57 = vmul.f32 %v12225_v37, %v14346_v3 }
 0x35c   : >> { %v5525_v36 = vadd.f32 %v5524_v50, %v5523_v63  ;;  %v5531_v14 = vadd.f32 %v5530_v22, %v5529_v23  ;;  %v5705_v15 = vadd.f32 %v5689_v44, %v14349_v58  ;;  %v5706_v25 = vadd.f32 %v5690_v54, %v14350_v20  ;;  %v14354_v63 = vld [vmem:[#allocation128_spill] sm:$0xff]  ;;  %v14355_v44 = vld [vmem:[#allocation53_spill] sm:$0xff]  ;;  %v14356_v54 = vld [vmem:[#allocation54_spill] sm:$0xff] }
 0x35d   : >> { %v5703_v4 = vadd.f32 %v5687_v59, %v14351_v39  ;;  %v5704_v8 = vadd.f32 %v5688_v57, %v14352_v35  ;;  %v5900_v38 = vmul.f32 %v12225_v37, %v14347_v52  ;;  %v5901_v0 = vmul.f32 %v12225_v37, %v14348_v10 }
 0x35e   : >> { %v5721_v46 = vmax.f32 %v5705_v15, 0.0  ;;  %v5722_v17 = vmax.f32 %v5706_v25, 0.0  ;;  %v5918_v9 = vadd.f32 %v5902_v30, %v14353_v51  ;;  %v5919_v23 = vadd.f32 %v5903_v18, %v14354_v63 }
 0x35f   : >> { %v5719_v1 = vmax.f32 %v5703_v4, 0.0  ;;  %v5720_v58 = vmax.f32 %v5704_v8, 0.0  ;;  %v5916_v20 = vadd.f32 %v5900_v38, %v14355_v44  ;;  %v5917_v59 = vadd.f32 %v5901_v0, %v14356_v54 }
 0x360   : >> { %v5747_v31 = vrot.slane %v5721_v46, 4  ;;  %v5753_v57 = vrot.slane %v5722_v17, 4  ;;  %v5934_v47 = vmax.f32 %v5918_v9, 0.0  ;;  %v5935_v7 = vmax.f32 %v5919_v23, 0.0 }
 0x361   : >> { %v5735_v50 = vrot.slane %v5719_v1, 4  ;;  %v5741_v22 = vrot.slane %v5720_v58, 4  ;;  %v5932_v39 = vmax.f32 %v5916_v20, 0.0  ;;  %v5933_v35 = vmax.f32 %v5917_v59, 0.0 }
 0x362   : >> { %v5748_v15 = vadd.f32 %v5747_v31, %v5721_v46  ;;  %v5754_v25 = vadd.f32 %v5753_v57, %v5722_v17  ;;  %v5960_v10 = vrot.slane %v5934_v47, 4  ;;  %v5966_v30 = vrot.slane %v5935_v7, 4 }
 0x363   : >> { %v5736_v51 = vadd.f32 %v5735_v50, %v5719_v1  ;;  %v5742_v18 = vadd.f32 %v5741_v22, %v5720_v58  ;;  %v5948_v4 = vrot.slane %v5932_v39, 4  ;;  %v5954_v8 = vrot.slane %v5933_v35, 4 }
 0x364   : >> { %v5325_v63 = vrot.slane %v5324_v56, 1  ;;  %v5331_v38 = vrot.slane %v5330_v26, 1  ;;  %v5961_v44 = vadd.f32 %v5960_v10, %v5934_v47  ;;  %v5967_v0 = vadd.f32 %v5966_v30, %v5935_v7 }
 0x365   : >> { %v5538_v54 = vrot.slane %v5537_v60, 1  ;;  %v5544_v52 = vrot.slane %v5543_v53, 1  ;;  %v5949_v9 = vadd.f32 %v5948_v4, %v5932_v39  ;;  %v5955_v23 = vadd.f32 %v5954_v8, %v5933_v35 }
 0x366   : >> { %v5313_v3 = vrot.slane %v5312_v27, 1  ;;  %v5319_v43 = vrot.slane %v5318_v61, 1  ;;  %v5526_v20 = vrot.slane %v5525_v36, 1  ;;  %v5532_v59 = vrot.slane %v5531_v14, 1 }
 0x367   : >> { %v5737_v46 = vrot.slane %v5736_v51, 2  ;;  %v5743_v17 = vrot.slane %v5742_v18, 2  ;;  %v5749_v31 = vrot.slane %v5748_v15, 2  ;;  %v5755_v57 = vrot.slane %v5754_v25, 2 }
 0x368   : >> { %v12323_v1 = vadd.f32 %v5325_v63, %v5324_v56  ;;  %v12325_v58 = vadd.f32 %v5331_v38, %v5330_v26  ;;  %v5962_v50 = vrot.slane %v5961_v44, 2  ;;  %v5968_v22 = vrot.slane %v5967_v0, 2 }
 0x369   : >> { %v12327_v10 = vadd.f32 %v5538_v54, %v5537_v60  ;;  %v12329_v47 = vadd.f32 %v5544_v52, %v5543_v53  ;;  %v5950_v7 = vrot.slane %v5949_v9, 2  ;;  %v5956_v39 = vrot.slane %v5955_v23, 2  ;;  %v14359_v52 = vld [vmem:[#allocation55_spill] sm:$0xff] }
 0x36a   : >> { %v12331_v35 = vadd.f32 %v5313_v3, %v5312_v27  ;;  %v12333_v30 = vadd.f32 %v5319_v43, %v5318_v61  ;;  %v12335_v4 = vadd.f32 %v5526_v20, %v5525_v36  ;;  %v12337_v8 = vadd.f32 %v5532_v59, %v5531_v14  ;;  %v14357_v61 = vld [vmem:[#allocation129_spill] sm:$0xff]  ;;  %v14358_v43 = vld [vmem:[#allocation130_spill] sm:$0xff]  ;;  %v14362_v20 = vld [vmem:[#allocation132_spill] sm:$0xff] }
 0x36b   : >> { %v5738_v56 = vadd.f32 %v5737_v46, %v5736_v51  ;;  %v5744_v63 = vadd.f32 %v5743_v17, %v5742_v18  ;;  %v5750_v26 = vadd.f32 %v5749_v31, %v5748_v15  ;;  %v5756_v38 = vadd.f32 %v5755_v57, %v5754_v25  ;;  %v14360_v15 = vld [vmem:[#allocation56_spill] sm:$0xff]  ;;  %v14363_v46 = vld [vmem:[#allocation57_spill] sm:$0xff]  ;;  %v14364_v31 = vld [vmem:[#allocation58_spill] sm:$0xff] }
 0x36c   : >> { %v5963_v2 = vadd.f32 %v5962_v50, %v5961_v44  ;;  %v5969_v48 = vadd.f32 %v5968_v22, %v5967_v0  ;;  %v6113_v53 = vmul.f32 %v12225_v37, %v12055_v32  ;;  %v6114_v60 = vmul.f32 %v12225_v37, %v12057_v40 }
 0x36d   : >> { %v5951_v27 = vadd.f32 %v5950_v7, %v5949_v9  ;;  %v5957_v3 = vadd.f32 %v5956_v39, %v5955_v23  ;;  %v6131_v36 = vadd.f32 %v12277_v21, %v14357_v61  ;;  %v6132_v14 = vadd.f32 %v12281_v45, %v14358_v43  ;;  %v14361_v9 = vld [vmem:[#allocation131_spill] sm:$0xff] }
 0x36e   : >> { %v6129_v51 = vadd.f32 %v6113_v53, %v14359_v52  ;;  %v6130_v25 = vadd.f32 %v6114_v60, %v14360_v15  ;;  %v6326_v18 = vmul.f32 %v12225_v37, %v12059_v11  ;;  %v6327_v44 = vmul.f32 %v12225_v37, %v12061_v42 }
 0x36f   : >> { %v6147_v0 = vmax.f32 %v6131_v36, 0.0  ;;  %v6148_v54 = vmax.f32 %v6132_v14, 0.0  ;;  %v6344_v23 = vadd.f32 %v12285_v5, %v14361_v9  ;;  %v6345_v21 = vadd.f32 %v12289_v6, %v14362_v20 }
 0x370   : >> { %v6145_v59 = vmax.f32 %v6129_v51, 0.0  ;;  %v6146_v45 = vmax.f32 %v6130_v25, 0.0  ;;  %v6342_v17 = vadd.f32 %v6326_v18, %v14363_v46  ;;  %v6343_v57 = vadd.f32 %v6327_v44, %v14364_v31 }
 0x371   : >> { %v6173_v50 = vrot.slane %v6147_v0, 4  ;;  %v6179_v22 = vrot.slane %v6148_v54, 4  ;;  %v6360_v7 = vmax.f32 %v6344_v23, 0.0  ;;  %v6361_v39 = vmax.f32 %v6345_v21, 0.0 }
 0x372   : >> { %v6161_v53 = vrot.slane %v6145_v59, 4  ;;  %v6167_v60 = vrot.slane %v6146_v45, 4  ;;  %v6358_v61 = vmax.f32 %v6342_v17, 0.0  ;;  %v6359_v36 = vmax.f32 %v6343_v57, 0.0 }
 0x373   : >> { %v6174_v43 = vadd.f32 %v6173_v50, %v6147_v0  ;;  %v6180_v14 = vadd.f32 %v6179_v22, %v6148_v54  ;;  %v6386_v5 = vrot.slane %v6360_v7, 4  ;;  %v6392_v52 = vrot.slane %v6361_v39, 4 }
 0x374   : >> { %v6162_v15 = vadd.f32 %v6161_v53, %v6145_v59  ;;  %v6168_v6 = vadd.f32 %v6167_v60, %v6146_v45  ;;  %v6374_v51 = vrot.slane %v6358_v61, 4  ;;  %v6380_v25 = vrot.slane %v6359_v36, 4 }
 0x375   : >> { %v5751_v9 = vrot.slane %v5750_v26, 1  ;;  %v5757_v18 = vrot.slane %v5756_v38, 1  ;;  %v6387_v20 = vadd.f32 %v6386_v5, %v6360_v7  ;;  %v6393_v44 = vadd.f32 %v6392_v52, %v6361_v39 }
 0x376   : >> { %v5739_v46 = vrot.slane %v5738_v56, 1  ;;  %v5745_v31 = vrot.slane %v5744_v63, 1  ;;  %v6375_v23 = vadd.f32 %v6374_v51, %v6358_v61  ;;  %v6381_v21 = vadd.f32 %v6380_v25, %v6359_v36 }
 0x377   : >> { %v5952_v42 = vrot.slane %v5951_v27, 1  ;;  %v5958_v11 = vrot.slane %v5957_v3, 1  ;;  %v5964_v17 = vrot.slane %v5963_v2, 1  ;;  %v5970_v57 = vrot.slane %v5969_v48, 1 }
 0x378   : >> { %v6163_v0 = vrot.slane %v6162_v15, 2  ;;  %v6169_v54 = vrot.slane %v6168_v6, 2  ;;  %v6175_v50 = vrot.slane %v6174_v43, 2  ;;  %v6181_v22 = vrot.slane %v6180_v14, 2 }
 0x379   : >> { %v12359_v59 = vadd.f32 %v5751_v9, %v5750_v26  ;;  %v12361_v45 = vadd.f32 %v5757_v18, %v5756_v38  ;;  %v6388_v53 = vrot.slane %v6387_v20, 2  ;;  %v6394_v60 = vrot.slane %v6393_v44, 2 }
 0x37a   : >> { %v12363_v7 = vadd.f32 %v5739_v46, %v5738_v56  ;;  %v12365_v39 = vadd.f32 %v5745_v31, %v5744_v63  ;;  %v6376_v61 = vrot.slane %v6375_v23, 2  ;;  %v6382_v36 = vrot.slane %v6381_v21, 2 }
 0x37b   : >> { %v12367_v5 = vadd.f32 %v5952_v42, %v5951_v27  ;;  %v12369_v52 = vadd.f32 %v5958_v11, %v5957_v3  ;;  %v12371_v51 = vadd.f32 %v5964_v17, %v5963_v2  ;;  %v12373_v25 = vadd.f32 %v5970_v57, %v5969_v48  ;;  %v14365_v27 = vld [vmem:[#allocation133_spill] sm:$0xff] }
 0x37c   : >> { %v12375_v26 = vadd.f32 %v6163_v0, %v6162_v15  ;;  %v12377_v38 = vadd.f32 %v6169_v54, %v6168_v6  ;;  %v12379_v9 = vadd.f32 %v6175_v50, %v6174_v43  ;;  %v12381_v56 = vadd.f32 %v6181_v22, %v6180_v14  ;;  %v14366_v43 = vld [vmem:[#allocation134_spill] sm:$0xff]  ;;  %v14367_v15 = vld [vmem:[#allocation59_spill] sm:$0xff]  ;;  %v14370_v0 = vld [vmem:[#allocation136_spill] sm:$0xff] }
 0x37d   : >> { %v12383_v63 = vadd.f32 %v6388_v53, %v6387_v20  ;;  %v12385_v18 = vadd.f32 %v6394_v60, %v6393_v44  ;;  %v6539_v11 = vmul.f32 %v12225_v37, %v12063_v55  ;;  %v6540_v42 = vmul.f32 %v12225_v37, %v12065_v28  ;;  %v14368_v20 = vld [vmem:[#allocation60_spill] sm:$0xff]  ;;  %v14371_v50 = vld [vmem:[#allocation61_spill] sm:$0xff]  ;;  %v14372_v53 = vld [vmem:[#allocation62_spill] sm:$0xff] }
 0x37e   : >> { %v12391_v48 = vadd.f32 %v6376_v61, %v6375_v23  ;;  %v12393_v2 = vadd.f32 %v6382_v36, %v6381_v21  ;;  %v6557_v3 = vadd.f32 %v12293_v19, %v14365_v27  ;;  %v6558_v14 = vadd.f32 %v12297_v12, %v14366_v43  ;;  %v14369_v21 = vld [vmem:[#allocation135_spill] sm:$0xff] }
 0x37f   : >> { %v6555_v6 = vadd.f32 %v6539_v11, %v14367_v15  ;;  %v6556_v44 = vadd.f32 %v6540_v42, %v14368_v20  ;;  %v6752_v46 = vmul.f32 %v12225_v37, %v14309_v16  ;;  %v6753_v31 = vmul.f32 %v12225_v37, %v14310_v62 }
 0x380   : >> { %v6573_v23 = vmax.f32 %v6557_v3, 0.0  ;;  %v6574_v17 = vmax.f32 %v6558_v14, 0.0  ;;  %v6770_v57 = vadd.f32 %v12301_v24, %v14369_v21  ;;  %v6771_v19 = vadd.f32 %v12305_v49, %v14370_v0 }
 0x381   : >> { %v6571_v54 = vmax.f32 %v6555_v6, 0.0  ;;  %v6572_v12 = vmax.f32 %v6556_v44, 0.0  ;;  %v6768_v22 = vadd.f32 %v6752_v46, %v14371_v50  ;;  %v6769_v60 = vadd.f32 %v6753_v31, %v14372_v53 }
 0x382   : >> { %v6599_v61 = vrot.slane %v6573_v23, 4  ;;  %v6605_v36 = vrot.slane %v6574_v17, 4  ;;  %v6786_v11 = vmax.f32 %v6770_v57, 0.0  ;;  %v6787_v42 = vmax.f32 %v6771_v19, 0.0 }
 0x383   : >> { %v6587_v27 = vrot.slane %v6571_v54, 4  ;;  %v6593_v37 = vrot.slane %v6572_v12, 4  ;;  %v6784_v3 = vmax.f32 %v6768_v22, 0.0  ;;  %v6785_v43 = vmax.f32 %v6769_v60, 0.0 }
 0x384   : >> { %v6600_v14 = vadd.f32 %v6599_v61, %v6573_v23  ;;  %v6606_v15 = vadd.f32 %v6605_v36, %v6574_v17  ;;  %v6812_v24 = vrot.slane %v6786_v11, 4  ;;  %v6818_v20 = vrot.slane %v6787_v42, 4 }
 0x385   : >> { %v6588_v21 = vadd.f32 %v6587_v27, %v6571_v54  ;;  %v6594_v49 = vadd.f32 %v6593_v37, %v6572_v12  ;;  %v6800_v6 = vrot.slane %v6784_v3, 4  ;;  %v6806_v44 = vrot.slane %v6785_v43, 4 }
 0x386   : >> { %v6601_v0 = vrot.slane %v6600_v14, 2  ;;  %v6607_v46 = vrot.slane %v6606_v15, 2  ;;  %v6813_v50 = vadd.f32 %v6812_v24, %v6786_v11  ;;  %v6819_v31 = vadd.f32 %v6818_v20, %v6787_v42 }
 0x387   : >> { %v6589_v53 = vrot.slane %v6588_v21, 2  ;;  %v6595_v57 = vrot.slane %v6594_v49, 2  ;;  %v6801_v19 = vadd.f32 %v6800_v6, %v6784_v3  ;;  %v6807_v62 = vadd.f32 %v6806_v44, %v6785_v43 }
 0x388   : >> { %v6602_v16 = vadd.f32 %v6601_v0, %v6600_v14  ;;  %v6608_v22 = vadd.f32 %v6607_v46, %v6606_v15  ;;  %v6814_v60 = vrot.slane %v6813_v50, 2  ;;  %v6820_v23 = vrot.slane %v6819_v31, 2 }
 0x389   : >> { %v6590_v17 = vadd.f32 %v6589_v53, %v6588_v21  ;;  %v6596_v61 = vadd.f32 %v6595_v57, %v6594_v49  ;;  %v6802_v36 = vrot.slane %v6801_v19, 2  ;;  %v6808_v54 = vrot.slane %v6807_v62, 2 }
 0x38a   : >> { %v6165_v12 = vrot.slane %v12375_v26, 1  ;;  %v6177_v27 = vrot.slane %v12379_v9, 1  ;;  %v6183_v11 = vrot.slane %v12381_v56, 1  ;;  %v6815_v42 = vadd.f32 %v6814_v60, %v6813_v50 }
 0x38b   : >> { %v6171_v37 = vrot.slane %v12377_v38, 1  ;;  %v6390_v3 = vrot.slane %v12383_v63, 1  ;;  %v6803_v43 = vadd.f32 %v6802_v36, %v6801_v19  ;;  %v6821_v14 = vadd.f32 %v6820_v23, %v6819_v31 }
 0x38c   : >> { %v6378_v15 = vrot.slane %v12391_v48, 1  ;;  %v6384_v24 = vrot.slane %v12393_v2, 1  ;;  %v6396_v20 = vrot.slane %v12385_v18, 1  ;;  %v6809_v21 = vadd.f32 %v6808_v54, %v6807_v62 }
 0x38d   : >> { %v6591_v49 = vrot.slane %v6590_v17, 1  ;;  %v6597_v6 = vrot.slane %v6596_v61, 1  ;;  %v6603_v44 = vrot.slane %v6602_v16, 1  ;;  %v6609_v0 = vrot.slane %v6608_v22, 1 }
 0x38e   : >> { %v6166_v46 = vadd.f32 %v6165_v12, %v12375_v26  ;;  %v6178_v50 = vadd.f32 %v6177_v27, %v12379_v9  ;;  %v6184_v53 = vadd.f32 %v6183_v11, %v12381_v56  ;;  %v6816_v57 = vrot.slane %v6815_v42, 1  ;;  %v14386_v11 = vld [vmem:[#allocation81_spill] sm:$0xff] }
 0x38f   : >> { %v6172_v31 = vadd.f32 %v6171_v37, %v12377_v38  ;;  %v6391_v19 = vadd.f32 %v6390_v3, %v12383_v63  ;;  %v6804_v60 = vrot.slane %v6803_v43, 1  ;;  %v6822_v23 = vrot.slane %v6821_v14, 1 }
 0x390   : >> { %v6379_v36 = vadd.f32 %v6378_v15, %v12391_v48  ;;  %v6385_v62 = vadd.f32 %v6384_v24, %v12393_v2  ;;  %v6397_v54 = vadd.f32 %v6396_v20, %v12385_v18  ;;  %v6810_v28 = vrot.slane %v6809_v21, 1  ;;  %v14389_v15 = vld [vmem:[#allocation82_spill] sm:$0xff]  ;;  %v14391_v20 = vld [vmem:[#allocation36_spill] sm:$0xff] }
 0x391   : >> { %v6592_v55 = vadd.f32 %v6591_v49, %v6590_v17  ;;  %v6598_v26 = vadd.f32 %v6597_v6, %v6596_v61  ;;  %v6604_v12 = vadd.f32 %v6603_v44, %v6602_v16  ;;  %v6610_v9 = vadd.f32 %v6609_v0, %v6608_v22  ;;  %v9939_v22 = vpop.permute.xlu0 %9938  ;;  %v14392_v49 = vld [vmem:[#allocation37_spill] sm:$0xff]  ;;  %v14393_v6 = vld [vmem:[#allocation38_spill] sm:$0xff] }
 0x392   : >> { %v6817_v27 = vadd.f32 %v6816_v57, %v6815_v42  ;;  %v6913_v38 = vsel %vm6912_vm2, %v12323_v1, %v12331_v35  ;;  %v6926_v56 = vsel %vm6912_vm2, %v12325_v58, %v12333_v30  ;;  %v6951_v63 = vsel %vm6912_vm2, %v12327_v10, %v12335_v4  ;;  %v14394_v0 = vld [vmem:[#allocation65_spill] sm:$0xff]  ;;  %v14398_v57 = vld [vmem:[#allocation183_spill] sm:$0xff] }
 0x393   : >> { %v6805_v48 = vadd.f32 %v6804_v60, %v6803_v43  ;;  %v6823_v18 = vadd.f32 %v6822_v23, %v6821_v14  ;;  %v6958_v16 = vsel %vm6912_vm2, %v12329_v47, %v12337_v8  ;;  %v6983_v2 = vsel %vm6912_vm2, %v12359_v59, %v12363_v7  ;;  %v14378_v7 = vld [vmem:[#allocation178_spill] sm:$0xff]  ;;  %v14388_v43 = vld [vmem:[#allocation35_spill] sm:$0xff] }
 0x394   : >> { %v6811_v1 = vadd.f32 %v6810_v28, %v6809_v21  ;;  %v6990_v58 = vsel %vm6912_vm2, %v12361_v45, %v12365_v39  ;;  %v7015_v10 = vsel %vm6912_vm2, %v12371_v51, %v12367_v5  ;;  %v7022_v35 = vsel %vm6912_vm2, %v12373_v25, %v12369_v52  ;;  %v14380_v39 = vld [vmem:[#allocation179_spill] sm:$0xff]  ;;  %v14382_v5 = vld [vmem:[#allocation180_spill] sm:$0xff] }
 0x395   : >> { %v12453_v47 = vsel %vm6914_vm3, %v12135_v13, %v6913_v38  ;;  %v12457_v30 = vsel %vm6914_vm3, %v12137_v34, %v6926_v56  ;;  %v12461_v28 = vsel %vm6914_vm3, %v12139_v29, %v6951_v63  ;;  %v7047_v4 = vsel %vm6912_vm2, %v6178_v50, %v6166_v46  ;;  %v14384_v51 = vld [vmem:[#allocation63_spill] sm:$0xff]  ;;  %v14396_v50 = vld [vmem:[#allocation69_spill] sm:$0xff] }
 0x396   : >> { %14373 = vst [vmem:[#allocation137_spill] sm:$0xff] %v12453_v47  ;;  %v12466_v8 = vsel %vm6914_vm3, %v12141_v41, %v6958_v16  ;;  %v12470_v59 = vsel %vm6914_vm3, %v12169_v33, %v6983_v2  ;;  %v7054_v13 = vsel %vm6912_vm2, %v6184_v53, %v6172_v31  ;;  %v9941_v45 = vunpack.i.h.bf16 %v9939_v22  ;;  %v14401_v23 = vld [vmem:[#allocation123_spill] sm:$0xff]  ;;  %v14407_v56 = vld [vmem:[#allocation41_spill] sm:$0xff] }
 0x397   : >> { %14374 = vst [vmem:[#allocation138_spill] sm:$0xff] %v12457_v30  ;;  %v12475_v34 = vsel %vm6914_vm3, %v14378_v7, %v6990_v58  ;;  %v12479_v29 = vsel %vm6914_vm3, %v14380_v39, %v7015_v10  ;;  %v12483_v52 = vsel %vm6914_vm3, %v14382_v5, %v7022_v35  ;;  %v7079_v41 = vsel %vm6912_vm2, %v6391_v19, %v6379_v36  ;;  %v14400_v19 = vld [vmem:[#allocation39_spill] sm:$0xff]  ;;  %v14413_v7 = vld [vmem:[#allocation44_spill] sm:$0xff]  ;;  %v14414_v39 = vld [vmem:[#allocation93_spill] sm:$0xff] }
 0x398   : >> { %14375 = vst [vmem:[#allocation139_spill] sm:$0xff] %v12461_v28  ;;  %v12488_v33 = vsel %vm6914_vm3, %v14384_v51, %v7047_v4  ;;  %v7086_v25 = vsel %vm6912_vm2, %v6397_v54, %v6385_v62  ;;  %v7111_v17 = vsel %vm6912_vm2, %v6604_v12, %v6592_v55  ;;  %v7118_v61 = vsel %vm6912_vm2, %v6610_v9, %v6598_v26  ;;  %v14403_v62 = vld [vmem:[#allocation124_spill] sm:$0xff]  ;;  %v14409_v16 = vld [vmem:[#allocation43_spill] sm:$0xff] }
 0x399   : >> { %14376 = vst [vmem:[#allocation140_spill] sm:$0xff] %v12466_v8  ;;  %v12495_v42 = vsel %vm6914_vm3, %v14386_v11, %v7054_v13  ;;  %v7143_v37 = vsel %vm6912_vm2, %v6817_v27, %v6805_v48  ;;  %v7150_v3 = vsel %vm6912_vm2, %v6823_v18, %v6811_v1  ;;  %v5200_v14 = vmul.f32 %v9941_v45, %v14388_v43  ;;  %v14405_v26 = vld [vmem:[#allocation40_spill] sm:$0xff]  ;;  %v14406_v27 = vld [vmem:[#allocation89_spill] sm:$0xff]  ;;  %v14408_v48 = vld [vmem:[#allocation42_spill] sm:$0xff] }
 0x39a   : >> { %14377 = vst [vmem:[#allocation125_spill] sm:$0xff] %v12470_v59  ;;  %v12502_v24 = vsel %vm6914_vm3, %v14389_v15, %v7079_v41  ;;  %v5201_v21 = vmul.f32 %v9941_v45, %v14391_v20  ;;  %v5445_v55 = vmul.f32 %v9941_v45, %v14392_v49  ;;  %v5446_v44 = vmul.f32 %v9941_v45, %v14393_v6  ;;  %v14410_v1 = vld [vmem:[#allocation90_spill] sm:$0xff]  ;;  %v14411_v10 = vld [vmem:[#allocation91_spill] sm:$0xff]  ;;  %v14412_v4 = vld [vmem:[#allocation92_spill] sm:$0xff] }
 0x39b   : >> { %14379 = vst [vmem:[#allocation126_spill] sm:$0xff] %v12475_v34  ;;  %v12509_v46 = vsel %vm6914_vm3, %v14394_v0, %v7086_v25  ;;  %v12513_v53 = vsel %vm6914_vm3, %v14396_v50, %v7111_v17  ;;  %v12517_v31 = vsel %vm6914_vm3, %v14398_v57, %v7118_v61  ;;  %v5658_v60 = vmul.f32 %v9941_v45, %v14400_v19  ;;  %v14415_v41 = vld [vmem:[#allocation45_spill] sm:$0xff]  ;;  %v14416_v25 = vld [vmem:[#allocation46_spill] sm:$0xff]  ;;  %v14417_v61 = vld [vmem:[#allocation47_spill] sm:$0xff] }
 0x39c   : >> { %14381 = vst [vmem:[#allocation51_spill] sm:$0xff] %v12479_v29  ;;  %v12522_v36 = vsel %vm6914_vm3, %v14401_v23, %v7143_v37  ;;  %v12526_v54 = vsel %vm6914_vm3, %v14403_v62, %v7150_v3  ;;  %v5659_v12 = vmul.f32 %v9941_v45, %v14405_v26  ;;  %v9940_v9 = vunpack.i.l.bf16 %v9939_v22  ;;  %v14418_v37 = vld [vmem:[#allocation94_spill] sm:$0xff]  ;;  %v14422_v50 = vld [vmem:[#allocation95_spill] sm:$0xff]  ;;  %v14424_v62 = vld [vmem:[#allocation97_spill] sm:$0xff] }
 0x39d   : >> { %14383 = vst [vmem:[#allocation52_spill] sm:$0xff] %v12483_v52  ;;  %v12530_v38 = vadd.f32 %v5200_v14, %v14406_v27  ;;  %v5871_v63 = vmul.f32 %v9941_v45, %v14407_v56  ;;  %v5872_v18 = vmul.f32 %v9941_v45, %v14408_v48  ;;  %v6084_v2 = vmul.f32 %v9941_v45, %v14409_v16  ;;  %v14419_v14 = vld [vmem:[#allocation48_spill] sm:$0xff] }
 0x39e   : >> { %14385 = vst [vmem:[#allocation127_spill] sm:$0xff] %v12488_v33  ;;  %v12536_v58 = vadd.f32 %v5201_v21, %v14410_v1  ;;  %v12539_v35 = vadd.f32 %v5445_v55, %v14411_v10  ;;  %v12542_v13 = vadd.f32 %v5446_v44, %v14412_v4  ;;  %v6085_v22 = vmul.f32 %v9941_v45, %v14413_v7  ;;  %v14420_v21 = vld [vmem:[#allocation49_spill] sm:$0xff]  ;;  %v14421_v44 = vld [vmem:[#allocation50_spill] sm:$0xff]  ;;  %v14462_v52 = vld [vmem:[#allocation72_spill] sm:$0xff] }
 0x39f   : >> { %14387 = vst [vmem:[#allocation128_spill] sm:$0xff] %v12495_v42  ;;  %v12546_v5 = vadd.f32 %v5658_v60, %v14414_v39  ;;  %v6297_v51 = vmul.f32 %v9941_v45, %v14415_v41  ;;  %v6298_v17 = vmul.f32 %v9941_v45, %v14416_v25  ;;  %v6510_v11 = vmul.f32 %v9941_v45, %v14417_v61  ;;  %v14423_v60 = vld [vmem:[#allocation96_spill] sm:$0xff]  ;;  %v14425_v10 = vld [vmem:[#allocation98_spill] sm:$0xff]  ;;  %v14461_v42 = vld [vmem:[#allocation71_spill] sm:$0xff] }
 0x3a0   : >> { %14390 = vst [vmem:[#allocation53_spill] sm:$0xff] %v12502_v24  ;;  %v12552_v3 = vadd.f32 %v5659_v12, %v14418_v37  ;;  %v6511_v15 = vmul.f32 %v9941_v45, %v14419_v14  ;;  %v6723_v55 = vmul.f32 %v9941_v45, %v14420_v21  ;;  %v6724_v0 = vmul.f32 %v9941_v45, %v14421_v44  ;;  %v14426_v37 = vld [vmem:[#allocation99_spill] sm:$0xff] }
 0x3a1   : >> { %14395 = vst [vmem:[#allocation54_spill] sm:$0xff] %v12509_v46  ;;  %v12558_v57 = vadd.f32 %v5871_v63, %v14422_v50  ;;  %v12561_v23 = vadd.f32 %v5872_v18, %v14423_v60  ;;  %v12564_v27 = vadd.f32 %v6084_v2, %v14424_v62  ;;  %v5198_v1 = vmul.f32 %v9940_v9, %v14388_v43  ;;  %v14427_v50 = vld [vmem:[#allocation100_spill] sm:$0xff]  ;;  %v14428_v60 = vld [vmem:[#allocation101_spill] sm:$0xff]  ;;  %v14430_v43 = vld [vmem:[#allocation102_spill] sm:$0xff] }
 0x3a2   : >> { %14397 = vst [vmem:[#allocation129_spill] sm:$0xff] %v12513_v53  ;;  %v12568_v12 = vadd.f32 %v6085_v22, %v14425_v10  ;;  %v5199_v4 = vmul.f32 %v9940_v9, %v14391_v20  ;;  %v5443_v39 = vmul.f32 %v9940_v9, %v14392_v49  ;;  %v5444_v45 = vmul.f32 %v9940_v9, %v14393_v6  ;;  %v14432_v10 = vld [vmem:[#allocation103_spill] sm:$0xff]  ;;  %v14434_v49 = vld [vmem:[#allocation104_spill] sm:$0xff]  ;;  %v14454_v53 = vld [vmem:[#allocation118_spill] sm:$0xff] }
 0x3a3   : >> { %14399 = vst [vmem:[#allocation130_spill] sm:$0xff] %v12517_v31  ;;  %v12574_v63 = vadd.f32 %v6297_v51, %v14426_v37  ;;  %v12577_v18 = vadd.f32 %v6298_v17, %v14427_v50  ;;  %v12580_v2 = vadd.f32 %v6510_v11, %v14428_v60  ;;  %v5656_v62 = vmul.f32 %v9940_v9, %v14400_v19  ;;  %v14436_v37 = vld [vmem:[#allocation105_spill] sm:$0xff]  ;;  %v9962_v60 = vpop.permute.xlu2 %9961  ;;  %v14437_v19 = vld [vmem:[#allocation106_spill] sm:$0xff] }
 0x3a4   : >> { %14402 = vst [vmem:[#allocation55_spill] sm:$0xff] %v12522_v36  ;;  %v12584_v22 = vadd.f32 %v6511_v15, %v14430_v43  ;;  %v12587_v20 = vadd.f32 %v6723_v55, %v14432_v10  ;;  %v5657_v51 = vmul.f32 %v9940_v9, %v14405_v26  ;;  %v5214_v6 = vadd.f32 %v5198_v1, %v14436_v37  ;;  %v14438_v15 = vld [vmem:[#allocation107_spill] sm:$0xff]  ;;  %v14439_v55 = vld [vmem:[#allocation108_spill] sm:$0xff] }
 0x3a5   : >> { %14404 = vst [vmem:[#allocation56_spill] sm:$0xff] %v12526_v54  ;;  %v12590_v54 = vadd.f32 %v6724_v0, %v14434_v49  ;;  %v5869_v17 = vmul.f32 %v9940_v9, %v14407_v56  ;;  %v5870_v11 = vmul.f32 %v9940_v9, %v14408_v48  ;;  %v6082_v50 = vmul.f32 %v9940_v9, %v14409_v16  ;;  %v14440_v0 = vld [vmem:[#allocation109_spill] sm:$0xff] }
 0x3a6   : >> { %14429 = vst [vmem:[#allocation131_spill] sm:$0xff] %v12580_v2  ;;  %v5215_v43 = vadd.f32 %v5199_v4, %v14437_v19  ;;  %v5459_v36 = vadd.f32 %v5443_v39, %v14438_v15  ;;  %v5460_v10 = vadd.f32 %v5444_v45, %v14439_v55  ;;  %v6083_v49 = vmul.f32 %v9940_v9, %v14413_v7  ;;  %v14441_v39 = vld [vmem:[#allocation110_spill] sm:$0xff]  ;;  %v14442_v15 = vld [vmem:[#allocation111_spill] sm:$0xff]  ;;  %v14443_v55 = vld [vmem:[#allocation112_spill] sm:$0xff] }
 0x3a7   : >> { %14431 = vst [vmem:[#allocation132_spill] sm:$0xff] %v12584_v22  ;;  %v12602_v31 = vadd.f32 %v5656_v62, %v14440_v0  ;;  %v6295_v1 = vmul.f32 %v9940_v9, %v14415_v41  ;;  %v6296_v37 = vmul.f32 %v9940_v9, %v14416_v25  ;;  %v6508_v48 = vmul.f32 %v9940_v9, %v14417_v61  ;;  %v14444_v25 = vld [vmem:[#allocation113_spill] sm:$0xff]  ;;  %v14445_v61 = vld [vmem:[#allocation114_spill] sm:$0xff] }
 0x3a8   : >> { %14433 = vst [vmem:[#allocation57_spill] sm:$0xff] %v12587_v20  ;;  %v6509_v16 = vmul.f32 %v9940_v9, %v14419_v14  ;;  %v6721_v56 = vmul.f32 %v9940_v9, %v14420_v21  ;;  %v6722_v19 = vmul.f32 %v9940_v9, %v14421_v44  ;;  %v12610_v4 = vunpack.i.h.bf16 %v9962_v60  ;;  %v14446_v21 = vld [vmem:[#allocation141_spill] sm:$0xff]  ;;  %v14447_v44 = vld [vmem:[#allocation142_spill] sm:$0xff] }
 0x3a9   : >> { %14435 = vst [vmem:[#allocation58_spill] sm:$0xff] %v12590_v54  ;;  %v12613_v45 = vadd.f32 %v5657_v51, %v14441_v39  ;;  %v12616_v62 = vadd.f32 %v5869_v17, %v14442_v15  ;;  %v12619_v0 = vadd.f32 %v5870_v11, %v14443_v55  ;;  %v12622_v41 = vadd.f32 %v6082_v50, %v14444_v25  ;;  %v14448_v39 = vld [vmem:[#allocation115_spill] sm:$0xff]  ;;  %v14449_v15 = vld [vmem:[#allocation116_spill] sm:$0xff] }
 0x3aa   : >> { %v12625_v14 = vadd.f32 %v6083_v49, %v14445_v61  ;;  %v5271_v9 = vmul.f32 %v12610_v4, %v14446_v21  ;;  %v5272_v7 = vmul.f32 %v12610_v4, %v14447_v44  ;;  %v12631_v51 = vunpack.i.l.bf16 %v9962_v60  ;;  %v14450_v55 = vld [vmem:[#allocation143_spill] sm:$0xff]  ;;  %v14451_v50 = vld [vmem:[#allocation144_spill] sm:$0xff]  ;;  %v14452_v49 = vld [vmem:[#allocation117_spill] sm:$0xff] }
 0x3ab   : >> { %v12634_v17 = vadd.f32 %v6295_v1, %v14448_v39  ;;  %v12637_v11 = vadd.f32 %v6296_v37, %v14449_v15  ;;  %v5484_v25 = vmul.f32 %v12610_v4, %v14450_v55  ;;  %v5485_v61 = vmul.f32 %v12610_v4, %v14451_v50  ;;  %v14456_v60 = vld [vmem:[#allocation119_spill] sm:$0xff]  ;;  %v14458_v1 = vld [vmem:[#allocation120_spill] sm:$0xff]  ;;  %v14460_v37 = vld [vmem:[#allocation70_spill] sm:$0xff] }
 0x3ac   : >> { %v12644_v26 = vadd.f32 %v6508_v48, %v14452_v49  ;;  %v12647_v46 = vadd.f32 %v6509_v16, %v14454_v53  ;;  %v12650_v24 = vadd.f32 %v6721_v56, %v14456_v60  ;;  %v12653_v39 = vadd.f32 %v6722_v19, %v14458_v1  ;;  %v14463_v53 = vld [vmem:[#allocation73_spill] sm:$0xff] }
 0x3ad   : >> { %v12657_v15 = vmul.f32 %v12610_v4, %v14460_v37  ;;  %v12661_v33 = vmul.f32 %v12610_v4, %v14461_v42  ;;  %v12665_v48 = vmul.f32 %v12610_v4, %v14462_v52  ;;  %v12669_v16 = vmul.f32 %v12610_v4, %v14463_v53 }
 0x3ae   : >> { %14453 = vst [vmem:[#allocation133_spill] sm:$0xff] %v12644_v26  ;;  %v5269_v56 = vmul.f32 %v12631_v51, %v14446_v21  ;;  %v5270_v19 = vmul.f32 %v12631_v51, %v14447_v44  ;;  %v5287_v49 = vadd.f32 %v5271_v9, %v12530_v38  ;;  %v5288_v60 = vadd.f32 %v5272_v7, %v12536_v58 }
 0x3af   : >> { %14455 = vst [vmem:[#allocation134_spill] sm:$0xff] %v12647_v46  ;;  %v5482_v1 = vmul.f32 %v12631_v51, %v14450_v55  ;;  %v5483_v29 = vmul.f32 %v12631_v51, %v14451_v50  ;;  %v5500_v34 = vadd.f32 %v5484_v25, %v12539_v35  ;;  %v5501_v59 = vadd.f32 %v5485_v61, %v12542_v13 }
 0x3b0   : >> { %14457 = vst [vmem:[#allocation59_spill] sm:$0xff] %v12650_v24  ;;  %v5285_v8 = vadd.f32 %v5269_v56, %v5214_v6  ;;  %v5286_v28 = vadd.f32 %v5270_v19, %v5215_v43  ;;  %v5303_v21 = vmax.f32 %v5287_v49, 0.0  ;;  %v5304_v30 = vmax.f32 %v5288_v60, 0.0 }
 0x3b1   : >> { %14459 = vst [vmem:[#allocation60_spill] sm:$0xff] %v12653_v39  ;;  %v5498_v47 = vadd.f32 %v5482_v1, %v5459_v36  ;;  %v5499_v44 = vadd.f32 %v5483_v29, %v5460_v10  ;;  %v5516_v39 = vmax.f32 %v5500_v34, 0.0  ;;  %v5517_v38 = vmax.f32 %v5501_v59, 0.0 }
 0x3b2   : >> { %v5301_v9 = vmax.f32 %v5285_v8, 0.0  ;;  %v5302_v58 = vmax.f32 %v5286_v28, 0.0  ;;  %v5369_v7 = vrot.slane %v5303_v21, 4  ;;  %v5375_v24 = vrot.slane %v5304_v30, 4 }
 0x3b3   : >> { %v5514_v55 = vmax.f32 %v5498_v47, 0.0  ;;  %v5515_v54 = vmax.f32 %v5499_v44, 0.0  ;;  %v5582_v20 = vrot.slane %v5516_v39, 4  ;;  %v5588_v50 = vrot.slane %v5517_v38, 4 }
 0x3b4   : >> { %v5357_v46 = vrot.slane %v5301_v9, 4  ;;  %v5363_v35 = vrot.slane %v5302_v58, 4  ;;  %v5370_v25 = vadd.f32 %v5369_v7, %v5303_v21  ;;  %v5376_v13 = vadd.f32 %v5375_v24, %v5304_v30 }
 0x3b5   : >> { %v5570_v6 = vrot.slane %v5514_v55, 4  ;;  %v5576_v43 = vrot.slane %v5515_v54, 4  ;;  %v5583_v61 = vadd.f32 %v5582_v20, %v5516_v39  ;;  %v5589_v56 = vadd.f32 %v5588_v50, %v5517_v38  ;;  %v14464_v39 = vld [vmem:[#allocation74_spill] sm:$0xff]  ;;  %v14465_v38 = vld [vmem:[#allocation75_spill] sm:$0xff] }
 0x3b6   : >> { %v5358_v36 = vadd.f32 %v5357_v46, %v5301_v9  ;;  %v5364_v29 = vadd.f32 %v5363_v35, %v5302_v58  ;;  %v5371_v34 = vrot.slane %v5370_v25, 2  ;;  %v5377_v59 = vrot.slane %v5376_v13, 2  ;;  %v14466_v35 = vld [vmem:[#allocation76_spill] sm:$0xff] }
 0x3b7   : >> { %v5571_v8 = vadd.f32 %v5570_v6, %v5514_v55  ;;  %v5577_v28 = vadd.f32 %v5576_v43, %v5515_v54  ;;  %v5584_v10 = vrot.slane %v5583_v61, 2  ;;  %v5590_v19 = vrot.slane %v5589_v56, 2  ;;  %v14470_v43 = vld [vmem:[#allocation78_spill] sm:$0xff] }
 0x3b8   : >> { %v5359_v47 = vrot.slane %v5358_v36, 2  ;;  %v5365_v44 = vrot.slane %v5364_v29, 2  ;;  %v12683_v49 = vadd.f32 %v5371_v34, %v5370_v25  ;;  %v12685_v60 = vadd.f32 %v5377_v59, %v5376_v13  ;;  %v14468_v13 = vld [vmem:[#allocation77_spill] sm:$0xff] }
 0x3b9   : >> { %v5572_v21 = vrot.slane %v5571_v8, 2  ;;  %v5578_v30 = vrot.slane %v5577_v28, 2  ;;  %v12687_v24 = vadd.f32 %v5584_v10, %v5583_v61  ;;  %v12689_v20 = vadd.f32 %v5590_v19, %v5589_v56  ;;  %v14472_v56 = vld [vmem:[#allocation79_spill] sm:$0xff] }
 0x3ba   : >> { %v12693_v46 = vmul.f32 %v12610_v4, %v12055_v32  ;;  %v12697_v54 = vmul.f32 %v12610_v4, %v12057_v40  ;;  %v12699_v55 = vadd.f32 %v5359_v47, %v5358_v36  ;;  %v12701_v50 = vadd.f32 %v5365_v44, %v5364_v29 }
 0x3bb   : >> { %v12705_v1 = vmul.f32 %v12610_v4, %v14464_v39  ;;  %v12709_v9 = vmul.f32 %v12610_v4, %v14465_v38  ;;  %v12711_v58 = vadd.f32 %v5572_v21, %v5571_v8  ;;  %v12713_v7 = vadd.f32 %v5578_v30, %v5577_v28 }
 0x3bc   : >> { %v12717_v25 = vmul.f32 %v12610_v4, %v14466_v35  ;;  %v12721_v6 = vmul.f32 %v12610_v4, %v14468_v13  ;;  %v12725_v61 = vmul.f32 %v12610_v4, %v14470_v43  ;;  %v12729_v36 = vmul.f32 %v12610_v4, %v14472_v56 }
 0x3bd   : >> { %v5373_v29 = vrot.slane %v12683_v49, 1  ;;  %v5379_v34 = vrot.slane %v12685_v60, 1  ;;  %v5586_v59 = vrot.slane %v12687_v24, 1  ;;  %v5592_v8 = vrot.slane %v12689_v20, 1 }
 0x3be   : >> { %14467 = vst [vmem:[#allocation135_spill] sm:$0xff] %v12717_v25  ;;  %v5361_v28 = vrot.slane %v12699_v55, 1  ;;  %v5367_v10 = vrot.slane %v12701_v50, 1  ;;  %v5695_v19 = vmul.f32 %v12631_v51, %v14460_v37  ;;  %v5696_v47 = vmul.f32 %v12631_v51, %v14461_v42 }
 0x3bf   : >> { %14469 = vst [vmem:[#allocation136_spill] sm:$0xff] %v12721_v6  ;;  %v5574_v4 = vrot.slane %v12711_v58, 1  ;;  %v5580_v44 = vrot.slane %v12713_v7, 1  ;;  %v5713_v21 = vadd.f32 %v12657_v15, %v12546_v5  ;;  %v5714_v30 = vadd.f32 %v12661_v33, %v12552_v3 }
 0x3c0   : >> { %14471 = vst [vmem:[#allocation61_spill] sm:$0xff] %v12725_v61  ;;  %v5712_v61 = vadd.f32 %v5696_v47, %v12613_v45  ;;  %v5908_v37 = vmul.f32 %v12631_v51, %v14462_v52  ;;  %v5909_v42 = vmul.f32 %v12631_v51, %v14463_v53  ;;  %v5926_v26 = vadd.f32 %v12665_v48, %v12558_v57 }
 0x3c1   : >> { %14473 = vst [vmem:[#allocation62_spill] sm:$0xff] %v12729_v36  ;;  %v5711_v36 = vadd.f32 %v5695_v19, %v12602_v31  ;;  %v5729_v56 = vmax.f32 %v5713_v21, 0.0  ;;  %v5730_v43 = vmax.f32 %v5714_v30, 0.0  ;;  %v5927_v5 = vadd.f32 %v12669_v16, %v12561_v23 }
 0x3c2   : >> { %v5728_v33 = vmax.f32 %v5712_v61, 0.0  ;;  %v5924_v31 = vadd.f32 %v5908_v37, %v12616_v62  ;;  %v5925_v3 = vadd.f32 %v5909_v42, %v12619_v0  ;;  %v5942_v47 = vmax.f32 %v5926_v26, 0.0 }
 0x3c3   : >> { %v5727_v15 = vmax.f32 %v5711_v36, 0.0  ;;  %v5795_v45 = vrot.slane %v5729_v56, 4  ;;  %v5801_v19 = vrot.slane %v5730_v43, 4  ;;  %v5943_v52 = vmax.f32 %v5927_v5, 0.0 }
 0x3c4   : >> { %v5789_v53 = vrot.slane %v5728_v33, 4  ;;  %v5940_v21 = vmax.f32 %v5924_v31, 0.0  ;;  %v5941_v30 = vmax.f32 %v5925_v3, 0.0  ;;  %v6008_v57 = vrot.slane %v5942_v47, 4 }
 0x3c5   : >> { %v5783_v6 = vrot.slane %v5727_v15, 4  ;;  %v5796_v22 = vadd.f32 %v5795_v45, %v5729_v56  ;;  %v5802_v25 = vadd.f32 %v5801_v19, %v5730_v43  ;;  %v6014_v48 = vrot.slane %v5943_v52, 4 }
 0x3c6   : >> { %v5790_v23 = vadd.f32 %v5789_v53, %v5728_v33  ;;  %v5996_v16 = vrot.slane %v5940_v21, 4  ;;  %v6002_v61 = vrot.slane %v5941_v30, 4  ;;  %v6009_v37 = vadd.f32 %v6008_v57, %v5942_v47 }
 0x3c7   : >> { %v5784_v2 = vadd.f32 %v5783_v6, %v5727_v15  ;;  %v5797_v36 = vrot.slane %v5796_v22, 2  ;;  %v5803_v62 = vrot.slane %v5802_v25, 2  ;;  %v6015_v42 = vadd.f32 %v6014_v48, %v5943_v52 }
 0x3c8   : >> { %v5791_v13 = vrot.slane %v5790_v23, 2  ;;  %v5997_v26 = vadd.f32 %v5996_v16, %v5940_v21  ;;  %v6003_v5 = vadd.f32 %v6002_v61, %v5941_v30  ;;  %v6010_v56 = vrot.slane %v6009_v37, 2 }
 0x3c9   : >> { %v5785_v0 = vrot.slane %v5784_v2, 2  ;;  %v12759_v35 = vadd.f32 %v5797_v36, %v5796_v22  ;;  %v12761_v31 = vadd.f32 %v5803_v62, %v5802_v25  ;;  %v6016_v43 = vrot.slane %v6015_v42, 2 }
 0x3ca   : >> { %v12765_v6 = vadd.f32 %v5791_v13, %v5790_v23  ;;  %v5998_v53 = vrot.slane %v5997_v26, 2  ;;  %v6004_v15 = vrot.slane %v6003_v5, 2  ;;  %v12768_v33 = vadd.f32 %v5373_v29, %v12683_v49 }
 0x3cb   : >> { %v12763_v3 = vadd.f32 %v5785_v0, %v5784_v2  ;;  %v12771_v52 = vadd.f32 %v5379_v34, %v12685_v60  ;;  %v12773_v45 = vadd.f32 %v6010_v56, %v6009_v37  ;;  %v12775_v22 = vadd.f32 %v6016_v43, %v6015_v42 }
 0x3cc   : >> { %v12778_v25 = vadd.f32 %v5586_v59, %v12687_v24  ;;  %v12781_v2 = vadd.f32 %v5592_v8, %v12689_v20  ;;  %v12783_v13 = vadd.f32 %v5998_v53, %v5997_v26  ;;  %v12785_v19 = vadd.f32 %v6004_v15, %v6003_v5 }
 0x3cd   : >> { %v12788_v49 = vadd.f32 %v5361_v28, %v12699_v55  ;;  %v12791_v60 = vadd.f32 %v5367_v10, %v12701_v50  ;;  %v12794_v29 = vadd.f32 %v5574_v4, %v12711_v58  ;;  %v12797_v34 = vadd.f32 %v5580_v44, %v12713_v7 }
 0x3ce   : >> { %v5787_v24 = vrot.slane %v12763_v3, 1  ;;  %v5793_v20 = vrot.slane %v12765_v6, 1  ;;  %v5799_v59 = vrot.slane %v12759_v35, 1  ;;  %v5805_v8 = vrot.slane %v12761_v31, 1 }
 0x3cf   : >> { %v6012_v55 = vrot.slane %v12773_v45, 1  ;;  %v6018_v28 = vrot.slane %v12775_v22, 1  ;;  %v6121_v50 = vmul.f32 %v12631_v51, %v12055_v32  ;;  %v6122_v58 = vmul.f32 %v12631_v51, %v12057_v40 }
 0x3d0   : >> { %v6000_v7 = vrot.slane %v12783_v13, 1  ;;  %v6006_v10 = vrot.slane %v12785_v19, 1  ;;  %v6139_v4 = vadd.f32 %v12693_v46, %v12564_v27  ;;  %v6140_v44 = vadd.f32 %v12697_v54, %v12568_v12 }
 0x3d1   : >> { %v6137_v47 = vadd.f32 %v6121_v50, %v12622_v41  ;;  %v6138_v21 = vadd.f32 %v6122_v58, %v12625_v14  ;;  %v6334_v30 = vmul.f32 %v12631_v51, %v14464_v39  ;;  %v6335_v57 = vmul.f32 %v12631_v51, %v14465_v38 }
 0x3d2   : >> { %v6155_v48 = vmax.f32 %v6139_v4, 0.0  ;;  %v6156_v23 = vmax.f32 %v6140_v44, 0.0  ;;  %v6352_v16 = vadd.f32 %v12705_v1, %v12574_v63  ;;  %v6353_v27 = vadd.f32 %v12709_v9, %v12577_v18 }
 0x3d3   : >> { %v6153_v46 = vmax.f32 %v6137_v47, 0.0  ;;  %v6154_v12 = vmax.f32 %v6138_v21, 0.0  ;;  %v6350_v41 = vadd.f32 %v6334_v30, %v12634_v17  ;;  %v6351_v14 = vadd.f32 %v6335_v57, %v12637_v11 }
 0x3d4   : >> { %v6221_v54 = vrot.slane %v6155_v48, 4  ;;  %v6227_v61 = vrot.slane %v6156_v23, 4  ;;  %v6368_v36 = vmax.f32 %v6352_v16, 0.0  ;;  %v6369_v62 = vmax.f32 %v6353_v27, 0.0 }
 0x3d5   : >> { %v6209_v37 = vrot.slane %v6153_v46, 4  ;;  %v6215_v42 = vrot.slane %v6154_v12, 4  ;;  %v6366_v0 = vmax.f32 %v6350_v41, 0.0  ;;  %v6367_v26 = vmax.f32 %v6351_v14, 0.0 }
 0x3d6   : >> { %v6222_v5 = vadd.f32 %v6221_v54, %v6155_v48  ;;  %v6228_v56 = vadd.f32 %v6227_v61, %v6156_v23  ;;  %v6434_v63 = vrot.slane %v6368_v36, 4  ;;  %v6440_v1 = vrot.slane %v6369_v62, 4 }
 0x3d7   : >> { %v6210_v43 = vadd.f32 %v6209_v37, %v6153_v46  ;;  %v6216_v18 = vadd.f32 %v6215_v42, %v6154_v12  ;;  %v6422_v9 = vrot.slane %v6366_v0, 4  ;;  %v6428_v53 = vrot.slane %v6367_v26, 4 }
 0x3d8   : >> { %v6223_v15 = vrot.slane %v6222_v5, 2  ;;  %v6229_v17 = vrot.slane %v6228_v56, 2  ;;  %v6435_v50 = vadd.f32 %v6434_v63, %v6368_v36  ;;  %v6441_v11 = vadd.f32 %v6440_v1, %v6369_v62  ;;  %v14480_v1 = vld [vmem:[#allocation133_spill] sm:$0xff] }
 0x3d9   : >> { %v6211_v58 = vrot.slane %v6210_v43, 2  ;;  %v6217_v4 = vrot.slane %v6216_v18, 2  ;;  %v6423_v44 = vadd.f32 %v6422_v9, %v6366_v0  ;;  %v6429_v47 = vadd.f32 %v6428_v53, %v6367_v26  ;;  %v14477_v0 = vld [vmem:[#allocation135_spill] sm:$0xff]  ;;  %v14482_v53 = vld [vmem:[#allocation78_spill] sm:$0xff] }
 0x3da   : >> { %v6224_v21 = vadd.f32 %v6223_v15, %v6222_v5  ;;  %v12827_v30 = vadd.f32 %v6229_v17, %v6228_v56  ;;  %v6436_v57 = vrot.slane %v6435_v50, 2  ;;  %v6442_v48 = vrot.slane %v6441_v11, 2  ;;  %v14478_v5 = vld [vmem:[#allocation132_spill] sm:$0xff]  ;;  %v14483_v17 = vld [vmem:[#allocation79_spill] sm:$0xff] }
 0x3db   : >> { %v12829_v23 = vadd.f32 %v6211_v58, %v6210_v43  ;;  %v12831_v16 = vadd.f32 %v6217_v4, %v6216_v18  ;;  %v6424_v27 = vrot.slane %v6423_v44, 2  ;;  %v6430_v46 = vrot.slane %v6429_v47, 2  ;;  %v14479_v56 = vld [vmem:[#allocation136_spill] sm:$0xff]  ;;  %v14481_v18 = vld [vmem:[#allocation134_spill] sm:$0xff]  ;;  %v14484_v4 = vld [vmem:[#allocation57_spill] sm:$0xff] }
 0x3dc   : >> { %v12834_v12 = vadd.f32 %v5799_v59, %v12759_v35  ;;  %v12837_v41 = vadd.f32 %v5805_v8, %v12761_v31  ;;  %v6225_v14 = vrot.slane %v6224_v21, 1  ;;  %v12839_v54 = vadd.f32 %v6436_v57, %v6435_v50  ;;  %v14487_v57 = vld [vmem:[#allocation62_spill] sm:$0xff] }
 0x3dd   : >> { %v12842_v61 = vadd.f32 %v5787_v24, %v12763_v3  ;;  %v12845_v36 = vadd.f32 %v5793_v20, %v12765_v6  ;;  %v12847_v62 = vadd.f32 %v6424_v27, %v6423_v44  ;;  %v12849_v37 = vadd.f32 %v6442_v48, %v6441_v11  ;;  %v14485_v44 = vld [vmem:[#allocation61_spill] sm:$0xff] }
 0x3de   : >> { %v12852_v42 = vadd.f32 %v6000_v7, %v12783_v13  ;;  %v12855_v35 = vadd.f32 %v6006_v10, %v12785_v19  ;;  %v12858_v31 = vadd.f32 %v6012_v55, %v12773_v45  ;;  %v12861_v59 = vadd.f32 %v6018_v28, %v12775_v22  ;;  %v14474_v19 = vld [vmem:[#allocation76_spill] sm:$0xff]  ;;  %v14475_v45 = vld [vmem:[#allocation77_spill] sm:$0xff]  ;;  %v14476_v10 = vld [vmem:[#allocation131_spill] sm:$0xff] }
 0x3df   : >> { %v6231_v24 = vrot.slane %v12827_v30, 1  ;;  %v12866_v20 = vadd.f32 %v6430_v46, %v6429_v47  ;;  %v12868_v8 = vadd.f32 %v6225_v14, %v6224_v21  ;;  %v6547_v7 = vmul.f32 %v12631_v51, %v14474_v19  ;;  %v14486_v21 = vld [vmem:[#allocation58_spill] sm:$0xff]  ;;  %v14488_v14 = vld [vmem:[#allocation59_spill] sm:$0xff] }
 0x3e0   : >> { %v6548_v55 = vmul.f32 %v12631_v51, %v14475_v45  ;;  %v6565_v26 = vadd.f32 %v14477_v0, %v14476_v10  ;;  %v6566_v63 = vadd.f32 %v14479_v56, %v14478_v5  ;;  %v6760_v15 = vmul.f32 %v12631_v51, %v14482_v53  ;;  %v14489_v10 = vld [vmem:[#allocation60_spill] sm:$0xff] }
 0x3e1   : >> { %v6563_v43 = vadd.f32 %v6547_v7, %v14480_v1  ;;  %v6761_v50 = vmul.f32 %v12631_v51, %v14483_v17  ;;  %v6778_v47 = vadd.f32 %v14485_v44, %v14484_v4  ;;  %v6779_v48 = vadd.f32 %v14487_v57, %v14486_v21  ;;  %v14502_v17 = vld [vmem:[#allocation87_spill] sm:$0xff] }
 0x3e2   : >> { %v6564_v9 = vadd.f32 %v6548_v55, %v14481_v18  ;;  %v6581_v11 = vmax.f32 %v6565_v26, 0.0  ;;  %v6582_v58 = vmax.f32 %v6566_v63, 0.0  ;;  %v6776_v7 = vadd.f32 %v6760_v15, %v14488_v14 }
 0x3e3   : >> { %v6579_v27 = vmax.f32 %v6563_v43, 0.0  ;;  %v6777_v55 = vadd.f32 %v6761_v50, %v14489_v10  ;;  %v6794_v56 = vmax.f32 %v6778_v47, 0.0  ;;  %v6795_v1 = vmax.f32 %v6779_v48, 0.0 }
 0x3e4   : >> { %v6580_v46 = vmax.f32 %v6564_v9, 0.0  ;;  %v6647_v0 = vrot.slane %v6581_v11, 4  ;;  %v6653_v5 = vrot.slane %v6582_v58, 4  ;;  %v6792_v63 = vmax.f32 %v6776_v7, 0.0 }
 0x3e5   : >> { %v6635_v51 = vrot.slane %v6579_v27, 4  ;;  %v6793_v18 = vmax.f32 %v6777_v55, 0.0  ;;  %v6860_v44 = vrot.slane %v6794_v56, 4  ;;  %v6866_v13 = vrot.slane %v6795_v1, 4 }
 0x3e6   : >> { %v6641_v26 = vrot.slane %v6580_v46, 4  ;;  %v6648_v28 = vadd.f32 %v6647_v0, %v6581_v11  ;;  %v6654_v4 = vadd.f32 %v6653_v5, %v6582_v58  ;;  %v6848_v9 = vrot.slane %v6792_v63, 4 }
 0x3e7   : >> { %v6636_v21 = vadd.f32 %v6635_v51, %v6579_v27  ;;  %v6854_v57 = vrot.slane %v6793_v18, 4  ;;  %v6861_v14 = vadd.f32 %v6860_v44, %v6794_v56  ;;  %v6867_v10 = vadd.f32 %v6866_v13, %v6795_v1 }
 0x3e8   : >> { %v6642_v43 = vadd.f32 %v6641_v26, %v6580_v46  ;;  %v6649_v15 = vrot.slane %v6648_v28, 2  ;;  %v6655_v50 = vrot.slane %v6654_v4, 2  ;;  %v6849_v22 = vadd.f32 %v6848_v9, %v6792_v63 }
 0x3e9   : >> { %v6637_v47 = vrot.slane %v6636_v21, 2  ;;  %v6855_v6 = vadd.f32 %v6854_v57, %v6793_v18  ;;  %v6862_v55 = vrot.slane %v6861_v14, 2  ;;  %v6868_v11 = vrot.slane %v6867_v10, 2 }
 0x3ea   : >> { %v6643_v48 = vrot.slane %v6642_v43, 2  ;;  %v6650_v3 = vadd.f32 %v6649_v15, %v6648_v28  ;;  %v6656_v7 = vadd.f32 %v6655_v50, %v6654_v4  ;;  %v6850_v27 = vrot.slane %v6849_v22, 2 }
 0x3eb   : >> { %v6638_v58 = vadd.f32 %v6637_v47, %v6636_v21  ;;  %v6856_v46 = vrot.slane %v6855_v6, 2  ;;  %v12894_v5 = vadd.f32 %v6231_v24, %v12827_v30  ;;  %v6432_v51 = vrot.slane %v12866_v20, 1  ;;  %v14496_v47 = vld [vmem:[#allocation84_spill] sm:$0xff] }
 0x3ec   : >> { %v6644_v0 = vadd.f32 %v6643_v48, %v6642_v43  ;;  %v6863_v56 = vadd.f32 %v6862_v55, %v6861_v14  ;;  %v6869_v13 = vadd.f32 %v6868_v11, %v6867_v10  ;;  %v6651_v1 = vrot.slane %v6650_v3, 1  ;;  %v14495_v10 = vld [vmem:[#allocation137_spill] sm:$0xff]  ;;  %v14497_v48 = vld [vmem:[#allocation138_spill] sm:$0xff] }
 0x3ed   : >> { %v6657_v26 = vrot.slane %v6656_v7, 1  ;;  %v6851_v63 = vadd.f32 %v6850_v27, %v6849_v22  ;;  %v6857_v18 = vadd.f32 %v6856_v46, %v6855_v6  ;;  %v14490_v28 = vrot.slane %v12829_v23, 1  ;;  %v14498_v55 = vld [vmem:[#allocation85_spill] sm:$0xff] }
 0x3ee   : >> { %v14491_v44 = vrot.slane %v12831_v16, 1  ;;  %v6639_v43 = vrot.slane %v6638_v58, 1  ;;  %v6645_v9 = vrot.slane %v6644_v0, 1  ;;  %v14492_v30 = vrot.slane %v12847_v62, 1 }
 0x3ef   : >> { %v6214_v4 = vadd.f32 %v14490_v28, %v12829_v23  ;;  %v14493_v57 = vrot.slane %v12839_v54, 1  ;;  %v14494_v6 = vrot.slane %v12849_v37, 1  ;;  %v6864_v50 = vrot.slane %v6863_v56, 1 }
 0x3f0   : >> { %v6220_v21 = vadd.f32 %v14491_v44, %v12831_v16  ;;  %v6427_v24 = vadd.f32 %v14492_v30, %v12847_v62  ;;  %v6852_v23 = vrot.slane %v6851_v63, 1  ;;  %v6870_v14 = vrot.slane %v6869_v13, 1  ;;  %v14499_v30 = vld [vmem:[#allocation139_spill] sm:$0xff] }
 0x3f1   : >> { %v6439_v15 = vadd.f32 %v14493_v57, %v12839_v54  ;;  %v6445_v22 = vadd.f32 %v14494_v6, %v12849_v37  ;;  %v6917_v16 = vsel %vm6916_vm4, %v14496_v47, %v14495_v10  ;;  %v6928_v11 = vsel %vm6916_vm4, %v14498_v55, %v14497_v48  ;;  %v14500_v37 = vld [vmem:[#allocation86_spill] sm:$0xff]  ;;  %v14501_v6 = vld [vmem:[#allocation140_spill] sm:$0xff]  ;;  %v14508_v48 = vld [vmem:[#allocation181_spill] sm:$0xff] }
 0x3f2   : >> { %v6433_v62 = vadd.f32 %v6432_v51, %v12866_v20  ;;  %v6652_v27 = vadd.f32 %v6651_v1, %v6650_v3  ;;  %v6658_v46 = vadd.f32 %v6657_v26, %v6656_v7  ;;  %v6858_v54 = vrot.slane %v6857_v18, 1  ;;  %v14503_v20 = vld [vmem:[#allocation125_spill] sm:$0xff]  ;;  %v14504_v3 = vld [vmem:[#allocation88_spill] sm:$0xff] }
 0x3f3   : >> { %v6640_v28 = vadd.f32 %v6639_v43, %v6638_v58  ;;  %v6646_v44 = vadd.f32 %v6645_v9, %v6644_v0  ;;  %v6953_v57 = vsel %vm6916_vm4, %v14500_v37, %v14499_v30  ;;  %v6960_v53 = vsel %vm6916_vm4, %v14502_v17, %v14501_v6  ;;  %v14505_v58 = vld [vmem:[#allocation126_spill] sm:$0xff]  ;;  %v14506_v0 = vld [vmem:[#allocation177_spill] sm:$0xff]  ;;  %v14521_v30 = vld [vmem:[#allocation67_spill] sm:$0xff] }
 0x3f4   : >> { %v6919_v10 = vsel %vm6918_vm5, %v12788_v49, %v6917_v16  ;;  %v6929_v47 = vsel %vm6918_vm5, %v12791_v60, %v6928_v11  ;;  %v6985_v7 = vsel %vm6916_vm4, %v14504_v3, %v14503_v20  ;;  %v6992_v51 = vsel %vm6916_vm4, %v14506_v0, %v14505_v58  ;;  %v14507_v16 = vld [vmem:[#allocation51_spill] sm:$0xff]  ;;  %v14522_v37 = vld [vmem:[#allocation54_spill] sm:$0xff]  ;;  %v9957_v0 = vpop.permute.xlu1 %9956 }
 0x3f5   : >> { %v6853_v1 = vadd.f32 %v6852_v23, %v6851_v63  ;;  %v6865_v26 = vadd.f32 %v6864_v50, %v6863_v56  ;;  %v6871_v43 = vadd.f32 %v6870_v14, %v6869_v13  ;;  %v6954_v17 = vsel %vm6918_vm5, %v12794_v29, %v6953_v57  ;;  %v14511_v13 = vld [vmem:[#allocation52_spill] sm:$0xff]  ;;  %v14517_v23 = vld [vmem:[#allocation66_spill] sm:$0xff]  ;;  %v14526_v20 = vld [vmem:[#allocation83_spill] sm:$0xff] }
 0x3f6   : >> { %v6859_v9 = vadd.f32 %v6858_v54, %v6857_v18  ;;  %v6961_v49 = vsel %vm6918_vm5, %v12797_v34, %v6960_v53  ;;  %v6986_v60 = vsel %vm6918_vm5, %v12842_v61, %v6985_v7  ;;  %v7017_v55 = vsel %vm6916_vm4, %v14508_v48, %v14507_v16  ;;  %v14512_v34 = vld [vmem:[#allocation182_spill] sm:$0xff]  ;;  %v14515_v18 = vld [vmem:[#allocation80_spill] sm:$0xff]  ;;  %v14530_v16 = vld [vmem:[#allocation55_spill] sm:$0xff] }
 0x3f7   : >> { %v12946_v11 = vsel %vm6920_vm6, %v12768_v33, %v6919_v10  ;;  %v12950_v56 = vsel %vm6920_vm6, %v12771_v52, %v6929_v47  ;;  %v6993_v29 = vsel %vm6918_vm5, %v12845_v36, %v6992_v51  ;;  %v7024_v53 = vsel %vm6916_vm4, %v14512_v34, %v14511_v13  ;;  %v14514_v33 = vld [vmem:[#allocation127_spill] sm:$0xff]  ;;  %v14516_v52 = vld [vmem:[#allocation128_spill] sm:$0xff]  ;;  %v14525_v47 = vld [vmem:[#allocation129_spill] sm:$0xff] }
 0x3f8   : >> { %14509 = vst [vmem:[#allocation178_spill] sm:$0xff] %v12946_v11  ;;  %v12959_v61 = vsel %vm6920_vm6, %v12778_v25, %v6954_v17  ;;  %v7018_v63 = vsel %vm6918_vm5, %v12852_v42, %v7017_v55  ;;  %v7049_v50 = vsel %vm6916_vm4, %v14515_v18, %v14514_v33  ;;  %v7056_v14 = vsel %vm6916_vm4, %v14517_v23, %v14516_v52  ;;  %v14520_v25 = vld [vmem:[#allocation53_spill] sm:$0xff]  ;;  %v14523_v57 = vld [vmem:[#allocation64_spill] sm:$0xff]  ;;  %v14527_v3 = vld [vmem:[#allocation130_spill] sm:$0xff] }
 0x3f9   : >> { %14510 = vst [vmem:[#allocation179_spill] sm:$0xff] %v12950_v56  ;;  %v12971_v36 = vsel %vm6920_vm6, %v12781_v2, %v6961_v49  ;;  %v12975_v54 = vsel %vm6920_vm6, %v12834_v12, %v6986_v60  ;;  %v7081_v42 = vsel %vm6916_vm4, %v14521_v30, %v14520_v25  ;;  %v7088_v6 = vsel %vm6916_vm4, %v14523_v57, %v14522_v37  ;;  %v14528_v7 = vld [vmem:[#allocation68_spill] sm:$0xff]  ;;  %v14531_v48 = vld [vmem:[#allocation121_spill] sm:$0xff]  ;;  %v14533_v13 = vld [vmem:[#allocation122_spill] sm:$0xff] }
 0x3fa   : >> { %14513 = vst [vmem:[#allocation180_spill] sm:$0xff] %v12959_v61  ;;  %v12985_v10 = vsel %vm6920_vm6, %v12837_v41, %v6993_v29  ;;  %v7025_v2 = vsel %vm6918_vm5, %v12855_v35, %v7024_v53  ;;  %v7113_v12 = vsel %vm6916_vm4, %v14526_v20, %v14525_v47  ;;  %v7120_v58 = vsel %vm6916_vm4, %v14528_v7, %v14527_v3  ;;  %v14532_v29 = vld [vmem:[#allocation56_spill] sm:$0xff]  ;;  %v14545_v52 = vld [vmem:[#allocation37_spill] sm:$0xff]  ;;  %v14546_v23 = vld [vmem:[#allocation38_spill] sm:$0xff] }
 0x3fb   : >> { %14518 = vst [vmem:[#allocation63_spill] sm:$0xff] %v12971_v36  ;;  %v12997_v51 = vsel %vm6920_vm6, %v12858_v31, %v7018_v63  ;;  %v7050_v17 = vsel %vm6918_vm5, %v6214_v4, %v7049_v50  ;;  %v7057_v41 = vsel %vm6918_vm5, %v6220_v21, %v7056_v14  ;;  %v7082_v49 = vsel %vm6918_vm5, %v6427_v24, %v7081_v42  ;;  %v14541_v33 = vld [vmem:[#allocation36_spill] sm:$0xff]  ;;  %v14549_v37 = vld [vmem:[#allocation145_spill] sm:$0xff]  ;;  %v14552_v47 = vld [vmem:[#allocation42_spill] sm:$0xff] }
 0x3fc   : >> { %14519 = vst [vmem:[#allocation81_spill] sm:$0xff] %v12975_v54  ;;  %v7089_v35 = vsel %vm6918_vm5, %v6433_v62, %v7088_v6  ;;  %v7114_v60 = vsel %vm6918_vm5, %v6640_v28, %v7113_v12  ;;  %v7145_v55 = vsel %vm6916_vm4, %v14531_v48, %v14530_v16  ;;  %v7152_v34 = vsel %vm6916_vm4, %v14533_v13, %v14532_v29  ;;  %v14548_v30 = vld [vmem:[#allocation40_spill] sm:$0xff]  ;;  %v14553_v20 = vld [vmem:[#allocation43_spill] sm:$0xff]  ;;  %v14559_v48 = vld [vmem:[#allocation49_spill] sm:$0xff] }
 0x3fd   : >> { %14524 = vst [vmem:[#allocation82_spill] sm:$0xff] %v12985_v10  ;;  %v7121_v31 = vsel %vm6918_vm5, %v6646_v44, %v7120_v58  ;;  %v7146_v4 = vsel %vm6918_vm5, %v6853_v1, %v7145_v55  ;;  %v7153_v21 = vsel %vm6918_vm5, %v6859_v9, %v7152_v34  ;;  %v9959_v53 = vunpack.i.h.bf16 %v9957_v0  ;;  %v14540_v9 = vld [vmem:[#allocation35_spill] sm:$0xff]  ;;  %v14554_v3 = vld [vmem:[#allocation44_spill] sm:$0xff]  ;;  %v14555_v58 = vld [vmem:[#allocation45_spill] sm:$0xff] }
 0x3fe   : >> { %14529 = vst [vmem:[#allocation65_spill] sm:$0xff] %v12997_v51  ;;  %v13015_v24 = vsel %vm6920_vm6, %v12861_v59, %v7025_v2  ;;  %v13019_v62 = vsel %vm6920_vm6, %v12868_v8, %v7050_v17  ;;  %v13023_v28 = vsel %vm6920_vm6, %v12894_v5, %v7057_v41  ;;  %v13026_v63 = vsel %vm6920_vm6, %v6439_v15, %v7082_v49  ;;  %v14556_v17 = vld [vmem:[#allocation46_spill] sm:$0xff]  ;;  %v14557_v49 = vld [vmem:[#allocation47_spill] sm:$0xff] }
 0x3ff   : >> { %14534 = vst [vmem:[#allocation69_spill] sm:$0xff] %v13015_v24  ;;  %v13029_v44 = vsel %vm6920_vm6, %v6445_v22, %v7089_v35  ;;  %v13032_v1 = vsel %vm6920_vm6, %v6652_v27, %v7114_v60  ;;  %v5204_v59 = vmul.f32 %v9959_v53, %v14540_v9  ;;  %v5205_v18 = vmul.f32 %v9959_v53, %v14541_v33  ;;  %v14547_v27 = vld [vmem:[#allocation39_spill] sm:$0xff]  ;;  %v14558_v60 = vld [vmem:[#allocation48_spill] sm:$0xff]  ;;  %v14560_v29 = vld [vmem:[#allocation50_spill] sm:$0xff] }
 0x400   : >> { %14535 = vst [vmem:[#allocation183_spill] sm:$0xff] %v13019_v62  ;;  %v13037_v8 = vsel %vm6920_vm6, %v6658_v46, %v7121_v31  ;;  %v13040_v50 = vsel %vm6920_vm6, %v6865_v26, %v7146_v4  ;;  %v13043_v5 = vsel %vm6920_vm6, %v6871_v43, %v7153_v21  ;;  %v9958_v15 = vunpack.i.l.bf16 %v9957_v0  ;;  %v14550_v46 = vld [vmem:[#allocation146_spill] sm:$0xff]  ;;  %v14551_v26 = vld [vmem:[#allocation41_spill] sm:$0xff]  ;;  %v14561_v34 = vld [vmem:[#allocation147_spill] sm:$0xff] }
 0x401   : >> { %14536 = vst [vmem:[#allocation123_spill] sm:$0xff] %v13023_v28  ;;  %v5449_v22 = vmul.f32 %v9959_v53, %v14545_v52  ;;  %v5450_v14 = vmul.f32 %v9959_v53, %v14546_v23  ;;  %v5662_v25 = vmul.f32 %v9959_v53, %v14547_v27  ;;  %v5663_v42 = vmul.f32 %v9959_v53, %v14548_v30  ;;  %v14562_v4 = vld [vmem:[#allocation148_spill] sm:$0xff]  ;;  %v14568_v28 = vld [vmem:[#allocation154_spill] sm:$0xff]  ;;  %v14569_v24 = vld [vmem:[#allocation155_spill] sm:$0xff] }
 0x402   : >> { %14537 = vst [vmem:[#allocation124_spill] sm:$0xff] %v13026_v63  ;;  %v13050_v57 = vadd.f32 %v5204_v59, %v14549_v37  ;;  %v13053_v6 = vadd.f32 %v5205_v18, %v14550_v46  ;;  %v5875_v2 = vmul.f32 %v9959_v53, %v14551_v26  ;;  %v5876_v43 = vmul.f32 %v9959_v53, %v14552_v47  ;;  %v14563_v59 = vld [vmem:[#allocation149_spill] sm:$0xff]  ;;  %v14564_v37 = vld [vmem:[#allocation150_spill] sm:$0xff] }
 0x403   : >> { %14538 = vst [vmem:[#allocation89_spill] sm:$0xff] %v13029_v44  ;;  %v6088_v12 = vmul.f32 %v9959_v53, %v14553_v20  ;;  %v6089_v7 = vmul.f32 %v9959_v53, %v14554_v3  ;;  %v6301_v0 = vmul.f32 %v9959_v53, %v14555_v58  ;;  %v6302_v41 = vmul.f32 %v9959_v53, %v14556_v17  ;;  %v14567_v44 = vld [vmem:[#allocation153_spill] sm:$0xff] }
 0x404   : >> { %14539 = vst [vmem:[#allocation90_spill] sm:$0xff] %v13032_v1  ;;  %v6514_v35 = vmul.f32 %v9959_v53, %v14557_v49  ;;  %v6515_v16 = vmul.f32 %v9959_v53, %v14558_v60  ;;  %v6727_v55 = vmul.f32 %v9959_v53, %v14559_v48  ;;  %v6728_v13 = vmul.f32 %v9959_v53, %v14560_v29 }
 0x405   : >> { %14542 = vst [vmem:[#allocation91_spill] sm:$0xff] %v13037_v8  ;;  %v5465_v31 = vadd.f32 %v5449_v22, %v14561_v34  ;;  %v5466_v21 = vadd.f32 %v5450_v14, %v14562_v4  ;;  %v5678_v18 = vadd.f32 %v5662_v25, %v14563_v59  ;;  %v5679_v46 = vadd.f32 %v5663_v42, %v14564_v37  ;;  %v14566_v8 = vld [vmem:[#allocation152_spill] sm:$0xff]  ;;  %v14571_v42 = vld [vmem:[#allocation157_spill] sm:$0xff] }
 0x406   : >> { %14543 = vst [vmem:[#allocation92_spill] sm:$0xff] %v13040_v50  ;;  %v5892_v1 = vadd.f32 %v5876_v43, %v14566_v8  ;;  %v13072_v63 = vadd.f32 %v6088_v12, %v14567_v44  ;;  %v13075_v62 = vadd.f32 %v6089_v7, %v14568_v28  ;;  %v13078_v53 = vadd.f32 %v6301_v0, %v14569_v24  ;;  %v14570_v22 = vld [vmem:[#allocation156_spill] sm:$0xff]  ;;  %v14572_v8 = vld [vmem:[#allocation158_spill] sm:$0xff]  ;;  %v14573_v44 = vld [vmem:[#allocation159_spill] sm:$0xff] }
 0x407   : >> { %14544 = vst [vmem:[#allocation93_spill] sm:$0xff] %v13043_v5  ;;  %v14565_v5 = vld [vmem:[#allocation151_spill] sm:$0xff]  ;;  %v13081_v34 = vadd.f32 %v6302_v41, %v14570_v22  ;;  %v5202_v14 = vmul.f32 %v9958_v15, %v14540_v9  ;;  %v5203_v25 = vmul.f32 %v9958_v15, %v14541_v33  ;;  %v13092_v43 = vadd.f32 %v6727_v55, %v14573_v44  ;;  %v14574_v28 = vld [vmem:[#allocation160_spill] sm:$0xff]  ;;  %v14575_v0 = vld [vmem:[#allocation161_spill] sm:$0xff] }
 0x408   : >> { %v5891_v50 = vadd.f32 %v5875_v2, %v14565_v5  ;;  %v13086_v5 = vadd.f32 %v6514_v35, %v14571_v42  ;;  %v13089_v2 = vadd.f32 %v6515_v16, %v14572_v8  ;;  %v13095_v12 = vadd.f32 %v6728_v13, %v14574_v28  ;;  %v14576_v35 = vld [vmem:[#allocation162_spill] sm:$0xff] }
 0x409   : >> { %v5447_v24 = vmul.f32 %v9958_v15, %v14545_v52  ;;  %v5448_v7 = vmul.f32 %v9958_v15, %v14546_v23  ;;  %v5660_v9 = vmul.f32 %v9958_v15, %v14547_v27  ;;  %v5661_v33 = vmul.f32 %v9958_v15, %v14548_v30  ;;  %v14589_v44 = vld [vmem:[#allocation170_spill] sm:$0xff] }
 0x40a   : >> { %v13102_v41 = vadd.f32 %v5202_v14, %v14575_v0  ;;  %v13105_v16 = vadd.f32 %v5203_v25, %v14576_v35  ;;  %v5873_v55 = vmul.f32 %v9958_v15, %v14551_v26  ;;  %v5874_v4 = vmul.f32 %v9958_v15, %v14552_v47  ;;  %v9968_v14 = vpop.permute.xlu0 %9967  ;;  %v14577_v26 = vld [vmem:[#allocation163_spill] sm:$0xff]  ;;  %v14578_v47 = vld [vmem:[#allocation164_spill] sm:$0xff] }
 0x40b   : >> { %v6086_v13 = vmul.f32 %v9958_v15, %v14553_v20  ;;  %v6087_v52 = vmul.f32 %v9958_v15, %v14554_v3  ;;  %v6299_v23 = vmul.f32 %v9958_v15, %v14555_v58  ;;  %v6300_v27 = vmul.f32 %v9958_v15, %v14556_v17  ;;  %v14579_v3 = vld [vmem:[#allocation165_spill] sm:$0xff]  ;;  %v14581_v58 = vld [vmem:[#allocation166_spill] sm:$0xff] }
 0x40c   : >> { %v6512_v30 = vmul.f32 %v9958_v15, %v14557_v49  ;;  %v6513_v59 = vmul.f32 %v9958_v15, %v14558_v60  ;;  %v6725_v37 = vmul.f32 %v9958_v15, %v14559_v48  ;;  %v6726_v22 = vmul.f32 %v9958_v15, %v14560_v29  ;;  %v14583_v49 = vld [vmem:[#allocation167_spill] sm:$0xff]  ;;  %v14585_v60 = vld [vmem:[#allocation168_spill] sm:$0xff]  ;;  %v14587_v15 = vld [vmem:[#allocation169_spill] sm:$0xff] }
 0x40d   : >> { %v13118_v25 = vadd.f32 %v5447_v24, %v14577_v26  ;;  %v13121_v20 = vadd.f32 %v5448_v7, %v14578_v47  ;;  %v13124_v42 = vadd.f32 %v5660_v9, %v14579_v3  ;;  %v13127_v17 = vadd.f32 %v5661_v33, %v14581_v58  ;;  %v14591_v24 = vld [vmem:[#allocation171_spill] sm:$0xff]  ;;  %v14593_v9 = vld [vmem:[#allocation172_spill] sm:$0xff]  ;;  %v14595_v33 = vld [vmem:[#allocation173_spill] sm:$0xff] }
 0x40e   : >> { %v13130_v8 = vadd.f32 %v5873_v55, %v14583_v49  ;;  %v13133_v48 = vadd.f32 %v5874_v4, %v14585_v60  ;;  %v13136_v29 = vadd.f32 %v6086_v13, %v14587_v15  ;;  %v13139_v28 = vadd.f32 %v6087_v52, %v14589_v44  ;;  %v14597_v26 = vld [vmem:[#allocation174_spill] sm:$0xff]  ;;  %v14599_v47 = vld [vmem:[#allocation175_spill] sm:$0xff]  ;;  %v14601_v3 = vld [vmem:[#allocation176_spill] sm:$0xff] }
 0x40f   : >> { %14580 = vst [vmem:[#allocation94_spill] sm:$0xff] %v13124_v42  ;;  %v13142_v7 = vadd.f32 %v6299_v23, %v14591_v24  ;;  %v13145_v0 = vadd.f32 %v6300_v27, %v14593_v9  ;;  %v13148_v35 = vadd.f32 %v6512_v30, %v14595_v33  ;;  %v13150_v55 = vunpack.i.h.bf16 %v9968_v14  ;;  %v14603_v23 = vld [vmem:[#allocation141_spill] sm:$0xff]  ;;  %v14604_v49 = vld [vmem:[#allocation142_spill] sm:$0xff]  ;;  %v14605_v60 = vld [vmem:[#allocation143_spill] sm:$0xff] }
 0x410   : >> { %14582 = vst [vmem:[#allocation95_spill] sm:$0xff] %v13127_v17  ;;  %v13153_v4 = vadd.f32 %v6513_v59, %v14597_v26  ;;  %v13156_v13 = vadd.f32 %v6725_v37, %v14599_v47  ;;  %v13159_v52 = vadd.f32 %v6726_v22, %v14601_v3  ;;  %v13161_v58 = vunpack.i.l.bf16 %v9968_v14  ;;  %v14606_v44 = vld [vmem:[#allocation144_spill] sm:$0xff]  ;;  %v14607_v24 = vld [vmem:[#allocation70_spill] sm:$0xff]  ;;  %v14608_v9 = vld [vmem:[#allocation71_spill] sm:$0xff] }
 0x411   : >> { %14584 = vst [vmem:[#allocation96_spill] sm:$0xff] %v13130_v8  ;;  %v5275_v27 = vmul.f32 %v13150_v55, %v14603_v23  ;;  %v5276_v30 = vmul.f32 %v13150_v55, %v14604_v49  ;;  %v5488_v15 = vmul.f32 %v13150_v55, %v14605_v60  ;;  %v5489_v59 = vmul.f32 %v13150_v55, %v14606_v44  ;;  %v14609_v14 = vld [vmem:[#allocation72_spill] sm:$0xff]  ;;  %v14610_v26 = vld [vmem:[#allocation73_spill] sm:$0xff] }
 0x412   : >> { %14586 = vst [vmem:[#allocation97_spill] sm:$0xff] %v13133_v48  ;;  %v5701_v37 = vmul.f32 %v13150_v55, %v14607_v24  ;;  %v5702_v22 = vmul.f32 %v13150_v55, %v14608_v9  ;;  %v5914_v33 = vmul.f32 %v13150_v55, %v14609_v14  ;;  %v5915_v47 = vmul.f32 %v13150_v55, %v14610_v26 }
 0x413   : >> { %14588 = vst [vmem:[#allocation98_spill] sm:$0xff] %v13136_v29  ;;  %v5291_v3 = vadd.f32 %v5275_v27, %v13050_v57  ;;  %v5292_v51 = vadd.f32 %v5276_v30, %v13053_v6  ;;  %v5504_v10 = vadd.f32 %v5488_v15, %v5465_v31  ;;  %v5505_v54 = vadd.f32 %v5489_v59, %v5466_v21 }
 0x414   : >> { %14590 = vst [vmem:[#allocation99_spill] sm:$0xff] %v13139_v28  ;;  %v5717_v36 = vadd.f32 %v5701_v37, %v5678_v18  ;;  %v5718_v61 = vadd.f32 %v5702_v22, %v5679_v46  ;;  %v5930_v56 = vadd.f32 %v5914_v33, %v5891_v50  ;;  %v5931_v11 = vadd.f32 %v5915_v47, %v5892_v1 }
 0x415   : >> { %14592 = vst [vmem:[#allocation100_spill] sm:$0xff] %v13142_v7 }
 0x416   : >> { %14594 = vst [vmem:[#allocation101_spill] sm:$0xff] %v13145_v0  ;;  %v5733_v0 = vmax.f32 %v5717_v36, 0.0  ;;  %v5734_v7 = vmax.f32 %v5718_v61, 0.0  ;;  %v5946_v28 = vmax.f32 %v5930_v56, 0.0  ;;  %v5947_v29 = vmax.f32 %v5931_v11, 0.0 }
 0x417   : >> { %14596 = vst [vmem:[#allocation102_spill] sm:$0xff] %v13148_v35  ;;  %v5521_v35 = vmax.f32 %v5505_v54, 0.0 }
 0x418   : >> { %14598 = vst [vmem:[#allocation103_spill] sm:$0xff] %v13153_v4  ;;  %v5520_v4 = vmax.f32 %v5504_v10, 0.0  ;;  %v5819_v27 = vrot.slane %v5733_v0, 4  ;;  %v5825_v6 = vrot.slane %v5734_v7, 4  ;;  %v6032_v31 = vrot.slane %v5946_v28, 4 }
 0x419   : >> { %14600 = vst [vmem:[#allocation104_spill] sm:$0xff] %v13156_v13  ;;  %v5308_v13 = vmax.f32 %v5292_v51, 0.0  ;;  %v5612_v57 = vrot.slane %v5521_v35, 4  ;;  %v6038_v21 = vrot.slane %v5947_v29, 4 }
 0x41a   : >> { %14602 = vst [vmem:[#allocation105_spill] sm:$0xff] %v13159_v52  ;;  %v5307_v52 = vmax.f32 %v5291_v3, 0.0  ;;  %v5606_v17 = vrot.slane %v5520_v4, 4  ;;  %v5820_v30 = vadd.f32 %v5819_v27, %v5733_v0  ;;  %v5826_v51 = vadd.f32 %v5825_v6, %v5734_v7 }
 0x41b   : >> { %v5399_v8 = vrot.slane %v5308_v13, 4  ;;  %v5613_v1 = vadd.f32 %v5612_v57, %v5521_v35  ;;  %v6033_v10 = vadd.f32 %v6032_v31, %v5946_v28  ;;  %v6039_v54 = vadd.f32 %v6038_v21, %v5947_v29 }
 0x41c   : >> { %v5393_v48 = vrot.slane %v5307_v52, 4  ;;  %v5607_v50 = vadd.f32 %v5606_v17, %v5520_v4  ;;  %v5821_v15 = vrot.slane %v5820_v30, 2  ;;  %v5827_v59 = vrot.slane %v5826_v51, 2 }
 0x41d   : >> { %v5400_v46 = vadd.f32 %v5399_v8, %v5308_v13  ;;  %v5614_v11 = vrot.slane %v5613_v1, 2  ;;  %v6034_v37 = vrot.slane %v6033_v10, 2  ;;  %v6040_v22 = vrot.slane %v6039_v54, 2 }
 0x41e   : >> { %v5394_v18 = vadd.f32 %v5393_v48, %v5307_v52  ;;  %v5608_v56 = vrot.slane %v5607_v50, 2  ;;  %v5822_v48 = vadd.f32 %v5821_v15, %v5820_v30  ;;  %v5828_v8 = vadd.f32 %v5827_v59, %v5826_v51 }
 0x41f   : >> { %v5401_v61 = vrot.slane %v5400_v46, 2  ;;  %v5615_v42 = vadd.f32 %v5614_v11, %v5613_v1  ;;  %v6035_v17 = vadd.f32 %v6034_v37, %v6033_v10  ;;  %v6041_v35 = vadd.f32 %v6040_v22, %v6039_v54  ;;  %v14613_v11 = vld [vmem:[#allocation79_spill] sm:$0xff] }
 0x420   : >> { %v5395_v36 = vrot.slane %v5394_v18, 2  ;;  %v5609_v3 = vadd.f32 %v5608_v56, %v5607_v50  ;;  %v5823_v4 = vrot.slane %v5822_v48, 1  ;;  %v5829_v13 = vrot.slane %v5828_v8, 1 }
 0x421   : >> { %v5402_v47 = vadd.f32 %v5401_v61, %v5400_v46  ;;  %v5616_v29 = vrot.slane %v5615_v42, 1  ;;  %v6036_v52 = vrot.slane %v6035_v17, 1  ;;  %v6042_v57 = vrot.slane %v6041_v35, 1  ;;  %v14612_v61 = vld [vmem:[#allocation78_spill] sm:$0xff] }
 0x422   : >> { %v5396_v33 = vadd.f32 %v5395_v36, %v5394_v18  ;;  %v5610_v28 = vrot.slane %v5609_v3, 1  ;;  %v13189_v18 = vadd.f32 %v5823_v4, %v5822_v48  ;;  %v13191_v46 = vadd.f32 %v5829_v13, %v5828_v8 }
 0x423   : >> { %v5403_v7 = vrot.slane %v5402_v47, 1  ;;  %v13187_v21 = vadd.f32 %v5616_v29, %v5615_v42  ;;  %v13193_v50 = vadd.f32 %v6036_v52, %v6035_v17  ;;  %v13195_v1 = vadd.f32 %v6042_v57, %v6041_v35 }
 0x424   : >> { %v5397_v0 = vrot.slane %v5396_v33, 1  ;;  %v13185_v31 = vadd.f32 %v5610_v28, %v5609_v3  ;;  %v6127_v30 = vmul.f32 %v13150_v55, %v12055_v32  ;;  %v6128_v51 = vmul.f32 %v13150_v55, %v12057_v40 }
 0x425   : >> { %v13183_v6 = vadd.f32 %v5403_v7, %v5402_v47  ;;  %14611 = vst [vmem:[#allocation106_spill] sm:$0xff] %v13195_v1  ;;  %v6340_v10 = vmul.f32 %v13150_v55, %v14464_v39  ;;  %v6341_v42 = vmul.f32 %v13150_v55, %v14465_v38  ;;  %v6553_v54 = vmul.f32 %v13150_v55, %v14474_v19 }
 0x426   : >> { %v13181_v27 = vadd.f32 %v5397_v0, %v5396_v33  ;;  %v6554_v36 = vmul.f32 %v13150_v55, %v14475_v45  ;;  %v6766_v56 = vmul.f32 %v13150_v55, %v14612_v61  ;;  %v6767_v15 = vmul.f32 %v13150_v55, %v14613_v11 }
 0x427   : >> { %v6143_v59 = vadd.f32 %v6127_v30, %v13072_v63  ;;  %v6144_v37 = vadd.f32 %v6128_v51, %v13075_v62  ;;  %v6356_v22 = vadd.f32 %v6340_v10, %v13078_v53  ;;  %v6357_v33 = vadd.f32 %v6341_v42, %v13081_v34 }
 0x428   : >> { %v6569_v47 = vadd.f32 %v6553_v54, %v13086_v5  ;;  %v6570_v3 = vadd.f32 %v6554_v36, %v13089_v2  ;;  %v6782_v48 = vadd.f32 %v6766_v56, %v13092_v43  ;;  %v6783_v8 = vadd.f32 %v6767_v15, %v13095_v12 }
 0x429   : >> { %v6159_v17 = vmax.f32 %v6143_v59, 0.0  ;;  %v6160_v35 = vmax.f32 %v6144_v37, 0.0  ;;  %v6372_v0 = vmax.f32 %v6356_v22, 0.0  ;;  %v6373_v55 = vmax.f32 %v6357_v33, 0.0 }
 0x42a   : >> { %v6585_v7 = vmax.f32 %v6569_v47, 0.0  ;;  %v6586_v63 = vmax.f32 %v6570_v3, 0.0  ;;  %v6798_v28 = vmax.f32 %v6782_v48, 0.0  ;;  %v6799_v62 = vmax.f32 %v6783_v8, 0.0 }
 0x42b   : >> { %v6245_v29 = vrot.slane %v6159_v17, 4  ;;  %v6251_v53 = vrot.slane %v6160_v35, 4  ;;  %v6458_v4 = vrot.slane %v6372_v0, 4  ;;  %v6464_v34 = vrot.slane %v6373_v55, 4 }
 0x42c   : >> { %v6671_v13 = vrot.slane %v6585_v7, 4  ;;  %v6677_v5 = vrot.slane %v6586_v63, 4  ;;  %v6884_v52 = vrot.slane %v6798_v28, 4  ;;  %v6890_v2 = vrot.slane %v6799_v62, 4 }
 0x42d   : >> { %v6246_v57 = vadd.f32 %v6245_v29, %v6159_v17  ;;  %v6252_v43 = vadd.f32 %v6251_v53, %v6160_v35  ;;  %v6459_v30 = vadd.f32 %v6458_v4, %v6372_v0  ;;  %v6465_v12 = vadd.f32 %v6464_v34, %v6373_v55 }
 0x42e   : >> { %v6672_v51 = vadd.f32 %v6671_v13, %v6585_v7  ;;  %v6678_v10 = vadd.f32 %v6677_v5, %v6586_v63  ;;  %v6885_v42 = vadd.f32 %v6884_v52, %v6798_v28  ;;  %v6891_v54 = vadd.f32 %v6890_v2, %v6799_v62 }
 0x42f   : >> { %v6247_v36 = vrot.slane %v6246_v57, 2  ;;  %v6253_v56 = vrot.slane %v6252_v43, 2  ;;  %v6460_v15 = vrot.slane %v6459_v30, 2  ;;  %v6466_v59 = vrot.slane %v6465_v12, 2 }
 0x430   : >> { %v6673_v37 = vrot.slane %v6672_v51, 2  ;;  %v6679_v22 = vrot.slane %v6678_v10, 2  ;;  %v6886_v33 = vrot.slane %v6885_v42, 2  ;;  %v6892_v47 = vrot.slane %v6891_v54, 2 }
 0x431   : >> { %v6248_v3 = vadd.f32 %v6247_v36, %v6246_v57  ;;  %v6254_v48 = vadd.f32 %v6253_v56, %v6252_v43  ;;  %v6461_v8 = vadd.f32 %v6460_v15, %v6459_v30  ;;  %v6467_v1 = vadd.f32 %v6466_v59, %v6465_v12  ;;  %v14614_v59 = vld [vmem:[#allocation94_spill] sm:$0xff] }
 0x432   : >> { %v6674_v17 = vadd.f32 %v6673_v37, %v6672_v51  ;;  %v6680_v35 = vadd.f32 %v6679_v22, %v6678_v10  ;;  %v6887_v0 = vadd.f32 %v6886_v33, %v6885_v42  ;;  %v6893_v55 = vadd.f32 %v6892_v47, %v6891_v54  ;;  %v14616_v33 = vld [vmem:[#allocation96_spill] sm:$0xff]  ;;  %v14617_v47 = vld [vmem:[#allocation97_spill] sm:$0xff] }
 0x433   : >> { %v6249_v7 = vrot.slane %v6248_v3, 1  ;;  %v6255_v63 = vrot.slane %v6254_v48, 1  ;;  %v6462_v28 = vrot.slane %v6461_v8, 1  ;;  %v6468_v62 = vrot.slane %v6467_v1, 1 }
 0x434   : >> { %v6675_v29 = vrot.slane %v6674_v17, 1  ;;  %v6681_v53 = vrot.slane %v6680_v35, 1  ;;  %v6888_v4 = vrot.slane %v6887_v0, 1  ;;  %v6894_v34 = vrot.slane %v6893_v55, 1 }
 0x435   : >> { %v13221_v13 = vadd.f32 %v6249_v7, %v6248_v3  ;;  %v13223_v5 = vadd.f32 %v6255_v63, %v6254_v48  ;;  %v13225_v52 = vadd.f32 %v6462_v28, %v6461_v8  ;;  %v13227_v2 = vadd.f32 %v6468_v62, %v6467_v1 }
 0x436   : >> { %v13229_v57 = vadd.f32 %v6675_v29, %v6674_v17  ;;  %v13231_v43 = vadd.f32 %v6681_v53, %v6680_v35  ;;  %v13233_v30 = vadd.f32 %v6888_v4, %v6887_v0  ;;  %v13235_v12 = vadd.f32 %v6894_v34, %v6893_v55 }
 0x437   : >> { %v5273_v51 = vmul.f32 %v13161_v58, %v14603_v23  ;;  %v5274_v10 = vmul.f32 %v13161_v58, %v14604_v49  ;;  %v5486_v42 = vmul.f32 %v13161_v58, %v14605_v60  ;;  %v5487_v1 = vmul.f32 %v13161_v58, %v14606_v44 }
 0x438   : >> { %v5699_v54 = vmul.f32 %v13161_v58, %v14607_v24  ;;  %v5700_v36 = vmul.f32 %v13161_v58, %v14608_v9  ;;  %v5912_v56 = vmul.f32 %v13161_v58, %v14609_v14  ;;  %v5913_v23 = vmul.f32 %v13161_v58, %v14610_v26  ;;  %v14615_v24 = vld [vmem:[#allocation95_spill] sm:$0xff] }
 0x439   : >> { %v5289_v49 = vadd.f32 %v5273_v51, %v13102_v41  ;;  %v5290_v15 = vadd.f32 %v5274_v10, %v13105_v16  ;;  %v5502_v60 = vadd.f32 %v5486_v42, %v13118_v25  ;;  %v5503_v44 = vadd.f32 %v5487_v1, %v13121_v20 }
 0x43a   : >> { %v5715_v37 = vadd.f32 %v5699_v54, %v14614_v59  ;;  %v5716_v22 = vadd.f32 %v5700_v36, %v14615_v24  ;;  %v5928_v9 = vadd.f32 %v5912_v56, %v14616_v33  ;;  %v5929_v3 = vadd.f32 %v5913_v23, %v14617_v47 }
 0x43b   : >> { %v5305_v14 = vmax.f32 %v5289_v49, 0.0  ;;  %v5306_v48 = vmax.f32 %v5290_v15, 0.0  ;;  %v5518_v8 = vmax.f32 %v5502_v60, 0.0  ;;  %v5519_v26 = vmax.f32 %v5503_v44, 0.0 }
 0x43c   : >> { %v5731_v17 = vmax.f32 %v5715_v37, 0.0  ;;  %v5732_v41 = vmax.f32 %v5716_v22, 0.0  ;;  %v5944_v35 = vmax.f32 %v5928_v9, 0.0  ;;  %v5945_v16 = vmax.f32 %v5929_v3, 0.0 }
 0x43d   : >> { %v5381_v0 = vrot.slane %v5305_v14, 4  ;;  %v5387_v25 = vrot.slane %v5306_v48, 4  ;;  %v5594_v55 = vrot.slane %v5518_v8, 4  ;;  %v5600_v20 = vrot.slane %v5519_v26, 4 }
 0x43e   : >> { %v5807_v7 = vrot.slane %v5731_v17, 4  ;;  %v5813_v63 = vrot.slane %v5732_v41, 4  ;;  %v6020_v28 = vrot.slane %v5944_v35, 4  ;;  %v6026_v62 = vrot.slane %v5945_v16, 4 }
 0x43f   : >> { %v5382_v29 = vadd.f32 %v5381_v0, %v5305_v14  ;;  %v5388_v53 = vadd.f32 %v5387_v25, %v5306_v48  ;;  %v5595_v4 = vadd.f32 %v5594_v55, %v5518_v8  ;;  %v5601_v34 = vadd.f32 %v5600_v20, %v5519_v26 }
 0x440   : >> { %v5808_v51 = vadd.f32 %v5807_v7, %v5731_v17  ;;  %v5814_v10 = vadd.f32 %v5813_v63, %v5732_v41  ;;  %v6021_v42 = vadd.f32 %v6020_v28, %v5944_v35  ;;  %v6027_v1 = vadd.f32 %v6026_v62, %v5945_v16 }
 0x441   : >> { %v5383_v54 = vrot.slane %v5382_v29, 2  ;;  %v5389_v36 = vrot.slane %v5388_v53, 2  ;;  %v5596_v56 = vrot.slane %v5595_v4, 2  ;;  %v5602_v23 = vrot.slane %v5601_v34, 2 }
 0x442   : >> { %v5809_v49 = vrot.slane %v5808_v51, 2  ;;  %v5815_v15 = vrot.slane %v5814_v10, 2  ;;  %v6022_v60 = vrot.slane %v6021_v42, 2  ;;  %v6028_v44 = vrot.slane %v6027_v1, 2 }
 0x443   : >> { %v5384_v59 = vadd.f32 %v5383_v54, %v5382_v29  ;;  %v5390_v37 = vadd.f32 %v5389_v36, %v5388_v53  ;;  %v5597_v24 = vadd.f32 %v5596_v56, %v5595_v4  ;;  %v5603_v22 = vadd.f32 %v5602_v23, %v5601_v34  ;;  %v14619_v54 = vld [vmem:[#allocation99_spill] sm:$0xff]  ;;  %v14621_v23 = vld [vmem:[#allocation101_spill] sm:$0xff] }
 0x444   : >> { %v5810_v33 = vadd.f32 %v5809_v49, %v5808_v51  ;;  %v5816_v9 = vadd.f32 %v5815_v15, %v5814_v10  ;;  %v6023_v47 = vadd.f32 %v6022_v60, %v6021_v42  ;;  %v6029_v3 = vadd.f32 %v6028_v44, %v6027_v1  ;;  %v14618_v1 = vld [vmem:[#allocation98_spill] sm:$0xff]  ;;  %v14624_v44 = vld [vmem:[#allocation104_spill] sm:$0xff] }
 0x445   : >> { %v5385_v14 = vrot.slane %v5384_v59, 1  ;;  %v5391_v48 = vrot.slane %v5390_v37, 1  ;;  %v5598_v8 = vrot.slane %v5597_v24, 1  ;;  %v5604_v26 = vrot.slane %v5603_v22, 1  ;;  %v14622_v49 = vld [vmem:[#allocation102_spill] sm:$0xff] }
 0x446   : >> { %v5811_v17 = vrot.slane %v5810_v33, 1  ;;  %v5817_v41 = vrot.slane %v5816_v9, 1  ;;  %v6024_v35 = vrot.slane %v6023_v47, 1  ;;  %v6030_v16 = vrot.slane %v6029_v3, 1 }
 0x447   : >> { %v13261_v0 = vadd.f32 %v5385_v14, %v5384_v59  ;;  %v13263_v25 = vadd.f32 %v5391_v48, %v5390_v37  ;;  %v13265_v55 = vadd.f32 %v5598_v8, %v5597_v24  ;;  %v13267_v20 = vadd.f32 %v5604_v26, %v5603_v22  ;;  %v14625_v59 = vld [vmem:[#allocation105_spill] sm:$0xff] }
 0x448   : >> { %v13269_v7 = vadd.f32 %v5811_v17, %v5810_v33  ;;  %v13271_v63 = vadd.f32 %v5817_v41, %v5816_v9  ;;  %v13273_v28 = vadd.f32 %v6024_v35, %v6023_v47  ;;  %v13275_v62 = vadd.f32 %v6030_v16, %v6029_v3 }
 0x449   : >> { %v6125_v29 = vmul.f32 %v13161_v58, %v12055_v32  ;;  %v6126_v53 = vmul.f32 %v13161_v58, %v12057_v40  ;;  %v6338_v4 = vmul.f32 %v13161_v58, %v14464_v39  ;;  %v6339_v34 = vmul.f32 %v13161_v58, %v14465_v38  ;;  %v14620_v39 = vld [vmem:[#allocation100_spill] sm:$0xff] }
 0x44a   : >> { %v6551_v51 = vmul.f32 %v13161_v58, %v14474_v19  ;;  %v6552_v10 = vmul.f32 %v13161_v58, %v14475_v45  ;;  %v6764_v42 = vmul.f32 %v13161_v58, %v14612_v61  ;;  %v6765_v32 = vmul.f32 %v13161_v58, %v14613_v11  ;;  %v14623_v19 = vld [vmem:[#allocation103_spill] sm:$0xff] }
 0x44b   : >> { %v6141_v40 = vadd.f32 %v6125_v29, %v14618_v1  ;;  %v6142_v36 = vadd.f32 %v6126_v53, %v14619_v54  ;;  %v6354_v56 = vadd.f32 %v6338_v4, %v14620_v39  ;;  %v6355_v38 = vadd.f32 %v6339_v34, %v14621_v23 }
 0x44c   : >> { %v6567_v15 = vadd.f32 %v6551_v51, %v14622_v49  ;;  %v6568_v60 = vadd.f32 %v6552_v10, %v14623_v19  ;;  %v6780_v45 = vadd.f32 %v6764_v42, %v14624_v44  ;;  %v6781_v37 = vadd.f32 %v6765_v32, %v14625_v59 }
 0x44d   : >> { %v6157_v61 = vmax.f32 %v6141_v40, 0.0  ;;  %v6158_v24 = vmax.f32 %v6142_v36, 0.0  ;;  %v6370_v22 = vmax.f32 %v6354_v56, 0.0  ;;  %v6371_v58 = vmax.f32 %v6355_v38, 0.0 }
 0x44e   : >> { %v6583_v11 = vmax.f32 %v6567_v15, 0.0  ;;  %v6584_v33 = vmax.f32 %v6568_v60, 0.0  ;;  %v6796_v9 = vmax.f32 %v6780_v45, 0.0  ;;  %v6797_v47 = vmax.f32 %v6781_v37, 0.0 }
 0x44f   : >> { %v6233_v3 = vrot.slane %v6157_v61, 4  ;;  %v6239_v14 = vrot.slane %v6158_v24, 4  ;;  %v6446_v48 = vrot.slane %v6370_v22, 4  ;;  %v6452_v8 = vrot.slane %v6371_v58, 4 }
 0x450   : >> { %v6659_v26 = vrot.slane %v6583_v11, 4  ;;  %v6665_v17 = vrot.slane %v6584_v33, 4  ;;  %v6872_v41 = vrot.slane %v6796_v9, 4  ;;  %v6878_v35 = vrot.slane %v6797_v47, 4 }
 0x451   : >> { %v6234_v16 = vadd.f32 %v6233_v3, %v6157_v61  ;;  %v6240_v29 = vadd.f32 %v6239_v14, %v6158_v24  ;;  %v6447_v53 = vadd.f32 %v6446_v48, %v6370_v22  ;;  %v6453_v4 = vadd.f32 %v6452_v8, %v6371_v58 }
 0x452   : >> { %v6660_v34 = vadd.f32 %v6659_v26, %v6583_v11  ;;  %v6666_v51 = vadd.f32 %v6665_v17, %v6584_v33  ;;  %v6873_v10 = vadd.f32 %v6872_v41, %v6796_v9  ;;  %v6879_v42 = vadd.f32 %v6878_v35, %v6797_v47  ;;  %v14626_v35 = vld [vmem:[#allocation178_spill] sm:$0xff] }
 0x453   : >> { %v6235_v32 = vrot.slane %v6234_v16, 2  ;;  %v6241_v1 = vrot.slane %v6240_v29, 2  ;;  %v6448_v40 = vrot.slane %v6447_v53, 2  ;;  %v6454_v54 = vrot.slane %v6453_v4, 2 }
 0x454   : >> { %v6661_v36 = vrot.slane %v6660_v34, 2  ;;  %v6667_v39 = vrot.slane %v6666_v51, 2  ;;  %v6874_v56 = vrot.slane %v6873_v10, 2  ;;  %v6880_v23 = vrot.slane %v6879_v42, 2 }
 0x455   : >> { %v6236_v38 = vadd.f32 %v6235_v32, %v6234_v16  ;;  %v6242_v49 = vadd.f32 %v6241_v1, %v6240_v29  ;;  %v6449_v15 = vadd.f32 %v6448_v40, %v6447_v53  ;;  %v6455_v19 = vadd.f32 %v6454_v54, %v6453_v4  ;;  %v14627_v29 = vld [vmem:[#allocation179_spill] sm:$0xff]  ;;  %v14628_v4 = vld [vmem:[#allocation180_spill] sm:$0xff]  ;;  %v14630_v1 = vld [vmem:[#allocation81_spill] sm:$0xff] }
 0x456   : >> { %v6662_v60 = vadd.f32 %v6661_v36, %v6660_v34  ;;  %v6668_v44 = vadd.f32 %v6667_v39, %v6666_v51  ;;  %v6875_v45 = vadd.f32 %v6874_v56, %v6873_v10  ;;  %v6881_v59 = vadd.f32 %v6880_v23, %v6879_v42  ;;  %v14629_v51 = vld [vmem:[#allocation63_spill] sm:$0xff]  ;;  %v14631_v40 = vld [vmem:[#allocation82_spill] sm:$0xff]  ;;  %v14632_v54 = vld [vmem:[#allocation65_spill] sm:$0xff] }
 0x457   : >> { %v6237_v37 = vrot.slane %v6236_v38, 1  ;;  %v6243_v61 = vrot.slane %v6242_v49, 1  ;;  %v6450_v24 = vrot.slane %v6449_v15, 1  ;;  %v6456_v22 = vrot.slane %v6455_v19, 1  ;;  %v14633_v36 = vld [vmem:[#allocation69_spill] sm:$0xff]  ;;  %v14634_v39 = vld [vmem:[#allocation106_spill] sm:$0xff] }
 0x458   : >> { %v6663_v58 = vrot.slane %v6662_v60, 1  ;;  %v6669_v11 = vrot.slane %v6668_v44, 1  ;;  %v6876_v33 = vrot.slane %v6875_v45, 1  ;;  %v6882_v9 = vrot.slane %v6881_v59, 1  ;;  %v14635_v56 = vld [vmem:[#allocation183_spill] sm:$0xff] }
 0x459   : >> { %v6238_v47 = vadd.f32 %v6237_v37, %v6236_v38  ;;  %v6244_v3 = vadd.f32 %v6243_v61, %v6242_v49  ;;  %v6451_v14 = vadd.f32 %v6450_v24, %v6449_v15  ;;  %v6457_v48 = vadd.f32 %v6456_v22, %v6455_v19  ;;  %v14637_v49 = vld [vmem:[#allocation124_spill] sm:$0xff]  ;;  %v14638_v15 = vld [vmem:[#allocation89_spill] sm:$0xff] }
 0x45a   : >> { %v6664_v8 = vadd.f32 %v6663_v58, %v6662_v60  ;;  %v6670_v26 = vadd.f32 %v6669_v11, %v6668_v44  ;;  %v6877_v17 = vadd.f32 %v6876_v33, %v6875_v45  ;;  %v6883_v41 = vadd.f32 %v6882_v9, %v6881_v59  ;;  %v14639_v44 = vld [vmem:[#allocation90_spill] sm:$0xff]  ;;  %v14640_v59 = vld [vmem:[#allocation91_spill] sm:$0xff]  ;;  %v14641_v61 = vld [vmem:[#allocation92_spill] sm:$0xff] }
 0x45b   : >> { %v6923_v16 = vsel %vm6922_vm7, %v13261_v0, %v14626_v35  ;;  %v6931_v53 = vsel %vm6922_vm7, %v13263_v25, %v14627_v29  ;;  %v6956_v34 = vsel %vm6922_vm7, %v13265_v55, %v14628_v4  ;;  %v6963_v10 = vsel %vm6922_vm7, %v13267_v20, %v14629_v51  ;;  %v14642_v22 = vld [vmem:[#allocation93_spill] sm:$0xff]  ;;  %v14643_v11 = vld [vmem:[#allocation34_spill] sm:$0xff] }
 0x45c   : >> { %v6925_v42 = vsel %vm6924_vm8, %v13181_v27, %v6923_v16  ;;  %v6932_v32 = vsel %vm6924_vm8, %v13183_v6, %v6931_v53  ;;  %v6957_v0 = vsel %vm6924_vm8, %v13185_v31, %v6956_v34  ;;  %v6964_v25 = vsel %vm6924_vm8, %v13187_v21, %v6963_v10  ;;  %v14644_v9 = vld [vmem:[#allocation33_spill] sm:$0xff]  ;;  %v14650_v16 = vld [vmem:[#allocation27_spill] sm:$0xff]  ;;  %v14653_v34 = vld [vmem:[#allocation24_spill] sm:$0xff] }
 0x45d   : >> { %v6988_v55 = vsel %vm6922_vm7, %v13269_v7, %v14630_v1  ;;  %v6995_v20 = vsel %vm6922_vm7, %v13271_v63, %v14631_v40  ;;  %v7020_v27 = vsel %vm6922_vm7, %v13273_v28, %v14632_v54  ;;  %v7027_v6 = vsel %vm6922_vm7, %v13275_v62, %v14633_v36  ;;  %v14636_v28 = vld [vmem:[#allocation123_spill] sm:$0xff]  ;;  %v14652_v29 = vld [vmem:[#allocation25_spill] sm:$0xff] }
 0x45e   : >> { %v6989_v31 = vsel %vm6924_vm8, %v13189_v18, %v6988_v55  ;;  %v6996_v21 = vsel %vm6924_vm8, %v13191_v46, %v6995_v20  ;;  %v7021_v7 = vsel %vm6924_vm8, %v13193_v50, %v7020_v27  ;;  %v7028_v63 = vsel %vm6924_vm8, %v14634_v39, %v7027_v6  ;;  %v14654_v10 = vld [vmem:[#allocation23_spill] sm:$0xff]  ;;  %v14656_v1 = vld [vmem:[#allocation21_spill] sm:$0xff] }
 0x45f   : >> { %v7052_v23 = vsel %vm6922_vm7, %v6238_v47, %v14635_v56  ;;  %v7059_v38 = vsel %vm6922_vm7, %v6244_v3, %v14636_v28  ;;  %v7084_v62 = vsel %vm6922_vm7, %v6451_v14, %v14637_v49  ;;  %v7091_v18 = vsel %vm6922_vm7, %v6457_v48, %v14638_v15  ;;  %v14645_v3 = vld [vmem:[#allocation32_spill] sm:$0xff]  ;;  %v14646_v48 = vld [vmem:[#allocation31_spill] sm:$0xff]  ;;  %v7176_v6 = vld [vmem:[#allocation2] sm:$0xff] (%p13394_p5) }
 0x460   : >> { %v7053_v46 = vsel %vm6924_vm8, %v13221_v13, %v7052_v23  ;;  %v7060_v50 = vsel %vm6924_vm8, %v13223_v5, %v7059_v38  ;;  %v7085_v19 = vsel %vm6924_vm8, %v13225_v52, %v7084_v62  ;;  %v7092_v60 = vsel %vm6924_vm8, %v13227_v2, %v7091_v18  ;;  %v14659_v20 = vld [vmem:[#allocation19_spill] sm:$0xff]  ;;  %v7178_v38 = vld [vmem:[#allocation2 + $0x18] sm:$0xff] (%p13394_p5)  ;;  %v7180_v62 = vld [vmem:[#allocation2 + $0x68] sm:$0xff] (%p13394_p5) }
 0x461   : >> { %v7116_v45 = vsel %vm6922_vm7, %v6664_v8, %v14639_v44  ;;  %v7123_v37 = vsel %vm6922_vm7, %v6670_v26, %v14640_v59  ;;  %v7148_v24 = vsel %vm6922_vm7, %v6877_v17, %v14641_v61  ;;  %v7155_v13 = vsel %vm6922_vm7, %v6883_v41, %v14642_v22  ;;  %v14647_v26 = vld [vmem:[#allocation30_spill] sm:$0xff]  ;;  %v14649_v17 = vld [vmem:[#allocation28_spill] sm:$0xff]  ;;  %v7175_v36 = vld [vmem:[#allocation2 + $0x30] sm:$0xff] (%p13394_p5) }
 0x462   : >> { %v7117_v5 = vsel %vm6924_vm8, %v13229_v57, %v7116_v45  ;;  %v7124_v52 = vsel %vm6924_vm8, %v13231_v43, %v7123_v37  ;;  %v7149_v2 = vsel %vm6924_vm8, %v13233_v30, %v7148_v24  ;;  %v7156_v58 = vsel %vm6924_vm8, %v13235_v12, %v7155_v13  ;;  %v14648_v57 = vld [vmem:[#allocation29_spill] sm:$0xff]  ;;  %v14651_v30 = vld [vmem:[#allocation26_spill] sm:$0xff]  ;;  %v7179_v49 = vld [vmem:[#allocation2 + $0x50] sm:$0xff] (%p13394_p5) }
 0x463   : >> { %v7159_v33 = vadd.f32 %v14643_v11, %v6925_v42   ;;  %v7160_v47 = vadd.f32 %v14644_v9, %v6932_v32   ;;  %v7161_v14 = vadd.f32 %v14645_v3, %v6957_v0   ;;  %v7162_v8 = vadd.f32 %v14646_v48, %v6964_v25   ;;  %v14655_v32 = vld [vmem:[#allocation22_spill] sm:$0xff]  ;;  %v14657_v25 = vld [vmem:[#allocation20_spill] sm:$0xff]  ;;  %v7183_v45 = vld [vmem:[#allocation2 + $0x40] sm:$0xff] (%p13394_p5) }
 0x464   : >> { %v7163_v41 = vadd.f32 %v14647_v26, %v6989_v31   ;;  %v7164_v35 = vadd.f32 %v14648_v57, %v6996_v21   ;;  %v7165_v43 = vadd.f32 %v14649_v17, %v7021_v7   ;;  %v7166_v53 = vadd.f32 %v14650_v16, %v7028_v63   ;;  %v7177_v7 = vld [vmem:[#allocation2 + $0x58] sm:$0xff] (%p13394_p5)  ;;  %v7184_v37 = vld [vmem:[#allocation2 + $0x20] sm:$0xff] (%p13394_p5)  ;;  %v7188_v61 = vld [vmem:[#allocation2 + $0x70] sm:$0xff] (%p13394_p5) }
 0x465   : >> { %v7167_v4 = vadd.f32 %v14651_v30, %v7053_v46   ;;  %v7168_v12 = vadd.f32 %v14652_v29, %v7060_v50   ;;  %v7169_v51 = vadd.f32 %v14653_v34, %v7085_v19   ;;  %v7170_v42 = vadd.f32 %v14654_v10, %v7092_v60   ;;  %v7181_v46 = vld [vmem:[#allocation2 + $0x8] sm:$0xff] (%p13394_p5) }
 0x466   : >> { %v7171_v0 = vadd.f32 %v14655_v32, %v7117_v5   ;;  %v7172_v55 = vadd.f32 %v14656_v1, %v7124_v52   ;;  %v13388_v18 = vadd.f32 %v14657_v25, %v7149_v2   ;;  %v13391_v17 = vadd.f32 %v14659_v20, %v7156_v58   ;;  %v7182_v60 = vld [vmem:[#allocation2 + $0x48] sm:$0xff] (%p13394_p5) }
 0x467   : >> { %v14666_v21 = vmov %v7170_v42  ;;  %v14667_v22 = vmov %v7169_v51  ;;  %v14668_v23 = vmov %v7168_v12  ;;  %v14669_v24 = vmov %v7167_v4  ;;  %5050 = sbr.rel (!%p13394_p5) target bundleno = 510 (0x1fe), region = 225  ;;  %v7190_v5 = vld [vmem:[#allocation2 + $0x28] sm:$0xff] (%p13394_p5) }
 0x468   : >> { %v14658_v40 = vmov %v13388_v18  ;;  %v14660_v54 = vmov %v13391_v17  ;;  %v14664_v19 = vmov %v7172_v55  ;;  %v14665_v20 = vmov %v7171_v0  ;;  %v7186_v23 = vld [vmem:[#allocation2 + $0x38] sm:$0xff] (%p13394_p5) }
 0x469   : >> { %v14662_v17 = vmov %v14660_v54  ;;  %v14663_v18 = vmov %v14658_v40  ;;  %v14670_v25 = vmov %v7166_v53  ;;  %v14671_v26 = vmov %v7165_v43  ;;  %v7189_v22 = vld [vmem:[#allocation2 + $0x78] sm:$0xff] (%p13394_p5) }
 0x46a   : >> { %v14672_v27 = vmov %v7164_v35  ;;  %v14673_v28 = vmov %v7163_v41  ;;  %v14674_v29 = vmov %v7162_v8  ;;  %v14675_v30 = vmov %v7161_v14  ;;  %v7187_v18 = vld [vmem:[#allocation2 + $0x60] sm:$0xff] (%p13394_p5) }
 0x46b   : >> { %v14676_v31 = vmov %v7160_v47  ;;  %v14677_v32 = vmov %v7159_v33  ;;  %v7191_v39 = vadd.f32 (%p13394_p5), %v7175_v36, %v7159_v33  ;;  %v7192_v63 = vadd.f32 (%p13394_p5), %v7176_v6, %v7160_v47 }
 0x46c   : > { %v7193_v56 = vadd.f32 %v7177_v7, %v7161_v14  ;;  %v7194_v15 = vadd.f32 %v7178_v38, %v7162_v8  ;;  %v7195_v50 = vadd.f32 %v7179_v49, %v7163_v41  ;;  %v7196_v44 = vadd.f32 %v7180_v62, %v7164_v35  ;;  %v7185_v31 = vld [vmem:[#allocation2 + $0x10] sm:$0xff]  ;;  %s14678_s10 = scalar_lea.vmem (!%p8975_p6), [#allocation4], %s10966_s29 }
 0x46d   : > { %7207 = vst [vmem:[#allocation2 + $0x30] sm:$0xff] %v7191_v39  ;;  %v7197_v59 = vadd.f32 %v7181_v46, %v7165_v43  ;;  %v7198_v27 = vadd.f32 %v7182_v60, %v7166_v53  ;;  %v7199_v21 = vadd.f32 %v7183_v45, %v7167_v4  ;;  %v7200_v28 = vadd.f32 %v7184_v37, %v7168_v12 }
 0x46e   : > { %7208 = vst [vmem:[#allocation2] sm:$0xff] %v7192_v63  ;;  %v7201_v19 = vadd.f32 %v7185_v31, %v7169_v51  ;;  %v7202_v24 = vadd.f32 %v7186_v23, %v7170_v42  ;;  %v7203_v13 = vadd.f32 %v7187_v18, %v7171_v0  ;;  %v7204_v52 = vadd.f32 %v7188_v61, %v7172_v55 }
 0x46f   : > { %7209 = vst [vmem:[#allocation2 + $0x58] sm:$0xff] %v7193_v56  ;;  %v7205_v2 = vadd.f32 %v7189_v22, %v14658_v40  ;;  %v7206_v58 = vadd.f32 %v7190_v5, %v14660_v54 }
 0x470   : > { %7210 = vst [vmem:[#allocation2 + $0x18] sm:$0xff] %v7194_v15 }
 0x471   : > { %7211 = vst [vmem:[#allocation2 + $0x50] sm:$0xff] %v7195_v50 }
 0x472   : > { %7212 = vst [vmem:[#allocation2 + $0x68] sm:$0xff] %v7196_v44 }
 0x473   : > { %7213 = vst [vmem:[#allocation2 + $0x8] sm:$0xff] %v7197_v59 }
 0x474   : > { %7214 = vst [vmem:[#allocation2 + $0x48] sm:$0xff] %v7198_v27 }
 0x475   : > { %7215 = vst [vmem:[#allocation2 + $0x40] sm:$0xff] %v7199_v21 }
 0x476   : > { %7216 = vst [vmem:[#allocation2 + $0x20] sm:$0xff] %v7200_v28 }
 0x477   : > { %7217 = vst [vmem:[#allocation2 + $0x10] sm:$0xff] %v7201_v19 }
 0x478   : > { %7218 = vst [vmem:[#allocation2 + $0x38] sm:$0xff] %v7202_v24  ;;  %7226 = sbr.rel (%p8975_p6) target bundleno = 1420 (0x58c), region = 119 }
 0x479   : > { %7219 = vst [vmem:[#allocation2 + $0x60] sm:$0xff] %v7203_v13 }
 0x47a   : > { %7220 = vst [vmem:[#allocation2 + $0x70] sm:$0xff] %v7204_v52 }
 0x47b   : > { %7221 = vst [vmem:[#allocation2 + $0x78] sm:$0xff] %v7205_v2 }
 0x47c   : > { %7222 = vst [vmem:[#allocation2 + $0x28] sm:$0xff] %v7206_v58 }
 0x47d   : > { %v9542_v11 = vld [vmem:[%s13928_s2 + $0x38] sm:$0xff]  ;;  %v9541_v3 = vld [vmem:[%s13928_s2 + $0x30] sm:$0xff]  ;;  %v9540_v26 = vld [vmem:[%s13928_s2 + $0x28] sm:$0xff] }
 0x47e   : > { %v9550_v33 = vld [vmem:[%s13928_s2 + $0x78] sm:$0xff]  ;;  %8287 = vmatpush.bf16.msra.mxu0 %v9542_v11  ;;  %v9549_v14 = vld [vmem:[%s13928_s2 + $0x70] sm:$0xff]  ;;  %v9548_v41 = vld [vmem:[%s13928_s2 + $0x68] sm:$0xff] }
 0x47f   : > { %v9558_v9 = vld [vmem:[%s13928_s2 + $0xb8] sm:$0xff]  ;;  %8300 = vmatpush.bf16.msra.mxu1 %v9550_v33  ;;  %v9557_v48 = vld [vmem:[%s13928_s2 + $0xb0] sm:$0xff]  ;;  %v9556_v57 = vld [vmem:[%s13928_s2 + $0xa8] sm:$0xff] }
 0x480   : > { %v9566_v47 = vld [vmem:[%s13928_s2 + $0xf8] sm:$0xff]  ;;  %8313 = vmatpush.bf16.msra.mxu2 %v9558_v9  ;;  %v9565_v8 = vld [vmem:[%s13928_s2 + $0xf0] sm:$0xff]  ;;  %v9564_v35 = vld [vmem:[%s13928_s2 + $0xe8] sm:$0xff] }
 0x481   : > { %8326 = vmatpush.bf16.msra.mxu3 %v9566_v47  ;;  %v9539_v17 = vld [vmem:[%s13928_s2 + $0x20] sm:$0xff]  ;;  %v9538_v30 = vld [vmem:[%s13928_s2 + $0x18] sm:$0xff]  ;;  %v9537_v34 = vld [vmem:[%s13928_s2 + $0x10] sm:$0xff] }
 0x482   : > { %8288 = vmatpush.bf16.msra.mxu0 %v9541_v3  ;;  %v9547_v43 = vld [vmem:[%s13928_s2 + $0x60] sm:$0xff]  ;;  %v9546_v4 = vld [vmem:[%s13928_s2 + $0x58] sm:$0xff]  ;;  %v9545_v51 = vld [vmem:[%s13928_s2 + $0x50] sm:$0xff] }
 0x483   : > { %8301 = vmatpush.bf16.msra.mxu1 %v9549_v14  ;;  %v9555_v16 = vld [vmem:[%s13928_s2 + $0xa0] sm:$0xff]  ;;  %v9554_v29 = vld [vmem:[%s13928_s2 + $0x98] sm:$0xff]  ;;  %v9553_v10 = vld [vmem:[%s13928_s2 + $0x90] sm:$0xff] }
 0x484   : > { %8314 = vmatpush.bf16.msra.mxu2 %v9557_v48  ;;  %v9563_v53 = vld [vmem:[%s13928_s2 + $0xe0] sm:$0xff]  ;;  %v9562_v12 = vld [vmem:[%s13928_s2 + $0xd8] sm:$0xff]  ;;  %v9561_v42 = vld [vmem:[%s13928_s2 + $0xd0] sm:$0xff] }
 0x485   : > { %8327 = vmatpush.bf16.msra.mxu3 %v9565_v8  ;;  %v9536_v32 = vld [vmem:[%s13928_s2 + $0x8] sm:$0xff]  ;;  %v9535_v25 = vld [vmem:[%s13928_s2] sm:$0xff]  ;;  %v9574_v36 = vld [vmem:[%s13928_s2 + $0x138] sm:$0xff] }
 0x486   : > { %8289 = vmatpush.bf16.msra.mxu0 %v9540_v26  ;;  %v9544_v0 = vld [vmem:[%s13928_s2 + $0x48] sm:$0xff]  ;;  %v9543_v40 = vld [vmem:[%s13928_s2 + $0x40] sm:$0xff]  ;;  %v7229_v6 = vld [vmem:[#allocation2 + $0x58] sm:$0xff] }
 0x487   : > { %8302 = vmatpush.bf16.msra.mxu1 %v9548_v41  ;;  %v9552_v1 = vld [vmem:[%s13928_s2 + $0x88] sm:$0xff]  ;;  %v9551_v20 = vld [vmem:[%s13928_s2 + $0x80] sm:$0xff]  ;;  %v7227_v7 = vld [vmem:[#allocation2 + $0x30] sm:$0xff]  ;;  %v7245_v62 = vpack.c.bf16 %v7229_v6, %v7229_v6 }
 0x488   : > { %8315 = vmatpush.bf16.msra.mxu2 %v9556_v57  ;;  %v9560_v55 = vld [vmem:[%s13928_s2 + $0xc8] sm:$0xff]  ;;  %v9559_v54 = vld [vmem:[%s13928_s2 + $0xc0] sm:$0xff]  ;;  %v9582_v39 = vld [vmem:[%s13928_s2 + $0x178] sm:$0xff]  ;;  %v7243_v15 = vpack.c.bf16 %v7227_v7, %v7227_v7 }
 0x489   : > { %8328 = vmatpush.bf16.msra.mxu3 %v9564_v35  ;;  %v7230_v63 = vld [vmem:[#allocation2 + $0x18] sm:$0xff]  ;;  %v7228_v56 = vld [vmem:[#allocation2] sm:$0xff]  ;;  %v9573_v60 = vld [vmem:[%s13928_s2 + $0x130] sm:$0xff] }
 0x48a   : > { %8290 = vmatpush.bf16.msra.mxu0 %v9539_v17  ;;  %v9590_v38 = vld [vmem:[%s13928_s2 + $0x1b8] sm:$0xff]  ;;  %v7246_v46 = vpack.c.bf16 %v7230_v63, %v7230_v63  ;;  %v7244_v50 = vpack.c.bf16 %v7228_v56, %v7228_v56  ;;  %v9581_v44 = vld [vmem:[%s13928_s2 + $0x170] sm:$0xff]  ;;  %v9572_v37 = vld [vmem:[%s13928_s2 + $0x128] sm:$0xff] }
 0x48b   : > { %8303 = vmatpush.bf16.msra.mxu1 %v9547_v43  ;;  %v9598_v49 = vld [vmem:[%s13928_s2 + $0x1f8] sm:$0xff]  ;;  %v9589_v45 = vld [vmem:[%s13928_s2 + $0x1b0] sm:$0xff]  ;;  %v9580_v27 = vld [vmem:[%s13928_s2 + $0x168] sm:$0xff] }
 0x48c   : > { %8316 = vmatpush.bf16.msra.mxu2 %v9555_v16  ;;  %v9597_v59 = vld [vmem:[%s13928_s2 + $0x1f0] sm:$0xff]  ;;  %v9588_v31 = vld [vmem:[%s13928_s2 + $0x1a8] sm:$0xff]  ;;  %v9571_v23 = vld [vmem:[%s13928_s2 + $0x120] sm:$0xff] }
 0x48d   : > { %8329 = vmatpush.bf16.msra.mxu3 %v9563_v53  ;;  %v9596_v21 = vld [vmem:[%s13928_s2 + $0x1e8] sm:$0xff]  ;;  %v9579_v28 = vld [vmem:[%s13928_s2 + $0x160] sm:$0xff]  ;;  %v9570_v61 = vld [vmem:[%s13928_s2 + $0x118] sm:$0xff] }
 0x48e   : > { %8291 = vmatpush.bf16.msra.mxu0 %v9538_v30  ;;  %v9587_v18 = vld [vmem:[%s13928_s2 + $0x1a0] sm:$0xff]  ;;  %v9578_v24 = vld [vmem:[%s13928_s2 + $0x158] sm:$0xff]  ;;  %v9569_v5 = vld [vmem:[%s13928_s2 + $0x110] sm:$0xff] }
 0x48f   : > { %8304 = vmatpush.bf16.msra.mxu1 %v9546_v4  ;;  %v9595_v19 = vld [vmem:[%s13928_s2 + $0x1e0] sm:$0xff]  ;;  %v9586_v22 = vld [vmem:[%s13928_s2 + $0x198] sm:$0xff]  ;;  %v9577_v52 = vld [vmem:[%s13928_s2 + $0x150] sm:$0xff] }
 0x490   : > { %8317 = vmatpush.bf16.msra.mxu2 %v9554_v29  ;;  %v9594_v13 = vld [vmem:[%s13928_s2 + $0x1d8] sm:$0xff]  ;;  %v9585_v2 = vld [vmem:[%s13928_s2 + $0x190] sm:$0xff]  ;;  %v9568_v11 = vld [vmem:[%s13928_s2 + $0x108] sm:$0xff] }
 0x491   : > { %8330 = vmatpush.bf16.msra.mxu3 %v9562_v12  ;;  %v9593_v58 = vld [vmem:[%s13928_s2 + $0x1d0] sm:$0xff]  ;;  %v9576_v33 = vld [vmem:[%s13928_s2 + $0x148] sm:$0xff]  ;;  %v9567_v3 = vld [vmem:[%s13928_s2 + $0x100] sm:$0xff] }
 0x492   : > { %8292 = vmatpush.bf16.msra.mxu0 %v9537_v34  ;;  %v9584_v9 = vld [vmem:[%s13928_s2 + $0x188] sm:$0xff]  ;;  %v9575_v14 = vld [vmem:[%s13928_s2 + $0x140] sm:$0xff]  ;;  %v9606_v26 = vld [vmem:[%s13928_s2 + $0x238] sm:$0xff] }
 0x493   : > { %8305 = vmatpush.bf16.msra.mxu1 %v9545_v51  ;;  %v9592_v47 = vld [vmem:[%s13928_s2 + $0x1c8] sm:$0xff]  ;;  %v9583_v48 = vld [vmem:[%s13928_s2 + $0x180] sm:$0xff]  ;;  %v7231_v57 = vld [vmem:[#allocation2 + $0x50] sm:$0xff] }
 0x494   : > { %8318 = vmatpush.bf16.msra.mxu2 %v9553_v10  ;;  %v9591_v8 = vld [vmem:[%s13928_s2 + $0x1c0] sm:$0xff]  ;;  %v7233_v41 = vld [vmem:[#allocation2 + $0x8] sm:$0xff]  ;;  %v9614_v35 = vld [vmem:[%s13928_s2 + $0x278] sm:$0xff]  ;;  %v7247_v4 = vpack.c.bf16 %v7231_v57, %v7231_v57 }
 0x495   : > { %8331 = vmatpush.bf16.msra.mxu3 %v9561_v42  ;;  %v7234_v17 = vld [vmem:[#allocation2 + $0x48] sm:$0xff]  ;;  %v9622_v16 = vld [vmem:[%s13928_s2 + $0x2b8] sm:$0xff]  ;;  %v7249_v30 = vpack.c.bf16 %v7233_v41, %v7233_v41  ;;  %v9605_v34 = vld [vmem:[%s13928_s2 + $0x230] sm:$0xff] }
 0x496   : > { %8293 = vmatpush.bf16.msra.mxu0 %v9536_v32  ;;  %v7232_v43 = vld [vmem:[#allocation2 + $0x68] sm:$0xff]  ;;  %v9630_v53 = vld [vmem:[%s13928_s2 + $0x2f8] sm:$0xff]  ;;  %v7250_v29 = vpack.c.bf16 %v7234_v17, %v7234_v17  ;;  %v9613_v51 = vld [vmem:[%s13928_s2 + $0x270] sm:$0xff] }
 0x497   : > { %8306 = vmatpush.bf16.msra.mxu1 %v9544_v0  ;;  %v7248_v12 = vpack.c.bf16 %v7232_v43, %v7232_v43  ;;  %v9621_v10 = vld [vmem:[%s13928_s2 + $0x2b0] sm:$0xff]  ;;  %v9604_v32 = vld [vmem:[%s13928_s2 + $0x228] sm:$0xff]  ;;  %v9610_v6 = vld [vmem:[%s13928_s2 + $0x258] sm:$0xff] }
 0x498   : > { %8319 = vmatpush.bf16.msra.mxu2 %v9552_v1  ;;  %v9629_v42 = vld [vmem:[%s13928_s2 + $0x2f0] sm:$0xff]  ;;  %v9612_v0 = vld [vmem:[%s13928_s2 + $0x268] sm:$0xff]  ;;  %v9618_v7 = vld [vmem:[%s13928_s2 + $0x298] sm:$0xff] }
 0x499   : > { %8332 = vmatpush.bf16.msra.mxu3 %v9560_v55  ;;  %v9620_v1 = vld [vmem:[%s13928_s2 + $0x2a8] sm:$0xff]  ;;  %v9601_v63 = vld [vmem:[%s13928_s2 + $0x210] sm:$0xff]  ;;  %v9642_v41 = vld [vmem:[%s13928_s2 + $0x358] sm:$0xff] }
 0x49a   : > { %8294 = vmatpush.bf16.msra.mxu0 %v9535_v25  ;;  %v9628_v55 = vld [vmem:[%s13928_s2 + $0x2e8] sm:$0xff]  ;;  %v9603_v25 = vld [vmem:[%s13928_s2 + $0x220] sm:$0xff]  ;;  %v9609_v56 = vld [vmem:[%s13928_s2 + $0x250] sm:$0xff] }
 0x49b   : > { %8307 = vmatpush.bf16.msra.mxu1 %v9543_v40  ;;  %v9611_v40 = vld [vmem:[%s13928_s2 + $0x260] sm:$0xff]  ;;  %v9650_v57 = vld [vmem:[%s13928_s2 + $0x398] sm:$0xff]  ;;  %v9633_v17 = vld [vmem:[%s13928_s2 + $0x310] sm:$0xff] }
 0x49c   : > { %8320 = vmatpush.bf16.msra.mxu2 %v9551_v20  ;;  %v9619_v20 = vld [vmem:[%s13928_s2 + $0x2a0] sm:$0xff]  ;;  %v9641_v43 = vld [vmem:[%s13928_s2 + $0x350] sm:$0xff] }
 0x49d   : > { %8333 = vmatpush.bf16.msra.mxu3 %v9559_v54  ;;  %8295 = vmatmul.bf16.vlgmr.msra.gmra.mxu0 %v7243_v15  ;;  %v9627_v54 = vld [vmem:[%s13928_s2 + $0x2e0] sm:$0xff]  ;;  %v9608_v15 = vld [vmem:[%s13928_s2 + $0x248] sm:$0xff] }
 0x49e   : > { %8339 = vmatpush.bf16.msrb.mxu0 %v9574_v36  ;;  %8308 = vmatmul.bf16.vlgmr.msra.gmra.mxu1 %v7244_v50  ;;  %v9602_v36 = vld [vmem:[%s13928_s2 + $0x218] sm:$0xff]  ;;  %v9624_v50 = vld [vmem:[%s13928_s2 + $0x2c8] sm:$0xff] }
 0x49f   : > { %8352 = vmatpush.bf16.msrb.mxu1 %v9582_v39  ;;  %8321 = vmatmul.bf16.vlgmr.msra.gmra.mxu2 %v7245_v62  ;;  %v9626_v39 = vld [vmem:[%s13928_s2 + $0x2d8] sm:$0xff]  ;;  %v9600_v62 = vld [vmem:[%s13928_s2 + $0x208] sm:$0xff] }
 0x4a0   : > { %8365 = vmatpush.bf16.msrb.mxu2 %v9590_v38  ;;  %8334 = vmatmul.bf16.vlgmr.msra.gmra.mxu3 %v7246_v46  ;;  %v9617_v38 = vld [vmem:[%s13928_s2 + $0x290] sm:$0xff]  ;;  %v9616_v46 = vld [vmem:[%s13928_s2 + $0x288] sm:$0xff] }
 0x4a1   : > { %8378 = vmatpush.bf16.msrb.mxu3 %v9598_v49  ;;  %v9625_v49 = vld [vmem:[%s13928_s2 + $0x2d0] sm:$0xff] }
 0x4a2   : > { %8340 = vmatpush.bf16.msrb.mxu0 %v9573_v60  ;;  %v9599_v60 = vld [vmem:[%s13928_s2 + $0x200] sm:$0xff] }
 0x4a3   : > { %8353 = vmatpush.bf16.msrb.mxu1 %v9581_v44  ;;  %v9607_v44 = vld [vmem:[%s13928_s2 + $0x240] sm:$0xff] }
 0x4a4   : > { %8366 = vmatpush.bf16.msrb.mxu2 %v9589_v45  ;;  %v9615_v45 = vld [vmem:[%s13928_s2 + $0x280] sm:$0xff] }
 0x4a5   : > { %8379 = vmatpush.bf16.msrb.mxu3 %v9597_v59  ;;  %v9623_v59 = vld [vmem:[%s13928_s2 + $0x2c0] sm:$0xff] }
 0x4a6   : > { %8341 = vmatpush.bf16.msrb.mxu0 %v9572_v37  ;;  %v9638_v37 = vld [vmem:[%s13928_s2 + $0x338] sm:$0xff] }
 0x4a7   : > { %8354 = vmatpush.bf16.msrb.mxu1 %v9580_v27  ;;  %v7235_v27 = vld [vmem:[#allocation2 + $0x40] sm:$0xff] }
 0x4a8   : > { %8367 = vmatpush.bf16.msrb.mxu2 %v9588_v31  ;;  %v7237_v31 = vld [vmem:[#allocation2 + $0x10] sm:$0xff] }
 0x4a9   : > { %8380 = vmatpush.bf16.msrb.mxu3 %v9596_v21  ;;  %v9646_v21 = vld [vmem:[%s13928_s2 + $0x378] sm:$0xff] }
 0x4aa   : > { %8342 = vmatpush.bf16.msrb.mxu0 %v9571_v23  ;;  %v7236_v23 = vld [vmem:[#allocation2 + $0x20] sm:$0xff] }
 0x4ab   : > { %8355 = vmatpush.bf16.msrb.mxu1 %v9579_v28  ;;  %v7238_v28 = vld [vmem:[#allocation2 + $0x38] sm:$0xff] }
 0x4ac   : > { %8368 = vmatpush.bf16.msrb.mxu2 %v9587_v18  ;;  %v9654_v18 = vld [vmem:[%s13928_s2 + $0x3b8] sm:$0xff] }
 0x4ad   : > { %8381 = vmatpush.bf16.msrb.mxu3 %v9595_v19  ;;  %v9662_v19 = vld [vmem:[%s13928_s2 + $0x3f8] sm:$0xff] }
 0x4ae   : > { %8343 = vmatpush.bf16.msrb.mxu0 %v9570_v61  ;;  %v7251_v61 = vpack.c.bf16 %v7235_v27, %v7235_v27 }
 0x4af   : > { %8356 = vmatpush.bf16.msrb.mxu1 %v9578_v24  ;;  %v7253_v24 = vpack.c.bf16 %v7237_v31, %v7237_v31 }
 0x4b0   : > { %8369 = vmatpush.bf16.msrb.mxu2 %v9586_v22  ;;  %v7252_v22 = vpack.c.bf16 %v7236_v23, %v7236_v23 }
 0x4b1   : > { %8382 = vmatpush.bf16.msrb.mxu3 %v9594_v13  ;;  %v7254_v13 = vpack.c.bf16 %v7238_v28, %v7238_v28 }
 0x4b2   : > { %8344 = vmatpush.bf16.msrb.mxu0 %v9569_v5  ;;  %v9637_v5 = vld [vmem:[%s13928_s2 + $0x330] sm:$0xff] }
 0x4b3   : > { %8357 = vmatpush.bf16.msrb.mxu1 %v9577_v52  ;;  %v9645_v52 = vld [vmem:[%s13928_s2 + $0x370] sm:$0xff] }
 0x4b4   : > { %8370 = vmatpush.bf16.msrb.mxu2 %v9585_v2  ;;  %v9653_v2 = vld [vmem:[%s13928_s2 + $0x3b0] sm:$0xff] }
 0x4b5   : > { %8383 = vmatpush.bf16.msrb.mxu3 %v9593_v58  ;;  %v9661_v58 = vld [vmem:[%s13928_s2 + $0x3f0] sm:$0xff] }
 0x4b6   : > { %8345 = vmatpush.bf16.msrb.mxu0 %v9568_v11  ;;  %v9636_v11 = vld [vmem:[%s13928_s2 + $0x328] sm:$0xff] }
 0x4b7   : > { %8358 = vmatpush.bf16.msrb.mxu1 %v9576_v33  ;;  %v9644_v33 = vld [vmem:[%s13928_s2 + $0x368] sm:$0xff] }
 0x4b8   : > { %8371 = vmatpush.bf16.msrb.mxu2 %v9584_v9  ;;  %v9652_v9 = vld [vmem:[%s13928_s2 + $0x3a8] sm:$0xff] }
 0x4b9   : > { %8384 = vmatpush.bf16.msrb.mxu3 %v9592_v47  ;;  %v9660_v47 = vld [vmem:[%s13928_s2 + $0x3e8] sm:$0xff] }
 0x4ba   : > { %8346 = vmatpush.bf16.msrb.mxu0 %v9567_v3  ;;  %v9635_v3 = vld [vmem:[%s13928_s2 + $0x320] sm:$0xff] }
 0x4bb   : > { %8359 = vmatpush.bf16.msrb.mxu1 %v9575_v14  ;;  %v9643_v14 = vld [vmem:[%s13928_s2 + $0x360] sm:$0xff] }
 0x4bc   : > { %8372 = vmatpush.bf16.msrb.mxu2 %v9583_v48  ;;  %v9651_v48 = vld [vmem:[%s13928_s2 + $0x3a0] sm:$0xff] }
 0x4bd   : > { %8385 = vmatpush.bf16.msrb.mxu3 %v9591_v8  ;;  %8347 = vmatmul.bf16.vlgmr.msrb.gmra.mxu0 %v7247_v4  ;;  %v9659_v8 = vld [vmem:[%s13928_s2 + $0x3e0] sm:$0xff]  ;;  %v9640_v4 = vld [vmem:[%s13928_s2 + $0x348] sm:$0xff] }
 0x4be   : > { %8391 = vmatpush.bf16.msra.mxu0 %v9606_v26  ;;  %8360 = vmatmul.bf16.vlgmr.msrb.gmra.mxu1 %v7248_v12  ;;  %v9634_v26 = vld [vmem:[%s13928_s2 + $0x318] sm:$0xff]  ;;  %v9656_v12 = vld [vmem:[%s13928_s2 + $0x3c8] sm:$0xff] }
 0x4bf   : > { %8404 = vmatpush.bf16.msra.mxu1 %v9614_v35  ;;  %8373 = vmatmul.bf16.vlgmr.msrb.gmra.mxu2 %v7249_v30  ;;  %v9658_v35 = vld [vmem:[%s13928_s2 + $0x3d8] sm:$0xff]  ;;  %v9632_v30 = vld [vmem:[%s13928_s2 + $0x308] sm:$0xff] }
 0x4c0   : > { %8417 = vmatpush.bf16.msra.mxu2 %v9622_v16  ;;  %8386 = vmatmul.bf16.vlgmr.msrb.gmra.mxu3 %v7250_v29  ;;  %v9649_v16 = vld [vmem:[%s13928_s2 + $0x390] sm:$0xff]  ;;  %v9648_v29 = vld [vmem:[%s13928_s2 + $0x388] sm:$0xff] }
 0x4c1   : > { %8430 = vmatpush.bf16.msra.mxu3 %v9630_v53  ;;  %v9657_v53 = vld [vmem:[%s13928_s2 + $0x3d0] sm:$0xff] }
 0x4c2   : > { %8392 = vmatpush.bf16.msra.mxu0 %v9605_v34  ;;  %v9631_v34 = vld [vmem:[%s13928_s2 + $0x300] sm:$0xff] }
 0x4c3   : > { %8405 = vmatpush.bf16.msra.mxu1 %v9613_v51  ;;  %v9639_v51 = vld [vmem:[%s13928_s2 + $0x340] sm:$0xff] }
 0x4c4   : > { %8418 = vmatpush.bf16.msra.mxu2 %v9621_v10  ;;  %v9647_v10 = vld [vmem:[%s13928_s2 + $0x380] sm:$0xff] }
 0x4c5   : > { %8431 = vmatpush.bf16.msra.mxu3 %v9629_v42  ;;  %v7239_v42 = vld [vmem:[#allocation2 + $0x60] sm:$0xff] }
 0x4c6   : > { %8393 = vmatpush.bf16.msra.mxu0 %v9604_v32  ;;  %v7240_v32 = vld [vmem:[#allocation2 + $0x70] sm:$0xff] }
 0x4c7   : > { %8406 = vmatpush.bf16.msra.mxu1 %v9612_v0  ;;  %v9655_v0 = vld [vmem:[%s13928_s2 + $0x3c0] sm:$0xff] }
 0x4c8   : > { %8419 = vmatpush.bf16.msra.mxu2 %v9620_v1  ;;  %v7241_v1 = vld [vmem:[#allocation2 + $0x78] sm:$0xff] }
 0x4c9   : > { %8432 = vmatpush.bf16.msra.mxu3 %v9628_v55  ;;  %v7242_v55 = vld [vmem:[#allocation2 + $0x28] sm:$0xff] }
 0x4ca   : > { %8394 = vmatpush.bf16.msra.mxu0 %v9603_v25  ;;  %v7255_v25 = vpack.c.bf16 %v7239_v42, %v7239_v42 }
 0x4cb   : > { %8407 = vmatpush.bf16.msra.mxu1 %v9611_v40  ;;  %v7256_v40 = vpack.c.bf16 %v7240_v32, %v7240_v32 }
 0x4cc   : > { %8420 = vmatpush.bf16.msra.mxu2 %v9619_v20  ;;  %v7257_v20 = vpack.c.bf16 %v7241_v1, %v7241_v1 }
 0x4cd   : > { %8433 = vmatpush.bf16.msra.mxu3 %v9627_v54  ;;  %v7258_v54 = vpack.c.bf16 %v7242_v55, %v7242_v55 }
 0x4ce   : > { %8395 = vmatpush.bf16.msra.mxu0 %v9602_v36  ;;  %v9971_v36 = vld [vmem:[%s13929_s3] ss:$0 sm:$0xff] }
 0x4cf   : > { %8408 = vmatpush.bf16.msra.mxu1 %v9610_v6 }
 0x4d0   : > { %8421 = vmatpush.bf16.msra.mxu2 %v9618_v7 }
 0x4d1   : > { %8434 = vmatpush.bf16.msra.mxu3 %v9626_v39 }
 0x4d2   : > { %8396 = vmatpush.bf16.msra.mxu0 %v9601_v63 }
 0x4d3   : > { %8409 = vmatpush.bf16.msra.mxu1 %v9609_v56 }
 0x4d4   : > { %8422 = vmatpush.bf16.msra.mxu2 %v9617_v38 }
 0x4d5   : > { %8435 = vmatpush.bf16.msra.mxu3 %v9625_v49 }
 0x4d6   : > { %8397 = vmatpush.bf16.msra.mxu0 %v9600_v62 }
 0x4d7   : > { %8410 = vmatpush.bf16.msra.mxu1 %v9608_v15 }
 0x4d8   : > { %8423 = vmatpush.bf16.msra.mxu2 %v9616_v46 }
 0x4d9   : > { %8436 = vmatpush.bf16.msra.mxu3 %v9624_v50 }
 0x4da   : > { %8398 = vmatpush.bf16.msra.mxu0 %v9599_v60 }
 0x4db   : > { %8411 = vmatpush.bf16.msra.mxu1 %v9607_v44 }
 0x4dc   : > { %8424 = vmatpush.bf16.msra.mxu2 %v9615_v45 }
 0x4dd   : > { %8437 = vmatpush.bf16.msra.mxu3 %v9623_v59  ;;  %8399 = vmatmul.bf16.vlgmr.msra.gmra.mxu0 %v7251_v61 }
 0x4de   : > { %8443 = vmatpush.bf16.msrb.mxu0 %v9638_v37  ;;  %8412 = vmatmul.bf16.vlgmr.msra.gmra.mxu1 %v7252_v22 }
 0x4df   : > { %8456 = vmatpush.bf16.msrb.mxu1 %v9646_v21  ;;  %8425 = vmatmul.bf16.vlgmr.msra.gmra.mxu2 %v7253_v24 }
 0x4e0   : > { %8469 = vmatpush.bf16.msrb.mxu2 %v9654_v18  ;;  %8438 = vmatmul.bf16.vlgmr.msra.gmra.mxu3 %v7254_v13 }
 0x4e1   : > { %8482 = vmatpush.bf16.msrb.mxu3 %v9662_v19 }
 0x4e2   : > { %8444 = vmatpush.bf16.msrb.mxu0 %v9637_v5 }
 0x4e3   : > { %8457 = vmatpush.bf16.msrb.mxu1 %v9645_v52 }
 0x4e4   : > { %8470 = vmatpush.bf16.msrb.mxu2 %v9653_v2 }
 0x4e5   : > { %8483 = vmatpush.bf16.msrb.mxu3 %v9661_v58 }
 0x4e6   : > { %8445 = vmatpush.bf16.msrb.mxu0 %v9636_v11 }
 0x4e7   : > { %8458 = vmatpush.bf16.msrb.mxu1 %v9644_v33 }
 0x4e8   : > { %8471 = vmatpush.bf16.msrb.mxu2 %v9652_v9 }
 0x4e9   : > { %8484 = vmatpush.bf16.msrb.mxu3 %v9660_v47 }
 0x4ea   : > { %8446 = vmatpush.bf16.msrb.mxu0 %v9635_v3 }
 0x4eb   : > { %8459 = vmatpush.bf16.msrb.mxu1 %v9643_v14 }
 0x4ec   : > { %8472 = vmatpush.bf16.msrb.mxu2 %v9651_v48 }
 0x4ed   : > { %8485 = vmatpush.bf16.msrb.mxu3 %v9659_v8 }
 0x4ee   : > { %8447 = vmatpush.bf16.msrb.mxu0 %v9634_v26 }
 0x4ef   : > { %8460 = vmatpush.bf16.msrb.mxu1 %v9642_v41 }
 0x4f0   : > { %8473 = vmatpush.bf16.msrb.mxu2 %v9650_v57 }
 0x4f1   : > { %8486 = vmatpush.bf16.msrb.mxu3 %v9658_v35 }
 0x4f2   : > { %8448 = vmatpush.bf16.msrb.mxu0 %v9633_v17 }
 0x4f3   : > { %8461 = vmatpush.bf16.msrb.mxu1 %v9641_v43 }
 0x4f4   : > { %8474 = vmatpush.bf16.msrb.mxu2 %v9649_v16 }
 0x4f5   : > { %8487 = vmatpush.bf16.msrb.mxu3 %v9657_v53 }
 0x4f6   : > { %8449 = vmatpush.bf16.msrb.mxu0 %v9632_v30 }
 0x4f7   : > { %8462 = vmatpush.bf16.msrb.mxu1 %v9640_v4 }
 0x4f8   : > { %8475 = vmatpush.bf16.msrb.mxu2 %v9648_v29 }
 0x4f9   : > { %8488 = vmatpush.bf16.msrb.mxu3 %v9656_v12 }
 0x4fa   : > { %8450 = vmatpush.bf16.msrb.mxu0 %v9631_v34 }
 0x4fb   : > { %8463 = vmatpush.bf16.msrb.mxu1 %v9639_v51 }
 0x4fc   : > { %8476 = vmatpush.bf16.msrb.mxu2 %v9647_v10 }
 0x4fd   : > { %8489 = vmatpush.bf16.msrb.mxu3 %v9655_v0  ;;  %8451 = vmatmul.bf16.vlgmr.msrb.gmra.mxu0 %v7255_v25 }
 0x4fe   : > { %8464 = vmatmul.bf16.vlgmr.msrb.gmra.mxu1 %v7256_v40 }
 0x4ff   : > { %8477 = vmatmul.bf16.vlgmr.msrb.gmra.mxu2 %v7257_v20 }
 0x500   : > { %8490 = vmatmul.bf16.vlgmr.msrb.gmra.mxu3 %v7258_v54 }
 0x51a   : > { %v8296_v6 = vpop.f32.mrf.mxu0 }
 0x51b   : > { %v8297_v7 = vadd.f32 %v9971_v36, %v8296_v6  ;;  %v8309_v39 = vpop.f32.mrf.mxu1 }
 0x51d   : > { %v8310_v63 = vadd.f32 %v8309_v39, %v8297_v7 }
 0x522   : > { %v8322_v56 = vpop.f32.mrf.mxu2  ;;  %v8298_v62 = vpop.f32.mrf.mxu0 }
 0x523   : > { %v8323_v38 = vadd.f32 %v8322_v56, %v8310_v63  ;;  %v8335_v49 = vpop.f32.mrf.mxu3  ;;  %v8311_v46 = vpop.f32.mrf.mxu1 }
 0x525   : > { %v8336_v15 = vadd.f32 %v8335_v49, %v8323_v38 }
 0x52a   : > { %v8324_v50 = vpop.f32.mrf.mxu2 }
 0x52b   : > { %v8337_v60 = vpop.f32.mrf.mxu3 }
 0x53a   : > { %v8348_v44 = vpop.f32.mrf.mxu0 }
 0x53b   : > { %v8361_v45 = vpop.f32.mrf.mxu1  ;;  %v8349_v19 = vadd.f32 %v8348_v44, %v8336_v15 }
 0x53d   : > { %v8362_v13 = vadd.f32 %v8361_v45, %v8349_v19 }
 0x542   : > { %v8374_v59 = vpop.f32.mrf.mxu2  ;;  %v8350_v27 = vpop.f32.mrf.mxu0 }
 0x543   : > { %v8387_v37 = vpop.f32.mrf.mxu3  ;;  %v8363_v31 = vpop.f32.mrf.mxu1  ;;  %v8375_v52 = vadd.f32 %v8374_v59, %v8362_v13 }
 0x545   : > { %v8388_v11 = vadd.f32 %v8387_v37, %v8375_v52 }
 0x54a   : > { %v8376_v21 = vpop.f32.mrf.mxu2 }
 0x54b   : > { %v8389_v23 = vpop.f32.mrf.mxu3 }
 0x55a   : > { %v8400_v28 = vpop.f32.mrf.mxu0 }
 0x55b   : > { %v8413_v18 = vpop.f32.mrf.mxu1  ;;  %v8401_v33 = vadd.f32 %v8400_v28, %v8388_v11 }
 0x55d   : > { %v8414_v9 = vadd.f32 %v8413_v18, %v8401_v33 }
 0x562   : > { %v8426_v61 = vpop.f32.mrf.mxu2  ;;  %v8402_v22 = vpop.f32.mrf.mxu0 }
 0x563   : > { %v8439_v24 = vpop.f32.mrf.mxu3  ;;  %v8415_v5 = vpop.f32.mrf.mxu1  ;;  %v8427_v47 = vadd.f32 %v8426_v61, %v8414_v9 }
 0x565   : > { %v8440_v3 = vadd.f32 %v8439_v24, %v8427_v47 }
 0x56a   : > { %v8428_v2 = vpop.f32.mrf.mxu2 }
 0x56b   : > { %v8441_v58 = vpop.f32.mrf.mxu3 }
 0x57a   : > { %v8452_v14 = vpop.f32.mrf.mxu0 }
 0x57b   : > { %v8465_v48 = vpop.f32.mrf.mxu1  ;;  %v8453_v8 = vadd.f32 %v8452_v14, %v8440_v3 }
 0x57d   : > { %v8466_v26 = vadd.f32 %v8465_v48, %v8453_v8 }
 0x582   : > { %v8478_v41 = vpop.f32.mrf.mxu2  ;;  %v8454_v17 = vpop.f32.mrf.mxu0 }
 0x583   : > { %v8491_v57 = vpop.f32.mrf.mxu3  ;;  %v8479_v35 = vadd.f32 %v8478_v41, %v8466_v26  ;;  %v8467_v43 = vpop.f32.mrf.mxu1 }
 0x585   : > { %v8492_v16 = vadd.f32 %v8491_v57, %v8479_v35 }
 0x587   : > { %8495 = vst [vmem:[%s14678_s10] sm:$0xff] %v8492_v16 }
 0x58a   : > { %v8480_v53 = vpop.f32.mrf.mxu2 }
 0x58b   : > { %v8493_v30 = vpop.f32.mrf.mxu3 }
 0x58c PF: > { %s14679_s17 = sadd.s32 4294967295, %s10210_s22   ;;  %s13833_s4 = sshll.u32 %s10198_s19, 3 }
 0x58d   : > { %s13830_s27 = sand.u32 1, %s14679_s17   ;;  %s8531_s25 = scalar_lea.hbm %s13935_s9, %s13833_s4 }
 0x58e   : > { %s8533_s30 = sshll.u32 %s4577_s13, 4  ;;  %s8535_s21 = sshll.u32 %s8531_s25, 4  ;;  %s8534_s30 = int_to_ptr.vmem [resolvable:$true] %s8533_s30  ;;  %s8536_s21 = int_to_ptr.hbm [resolvable:$true] %s8535_s21 }
 0x58f   : > { %s14043_s12 = scalar_lea.sflag [#allocation7], %s13830_s27  ;;  %s9986_s24 = sshra.s32 %s8536_s21, 4  ;;  %s9987_s24 = int_to_ptr.hbm [resolvable:$true] %s9986_s24 }
 0x590   : > { %s9988_s16 = scalar_lea.hbm %s9987_s24, 8  ;;  %s9992_s26 = scalar_lea.hbm %s13935_s9, 16 }
 0x591   : > { %p9989_p8 = scmp.ne.s32.totalorder %s9987_s24, %s9988_s16  ;;  %p9993_p11 = scmp.lt.s32.totalorder %s9987_s24, %s13935_s9 }
 0x592   : > { %p9994_p13 = scmp.lt.s32.totalorder %s9992_s26, %s9988_s16 }
 0x593   : > { %p9990_p9 = pnand %p9989_p8, %p10413_p7 }
 0x594   : > { %p9995_p0 = por %p9994_p13, %p9993_p11 }
 0x595   : > { %p9991_p10 = pneg %p9990_p9 }
 0x597   : > { %p9996_p1 = pnand %p9995_p0, %p9991_p10 }
 0x599   : > { %9999 = shalt.err (!%p9996_p1)
}
 0x59a   : > { %9665 = dma.vmem_to_hbm [thread:$0]  (%p10413_p7), %s8534_s30, 128, %s8536_s21, %s14043_s12  }
 0x59b   : > { %s14680_s28 = sld [smem:[#allocation187_spill]]  ;;  %s14681_s25 = scalar_lea.vmem [#allocation4], %s10966_s29 }
 0x59c   : > { %s8519_s19 = sshll.u32 %s14681_s25, 4  ;;  %s14682_s16 = sand.u32 1, %s10178_s14   ;;  %s8520_s19 = int_to_ptr.vmem [resolvable:$true] %s8519_s19 }
 0x59d   : > { %s8497_s0 = scalar_lea.sflag [#allocation5], %s14682_s16 }
 0x5a1   : > { %s8517_s18 = scalar_lea.hbm %s14680_s28, %s13833_s4  ;;  %s10020_s21 = scalar_lea.hbm %s14680_s28, 16 }
 0x5a2   : > { %s8521_s24 = sshll.u32 %s8517_s18, 4  ;;  %s8522_s24 = int_to_ptr.hbm [resolvable:$true] %s8521_s24 }
 0x5a3   : > { %s10014_s26 = sshra.s32 %s8522_s24, 4  ;;  %s10015_s26 = int_to_ptr.hbm [resolvable:$true] %s10014_s26 }
 0x5a4   : > { %s10016_s23 = scalar_lea.hbm %s10015_s26, 8  ;;  %p10021_p5 = scmp.lt.s32.totalorder %s10015_s26, %s14680_s28 }
 0x5a5   : > { %p10017_p2 = scmp.ne.s32.totalorder %s10015_s26, %s10016_s23  ;;  %p10022_p6 = scmp.lt.s32.totalorder %s10020_s21, %s10016_s23 }
 0x5a7   : > { %p10018_p3 = pnand %p10017_p2, %p10413_p7  ;;  %p10023_p8 = por %p10022_p6, %p10021_p5 }
 0x5a9   : > { %p10019_p4 = pneg %p10018_p3 }
 0x5ab   : > { %p10024_p9 = pnand %p10023_p8, %p10019_p4 }
 0x5ad   : > { %10027 = shalt.err (!%p10024_p9)
}
 0x5ae   : > { %9664 = dma.vmem_to_hbm [thread:$0]  (%p10413_p7), %s8520_s19, 128, %s8522_s24, %s8497_s0  }
 0x5af   : > { %s14683_s16 = sld [smem:[#allocation188_spill]]  ;;  %s14685_s10 = scalar_lea.vmem [#allocation8], %s10966_s29 }
 0x5b0   : > { %s8547_s30 = sshll.u32 %s14685_s10, 4  ;;  %s8548_s30 = int_to_ptr.vmem [resolvable:$true] %s8547_s30 }
 0x5b5   : > { %s14684_s12 = smov %s14683_s16  ;;  %s8545_s20 = scalar_lea.hbm %s14683_s16, %s13833_s4 }
 0x5b6   : > { %s8549_s1 = sshll.u32 %s8545_s20, 4  ;;  %s10048_s19 = scalar_lea.hbm %s14684_s12, 16  ;;  %s8550_s1 = int_to_ptr.hbm [resolvable:$true] %s8549_s1 }
 0x5b7   : > { %s10042_s26 = sshra.s32 %s8550_s1, 4  ;;  %s10043_s26 = int_to_ptr.hbm [resolvable:$true] %s10042_s26 }
 0x5b8   : > { %s10044_s23 = scalar_lea.hbm %s10043_s26, 8  ;;  %p10049_p0 = scmp.lt.s32.totalorder %s10043_s26, %s14684_s12 }
 0x5b9   : > { %p10045_p10 = scmp.ne.s32.totalorder %s10043_s26, %s10044_s23  ;;  %p10050_p1 = scmp.lt.s32.totalorder %s10048_s19, %s10044_s23 }
 0x5bb   : > { %p10046_p11 = pnand %p10045_p10, %p10413_p7  ;;  %p10051_p2 = por %p10050_p1, %p10049_p0 }
 0x5bd   : > { %p10047_p13 = pneg %p10046_p11 }
 0x5bf   : > { %p10052_p3 = pnand %p10051_p2, %p10047_p13 }
 0x5c1   : > { %10055 = shalt.err (!%p10052_p3)
}
 0x5c2   : > { %s14686_s20 = scalar_lea.sflag [#allocation7], %s13830_s27 }
 0x5c3   : > { %9666 = dma.vmem_to_hbm [thread:$0]  (%p10413_p7), %s8548_s30, 128, %s8550_s1, %s14686_s20  }
 0x5c4 PF: > { %s14687_s29 = sld [smem:[#allocation11_spill]]  ;;  %p9680_p4 = scmp.ge.s32.totalorder %s10210_s22, 2 }
 0x5c6   : > { %p9671_p5 = pnand %p9680_p4, %p10423_p12 }
 0x5c8   : > { %p9672_p6 = pneg %p9671_p5 }
 0x5ca   : > { %s8561_s17 = sand.u32 1, %s14687_s29  }
 0x5cb   : > { %s8562_s18 = scalar_lea.sflag [#allocation5], %s8561_s17 }
 0x5cc   : > { %10165 = dma.done.wait (%p9672_p6), %s8562_s18, 128  }
 0x5cd   : > { %10167 = vsyncadd (%p9672_p6), %s8562_s18, 4294967168  ;;  %s14689_s25 = sadd.s32 4294967294, %s10210_s22  }
 0x5ce   : > { %s8571_s16 = sand.u32 1, %s14689_s25  }
 0x5cf   : > { %s8572_s10 = scalar_lea.sflag [#allocation7], %s8571_s16 }
 0x5d0   : > { %10169 = dma.done.wait (%p9672_p6), %s8572_s10, 256  }
 0x5d1   : > { %10171 = vsyncadd (%p9672_p6), %s8572_s10, 4294967040  ;;  %s27_s22 = sadd.s32 1, %s10210_s22   ;;  %s14690_s16 = sld [smem:[#allocation12_spill]] }
 0x5d2   : > { %p24_p7 = scmp.ge.s32.totalorder %s27_s22, 6   ;;  %s14691_s17 = sld [smem:[#allocation18_spill]] }
 0x5d3   : > { %s14692_s18 = sld [smem:[#allocation13_spill]]  ;;  %s14696_s13 = smov %s10178_s14 }
 0x5d4   : > { %s14693_s19 = sld [smem:[#allocation14_spill]]  ;;  %s14697_s14 = smov %s10182_s15 }
 0x5d5   : > { %s14694_s20 = sld [smem:[#allocation15_spill]]  ;;  %s14698_s15 = smov %s10428_s8 }
 0x5d6   : > { %s14695_s21 = sld [smem:[#allocation16_spill]]  ;;  %26 = sbr.rel (!%p24_p7) target bundleno = 14 (0xe), region = 236 }
 0x5db   :  { %8588 = vsyncpa [#allocation5], 1 }
 0x5dc   :  { %8590 = vsyncpa [#allocation5 + $0x1], 1 }
 0x5dd   :  { %8591 = vsyncpa [#allocation7], 1 }
 0x5de   :  { %8593 = vsyncpa [#allocation7 + $0x1], 1 }

</bundles_post_ra>
